<compile_context>
chip_gen: v7x
topology: tpu7x:2x2x1
jax: 0.10.0
libtpu: 0.0.40
codegen_flags: <defaults>
</compile_context>

<pallas_src>
import jax
import jax.numpy as jnp
from jax.experimental import pallas as pl
from jax.experimental.pallas import tpu as pltpu

HPAD = 128    # hidden size padded to one full 128-lane tile
DPAD = 128    # input feature size padded to one full 128-lane tile
HEAD_W = 128  # fused head hidden width (3*H//2 padded to one lane tile)
OUT_W = 128   # packed output width (col 0: price, col 1: vol, cols 2:5: options)
SUB = 8       # sublane granularity (batch padded to a multiple of this)


def _sigmoid(x):
    # tanh-form sigmoid: a single EUP op per gate instead of exp + divide.
    return 0.5 * jnp.tanh(0.5 * x) + 0.5


# ---------------------------------------------------------------------------
# Single fused kernel: LSTM layer 0 -> LSTM layer 1 -> attention -> 3 heads.
# ---------------------------------------------------------------------------
def fused_advanced_rnn_kernel(
    x_ref,                                   # (T*Bp, DPAD)  time-major flattened input (row = t*Bp + b)
    wih0_ref, whh0_ref, b0_ref,              # layer-0 LSTM: (DPAD, 4Hp), (Hp, 4Hp), (1, 4Hp)
    wih1_ref, whh1_ref, b1_ref,              # layer-1 LSTM: (Hp, 4Hp), (Hp, 4Hp), (1, 4Hp)
    wa1_ref, ba1_ref, wa2row_ref, ba2_ref,   # attention: (Hp, Hp), (1, Hp), (1, Hp), (1, 1)
    w1cat_ref, b1cat_ref, w2blk_ref, b2cat_ref,  # fused heads: (Hp, HEAD_W), (1, HEAD_W), (HEAD_W, OUT_W), (1, OUT_W)
    out_ref,                                 # (Bp, OUT_W) packed lane-dense output
    gp0_ref, gp1_ref, hs1_ref,               # VMEM scratch: (T*Bp, 4Hp), (T*Bp, 4Hp), (T*Bp, Hp)
):
    f32 = jnp.float32
    Bp = out_ref.shape[0]
    T = x_ref.shape[0] // Bp
    Hp = whh0_ref.shape[0]

    # ---- layer-0 input projection, hoisted: one batched MXU op for all T*Bp rows ----
    gp0_ref[...] = (jnp.dot(x_ref[...], wih0_ref[...], preferred_element_type=f32)
                    + b0_ref[...])

    # ---- layer 0 recurrence (static unroll; T small). Also computes layer-1's input
    #      projection per step (off the critical path) and stores it to scratch. ----
    h0 = jnp.zeros((Bp, Hp), f32)
    c0 = jnp.zeros((Bp, Hp), f32)
    for t in range(T):
        rows = pl.ds(t * Bp, Bp)                       # sublane-aligned (Bp is a multiple of 8)
        gates = gp0_ref[rows, :] + jnp.dot(h0, whh0_ref[...], preferred_element_type=f32)
        i_g = _sigmoid(gates[:, 0 * Hp:1 * Hp])        # lane-aligned 128-wide slices
        f_g = _sigmoid(gates[:, 1 * Hp:2 * Hp])
        g_g = jnp.tanh(gates[:, 2 * Hp:3 * Hp])
        o_g = _sigmoid(gates[:, 3 * Hp:4 * Hp])
        c0 = f_g * c0 + i_g * g_g
        h0 = o_g * jnp.tanh(c0)
        # TODO(synk): inter-layer dropout (training mode only) intentionally omitted.
        gp1_ref[rows, :] = (jnp.dot(h0, wih1_ref[...], preferred_element_type=f32)
                            + b1_ref[...])

    # ---- layer 1 recurrence ----
    h1 = jnp.zeros((Bp, Hp), f32)
    c1 = jnp.zeros((Bp, Hp), f32)
    for t in range(T):
        rows = pl.ds(t * Bp, Bp)
        gates = gp1_ref[rows, :] + jnp.dot(h1, whh1_ref[...], preferred_element_type=f32)
        i_g = _sigmoid(gates[:, 0 * Hp:1 * Hp])
        f_g = _sigmoid(gates[:, 1 * Hp:2 * Hp])
        g_g = jnp.tanh(gates[:, 2 * Hp:3 * Hp])
        o_g = _sigmoid(gates[:, 3 * Hp:4 * Hp])
        c1 = f_g * c1 + i_g * g_g
        h1 = o_g * jnp.tanh(c1)
        hs1_ref[rows, :] = h1

    # ---- attention pooling: batched projections + softmax over time ----
    hs1_all = hs1_ref[...]                                                  # (T*Bp, Hp)
    e = jnp.tanh(jnp.dot(hs1_all, wa1_ref[...], preferred_element_type=f32)
                 + ba1_ref[...])                                            # (T*Bp, Hp)
    # lane-dense multiply + cross-lane reduce instead of an N=1 (lane-sparse) matmul
    scores = jnp.sum(e * wa2row_ref[...], axis=-1, keepdims=True) + ba2_ref[...]   # (T*Bp, 1)

    score_t = [scores[t * Bp:(t + 1) * Bp, :] for t in range(T)]            # sublane-aligned slices
    m = score_t[0]
    for t in range(1, T):
        m = jnp.maximum(m, score_t[t])
    w_t = [jnp.exp(s - m) for s in score_t]
    denom = w_t[0]
    for t in range(1, T):
        denom = denom + w_t[t]
    inv_denom = pl.reciprocal(denom, approx=True)                           # (Bp, 1)

    attended = jnp.zeros((Bp, Hp), f32)
    for t in range(T):
        attended = attended + (w_t[t] * inv_denom) * hs1_all[t * Bp:(t + 1) * Bp, :]

    # ---- three heads fused: lane-dense matmul + ReLU + block-diagonal matmul ----
    hidden = jnp.dot(attended, w1cat_ref[...], preferred_element_type=f32) + b1cat_ref[...]
    hidden = jnp.maximum(hidden, 0.0)        # ReLU; Dropout is identity at inference
    out = jnp.dot(hidden, w2blk_ref[...], preferred_element_type=f32) + b2cat_ref[...]
    out_ref[...] = out                       # (Bp, OUT_W) lane-dense store


# ---------------------------------------------------------------------------
# Wrapper: single pallas_call, outputs sliced from the packed (Bp, 128) result.
# ---------------------------------------------------------------------------
@jax.jit
def advanced_rnn_forward(x_btd, kparams):
    B, T, D = x_btd.shape
    assert D <= DPAD, "input_size must fit in one 128-lane tile for this kernel"
    Bp = max(SUB, ((B + SUB - 1) // SUB) * SUB)   # pad batch to a multiple of 8 sublanes

    # time-major, batch/feature zero-padded, flattened (row = t*Bp + b)
    xt = jnp.transpose(x_btd, (1, 0, 2)).astype(jnp.float32)        # (T, B, D)
    xt = jnp.pad(xt, ((0, 0), (0, Bp - B), (0, DPAD - D)))          # (T, Bp, DPAD)
    x_flat = xt.reshape(T * Bp, DPAD)

    args = (
        x_flat,
        kparams["wih0"], kparams["whh0"], kparams["b0"],
        kparams["wih1"], kparams["whh1"], kparams["b1"],
        kparams["wa1"], kparams["ba1"], kparams["wa2row"], kparams["ba2"],
        kparams["w1cat"], kparams["b1cat"], kparams["w2blk"], kparams["b2cat"],
    )
    out = pl.pallas_call(
        fused_advanced_rnn_kernel,
        out_shape=jax.ShapeDtypeStruct((Bp, OUT_W), jnp.float32),
        in_specs=[pl.BlockSpec(memory_space=pltpu.MemorySpace.VMEM)] * len(args),
        out_specs=pl.BlockSpec(memory_space=pltpu.MemorySpace.VMEM),
        scratch_shapes=[
            pltpu.VMEM((T * Bp, 4 * HPAD), jnp.float32),   # layer-0 input projections
            pltpu.VMEM((T * Bp, 4 * HPAD), jnp.float32),   # layer-1 input projections
            pltpu.VMEM((T * Bp, HPAD), jnp.float32),       # layer-1 hidden states
        ],
    )(*args)
    price = out[:B, 0:1]
    vol = out[:B, 1:2]
    options = out[:B, 2:5]
    return price, vol, options


# ---------------------------------------------------------------------------
# Parameter construction (torch layout) + padding/fusing into kernel layout.
# ---------------------------------------------------------------------------
def init_params(key, input_size, hidden_size, num_layers):
    H = hidden_size
    params = {"lstm": []}
    scale = 0.1

    def nxt():
        nonlocal key
        key, sub = jax.random.split(key)
        return sub

    for layer in range(num_layers):
        d_in = input_size if layer == 0 else H
        w_ih = scale * jax.random.normal(nxt(), (4 * H, d_in), jnp.float32)
        w_hh = scale * jax.random.normal(nxt(), (4 * H, H), jnp.float32)
        b_ih = scale * jax.random.normal(nxt(), (4 * H,), jnp.float32)
        b_hh = scale * jax.random.normal(nxt(), (4 * H,), jnp.float32)
        params["lstm"].append(dict(
            wih_t=jnp.transpose(w_ih),              # (d_in, 4H), gate order [i, f, g, o]
            whh_t=jnp.transpose(w_hh),              # (H, 4H)
            b=(b_ih + b_hh).reshape(1, 4 * H),      # (1, 4H) — torch adds both biases
        ))

    def linear(d_in, d_out):
        w = scale * jax.random.normal(nxt(), (d_out, d_in), jnp.float32)
        b = scale * jax.random.normal(nxt(), (d_out,), jnp.float32)
        return jnp.transpose(w), b.reshape(1, d_out)     # (d_in, d_out), (1, d_out)

    params["wa1"], params["ba1"] = linear(H, H)          # attention Linear(H, H)
    params["wa2"], params["ba2"] = linear(H, 1)          # attention Linear(H, 1)
    params["wv1"], params["bv1"] = linear(H, H // 2)     # vol head
    params["wv2"], params["bv2"] = linear(H // 2, 1)
    params["wp1"], params["bp1"] = linear(H, H // 2)     # price head
    params["wp2"], params["bp2"] = linear(H // 2, 1)
    params["wo1"], params["bo1"] = linear(H, H // 2)     # options head
    params["wo2"], params["bo2"] = linear(H // 2, 3)
    return params


def prepare_kernel_params(params, input_size, hidden_size):
    """Pad / fuse torch-layout params into the lane-aligned, head-fused kernel layout."""
    H = hidden_size
    Hp = HPAD
    Hh = H // 2
    assert H <= Hp, "hidden_size must fit in one 128-lane tile for this kernel"
    assert input_size <= DPAD and 3 * Hh <= HEAD_W
    assert len(params["lstm"]) == 2, "fused kernel is specialized for num_layers=2"

    def pad_gate_cols(w):
        # (d_in, 4H) -> (d_in, 4Hp): each gate block zero-padded to a full 128-lane tile.
        blocks = [jnp.pad(w[:, g * H:(g + 1) * H], ((0, 0), (0, Hp - H))) for g in range(4)]
        return jnp.concatenate(blocks, axis=1)

    def pad_rows(w, rows):
        return jnp.pad(w, ((0, rows - w.shape[0]), (0, 0)))

    l0, l1 = params["lstm"]
    kp = {
        "wih0": pad_rows(pad_gate_cols(l0["wih_t"]), DPAD),          # (DPAD, 4Hp)
        "whh0": pad_rows(pad_gate_cols(l0["whh_t"]), Hp),            # (Hp, 4Hp)
        "b0": pad_gate_cols(l0["b"]),                                # (1, 4Hp)
        "wih1": pad_rows(pad_gate_cols(l1["wih_t"]), Hp),            # (Hp, 4Hp)
        "whh1": pad_rows(pad_gate_cols(l1["whh_t"]), Hp),            # (Hp, 4Hp)
        "b1": pad_gate_cols(l1["b"]),                                # (1, 4Hp)
        "wa1": jnp.pad(params["wa1"], ((0, Hp - H), (0, Hp - H))),   # (Hp, Hp)
        "ba1": jnp.pad(params["ba1"], ((0, 0), (0, Hp - H))),        # (1, Hp)
        "wa2row": jnp.pad(jnp.transpose(params["wa2"]),
                          ((0, 0), (0, Hp - H))),                    # (1, Hp) row for lane-reduce
        "ba2": params["ba2"],                                        # (1, 1)
    }

    # Fused head layer 1: columns = [price | vol | options] hidden units, padded lane-dense.
    w1cat = jnp.concatenate([params["wp1"], params["wv1"], params["wo1"]], axis=1)   # (H, 3Hh)
    kp["w1cat"] = jnp.pad(w1cat, ((0, Hp - H), (0, HEAD_W - 3 * Hh)))                # (Hp, HEAD_W)
    b1cat = jnp.concatenate([params["bp1"], params["bv1"], params["bo1"]], axis=1)   # (1, 3Hh)
    kp["b1cat"] = jnp.pad(b1cat, ((0, 0), (0, HEAD_W - 3 * Hh)))                     # (1, HEAD_W)
    # Fused head layer 2: block-diagonal; output cols 0=price, 1=vol, 2:5=options, rest zero.
    w2 = jnp.zeros((HEAD_W, OUT_W), jnp.float32)
    w2 = w2.at[0:Hh, 0:1].set(params["wp2"])
    w2 = w2.at[Hh:2 * Hh, 1:2].set(params["wv2"])
    w2 = w2.at[2 * Hh:3 * Hh, 2:5].set(params["wo2"])
    kp["w2blk"] = w2
    b2 = jnp.zeros((1, OUT_W), jnp.float32)
    b2 = b2.at[:, 0:1].set(params["bp2"])
    b2 = b2.at[:, 1:2].set(params["bv2"])
    b2 = b2.at[:, 2:5].set(params["bo2"])
    kp["b2cat"] = b2
    return kp


if __name__ == "__main__":
    B, T = 2, 8
    INPUT_SIZE, HIDDEN, NUM_LAYERS = 8, 32, 2

    key = jax.random.PRNGKey(0)
    key_x, key_p = jax.random.split(key)
    x = jax.random.normal(key_x, (B, T, INPUT_SIZE), jnp.float32)
    params = init_params(key_p, INPUT_SIZE, HIDDEN, NUM_LAYERS)
    kparams = prepare_kernel_params(params, INPUT_SIZE, HIDDEN)

    price_pred, vol_pred, options_pred = advanced_rnn_forward(x, kparams)
    jax.block_until_ready((price_pred, vol_pred, options_pred))

    assert price_pred.shape == (B, 1)
    assert vol_pred.shape == (B, 1)
    assert options_pred.shape == (B, 3)
    assert bool(jnp.all(jnp.isfinite(price_pred)))
    assert bool(jnp.all(jnp.isfinite(vol_pred)))
    assert bool(jnp.all(jnp.isfinite(options_pred)))
    print("KERNEL_OK")
</pallas_src>

<mosaic_0001>
module attributes {stable_mosaic.version = 11 : i64} {
  func.func @fused_advanced_rnn_kernel(%arg0: memref<64x128xf32, #tpu.memory_space<vmem>>, %arg1: memref<128x512xf32, #tpu.memory_space<vmem>>, %arg2: memref<128x512xf32, #tpu.memory_space<vmem>>, %arg3: memref<1x512xf32, #tpu.memory_space<vmem>>, %arg4: memref<128x512xf32, #tpu.memory_space<vmem>>, %arg5: memref<128x512xf32, #tpu.memory_space<vmem>>, %arg6: memref<1x512xf32, #tpu.memory_space<vmem>>, %arg7: memref<128x128xf32, #tpu.memory_space<vmem>>, %arg8: memref<1x128xf32, #tpu.memory_space<vmem>>, %arg9: memref<1x128xf32, #tpu.memory_space<vmem>>, %arg10: memref<1x1xf32, #tpu.memory_space<vmem>>, %arg11: memref<128x128xf32, #tpu.memory_space<vmem>>, %arg12: memref<1x128xf32, #tpu.memory_space<vmem>>, %arg13: memref<128x128xf32, #tpu.memory_space<vmem>>, %arg14: memref<1x128xf32, #tpu.memory_space<vmem>>, %arg15: memref<8x128xf32, #tpu.memory_space<vmem>>, %arg16: memref<64x512xf32, #tpu.memory_space<vmem>>, %arg17: memref<64x512xf32, #tpu.memory_space<vmem>>, %arg18: memref<64x128xf32, #tpu.memory_space<vmem>>) attributes {dimension_semantics = [], scalar_prefetch = 0 : i64, scratch_operands = 3 : i64, tpu.core_type = #tpu.core_type<tc>} {
    %c0 = arith.constant 0 : index
    %c0_0 = arith.constant 0 : index
    %0 = vector.load %arg0[%c0, %c0_0] : memref<64x128xf32, #tpu.memory_space<vmem>>, vector<64x128xf32>
    %c0_1 = arith.constant 0 : index
    %c0_2 = arith.constant 0 : index
    %1 = vector.load %arg1[%c0_1, %c0_2] : memref<128x512xf32, #tpu.memory_space<vmem>>, vector<128x512xf32>
    %cst = arith.constant dense<0.000000e+00> : vector<64x512xf32>
    %2 = tpu.matmul %0, %1, %cst {dimension_numbers = #tpu.dot_dimension_numbers<[1], [0], [0], [1], [0, 0, 1, 1], [], []>} : vector<64x128xf32>, vector<128x512xf32>, vector<64x512xf32> -> vector<64x512xf32>
    %c0_3 = arith.constant 0 : index
    %c0_4 = arith.constant 0 : index
    %3 = vector.load %arg3[%c0_3, %c0_4] : memref<1x512xf32, #tpu.memory_space<vmem>>, vector<1x512xf32>
    %4 = vector.broadcast %3 : vector<1x512xf32> to vector<64x512xf32>
    %5 = arith.addf %2, %4 : vector<64x512xf32>
    %c0_5 = arith.constant 0 : index
    %c0_6 = arith.constant 0 : index
    %6 = vector.load %arg16[%c0_5, %c0_6] : memref<64x512xf32, #tpu.memory_space<vmem>>, vector<64x512xf32>
    tpu.vector_store %arg16[%c0_5, %c0_6], %5 {strides = array<i32>} : memref<64x512xf32, #tpu.memory_space<vmem>>, vector<64x512xf32>,
    %cst_7 = arith.constant 0.000000e+00 : f32
    %7 = vector.broadcast %cst_7 : f32 to vector<8x128xf32>
    %cst_8 = arith.constant 0.000000e+00 : f32
    %8 = vector.broadcast %cst_8 : f32 to vector<8x128xf32>
    %c0_9 = arith.constant 0 : index
    %c0_10 = arith.constant 0 : index
    %9 = vector.load %arg16[%c0_9, %c0_10] : memref<64x512xf32, #tpu.memory_space<vmem>>, vector<8x512xf32>
    %c0_11 = arith.constant 0 : index
    %c0_12 = arith.constant 0 : index
    %10 = vector.load %arg2[%c0_11, %c0_12] : memref<128x512xf32, #tpu.memory_space<vmem>>, vector<128x512xf32>
    %cst_13 = arith.constant dense<0.000000e+00> : vector<8x512xf32>
    %11 = tpu.matmul %7, %10, %cst_13 {dimension_numbers = #tpu.dot_dimension_numbers<[1], [0], [0], [1], [0, 0, 1, 1], [], []>} : vector<8x128xf32>, vector<128x512xf32>, vector<8x512xf32> -> vector<8x512xf32>
    %12 = arith.addf %9, %11 : vector<8x512xf32>
    %13 = vector.extract_strided_slice %12 {offsets = [0, 0], sizes = [8, 128], strides = [1, 1]} : vector<8x512xf32> to vector<8x128xf32>
    %cst_14 = arith.constant 5.000000e-01 : f32
    %14 = vector.broadcast %cst_14 : f32 to vector<8x128xf32>
    %15 = arith.mulf %14, %13 : vector<8x128xf32>
    %16 = math.tanh %15 : vector<8x128xf32>
    %cst_15 = arith.constant 5.000000e-01 : f32
    %17 = vector.broadcast %cst_15 : f32 to vector<8x128xf32>
    %18 = arith.mulf %17, %16 : vector<8x128xf32>
    %cst_16 = arith.constant 5.000000e-01 : f32
    %19 = vector.broadcast %cst_16 : f32 to vector<8x128xf32>
    %20 = arith.addf %18, %19 : vector<8x128xf32>
    %21 = vector.extract_strided_slice %12 {offsets = [0, 128], sizes = [8, 128], strides = [1, 1]} : vector<8x512xf32> to vector<8x128xf32>
    %cst_17 = arith.constant 5.000000e-01 : f32
    %22 = vector.broadcast %cst_17 : f32 to vector<8x128xf32>
    %23 = arith.mulf %22, %21 : vector<8x128xf32>
    %24 = math.tanh %23 : vector<8x128xf32>
    %cst_18 = arith.constant 5.000000e-01 : f32
    %25 = vector.broadcast %cst_18 : f32 to vector<8x128xf32>
    %26 = arith.mulf %25, %24 : vector<8x128xf32>
    %cst_19 = arith.constant 5.000000e-01 : f32
    %27 = vector.broadcast %cst_19 : f32 to vector<8x128xf32>
    %28 = arith.addf %26, %27 : vector<8x128xf32>
    %29 = vector.extract_strided_slice %12 {offsets = [0, 256], sizes = [8, 128], strides = [1, 1]} : vector<8x512xf32> to vector<8x128xf32>
    %30 = math.tanh %29 : vector<8x128xf32>
    %31 = vector.extract_strided_slice %12 {offsets = [0, 384], sizes = [8, 128], strides = [1, 1]} : vector<8x512xf32> to vector<8x128xf32>
    %cst_20 = arith.constant 5.000000e-01 : f32
    %32 = vector.broadcast %cst_20 : f32 to vector<8x128xf32>
    %33 = arith.mulf %32, %31 : vector<8x128xf32>
    %34 = math.tanh %33 : vector<8x128xf32>
    %cst_21 = arith.constant 5.000000e-01 : f32
    %35 = vector.broadcast %cst_21 : f32 to vector<8x128xf32>
    %36 = arith.mulf %35, %34 : vector<8x128xf32>
    %cst_22 = arith.constant 5.000000e-01 : f32
    %37 = vector.broadcast %cst_22 : f32 to vector<8x128xf32>
    %38 = arith.addf %36, %37 : vector<8x128xf32>
    %39 = arith.mulf %28, %8 : vector<8x128xf32>
    %40 = arith.mulf %20, %30 : vector<8x128xf32>
    %41 = arith.addf %39, %40 : vector<8x128xf32>
    %42 = math.tanh %41 : vector<8x128xf32>
    %43 = arith.mulf %38, %42 : vector<8x128xf32>
    %c0_23 = arith.constant 0 : index
    %c0_24 = arith.constant 0 : index
    %44 = vector.load %arg4[%c0_23, %c0_24] : memref<128x512xf32, #tpu.memory_space<vmem>>, vector<128x512xf32>
    %cst_25 = arith.constant dense<0.000000e+00> : vector<8x512xf32>
    %45 = tpu.matmul %43, %44, %cst_25 {dimension_numbers = #tpu.dot_dimension_numbers<[1], [0], [0], [1], [0, 0, 1, 1], [], []>} : vector<8x128xf32>, vector<128x512xf32>, vector<8x512xf32> -> vector<8x512xf32>
    %c0_26 = arith.constant 0 : index
    %c0_27 = arith.constant 0 : index
    %46 = vector.load %arg6[%c0_26, %c0_27] : memref<1x512xf32, #tpu.memory_space<vmem>>, vector<1x512xf32>
    %47 = vector.broadcast %46 : vector<1x512xf32> to vector<8x512xf32>
    %48 = arith.addf %45, %47 : vector<8x512xf32>
    %c0_28 = arith.constant 0 : index
    %c0_29 = arith.constant 0 : index
    %49 = vector.load %arg17[%c0_28, %c0_29] : memref<64x512xf32, #tpu.memory_space<vmem>>, vector<8x512xf32>
    tpu.vector_store %arg17[%c0_28, %c0_29], %48 {strides = array<i32>} : memref<64x512xf32, #tpu.memory_space<vmem>>, vector<8x512xf32>,
    %c8 = arith.constant 8 : index
    %c0_30 = arith.constant 0 : index
    %50 = vector.load %arg16[%c8, %c0_30] : memref<64x512xf32, #tpu.memory_space<vmem>>, vector<8x512xf32>
    %c0_31 = arith.constant 0 : index
    %c0_32 = arith.constant 0 : index
    %51 = vector.load %arg2[%c0_31, %c0_32] : memref<128x512xf32, #tpu.memory_space<vmem>>, vector<128x512xf32>
    %cst_33 = arith.constant dense<0.000000e+00> : vector<8x512xf32>
    %52 = tpu.matmul %43, %51, %cst_33 {dimension_numbers = #tpu.dot_dimension_numbers<[1], [0], [0], [1], [0, 0, 1, 1], [], []>} : vector<8x128xf32>, vector<128x512xf32>, vector<8x512xf32> -> vector<8x512xf32>
    %53 = arith.addf %50, %52 : vector<8x512xf32>
    %54 = vector.extract_strided_slice %53 {offsets = [0, 0], sizes = [8, 128], strides = [1, 1]} : vector<8x512xf32> to vector<8x128xf32>
    %cst_34 = arith.constant 5.000000e-01 : f32
    %55 = vector.broadcast %cst_34 : f32 to vector<8x128xf32>
    %56 = arith.mulf %55, %54 : vector<8x128xf32>
    %57 = math.tanh %56 : vector<8x128xf32>
    %cst_35 = arith.constant 5.000000e-01 : f32
    %58 = vector.broadcast %cst_35 : f32 to vector<8x128xf32>
    %59 = arith.mulf %58, %57 : vector<8x128xf32>
    %cst_36 = arith.constant 5.000000e-01 : f32
    %60 = vector.broadcast %cst_36 : f32 to vector<8x128xf32>
    %61 = arith.addf %59, %60 : vector<8x128xf32>
    %62 = vector.extract_strided_slice %53 {offsets = [0, 128], sizes = [8, 128], strides = [1, 1]} : vector<8x512xf32> to vector<8x128xf32>
    %cst_37 = arith.constant 5.000000e-01 : f32
    %63 = vector.broadcast %cst_37 : f32 to vector<8x128xf32>
    %64 = arith.mulf %63, %62 : vector<8x128xf32>
    %65 = math.tanh %64 : vector<8x128xf32>
    %cst_38 = arith.constant 5.000000e-01 : f32
    %66 = vector.broadcast %cst_38 : f32 to vector<8x128xf32>
    %67 = arith.mulf %66, %65 : vector<8x128xf32>
    %cst_39 = arith.constant 5.000000e-01 : f32
    %68 = vector.broadcast %cst_39 : f32 to vector<8x128xf32>
    %69 = arith.addf %67, %68 : vector<8x128xf32>
    %70 = vector.extract_strided_slice %53 {offsets = [0, 256], sizes = [8, 128], strides = [1, 1]} : vector<8x512xf32> to vector<8x128xf32>
    %71 = math.tanh %70 : vector<8x128xf32>
    %72 = vector.extract_strided_slice %53 {offsets = [0, 384], sizes = [8, 128], strides = [1, 1]} : vector<8x512xf32> to vector<8x128xf32>
    %cst_40 = arith.constant 5.000000e-01 : f32
    %73 = vector.broadcast %cst_40 : f32 to vector<8x128xf32>
    %74 = arith.mulf %73, %72 : vector<8x128xf32>
    %75 = math.tanh %74 : vector<8x128xf32>
    %cst_41 = arith.constant 5.000000e-01 : f32
    %76 = vector.broadcast %cst_41 : f32 to vector<8x128xf32>
    %77 = arith.mulf %76, %75 : vector<8x128xf32>
    %cst_42 = arith.constant 5.000000e-01 : f32
    %78 = vector.broadcast %cst_42 : f32 to vector<8x128xf32>
    %79 = arith.addf %77, %78 : vector<8x128xf32>
    %80 = arith.mulf %69, %41 : vector<8x128xf32>
    %81 = arith.mulf %61, %71 : vector<8x128xf32>
    %82 = arith.addf %80, %81 : vector<8x128xf32>
    %83 = math.tanh %82 : vector<8x128xf32>
    %84 = arith.mulf %79, %83 : vector<8x128xf32>
    %c0_43 = arith.constant 0 : index
    %c0_44 = arith.constant 0 : index
    %85 = vector.load %arg4[%c0_43, %c0_44] : memref<128x512xf32, #tpu.memory_space<vmem>>, vector<128x512xf32>
    %cst_45 = arith.constant dense<0.000000e+00> : vector<8x512xf32>
    %86 = tpu.matmul %84, %85, %cst_45 {dimension_numbers = #tpu.dot_dimension_numbers<[1], [0], [0], [1], [0, 0, 1, 1], [], []>} : vector<8x128xf32>, vector<128x512xf32>, vector<8x512xf32> -> vector<8x512xf32>
    %c0_46 = arith.constant 0 : index
    %c0_47 = arith.constant 0 : index
    %87 = vector.load %arg6[%c0_46, %c0_47] : memref<1x512xf32, #tpu.memory_space<vmem>>, vector<1x512xf32>
    %88 = vector.broadcast %87 : vector<1x512xf32> to vector<8x512xf32>
    %89 = arith.addf %86, %88 : vector<8x512xf32>
    %c8_48 = arith.constant 8 : index
    %c0_49 = arith.constant 0 : index
    %90 = vector.load %arg17[%c8_48, %c0_49] : memref<64x512xf32, #tpu.memory_space<vmem>>, vector<8x512xf32>
    tpu.vector_store %arg17[%c8_48, %c0_49], %89 {strides = array<i32>} : memref<64x512xf32, #tpu.memory_space<vmem>>, vector<8x512xf32>,
    %c16 = arith.constant 16 : index
    %c0_50 = arith.constant 0 : index
    %91 = vector.load %arg16[%c16, %c0_50] : memref<64x512xf32, #tpu.memory_space<vmem>>, vector<8x512xf32>
    %c0_51 = arith.constant 0 : index
    %c0_52 = arith.constant 0 : index
    %92 = vector.load %arg2[%c0_51, %c0_52] : memref<128x512xf32, #tpu.memory_space<vmem>>, vector<128x512xf32>
    %cst_53 = arith.constant dense<0.000000e+00> : vector<8x512xf32>
    %93 = tpu.matmul %84, %92, %cst_53 {dimension_numbers = #tpu.dot_dimension_numbers<[1], [0], [0], [1], [0, 0, 1, 1], [], []>} : vector<8x128xf32>, vector<128x512xf32>, vector<8x512xf32> -> vector<8x512xf32>
    %94 = arith.addf %91, %93 : vector<8x512xf32>
    %95 = vector.extract_strided_slice %94 {offsets = [0, 0], sizes = [8, 128], strides = [1, 1]} : vector<8x512xf32> to vector<8x128xf32>
    %cst_54 = arith.constant 5.000000e-01 : f32
    %96 = vector.broadcast %cst_54 : f32 to vector<8x128xf32>
    %97 = arith.mulf %96, %95 : vector<8x128xf32>
    %98 = math.tanh %97 : vector<8x128xf32>
    %cst_55 = arith.constant 5.000000e-01 : f32
    %99 = vector.broadcast %cst_55 : f32 to vector<8x128xf32>
    %100 = arith.mulf %99, %98 : vector<8x128xf32>
    %cst_56 = arith.constant 5.000000e-01 : f32
    %101 = vector.broadcast %cst_56 : f32 to vector<8x128xf32>
    %102 = arith.addf %100, %101 : vector<8x128xf32>
    %103 = vector.extract_strided_slice %94 {offsets = [0, 128], sizes = [8, 128], strides = [1, 1]} : vector<8x512xf32> to vector<8x128xf32>
    %cst_57 = arith.constant 5.000000e-01 : f32
    %104 = vector.broadcast %cst_57 : f32 to vector<8x128xf32>
    %105 = arith.mulf %104, %103 : vector<8x128xf32>
    %106 = math.tanh %105 : vector<8x128xf32>
    %cst_58 = arith.constant 5.000000e-01 : f32
    %107 = vector.broadcast %cst_58 : f32 to vector<8x128xf32>
    %108 = arith.mulf %107, %106 : vector<8x128xf32>
    %cst_59 = arith.constant 5.000000e-01 : f32
    %109 = vector.broadcast %cst_59 : f32 to vector<8x128xf32>
    %110 = arith.addf %108, %109 : vector<8x128xf32>
    %111 = vector.extract_strided_slice %94 {offsets = [0, 256], sizes = [8, 128], strides = [1, 1]} : vector<8x512xf32> to vector<8x128xf32>
    %112 = math.tanh %111 : vector<8x128xf32>
    %113 = vector.extract_strided_slice %94 {offsets = [0, 384], sizes = [8, 128], strides = [1, 1]} : vector<8x512xf32> to vector<8x128xf32>
    %cst_60 = arith.constant 5.000000e-01 : f32
    %114 = vector.broadcast %cst_60 : f32 to vector<8x128xf32>
    %115 = arith.mulf %114, %113 : vector<8x128xf32>
    %116 = math.tanh %115 : vector<8x128xf32>
    %cst_61 = arith.constant 5.000000e-01 : f32
    %117 = vector.broadcast %cst_61 : f32 to vector<8x128xf32>
    %118 = arith.mulf %117, %116 : vector<8x128xf32>
    %cst_62 = arith.constant 5.000000e-01 : f32
    %119 = vector.broadcast %cst_62 : f32 to vector<8x128xf32>
    %120 = arith.addf %118, %119 : vector<8x128xf32>
    %121 = arith.mulf %110, %82 : vector<8x128xf32>
    %122 = arith.mulf %102, %112 : vector<8x128xf32>
    %123 = arith.addf %121, %122 : vector<8x128xf32>
    %124 = math.tanh %123 : vector<8x128xf32>
    %125 = arith.mulf %120, %124 : vector<8x128xf32>
    %c0_63 = arith.constant 0 : index
    %c0_64 = arith.constant 0 : index
    %126 = vector.load %arg4[%c0_63, %c0_64] : memref<128x512xf32, #tpu.memory_space<vmem>>, vector<128x512xf32>
    %cst_65 = arith.constant dense<0.000000e+00> : vector<8x512xf32>
    %127 = tpu.matmul %125, %126, %cst_65 {dimension_numbers = #tpu.dot_dimension_numbers<[1], [0], [0], [1], [0, 0, 1, 1], [], []>} : vector<8x128xf32>, vector<128x512xf32>, vector<8x512xf32> -> vector<8x512xf32>
    %c0_66 = arith.constant 0 : index
    %c0_67 = arith.constant 0 : index
    %128 = vector.load %arg6[%c0_66, %c0_67] : memref<1x512xf32, #tpu.memory_space<vmem>>, vector<1x512xf32>
    %129 = vector.broadcast %128 : vector<1x512xf32> to vector<8x512xf32>
    %130 = arith.addf %127, %129 : vector<8x512xf32>
    %c16_68 = arith.constant 16 : index
    %c0_69 = arith.constant 0 : index
    %131 = vector.load %arg17[%c16_68, %c0_69] : memref<64x512xf32, #tpu.memory_space<vmem>>, vector<8x512xf32>
    tpu.vector_store %arg17[%c16_68, %c0_69], %130 {strides = array<i32>} : memref<64x512xf32, #tpu.memory_space<vmem>>, vector<8x512xf32>,
    %c24 = arith.constant 24 : index
    %c0_70 = arith.constant 0 : index
    %132 = vector.load %arg16[%c24, %c0_70] : memref<64x512xf32, #tpu.memory_space<vmem>>, vector<8x512xf32>
    %c0_71 = arith.constant 0 : index
    %c0_72 = arith.constant 0 : index
    %133 = vector.load %arg2[%c0_71, %c0_72] : memref<128x512xf32, #tpu.memory_space<vmem>>, vector<128x512xf32>
    %cst_73 = arith.constant dense<0.000000e+00> : vector<8x512xf32>
    %134 = tpu.matmul %125, %133, %cst_73 {dimension_numbers = #tpu.dot_dimension_numbers<[1], [0], [0], [1], [0, 0, 1, 1], [], []>} : vector<8x128xf32>, vector<128x512xf32>, vector<8x512xf32> -> vector<8x512xf32>
    %135 = arith.addf %132, %134 : vector<8x512xf32>
    %136 = vector.extract_strided_slice %135 {offsets = [0, 0], sizes = [8, 128], strides = [1, 1]} : vector<8x512xf32> to vector<8x128xf32>
    %cst_74 = arith.constant 5.000000e-01 : f32
    %137 = vector.broadcast %cst_74 : f32 to vector<8x128xf32>
    %138 = arith.mulf %137, %136 : vector<8x128xf32>
    %139 = math.tanh %138 : vector<8x128xf32>
    %cst_75 = arith.constant 5.000000e-01 : f32
    %140 = vector.broadcast %cst_75 : f32 to vector<8x128xf32>
    %141 = arith.mulf %140, %139 : vector<8x128xf32>
    %cst_76 = arith.constant 5.000000e-01 : f32
    %142 = vector.broadcast %cst_76 : f32 to vector<8x128xf32>
    %143 = arith.addf %141, %142 : vector<8x128xf32>
    %144 = vector.extract_strided_slice %135 {offsets = [0, 128], sizes = [8, 128], strides = [1, 1]} : vector<8x512xf32> to vector<8x128xf32>
    %cst_77 = arith.constant 5.000000e-01 : f32
    %145 = vector.broadcast %cst_77 : f32 to vector<8x128xf32>
    %146 = arith.mulf %145, %144 : vector<8x128xf32>
    %147 = math.tanh %146 : vector<8x128xf32>
    %cst_78 = arith.constant 5.000000e-01 : f32
    %148 = vector.broadcast %cst_78 : f32 to vector<8x128xf32>
    %149 = arith.mulf %148, %147 : vector<8x128xf32>
    %cst_79 = arith.constant 5.000000e-01 : f32
    %150 = vector.broadcast %cst_79 : f32 to vector<8x128xf32>
    %151 = arith.addf %149, %150 : vector<8x128xf32>
    %152 = vector.extract_strided_slice %135 {offsets = [0, 256], sizes = [8, 128], strides = [1, 1]} : vector<8x512xf32> to vector<8x128xf32>
    %153 = math.tanh %152 : vector<8x128xf32>
    %154 = vector.extract_strided_slice %135 {offsets = [0, 384], sizes = [8, 128], strides = [1, 1]} : vector<8x512xf32> to vector<8x128xf32>
    %cst_80 = arith.constant 5.000000e-01 : f32
    %155 = vector.broadcast %cst_80 : f32 to vector<8x128xf32>
    %156 = arith.mulf %155, %154 : vector<8x128xf32>
    %157 = math.tanh %156 : vector<8x128xf32>
    %cst_81 = arith.constant 5.000000e-01 : f32
    %158 = vector.broadcast %cst_81 : f32 to vector<8x128xf32>
    %159 = arith.mulf %158, %157 : vector<8x128xf32>
    %cst_82 = arith.constant 5.000000e-01 : f32
    %160 = vector.broadcast %cst_82 : f32 to vector<8x128xf32>
    %161 = arith.addf %159, %160 : vector<8x128xf32>
    %162 = arith.mulf %151, %123 : vector<8x128xf32>
    %163 = arith.mulf %143, %153 : vector<8x128xf32>
    %164 = arith.addf %162, %163 : vector<8x128xf32>
    %165 = math.tanh %164 : vector<8x128xf32>
    %166 = arith.mulf %161, %165 : vector<8x128xf32>
    %c0_83 = arith.constant 0 : index
    %c0_84 = arith.constant 0 : index
    %167 = vector.load %arg4[%c0_83, %c0_84] : memref<128x512xf32, #tpu.memory_space<vmem>>, vector<128x512xf32>
    %cst_85 = arith.constant dense<0.000000e+00> : vector<8x512xf32>
    %168 = tpu.matmul %166, %167, %cst_85 {dimension_numbers = #tpu.dot_dimension_numbers<[1], [0], [0], [1], [0, 0, 1, 1], [], []>} : vector<8x128xf32>, vector<128x512xf32>, vector<8x512xf32> -> vector<8x512xf32>
    %c0_86 = arith.constant 0 : index
    %c0_87 = arith.constant 0 : index
    %169 = vector.load %arg6[%c0_86, %c0_87] : memref<1x512xf32, #tpu.memory_space<vmem>>, vector<1x512xf32>
    %170 = vector.broadcast %169 : vector<1x512xf32> to vector<8x512xf32>
    %171 = arith.addf %168, %170 : vector<8x512xf32>
    %c24_88 = arith.constant 24 : index
    %c0_89 = arith.constant 0 : index
    %172 = vector.load %arg17[%c24_88, %c0_89] : memref<64x512xf32, #tpu.memory_space<vmem>>, vector<8x512xf32>
    tpu.vector_store %arg17[%c24_88, %c0_89], %171 {strides = array<i32>} : memref<64x512xf32, #tpu.memory_space<vmem>>, vector<8x512xf32>,
    %c32 = arith.constant 32 : index
    %c0_90 = arith.constant 0 : index
    %173 = vector.load %arg16[%c32, %c0_90] : memref<64x512xf32, #tpu.memory_space<vmem>>, vector<8x512xf32>
    %c0_91 = arith.constant 0 : index
    %c0_92 = arith.constant 0 : index
    %174 = vector.load %arg2[%c0_91, %c0_92] : memref<128x512xf32, #tpu.memory_space<vmem>>, vector<128x512xf32>
    %cst_93 = arith.constant dense<0.000000e+00> : vector<8x512xf32>
    %175 = tpu.matmul %166, %174, %cst_93 {dimension_numbers = #tpu.dot_dimension_numbers<[1], [0], [0], [1], [0, 0, 1, 1], [], []>} : vector<8x128xf32>, vector<128x512xf32>, vector<8x512xf32> -> vector<8x512xf32>
    %176 = arith.addf %173, %175 : vector<8x512xf32>
    %177 = vector.extract_strided_slice %176 {offsets = [0, 0], sizes = [8, 128], strides = [1, 1]} : vector<8x512xf32> to vector<8x128xf32>
    %cst_94 = arith.constant 5.000000e-01 : f32
    %178 = vector.broadcast %cst_94 : f32 to vector<8x128xf32>
    %179 = arith.mulf %178, %177 : vector<8x128xf32>
    %180 = math.tanh %179 : vector<8x128xf32>
    %cst_95 = arith.constant 5.000000e-01 : f32
    %181 = vector.broadcast %cst_95 : f32 to vector<8x128xf32>
    %182 = arith.mulf %181, %180 : vector<8x128xf32>
    %cst_96 = arith.constant 5.000000e-01 : f32
    %183 = vector.broadcast %cst_96 : f32 to vector<8x128xf32>
    %184 = arith.addf %182, %183 : vector<8x128xf32>
    %185 = vector.extract_strided_slice %176 {offsets = [0, 128], sizes = [8, 128], strides = [1, 1]} : vector<8x512xf32> to vector<8x128xf32>
    %cst_97 = arith.constant 5.000000e-01 : f32
    %186 = vector.broadcast %cst_97 : f32 to vector<8x128xf32>
    %187 = arith.mulf %186, %185 : vector<8x128xf32>
    %188 = math.tanh %187 : vector<8x128xf32>
    %cst_98 = arith.constant 5.000000e-01 : f32
    %189 = vector.broadcast %cst_98 : f32 to vector<8x128xf32>
    %190 = arith.mulf %189, %188 : vector<8x128xf32>
    %cst_99 = arith.constant 5.000000e-01 : f32
    %191 = vector.broadcast %cst_99 : f32 to vector<8x128xf32>
    %192 = arith.addf %190, %191 : vector<8x128xf32>
    %193 = vector.extract_strided_slice %176 {offsets = [0, 256], sizes = [8, 128], strides = [1, 1]} : vector<8x512xf32> to vector<8x128xf32>
    %194 = math.tanh %193 : vector<8x128xf32>
    %195 = vector.extract_strided_slice %176 {offsets = [0, 384], sizes = [8, 128], strides = [1, 1]} : vector<8x512xf32> to vector<8x128xf32>
    %cst_100 = arith.constant 5.000000e-01 : f32
    %196 = vector.broadcast %cst_100 : f32 to vector<8x128xf32>
    %197 = arith.mulf %196, %195 : vector<8x128xf32>
    %198 = math.tanh %197 : vector<8x128xf32>
    %cst_101 = arith.constant 5.000000e-01 : f32
    %199 = vector.broadcast %cst_101 : f32 to vector<8x128xf32>
    %200 = arith.mulf %199, %198 : vector<8x128xf32>
    %cst_102 = arith.constant 5.000000e-01 : f32
    %201 = vector.broadcast %cst_102 : f32 to vector<8x128xf32>
    %202 = arith.addf %200, %201 : vector<8x128xf32>
    %203 = arith.mulf %192, %164 : vector<8x128xf32>
    %204 = arith.mulf %184, %194 : vector<8x128xf32>
    %205 = arith.addf %203, %204 : vector<8x128xf32>
    %206 = math.tanh %205 : vector<8x128xf32>
    %207 = arith.mulf %202, %206 : vector<8x128xf32>
    %c0_103 = arith.constant 0 : index
    %c0_104 = arith.constant 0 : index
    %208 = vector.load %arg4[%c0_103, %c0_104] : memref<128x512xf32, #tpu.memory_space<vmem>>, vector<128x512xf32>
    %cst_105 = arith.constant dense<0.000000e+00> : vector<8x512xf32>
    %209 = tpu.matmul %207, %208, %cst_105 {dimension_numbers = #tpu.dot_dimension_numbers<[1], [0], [0], [1], [0, 0, 1, 1], [], []>} : vector<8x128xf32>, vector<128x512xf32>, vector<8x512xf32> -> vector<8x512xf32>
    %c0_106 = arith.constant 0 : index
    %c0_107 = arith.constant 0 : index
    %210 = vector.load %arg6[%c0_106, %c0_107] : memref<1x512xf32, #tpu.memory_space<vmem>>, vector<1x512xf32>
    %211 = vector.broadcast %210 : vector<1x512xf32> to vector<8x512xf32>
    %212 = arith.addf %209, %211 : vector<8x512xf32>
    %c32_108 = arith.constant 32 : index
    %c0_109 = arith.constant 0 : index
    %213 = vector.load %arg17[%c32_108, %c0_109] : memref<64x512xf32, #tpu.memory_space<vmem>>, vector<8x512xf32>
    tpu.vector_store %arg17[%c32_108, %c0_109], %212 {strides = array<i32>} : memref<64x512xf32, #tpu.memory_space<vmem>>, vector<8x512xf32>,
    %c40 = arith.constant 40 : index
    %c0_110 = arith.constant 0 : index
    %214 = vector.load %arg16[%c40, %c0_110] : memref<64x512xf32, #tpu.memory_space<vmem>>, vector<8x512xf32>
    %c0_111 = arith.constant 0 : index
    %c0_112 = arith.constant 0 : index
    %215 = vector.load %arg2[%c0_111, %c0_112] : memref<128x512xf32, #tpu.memory_space<vmem>>, vector<128x512xf32>
    %cst_113 = arith.constant dense<0.000000e+00> : vector<8x512xf32>
    %216 = tpu.matmul %207, %215, %cst_113 {dimension_numbers = #tpu.dot_dimension_numbers<[1], [0], [0], [1], [0, 0, 1, 1], [], []>} : vector<8x128xf32>, vector<128x512xf32>, vector<8x512xf32> -> vector<8x512xf32>
    %217 = arith.addf %214, %216 : vector<8x512xf32>
    %218 = vector.extract_strided_slice %217 {offsets = [0, 0], sizes = [8, 128], strides = [1, 1]} : vector<8x512xf32> to vector<8x128xf32>
    %cst_114 = arith.constant 5.000000e-01 : f32
    %219 = vector.broadcast %cst_114 : f32 to vector<8x128xf32>
    %220 = arith.mulf %219, %218 : vector<8x128xf32>
    %221 = math.tanh %220 : vector<8x128xf32>
    %cst_115 = arith.constant 5.000000e-01 : f32
    %222 = vector.broadcast %cst_115 : f32 to vector<8x128xf32>
    %223 = arith.mulf %222, %221 : vector<8x128xf32>
    %cst_116 = arith.constant 5.000000e-01 : f32
    %224 = vector.broadcast %cst_116 : f32 to vector<8x128xf32>
    %225 = arith.addf %223, %224 : vector<8x128xf32>
    %226 = vector.extract_strided_slice %217 {offsets = [0, 128], sizes = [8, 128], strides = [1, 1]} : vector<8x512xf32> to vector<8x128xf32>
    %cst_117 = arith.constant 5.000000e-01 : f32
    %227 = vector.broadcast %cst_117 : f32 to vector<8x128xf32>
    %228 = arith.mulf %227, %226 : vector<8x128xf32>
    %229 = math.tanh %228 : vector<8x128xf32>
    %cst_118 = arith.constant 5.000000e-01 : f32
    %230 = vector.broadcast %cst_118 : f32 to vector<8x128xf32>
    %231 = arith.mulf %230, %229 : vector<8x128xf32>
    %cst_119 = arith.constant 5.000000e-01 : f32
    %232 = vector.broadcast %cst_119 : f32 to vector<8x128xf32>
    %233 = arith.addf %231, %232 : vector<8x128xf32>
    %234 = vector.extract_strided_slice %217 {offsets = [0, 256], sizes = [8, 128], strides = [1, 1]} : vector<8x512xf32> to vector<8x128xf32>
    %235 = math.tanh %234 : vector<8x128xf32>
    %236 = vector.extract_strided_slice %217 {offsets = [0, 384], sizes = [8, 128], strides = [1, 1]} : vector<8x512xf32> to vector<8x128xf32>
    %cst_120 = arith.constant 5.000000e-01 : f32
    %237 = vector.broadcast %cst_120 : f32 to vector<8x128xf32>
    %238 = arith.mulf %237, %236 : vector<8x128xf32>
    %239 = math.tanh %238 : vector<8x128xf32>
    %cst_121 = arith.constant 5.000000e-01 : f32
    %240 = vector.broadcast %cst_121 : f32 to vector<8x128xf32>
    %241 = arith.mulf %240, %239 : vector<8x128xf32>
    %cst_122 = arith.constant 5.000000e-01 : f32
    %242 = vector.broadcast %cst_122 : f32 to vector<8x128xf32>
    %243 = arith.addf %241, %242 : vector<8x128xf32>
    %244 = arith.mulf %233, %205 : vector<8x128xf32>
    %245 = arith.mulf %225, %235 : vector<8x128xf32>
    %246 = arith.addf %244, %245 : vector<8x128xf32>
    %247 = math.tanh %246 : vector<8x128xf32>
    %248 = arith.mulf %243, %247 : vector<8x128xf32>
    %c0_123 = arith.constant 0 : index
    %c0_124 = arith.constant 0 : index
    %249 = vector.load %arg4[%c0_123, %c0_124] : memref<128x512xf32, #tpu.memory_space<vmem>>, vector<128x512xf32>
    %cst_125 = arith.constant dense<0.000000e+00> : vector<8x512xf32>
    %250 = tpu.matmul %248, %249, %cst_125 {dimension_numbers = #tpu.dot_dimension_numbers<[1], [0], [0], [1], [0, 0, 1, 1], [], []>} : vector<8x128xf32>, vector<128x512xf32>, vector<8x512xf32> -> vector<8x512xf32>
    %c0_126 = arith.constant 0 : index
    %c0_127 = arith.constant 0 : index
    %251 = vector.load %arg6[%c0_126, %c0_127] : memref<1x512xf32, #tpu.memory_space<vmem>>, vector<1x512xf32>
    %252 = vector.broadcast %251 : vector<1x512xf32> to vector<8x512xf32>
    %253 = arith.addf %250, %252 : vector<8x512xf32>
    %c40_128 = arith.constant 40 : index
    %c0_129 = arith.constant 0 : index
    %254 = vector.load %arg17[%c40_128, %c0_129] : memref<64x512xf32, #tpu.memory_space<vmem>>, vector<8x512xf32>
    tpu.vector_store %arg17[%c40_128, %c0_129], %253 {strides = array<i32>} : memref<64x512xf32, #tpu.memory_space<vmem>>, vector<8x512xf32>,
    %c48 = arith.constant 48 : index
    %c0_130 = arith.constant 0 : index
    %255 = vector.load %arg16[%c48, %c0_130] : memref<64x512xf32, #tpu.memory_space<vmem>>, vector<8x512xf32>
    %c0_131 = arith.constant 0 : index
    %c0_132 = arith.constant 0 : index
    %256 = vector.load %arg2[%c0_131, %c0_132] : memref<128x512xf32, #tpu.memory_space<vmem>>, vector<128x512xf32>
    %cst_133 = arith.constant dense<0.000000e+00> : vector<8x512xf32>
    %257 = tpu.matmul %248, %256, %cst_133 {dimension_numbers = #tpu.dot_dimension_numbers<[1], [0], [0], [1], [0, 0, 1, 1], [], []>} : vector<8x128xf32>, vector<128x512xf32>, vector<8x512xf32> -> vector<8x512xf32>
    %258 = arith.addf %255, %257 : vector<8x512xf32>
    %259 = vector.extract_strided_slice %258 {offsets = [0, 0], sizes = [8, 128], strides = [1, 1]} : vector<8x512xf32> to vector<8x128xf32>
    %cst_134 = arith.constant 5.000000e-01 : f32
    %260 = vector.broadcast %cst_134 : f32 to vector<8x128xf32>
    %261 = arith.mulf %260, %259 : vector<8x128xf32>
    %262 = math.tanh %261 : vector<8x128xf32>
    %cst_135 = arith.constant 5.000000e-01 : f32
    %263 = vector.broadcast %cst_135 : f32 to vector<8x128xf32>
    %264 = arith.mulf %263, %262 : vector<8x128xf32>
    %cst_136 = arith.constant 5.000000e-01 : f32
    %265 = vector.broadcast %cst_136 : f32 to vector<8x128xf32>
    %266 = arith.addf %264, %265 : vector<8x128xf32>
    %267 = vector.extract_strided_slice %258 {offsets = [0, 128], sizes = [8, 128], strides = [1, 1]} : vector<8x512xf32> to vector<8x128xf32>
    %cst_137 = arith.constant 5.000000e-01 : f32
    %268 = vector.broadcast %cst_137 : f32 to vector<8x128xf32>
    %269 = arith.mulf %268, %267 : vector<8x128xf32>
    %270 = math.tanh %269 : vector<8x128xf32>
    %cst_138 = arith.constant 5.000000e-01 : f32
    %271 = vector.broadcast %cst_138 : f32 to vector<8x128xf32>
    %272 = arith.mulf %271, %270 : vector<8x128xf32>
    %cst_139 = arith.constant 5.000000e-01 : f32
    %273 = vector.broadcast %cst_139 : f32 to vector<8x128xf32>
    %274 = arith.addf %272, %273 : vector<8x128xf32>
    %275 = vector.extract_strided_slice %258 {offsets = [0, 256], sizes = [8, 128], strides = [1, 1]} : vector<8x512xf32> to vector<8x128xf32>
    %276 = math.tanh %275 : vector<8x128xf32>
    %277 = vector.extract_strided_slice %258 {offsets = [0, 384], sizes = [8, 128], strides = [1, 1]} : vector<8x512xf32> to vector<8x128xf32>
    %cst_140 = arith.constant 5.000000e-01 : f32
    %278 = vector.broadcast %cst_140 : f32 to vector<8x128xf32>
    %279 = arith.mulf %278, %277 : vector<8x128xf32>
    %280 = math.tanh %279 : vector<8x128xf32>
    %cst_141 = arith.constant 5.000000e-01 : f32
    %281 = vector.broadcast %cst_141 : f32 to vector<8x128xf32>
    %282 = arith.mulf %281, %280 : vector<8x128xf32>
    %cst_142 = arith.constant 5.000000e-01 : f32
    %283 = vector.broadcast %cst_142 : f32 to vector<8x128xf32>
    %284 = arith.addf %282, %283 : vector<8x128xf32>
    %285 = arith.mulf %274, %246 : vector<8x128xf32>
    %286 = arith.mulf %266, %276 : vector<8x128xf32>
    %287 = arith.addf %285, %286 : vector<8x128xf32>
    %288 = math.tanh %287 : vector<8x128xf32>
    %289 = arith.mulf %284, %288 : vector<8x128xf32>
    %c0_143 = arith.constant 0 : index
    %c0_144 = arith.constant 0 : index
    %290 = vector.load %arg4[%c0_143, %c0_144] : memref<128x512xf32, #tpu.memory_space<vmem>>, vector<128x512xf32>
    %cst_145 = arith.constant dense<0.000000e+00> : vector<8x512xf32>
    %291 = tpu.matmul %289, %290, %cst_145 {dimension_numbers = #tpu.dot_dimension_numbers<[1], [0], [0], [1], [0, 0, 1, 1], [], []>} : vector<8x128xf32>, vector<128x512xf32>, vector<8x512xf32> -> vector<8x512xf32>
    %c0_146 = arith.constant 0 : index
    %c0_147 = arith.constant 0 : index
    %292 = vector.load %arg6[%c0_146, %c0_147] : memref<1x512xf32, #tpu.memory_space<vmem>>, vector<1x512xf32>
    %293 = vector.broadcast %292 : vector<1x512xf32> to vector<8x512xf32>
    %294 = arith.addf %291, %293 : vector<8x512xf32>
    %c48_148 = arith.constant 48 : index
    %c0_149 = arith.constant 0 : index
    %295 = vector.load %arg17[%c48_148, %c0_149] : memref<64x512xf32, #tpu.memory_space<vmem>>, vector<8x512xf32>
    tpu.vector_store %arg17[%c48_148, %c0_149], %294 {strides = array<i32>} : memref<64x512xf32, #tpu.memory_space<vmem>>, vector<8x512xf32>,
    %c56 = arith.constant 56 : index
    %c0_150 = arith.constant 0 : index
    %296 = vector.load %arg16[%c56, %c0_150] : memref<64x512xf32, #tpu.memory_space<vmem>>, vector<8x512xf32>
    %c0_151 = arith.constant 0 : index
    %c0_152 = arith.constant 0 : index
    %297 = vector.load %arg2[%c0_151, %c0_152] : memref<128x512xf32, #tpu.memory_space<vmem>>, vector<128x512xf32>
    %cst_153 = arith.constant dense<0.000000e+00> : vector<8x512xf32>
    %298 = tpu.matmul %289, %297, %cst_153 {dimension_numbers = #tpu.dot_dimension_numbers<[1], [0], [0], [1], [0, 0, 1, 1], [], []>} : vector<8x128xf32>, vector<128x512xf32>, vector<8x512xf32> -> vector<8x512xf32>
    %299 = arith.addf %296, %298 : vector<8x512xf32>
    %300 = vector.extract_strided_slice %299 {offsets = [0, 0], sizes = [8, 128], strides = [1, 1]} : vector<8x512xf32> to vector<8x128xf32>
    %cst_154 = arith.constant 5.000000e-01 : f32
    %301 = vector.broadcast %cst_154 : f32 to vector<8x128xf32>
    %302 = arith.mulf %301, %300 : vector<8x128xf32>
    %303 = math.tanh %302 : vector<8x128xf32>
    %cst_155 = arith.constant 5.000000e-01 : f32
    %304 = vector.broadcast %cst_155 : f32 to vector<8x128xf32>
    %305 = arith.mulf %304, %303 : vector<8x128xf32>
    %cst_156 = arith.constant 5.000000e-01 : f32
    %306 = vector.broadcast %cst_156 : f32 to vector<8x128xf32>
    %307 = arith.addf %305, %306 : vector<8x128xf32>
    %308 = vector.extract_strided_slice %299 {offsets = [0, 128], sizes = [8, 128], strides = [1, 1]} : vector<8x512xf32> to vector<8x128xf32>
    %cst_157 = arith.constant 5.000000e-01 : f32
    %309 = vector.broadcast %cst_157 : f32 to vector<8x128xf32>
    %310 = arith.mulf %309, %308 : vector<8x128xf32>
    %311 = math.tanh %310 : vector<8x128xf32>
    %cst_158 = arith.constant 5.000000e-01 : f32
    %312 = vector.broadcast %cst_158 : f32 to vector<8x128xf32>
    %313 = arith.mulf %312, %311 : vector<8x128xf32>
    %cst_159 = arith.constant 5.000000e-01 : f32
    %314 = vector.broadcast %cst_159 : f32 to vector<8x128xf32>
    %315 = arith.addf %313, %314 : vector<8x128xf32>
    %316 = vector.extract_strided_slice %299 {offsets = [0, 256], sizes = [8, 128], strides = [1, 1]} : vector<8x512xf32> to vector<8x128xf32>
    %317 = math.tanh %316 : vector<8x128xf32>
    %318 = vector.extract_strided_slice %299 {offsets = [0, 384], sizes = [8, 128], strides = [1, 1]} : vector<8x512xf32> to vector<8x128xf32>
    %cst_160 = arith.constant 5.000000e-01 : f32
    %319 = vector.broadcast %cst_160 : f32 to vector<8x128xf32>
    %320 = arith.mulf %319, %318 : vector<8x128xf32>
    %321 = math.tanh %320 : vector<8x128xf32>
    %cst_161 = arith.constant 5.000000e-01 : f32
    %322 = vector.broadcast %cst_161 : f32 to vector<8x128xf32>
    %323 = arith.mulf %322, %321 : vector<8x128xf32>
    %cst_162 = arith.constant 5.000000e-01 : f32
    %324 = vector.broadcast %cst_162 : f32 to vector<8x128xf32>
    %325 = arith.addf %323, %324 : vector<8x128xf32>
    %326 = arith.mulf %315, %287 : vector<8x128xf32>
    %327 = arith.mulf %307, %317 : vector<8x128xf32>
    %328 = arith.addf %326, %327 : vector<8x128xf32>
    %329 = math.tanh %328 : vector<8x128xf32>
    %330 = arith.mulf %325, %329 : vector<8x128xf32>
    %c0_163 = arith.constant 0 : index
    %c0_164 = arith.constant 0 : index
    %331 = vector.load %arg4[%c0_163, %c0_164] : memref<128x512xf32, #tpu.memory_space<vmem>>, vector<128x512xf32>
    %cst_165 = arith.constant dense<0.000000e+00> : vector<8x512xf32>
    %332 = tpu.matmul %330, %331, %cst_165 {dimension_numbers = #tpu.dot_dimension_numbers<[1], [0], [0], [1], [0, 0, 1, 1], [], []>} : vector<8x128xf32>, vector<128x512xf32>, vector<8x512xf32> -> vector<8x512xf32>
    %c0_166 = arith.constant 0 : index
    %c0_167 = arith.constant 0 : index
    %333 = vector.load %arg6[%c0_166, %c0_167] : memref<1x512xf32, #tpu.memory_space<vmem>>, vector<1x512xf32>
    %334 = vector.broadcast %333 : vector<1x512xf32> to vector<8x512xf32>
    %335 = arith.addf %332, %334 : vector<8x512xf32>
    %c56_168 = arith.constant 56 : index
    %c0_169 = arith.constant 0 : index
    %336 = vector.load %arg17[%c56_168, %c0_169] : memref<64x512xf32, #tpu.memory_space<vmem>>, vector<8x512xf32>
    tpu.vector_store %arg17[%c56_168, %c0_169], %335 {strides = array<i32>} : memref<64x512xf32, #tpu.memory_space<vmem>>, vector<8x512xf32>,
    %cst_170 = arith.constant 0.000000e+00 : f32
    %337 = vector.broadcast %cst_170 : f32 to vector<8x128xf32>
    %cst_171 = arith.constant 0.000000e+00 : f32
    %338 = vector.broadcast %cst_171 : f32 to vector<8x128xf32>
    %c0_172 = arith.constant 0 : index
    %c0_173 = arith.constant 0 : index
    %339 = vector.load %arg17[%c0_172, %c0_173] : memref<64x512xf32, #tpu.memory_space<vmem>>, vector<8x512xf32>
    %c0_174 = arith.constant 0 : index
    %c0_175 = arith.constant 0 : index
    %340 = vector.load %arg5[%c0_174, %c0_175] : memref<128x512xf32, #tpu.memory_space<vmem>>, vector<128x512xf32>
    %cst_176 = arith.constant dense<0.000000e+00> : vector<8x512xf32>
    %341 = tpu.matmul %337, %340, %cst_176 {dimension_numbers = #tpu.dot_dimension_numbers<[1], [0], [0], [1], [0, 0, 1, 1], [], []>} : vector<8x128xf32>, vector<128x512xf32>, vector<8x512xf32> -> vector<8x512xf32>
    %342 = arith.addf %339, %341 : vector<8x512xf32>
    %343 = vector.extract_strided_slice %342 {offsets = [0, 0], sizes = [8, 128], strides = [1, 1]} : vector<8x512xf32> to vector<8x128xf32>
    %cst_177 = arith.constant 5.000000e-01 : f32
    %344 = vector.broadcast %cst_177 : f32 to vector<8x128xf32>
    %345 = arith.mulf %344, %343 : vector<8x128xf32>
    %346 = math.tanh %345 : vector<8x128xf32>
    %cst_178 = arith.constant 5.000000e-01 : f32
    %347 = vector.broadcast %cst_178 : f32 to vector<8x128xf32>
    %348 = arith.mulf %347, %346 : vector<8x128xf32>
    %cst_179 = arith.constant 5.000000e-01 : f32
    %349 = vector.broadcast %cst_179 : f32 to vector<8x128xf32>
    %350 = arith.addf %348, %349 : vector<8x128xf32>
    %351 = vector.extract_strided_slice %342 {offsets = [0, 128], sizes = [8, 128], strides = [1, 1]} : vector<8x512xf32> to vector<8x128xf32>
    %cst_180 = arith.constant 5.000000e-01 : f32
    %352 = vector.broadcast %cst_180 : f32 to vector<8x128xf32>
    %353 = arith.mulf %352, %351 : vector<8x128xf32>
    %354 = math.tanh %353 : vector<8x128xf32>
    %cst_181 = arith.constant 5.000000e-01 : f32
    %355 = vector.broadcast %cst_181 : f32 to vector<8x128xf32>
    %356 = arith.mulf %355, %354 : vector<8x128xf32>
    %cst_182 = arith.constant 5.000000e-01 : f32
    %357 = vector.broadcast %cst_182 : f32 to vector<8x128xf32>
    %358 = arith.addf %356, %357 : vector<8x128xf32>
    %359 = vector.extract_strided_slice %342 {offsets = [0, 256], sizes = [8, 128], strides = [1, 1]} : vector<8x512xf32> to vector<8x128xf32>
    %360 = math.tanh %359 : vector<8x128xf32>
    %361 = vector.extract_strided_slice %342 {offsets = [0, 384], sizes = [8, 128], strides = [1, 1]} : vector<8x512xf32> to vector<8x128xf32>
    %cst_183 = arith.constant 5.000000e-01 : f32
    %362 = vector.broadcast %cst_183 : f32 to vector<8x128xf32>
    %363 = arith.mulf %362, %361 : vector<8x128xf32>
    %364 = math.tanh %363 : vector<8x128xf32>
    %cst_184 = arith.constant 5.000000e-01 : f32
    %365 = vector.broadcast %cst_184 : f32 to vector<8x128xf32>
    %366 = arith.mulf %365, %364 : vector<8x128xf32>
    %cst_185 = arith.constant 5.000000e-01 : f32
    %367 = vector.broadcast %cst_185 : f32 to vector<8x128xf32>
    %368 = arith.addf %366, %367 : vector<8x128xf32>
    %369 = arith.mulf %358, %338 : vector<8x128xf32>
    %370 = arith.mulf %350, %360 : vector<8x128xf32>
    %371 = arith.addf %369, %370 : vector<8x128xf32>
    %372 = math.tanh %371 : vector<8x128xf32>
    %373 = arith.mulf %368, %372 : vector<8x128xf32>
    %c0_186 = arith.constant 0 : index
    %c0_187 = arith.constant 0 : index
    %374 = vector.load %arg18[%c0_186, %c0_187] : memref<64x128xf32, #tpu.memory_space<vmem>>, vector<8x128xf32>
    tpu.vector_store %arg18[%c0_186, %c0_187], %373 {strides = array<i32>} : memref<64x128xf32, #tpu.memory_space<vmem>>, vector<8x128xf32>,
    %c8_188 = arith.constant 8 : index
    %c0_189 = arith.constant 0 : index
    %375 = vector.load %arg17[%c8_188, %c0_189] : memref<64x512xf32, #tpu.memory_space<vmem>>, vector<8x512xf32>
    %c0_190 = arith.constant 0 : index
    %c0_191 = arith.constant 0 : index
    %376 = vector.load %arg5[%c0_190, %c0_191] : memref<128x512xf32, #tpu.memory_space<vmem>>, vector<128x512xf32>
    %cst_192 = arith.constant dense<0.000000e+00> : vector<8x512xf32>
    %377 = tpu.matmul %373, %376, %cst_192 {dimension_numbers = #tpu.dot_dimension_numbers<[1], [0], [0], [1], [0, 0, 1, 1], [], []>} : vector<8x128xf32>, vector<128x512xf32>, vector<8x512xf32> -> vector<8x512xf32>
    %378 = arith.addf %375, %377 : vector<8x512xf32>
    %379 = vector.extract_strided_slice %378 {offsets = [0, 0], sizes = [8, 128], strides = [1, 1]} : vector<8x512xf32> to vector<8x128xf32>
    %cst_193 = arith.constant 5.000000e-01 : f32
    %380 = vector.broadcast %cst_193 : f32 to vector<8x128xf32>
    %381 = arith.mulf %380, %379 : vector<8x128xf32>
    %382 = math.tanh %381 : vector<8x128xf32>
    %cst_194 = arith.constant 5.000000e-01 : f32
    %383 = vector.broadcast %cst_194 : f32 to vector<8x128xf32>
    %384 = arith.mulf %383, %382 : vector<8x128xf32>
    %cst_195 = arith.constant 5.000000e-01 : f32
    %385 = vector.broadcast %cst_195 : f32 to vector<8x128xf32>
    %386 = arith.addf %384, %385 : vector<8x128xf32>
    %387 = vector.extract_strided_slice %378 {offsets = [0, 128], sizes = [8, 128], strides = [1, 1]} : vector<8x512xf32> to vector<8x128xf32>
    %cst_196 = arith.constant 5.000000e-01 : f32
    %388 = vector.broadcast %cst_196 : f32 to vector<8x128xf32>
    %389 = arith.mulf %388, %387 : vector<8x128xf32>
    %390 = math.tanh %389 : vector<8x128xf32>
    %cst_197 = arith.constant 5.000000e-01 : f32
    %391 = vector.broadcast %cst_197 : f32 to vector<8x128xf32>
    %392 = arith.mulf %391, %390 : vector<8x128xf32>
    %cst_198 = arith.constant 5.000000e-01 : f32
    %393 = vector.broadcast %cst_198 : f32 to vector<8x128xf32>
    %394 = arith.addf %392, %393 : vector<8x128xf32>
    %395 = vector.extract_strided_slice %378 {offsets = [0, 256], sizes = [8, 128], strides = [1, 1]} : vector<8x512xf32> to vector<8x128xf32>
    %396 = math.tanh %395 : vector<8x128xf32>
    %397 = vector.extract_strided_slice %378 {offsets = [0, 384], sizes = [8, 128], strides = [1, 1]} : vector<8x512xf32> to vector<8x128xf32>
    %cst_199 = arith.constant 5.000000e-01 : f32
    %398 = vector.broadcast %cst_199 : f32 to vector<8x128xf32>
    %399 = arith.mulf %398, %397 : vector<8x128xf32>
    %400 = math.tanh %399 : vector<8x128xf32>
    %cst_200 = arith.constant 5.000000e-01 : f32
    %401 = vector.broadcast %cst_200 : f32 to vector<8x128xf32>
    %402 = arith.mulf %401, %400 : vector<8x128xf32>
    %cst_201 = arith.constant 5.000000e-01 : f32
    %403 = vector.broadcast %cst_201 : f32 to vector<8x128xf32>
    %404 = arith.addf %402, %403 : vector<8x128xf32>
    %405 = arith.mulf %394, %371 : vector<8x128xf32>
    %406 = arith.mulf %386, %396 : vector<8x128xf32>
    %407 = arith.addf %405, %406 : vector<8x128xf32>
    %408 = math.tanh %407 : vector<8x128xf32>
    %409 = arith.mulf %404, %408 : vector<8x128xf32>
    %c8_202 = arith.constant 8 : index
    %c0_203 = arith.constant 0 : index
    %410 = vector.load %arg18[%c8_202, %c0_203] : memref<64x128xf32, #tpu.memory_space<vmem>>, vector<8x128xf32>
    tpu.vector_store %arg18[%c8_202, %c0_203], %409 {strides = array<i32>} : memref<64x128xf32, #tpu.memory_space<vmem>>, vector<8x128xf32>,
    %c16_204 = arith.constant 16 : index
    %c0_205 = arith.constant 0 : index
    %411 = vector.load %arg17[%c16_204, %c0_205] : memref<64x512xf32, #tpu.memory_space<vmem>>, vector<8x512xf32>
    %c0_206 = arith.constant 0 : index
    %c0_207 = arith.constant 0 : index
    %412 = vector.load %arg5[%c0_206, %c0_207] : memref<128x512xf32, #tpu.memory_space<vmem>>, vector<128x512xf32>
    %cst_208 = arith.constant dense<0.000000e+00> : vector<8x512xf32>
    %413 = tpu.matmul %409, %412, %cst_208 {dimension_numbers = #tpu.dot_dimension_numbers<[1], [0], [0], [1], [0, 0, 1, 1], [], []>} : vector<8x128xf32>, vector<128x512xf32>, vector<8x512xf32> -> vector<8x512xf32>
    %414 = arith.addf %411, %413 : vector<8x512xf32>
    %415 = vector.extract_strided_slice %414 {offsets = [0, 0], sizes = [8, 128], strides = [1, 1]} : vector<8x512xf32> to vector<8x128xf32>
    %cst_209 = arith.constant 5.000000e-01 : f32
    %416 = vector.broadcast %cst_209 : f32 to vector<8x128xf32>
    %417 = arith.mulf %416, %415 : vector<8x128xf32>
    %418 = math.tanh %417 : vector<8x128xf32>
    %cst_210 = arith.constant 5.000000e-01 : f32
    %419 = vector.broadcast %cst_210 : f32 to vector<8x128xf32>
    %420 = arith.mulf %419, %418 : vector<8x128xf32>
    %cst_211 = arith.constant 5.000000e-01 : f32
    %421 = vector.broadcast %cst_211 : f32 to vector<8x128xf32>
    %422 = arith.addf %420, %421 : vector<8x128xf32>
    %423 = vector.extract_strided_slice %414 {offsets = [0, 128], sizes = [8, 128], strides = [1, 1]} : vector<8x512xf32> to vector<8x128xf32>
    %cst_212 = arith.constant 5.000000e-01 : f32
    %424 = vector.broadcast %cst_212 : f32 to vector<8x128xf32>
    %425 = arith.mulf %424, %423 : vector<8x128xf32>
    %426 = math.tanh %425 : vector<8x128xf32>
    %cst_213 = arith.constant 5.000000e-01 : f32
    %427 = vector.broadcast %cst_213 : f32 to vector<8x128xf32>
    %428 = arith.mulf %427, %426 : vector<8x128xf32>
    %cst_214 = arith.constant 5.000000e-01 : f32
    %429 = vector.broadcast %cst_214 : f32 to vector<8x128xf32>
    %430 = arith.addf %428, %429 : vector<8x128xf32>
    %431 = vector.extract_strided_slice %414 {offsets = [0, 256], sizes = [8, 128], strides = [1, 1]} : vector<8x512xf32> to vector<8x128xf32>
    %432 = math.tanh %431 : vector<8x128xf32>
    %433 = vector.extract_strided_slice %414 {offsets = [0, 384], sizes = [8, 128], strides = [1, 1]} : vector<8x512xf32> to vector<8x128xf32>
    %cst_215 = arith.constant 5.000000e-01 : f32
    %434 = vector.broadcast %cst_215 : f32 to vector<8x128xf32>
    %435 = arith.mulf %434, %433 : vector<8x128xf32>
    %436 = math.tanh %435 : vector<8x128xf32>
    %cst_216 = arith.constant 5.000000e-01 : f32
    %437 = vector.broadcast %cst_216 : f32 to vector<8x128xf32>
    %438 = arith.mulf %437, %436 : vector<8x128xf32>
    %cst_217 = arith.constant 5.000000e-01 : f32
    %439 = vector.broadcast %cst_217 : f32 to vector<8x128xf32>
    %440 = arith.addf %438, %439 : vector<8x128xf32>
    %441 = arith.mulf %430, %407 : vector<8x128xf32>
    %442 = arith.mulf %422, %432 : vector<8x128xf32>
    %443 = arith.addf %441, %442 : vector<8x128xf32>
    %444 = math.tanh %443 : vector<8x128xf32>
    %445 = arith.mulf %440, %444 : vector<8x128xf32>
    %c16_218 = arith.constant 16 : index
    %c0_219 = arith.constant 0 : index
    %446 = vector.load %arg18[%c16_218, %c0_219] : memref<64x128xf32, #tpu.memory_space<vmem>>, vector<8x128xf32>
    tpu.vector_store %arg18[%c16_218, %c0_219], %445 {strides = array<i32>} : memref<64x128xf32, #tpu.memory_space<vmem>>, vector<8x128xf32>,
    %c24_220 = arith.constant 24 : index
    %c0_221 = arith.constant 0 : index
    %447 = vector.load %arg17[%c24_220, %c0_221] : memref<64x512xf32, #tpu.memory_space<vmem>>, vector<8x512xf32>
    %c0_222 = arith.constant 0 : index
    %c0_223 = arith.constant 0 : index
    %448 = vector.load %arg5[%c0_222, %c0_223] : memref<128x512xf32, #tpu.memory_space<vmem>>, vector<128x512xf32>
    %cst_224 = arith.constant dense<0.000000e+00> : vector<8x512xf32>
    %449 = tpu.matmul %445, %448, %cst_224 {dimension_numbers = #tpu.dot_dimension_numbers<[1], [0], [0], [1], [0, 0, 1, 1], [], []>} : vector<8x128xf32>, vector<128x512xf32>, vector<8x512xf32> -> vector<8x512xf32>
    %450 = arith.addf %447, %449 : vector<8x512xf32>
    %451 = vector.extract_strided_slice %450 {offsets = [0, 0], sizes = [8, 128], strides = [1, 1]} : vector<8x512xf32> to vector<8x128xf32>
    %cst_225 = arith.constant 5.000000e-01 : f32
    %452 = vector.broadcast %cst_225 : f32 to vector<8x128xf32>
    %453 = arith.mulf %452, %451 : vector<8x128xf32>
    %454 = math.tanh %453 : vector<8x128xf32>
    %cst_226 = arith.constant 5.000000e-01 : f32
    %455 = vector.broadcast %cst_226 : f32 to vector<8x128xf32>
    %456 = arith.mulf %455, %454 : vector<8x128xf32>
    %cst_227 = arith.constant 5.000000e-01 : f32
    %457 = vector.broadcast %cst_227 : f32 to vector<8x128xf32>
    %458 = arith.addf %456, %457 : vector<8x128xf32>
    %459 = vector.extract_strided_slice %450 {offsets = [0, 128], sizes = [8, 128], strides = [1, 1]} : vector<8x512xf32> to vector<8x128xf32>
    %cst_228 = arith.constant 5.000000e-01 : f32
    %460 = vector.broadcast %cst_228 : f32 to vector<8x128xf32>
    %461 = arith.mulf %460, %459 : vector<8x128xf32>
    %462 = math.tanh %461 : vector<8x128xf32>
    %cst_229 = arith.constant 5.000000e-01 : f32
    %463 = vector.broadcast %cst_229 : f32 to vector<8x128xf32>
    %464 = arith.mulf %463, %462 : vector<8x128xf32>
    %cst_230 = arith.constant 5.000000e-01 : f32
    %465 = vector.broadcast %cst_230 : f32 to vector<8x128xf32>
    %466 = arith.addf %464, %465 : vector<8x128xf32>
    %467 = vector.extract_strided_slice %450 {offsets = [0, 256], sizes = [8, 128], strides = [1, 1]} : vector<8x512xf32> to vector<8x128xf32>
    %468 = math.tanh %467 : vector<8x128xf32>
    %469 = vector.extract_strided_slice %450 {offsets = [0, 384], sizes = [8, 128], strides = [1, 1]} : vector<8x512xf32> to vector<8x128xf32>
    %cst_231 = arith.constant 5.000000e-01 : f32
    %470 = vector.broadcast %cst_231 : f32 to vector<8x128xf32>
    %471 = arith.mulf %470, %469 : vector<8x128xf32>
    %472 = math.tanh %471 : vector<8x128xf32>
    %cst_232 = arith.constant 5.000000e-01 : f32
    %473 = vector.broadcast %cst_232 : f32 to vector<8x128xf32>
    %474 = arith.mulf %473, %472 : vector<8x128xf32>
    %cst_233 = arith.constant 5.000000e-01 : f32
    %475 = vector.broadcast %cst_233 : f32 to vector<8x128xf32>
    %476 = arith.addf %474, %475 : vector<8x128xf32>
    %477 = arith.mulf %466, %443 : vector<8x128xf32>
    %478 = arith.mulf %458, %468 : vector<8x128xf32>
    %479 = arith.addf %477, %478 : vector<8x128xf32>
    %480 = math.tanh %479 : vector<8x128xf32>
    %481 = arith.mulf %476, %480 : vector<8x128xf32>
    %c24_234 = arith.constant 24 : index
    %c0_235 = arith.constant 0 : index
    %482 = vector.load %arg18[%c24_234, %c0_235] : memref<64x128xf32, #tpu.memory_space<vmem>>, vector<8x128xf32>
    tpu.vector_store %arg18[%c24_234, %c0_235], %481 {strides = array<i32>} : memref<64x128xf32, #tpu.memory_space<vmem>>, vector<8x128xf32>,
    %c32_236 = arith.constant 32 : index
    %c0_237 = arith.constant 0 : index
    %483 = vector.load %arg17[%c32_236, %c0_237] : memref<64x512xf32, #tpu.memory_space<vmem>>, vector<8x512xf32>
    %c0_238 = arith.constant 0 : index
    %c0_239 = arith.constant 0 : index
    %484 = vector.load %arg5[%c0_238, %c0_239] : memref<128x512xf32, #tpu.memory_space<vmem>>, vector<128x512xf32>
    %cst_240 = arith.constant dense<0.000000e+00> : vector<8x512xf32>
    %485 = tpu.matmul %481, %484, %cst_240 {dimension_numbers = #tpu.dot_dimension_numbers<[1], [0], [0], [1], [0, 0, 1, 1], [], []>} : vector<8x128xf32>, vector<128x512xf32>, vector<8x512xf32> -> vector<8x512xf32>
    %486 = arith.addf %483, %485 : vector<8x512xf32>
    %487 = vector.extract_strided_slice %486 {offsets = [0, 0], sizes = [8, 128], strides = [1, 1]} : vector<8x512xf32> to vector<8x128xf32>
    %cst_241 = arith.constant 5.000000e-01 : f32
    %488 = vector.broadcast %cst_241 : f32 to vector<8x128xf32>
    %489 = arith.mulf %488, %487 : vector<8x128xf32>
    %490 = math.tanh %489 : vector<8x128xf32>
    %cst_242 = arith.constant 5.000000e-01 : f32
    %491 = vector.broadcast %cst_242 : f32 to vector<8x128xf32>
    %492 = arith.mulf %491, %490 : vector<8x128xf32>
    %cst_243 = arith.constant 5.000000e-01 : f32
    %493 = vector.broadcast %cst_243 : f32 to vector<8x128xf32>
    %494 = arith.addf %492, %493 : vector<8x128xf32>
    %495 = vector.extract_strided_slice %486 {offsets = [0, 128], sizes = [8, 128], strides = [1, 1]} : vector<8x512xf32> to vector<8x128xf32>
    %cst_244 = arith.constant 5.000000e-01 : f32
    %496 = vector.broadcast %cst_244 : f32 to vector<8x128xf32>
    %497 = arith.mulf %496, %495 : vector<8x128xf32>
    %498 = math.tanh %497 : vector<8x128xf32>
    %cst_245 = arith.constant 5.000000e-01 : f32
    %499 = vector.broadcast %cst_245 : f32 to vector<8x128xf32>
    %500 = arith.mulf %499, %498 : vector<8x128xf32>
    %cst_246 = arith.constant 5.000000e-01 : f32
    %501 = vector.broadcast %cst_246 : f32 to vector<8x128xf32>
    %502 = arith.addf %500, %501 : vector<8x128xf32>
    %503 = vector.extract_strided_slice %486 {offsets = [0, 256], sizes = [8, 128], strides = [1, 1]} : vector<8x512xf32> to vector<8x128xf32>
    %504 = math.tanh %503 : vector<8x128xf32>
    %505 = vector.extract_strided_slice %486 {offsets = [0, 384], sizes = [8, 128], strides = [1, 1]} : vector<8x512xf32> to vector<8x128xf32>
    %cst_247 = arith.constant 5.000000e-01 : f32
    %506 = vector.broadcast %cst_247 : f32 to vector<8x128xf32>
    %507 = arith.mulf %506, %505 : vector<8x128xf32>
    %508 = math.tanh %507 : vector<8x128xf32>
    %cst_248 = arith.constant 5.000000e-01 : f32
    %509 = vector.broadcast %cst_248 : f32 to vector<8x128xf32>
    %510 = arith.mulf %509, %508 : vector<8x128xf32>
    %cst_249 = arith.constant 5.000000e-01 : f32
    %511 = vector.broadcast %cst_249 : f32 to vector<8x128xf32>
    %512 = arith.addf %510, %511 : vector<8x128xf32>
    %513 = arith.mulf %502, %479 : vector<8x128xf32>
    %514 = arith.mulf %494, %504 : vector<8x128xf32>
    %515 = arith.addf %513, %514 : vector<8x128xf32>
    %516 = math.tanh %515 : vector<8x128xf32>
    %517 = arith.mulf %512, %516 : vector<8x128xf32>
    %c32_250 = arith.constant 32 : index
    %c0_251 = arith.constant 0 : index
    %518 = vector.load %arg18[%c32_250, %c0_251] : memref<64x128xf32, #tpu.memory_space<vmem>>, vector<8x128xf32>
    tpu.vector_store %arg18[%c32_250, %c0_251], %517 {strides = array<i32>} : memref<64x128xf32, #tpu.memory_space<vmem>>, vector<8x128xf32>,
    %c40_252 = arith.constant 40 : index
    %c0_253 = arith.constant 0 : index
    %519 = vector.load %arg17[%c40_252, %c0_253] : memref<64x512xf32, #tpu.memory_space<vmem>>, vector<8x512xf32>
    %c0_254 = arith.constant 0 : index
    %c0_255 = arith.constant 0 : index
    %520 = vector.load %arg5[%c0_254, %c0_255] : memref<128x512xf32, #tpu.memory_space<vmem>>, vector<128x512xf32>
    %cst_256 = arith.constant dense<0.000000e+00> : vector<8x512xf32>
    %521 = tpu.matmul %517, %520, %cst_256 {dimension_numbers = #tpu.dot_dimension_numbers<[1], [0], [0], [1], [0, 0, 1, 1], [], []>} : vector<8x128xf32>, vector<128x512xf32>, vector<8x512xf32> -> vector<8x512xf32>
    %522 = arith.addf %519, %521 : vector<8x512xf32>
    %523 = vector.extract_strided_slice %522 {offsets = [0, 0], sizes = [8, 128], strides = [1, 1]} : vector<8x512xf32> to vector<8x128xf32>
    %cst_257 = arith.constant 5.000000e-01 : f32
    %524 = vector.broadcast %cst_257 : f32 to vector<8x128xf32>
    %525 = arith.mulf %524, %523 : vector<8x128xf32>
    %526 = math.tanh %525 : vector<8x128xf32>
    %cst_258 = arith.constant 5.000000e-01 : f32
    %527 = vector.broadcast %cst_258 : f32 to vector<8x128xf32>
    %528 = arith.mulf %527, %526 : vector<8x128xf32>
    %cst_259 = arith.constant 5.000000e-01 : f32
    %529 = vector.broadcast %cst_259 : f32 to vector<8x128xf32>
    %530 = arith.addf %528, %529 : vector<8x128xf32>
    %531 = vector.extract_strided_slice %522 {offsets = [0, 128], sizes = [8, 128], strides = [1, 1]} : vector<8x512xf32> to vector<8x128xf32>
    %cst_260 = arith.constant 5.000000e-01 : f32
    %532 = vector.broadcast %cst_260 : f32 to vector<8x128xf32>
    %533 = arith.mulf %532, %531 : vector<8x128xf32>
    %534 = math.tanh %533 : vector<8x128xf32>
    %cst_261 = arith.constant 5.000000e-01 : f32
    %535 = vector.broadcast %cst_261 : f32 to vector<8x128xf32>
    %536 = arith.mulf %535, %534 : vector<8x128xf32>
    %cst_262 = arith.constant 5.000000e-01 : f32
    %537 = vector.broadcast %cst_262 : f32 to vector<8x128xf32>
    %538 = arith.addf %536, %537 : vector<8x128xf32>
    %539 = vector.extract_strided_slice %522 {offsets = [0, 256], sizes = [8, 128], strides = [1, 1]} : vector<8x512xf32> to vector<8x128xf32>
    %540 = math.tanh %539 : vector<8x128xf32>
    %541 = vector.extract_strided_slice %522 {offsets = [0, 384], sizes = [8, 128], strides = [1, 1]} : vector<8x512xf32> to vector<8x128xf32>
    %cst_263 = arith.constant 5.000000e-01 : f32
    %542 = vector.broadcast %cst_263 : f32 to vector<8x128xf32>
    %543 = arith.mulf %542, %541 : vector<8x128xf32>
    %544 = math.tanh %543 : vector<8x128xf32>
    %cst_264 = arith.constant 5.000000e-01 : f32
    %545 = vector.broadcast %cst_264 : f32 to vector<8x128xf32>
    %546 = arith.mulf %545, %544 : vector<8x128xf32>
    %cst_265 = arith.constant 5.000000e-01 : f32
    %547 = vector.broadcast %cst_265 : f32 to vector<8x128xf32>
    %548 = arith.addf %546, %547 : vector<8x128xf32>
    %549 = arith.mulf %538, %515 : vector<8x128xf32>
    %550 = arith.mulf %530, %540 : vector<8x128xf32>
    %551 = arith.addf %549, %550 : vector<8x128xf32>
    %552 = math.tanh %551 : vector<8x128xf32>
    %553 = arith.mulf %548, %552 : vector<8x128xf32>
    %c40_266 = arith.constant 40 : index
    %c0_267 = arith.constant 0 : index
    %554 = vector.load %arg18[%c40_266, %c0_267] : memref<64x128xf32, #tpu.memory_space<vmem>>, vector<8x128xf32>
    tpu.vector_store %arg18[%c40_266, %c0_267], %553 {strides = array<i32>} : memref<64x128xf32, #tpu.memory_space<vmem>>, vector<8x128xf32>,
    %c48_268 = arith.constant 48 : index
    %c0_269 = arith.constant 0 : index
    %555 = vector.load %arg17[%c48_268, %c0_269] : memref<64x512xf32, #tpu.memory_space<vmem>>, vector<8x512xf32>
    %c0_270 = arith.constant 0 : index
    %c0_271 = arith.constant 0 : index
    %556 = vector.load %arg5[%c0_270, %c0_271] : memref<128x512xf32, #tpu.memory_space<vmem>>, vector<128x512xf32>
    %cst_272 = arith.constant dense<0.000000e+00> : vector<8x512xf32>
    %557 = tpu.matmul %553, %556, %cst_272 {dimension_numbers = #tpu.dot_dimension_numbers<[1], [0], [0], [1], [0, 0, 1, 1], [], []>} : vector<8x128xf32>, vector<128x512xf32>, vector<8x512xf32> -> vector<8x512xf32>
    %558 = arith.addf %555, %557 : vector<8x512xf32>
    %559 = vector.extract_strided_slice %558 {offsets = [0, 0], sizes = [8, 128], strides = [1, 1]} : vector<8x512xf32> to vector<8x128xf32>
    %cst_273 = arith.constant 5.000000e-01 : f32
    %560 = vector.broadcast %cst_273 : f32 to vector<8x128xf32>
    %561 = arith.mulf %560, %559 : vector<8x128xf32>
    %562 = math.tanh %561 : vector<8x128xf32>
    %cst_274 = arith.constant 5.000000e-01 : f32
    %563 = vector.broadcast %cst_274 : f32 to vector<8x128xf32>
    %564 = arith.mulf %563, %562 : vector<8x128xf32>
    %cst_275 = arith.constant 5.000000e-01 : f32
    %565 = vector.broadcast %cst_275 : f32 to vector<8x128xf32>
    %566 = arith.addf %564, %565 : vector<8x128xf32>
    %567 = vector.extract_strided_slice %558 {offsets = [0, 128], sizes = [8, 128], strides = [1, 1]} : vector<8x512xf32> to vector<8x128xf32>
    %cst_276 = arith.constant 5.000000e-01 : f32
    %568 = vector.broadcast %cst_276 : f32 to vector<8x128xf32>
    %569 = arith.mulf %568, %567 : vector<8x128xf32>
    %570 = math.tanh %569 : vector<8x128xf32>
    %cst_277 = arith.constant 5.000000e-01 : f32
    %571 = vector.broadcast %cst_277 : f32 to vector<8x128xf32>
    %572 = arith.mulf %571, %570 : vector<8x128xf32>
    %cst_278 = arith.constant 5.000000e-01 : f32
    %573 = vector.broadcast %cst_278 : f32 to vector<8x128xf32>
    %574 = arith.addf %572, %573 : vector<8x128xf32>
    %575 = vector.extract_strided_slice %558 {offsets = [0, 256], sizes = [8, 128], strides = [1, 1]} : vector<8x512xf32> to vector<8x128xf32>
    %576 = math.tanh %575 : vector<8x128xf32>
    %577 = vector.extract_strided_slice %558 {offsets = [0, 384], sizes = [8, 128], strides = [1, 1]} : vector<8x512xf32> to vector<8x128xf32>
    %cst_279 = arith.constant 5.000000e-01 : f32
    %578 = vector.broadcast %cst_279 : f32 to vector<8x128xf32>
    %579 = arith.mulf %578, %577 : vector<8x128xf32>
    %580 = math.tanh %579 : vector<8x128xf32>
    %cst_280 = arith.constant 5.000000e-01 : f32
    %581 = vector.broadcast %cst_280 : f32 to vector<8x128xf32>
    %582 = arith.mulf %581, %580 : vector<8x128xf32>
    %cst_281 = arith.constant 5.000000e-01 : f32
    %583 = vector.broadcast %cst_281 : f32 to vector<8x128xf32>
    %584 = arith.addf %582, %583 : vector<8x128xf32>
    %585 = arith.mulf %574, %551 : vector<8x128xf32>
    %586 = arith.mulf %566, %576 : vector<8x128xf32>
    %587 = arith.addf %585, %586 : vector<8x128xf32>
    %588 = math.tanh %587 : vector<8x128xf32>
    %589 = arith.mulf %584, %588 : vector<8x128xf32>
    %c48_282 = arith.constant 48 : index
    %c0_283 = arith.constant 0 : index
    %590 = vector.load %arg18[%c48_282, %c0_283] : memref<64x128xf32, #tpu.memory_space<vmem>>, vector<8x128xf32>
    tpu.vector_store %arg18[%c48_282, %c0_283], %589 {strides = array<i32>} : memref<64x128xf32, #tpu.memory_space<vmem>>, vector<8x128xf32>,
    %c56_284 = arith.constant 56 : index
    %c0_285 = arith.constant 0 : index
    %591 = vector.load %arg17[%c56_284, %c0_285] : memref<64x512xf32, #tpu.memory_space<vmem>>, vector<8x512xf32>
    %c0_286 = arith.constant 0 : index
    %c0_287 = arith.constant 0 : index
    %592 = vector.load %arg5[%c0_286, %c0_287] : memref<128x512xf32, #tpu.memory_space<vmem>>, vector<128x512xf32>
    %cst_288 = arith.constant dense<0.000000e+00> : vector<8x512xf32>
    %593 = tpu.matmul %589, %592, %cst_288 {dimension_numbers = #tpu.dot_dimension_numbers<[1], [0], [0], [1], [0, 0, 1, 1], [], []>} : vector<8x128xf32>, vector<128x512xf32>, vector<8x512xf32> -> vector<8x512xf32>
    %594 = arith.addf %591, %593 : vector<8x512xf32>
    %595 = vector.extract_strided_slice %594 {offsets = [0, 0], sizes = [8, 128], strides = [1, 1]} : vector<8x512xf32> to vector<8x128xf32>
    %cst_289 = arith.constant 5.000000e-01 : f32
    %596 = vector.broadcast %cst_289 : f32 to vector<8x128xf32>
    %597 = arith.mulf %596, %595 : vector<8x128xf32>
    %598 = math.tanh %597 : vector<8x128xf32>
    %cst_290 = arith.constant 5.000000e-01 : f32
    %599 = vector.broadcast %cst_290 : f32 to vector<8x128xf32>
    %600 = arith.mulf %599, %598 : vector<8x128xf32>
    %cst_291 = arith.constant 5.000000e-01 : f32
    %601 = vector.broadcast %cst_291 : f32 to vector<8x128xf32>
    %602 = arith.addf %600, %601 : vector<8x128xf32>
    %603 = vector.extract_strided_slice %594 {offsets = [0, 128], sizes = [8, 128], strides = [1, 1]} : vector<8x512xf32> to vector<8x128xf32>
    %cst_292 = arith.constant 5.000000e-01 : f32
    %604 = vector.broadcast %cst_292 : f32 to vector<8x128xf32>
    %605 = arith.mulf %604, %603 : vector<8x128xf32>
    %606 = math.tanh %605 : vector<8x128xf32>
    %cst_293 = arith.constant 5.000000e-01 : f32
    %607 = vector.broadcast %cst_293 : f32 to vector<8x128xf32>
    %608 = arith.mulf %607, %606 : vector<8x128xf32>
    %cst_294 = arith.constant 5.000000e-01 : f32
    %609 = vector.broadcast %cst_294 : f32 to vector<8x128xf32>
    %610 = arith.addf %608, %609 : vector<8x128xf32>
    %611 = vector.extract_strided_slice %594 {offsets = [0, 256], sizes = [8, 128], strides = [1, 1]} : vector<8x512xf32> to vector<8x128xf32>
    %612 = math.tanh %611 : vector<8x128xf32>
    %613 = vector.extract_strided_slice %594 {offsets = [0, 384], sizes = [8, 128], strides = [1, 1]} : vector<8x512xf32> to vector<8x128xf32>
    %cst_295 = arith.constant 5.000000e-01 : f32
    %614 = vector.broadcast %cst_295 : f32 to vector<8x128xf32>
    %615 = arith.mulf %614, %613 : vector<8x128xf32>
    %616 = math.tanh %615 : vector<8x128xf32>
    %cst_296 = arith.constant 5.000000e-01 : f32
    %617 = vector.broadcast %cst_296 : f32 to vector<8x128xf32>
    %618 = arith.mulf %617, %616 : vector<8x128xf32>
    %cst_297 = arith.constant 5.000000e-01 : f32
    %619 = vector.broadcast %cst_297 : f32 to vector<8x128xf32>
    %620 = arith.addf %618, %619 : vector<8x128xf32>
    %621 = arith.mulf %610, %587 : vector<8x128xf32>
    %622 = arith.mulf %602, %612 : vector<8x128xf32>
    %623 = arith.addf %621, %622 : vector<8x128xf32>
    %624 = math.tanh %623 : vector<8x128xf32>
    %625 = arith.mulf %620, %624 : vector<8x128xf32>
    %c56_298 = arith.constant 56 : index
    %c0_299 = arith.constant 0 : index
    %626 = vector.load %arg18[%c56_298, %c0_299] : memref<64x128xf32, #tpu.memory_space<vmem>>, vector<8x128xf32>
    tpu.vector_store %arg18[%c56_298, %c0_299], %625 {strides = array<i32>} : memref<64x128xf32, #tpu.memory_space<vmem>>, vector<8x128xf32>,
    %c0_300 = arith.constant 0 : index
    %c0_301 = arith.constant 0 : index
    %627 = vector.load %arg18[%c0_300, %c0_301] : memref<64x128xf32, #tpu.memory_space<vmem>>, vector<64x128xf32>
    %c0_302 = arith.constant 0 : index
    %c0_303 = arith.constant 0 : index
    %628 = vector.load %arg7[%c0_302, %c0_303] : memref<128x128xf32, #tpu.memory_space<vmem>>, vector<128x128xf32>
    %cst_304 = arith.constant dense<0.000000e+00> : vector<64x128xf32>
    %629 = tpu.matmul %627, %628, %cst_304 {dimension_numbers = #tpu.dot_dimension_numbers<[1], [0], [0], [1], [0, 0, 1, 1], [], []>} : vector<64x128xf32>, vector<128x128xf32>, vector<64x128xf32> -> vector<64x128xf32>
    %c0_305 = arith.constant 0 : index
    %c0_306 = arith.constant 0 : index
    %630 = vector.load %arg8[%c0_305, %c0_306] : memref<1x128xf32, #tpu.memory_space<vmem>>, vector<1x128xf32>
    %631 = vector.broadcast %630 : vector<1x128xf32> to vector<64x128xf32>
    %632 = arith.addf %629, %631 : vector<64x128xf32>
    %633 = math.tanh %632 : vector<64x128xf32>
    %c0_307 = arith.constant 0 : index
    %c0_308 = arith.constant 0 : index
    %634 = vector.load %arg9[%c0_307, %c0_308] : memref<1x128xf32, #tpu.memory_space<vmem>>, vector<1x128xf32>
    %635 = vector.broadcast %634 : vector<1x128xf32> to vector<64x128xf32>
    %636 = arith.mulf %633, %635 : vector<64x128xf32>
    %cst_309 = arith.constant dense<0.000000e+00> : vector<64xf32>
    %637 = vector.multi_reduction <add>, %636, %cst_309 [1] : vector<64x128xf32> to vector<64xf32>
    %638 = vector.shape_cast %637 : vector<64xf32> to vector<64x1xf32>
    %c0_310 = arith.constant 0 : index
    %c0_311 = arith.constant 0 : index
    %639 = vector.load %arg10[%c0_310, %c0_311] : memref<1x1xf32, #tpu.memory_space<vmem>>, vector<1x1xf32>
    %640 = vector.broadcast %639 : vector<1x1xf32> to vector<64x1xf32>
    %641 = arith.addf %638, %640 : vector<64x1xf32>
    %642 = vector.extract_strided_slice %641 {offsets = [0, 0], sizes = [8, 1], strides = [1, 1]} : vector<64x1xf32> to vector<8x1xf32>
    %643 = vector.extract_strided_slice %641 {offsets = [8, 0], sizes = [8, 1], strides = [1, 1]} : vector<64x1xf32> to vector<8x1xf32>
    %644 = vector.extract_strided_slice %641 {offsets = [16, 0], sizes = [8, 1], strides = [1, 1]} : vector<64x1xf32> to vector<8x1xf32>
    %645 = vector.extract_strided_slice %641 {offsets = [24, 0], sizes = [8, 1], strides = [1, 1]} : vector<64x1xf32> to vector<8x1xf32>
    %646 = vector.extract_strided_slice %641 {offsets = [32, 0], sizes = [8, 1], strides = [1, 1]} : vector<64x1xf32> to vector<8x1xf32>
    %647 = vector.extract_strided_slice %641 {offsets = [40, 0], sizes = [8, 1], strides = [1, 1]} : vector<64x1xf32> to vector<8x1xf32>
    %648 = vector.extract_strided_slice %641 {offsets = [48, 0], sizes = [8, 1], strides = [1, 1]} : vector<64x1xf32> to vector<8x1xf32>
    %649 = vector.extract_strided_slice %641 {offsets = [56, 0], sizes = [8, 1], strides = [1, 1]} : vector<64x1xf32> to vector<8x1xf32>
    %650 = arith.maximumf %642, %643 : vector<8x1xf32>
    %651 = arith.maximumf %650, %644 : vector<8x1xf32>
    %652 = arith.maximumf %651, %645 : vector<8x1xf32>
    %653 = arith.maximumf %652, %646 : vector<8x1xf32>
    %654 = arith.maximumf %653, %647 : vector<8x1xf32>
    %655 = arith.maximumf %654, %648 : vector<8x1xf32>
    %656 = arith.maximumf %655, %649 : vector<8x1xf32>
    %657 = arith.subf %642, %656 : vector<8x1xf32>
    %658 = math.exp %657 : vector<8x1xf32>
    %659 = arith.subf %643, %656 : vector<8x1xf32>
    %660 = math.exp %659 : vector<8x1xf32>
    %661 = arith.subf %644, %656 : vector<8x1xf32>
    %662 = math.exp %661 : vector<8x1xf32>
    %663 = arith.subf %645, %656 : vector<8x1xf32>
    %664 = math.exp %663 : vector<8x1xf32>
    %665 = arith.subf %646, %656 : vector<8x1xf32>
    %666 = math.exp %665 : vector<8x1xf32>
    %667 = arith.subf %647, %656 : vector<8x1xf32>
    %668 = math.exp %667 : vector<8x1xf32>
    %669 = arith.subf %648, %656 : vector<8x1xf32>
    %670 = math.exp %669 : vector<8x1xf32>
    %671 = arith.subf %649, %656 : vector<8x1xf32>
    %672 = math.exp %671 : vector<8x1xf32>
    %673 = arith.addf %658, %660 : vector<8x1xf32>
    %674 = arith.addf %673, %662 : vector<8x1xf32>
    %675 = arith.addf %674, %664 : vector<8x1xf32>
    %676 = arith.addf %675, %666 : vector<8x1xf32>
    %677 = arith.addf %676, %668 : vector<8x1xf32>
    %678 = arith.addf %677, %670 : vector<8x1xf32>
    %679 = arith.addf %678, %672 : vector<8x1xf32>
    %680 = tpu.reciprocal %679 {approx = true} : vector<8x1xf32> -> vector<8x1xf32>
    %cst_312 = arith.constant 0.000000e+00 : f32
    %681 = vector.broadcast %cst_312 : f32 to vector<8x128xf32>
    %682 = arith.mulf %658, %680 : vector<8x1xf32>
    %683 = vector.extract_strided_slice %627 {offsets = [0, 0], sizes = [8, 128], strides = [1, 1]} : vector<64x128xf32> to vector<8x128xf32>
    %684 = vector.broadcast %682 : vector<8x1xf32> to vector<8x128xf32>
    %685 = arith.mulf %684, %683 : vector<8x128xf32>
    %686 = arith.addf %681, %685 : vector<8x128xf32>
    %687 = arith.mulf %660, %680 : vector<8x1xf32>
    %688 = vector.extract_strided_slice %627 {offsets = [8, 0], sizes = [8, 128], strides = [1, 1]} : vector<64x128xf32> to vector<8x128xf32>
    %689 = vector.broadcast %687 : vector<8x1xf32> to vector<8x128xf32>
    %690 = arith.mulf %689, %688 : vector<8x128xf32>
    %691 = arith.addf %686, %690 : vector<8x128xf32>
    %692 = arith.mulf %662, %680 : vector<8x1xf32>
    %693 = vector.extract_strided_slice %627 {offsets = [16, 0], sizes = [8, 128], strides = [1, 1]} : vector<64x128xf32> to vector<8x128xf32>
    %694 = vector.broadcast %692 : vector<8x1xf32> to vector<8x128xf32>
    %695 = arith.mulf %694, %693 : vector<8x128xf32>
    %696 = arith.addf %691, %695 : vector<8x128xf32>
    %697 = arith.mulf %664, %680 : vector<8x1xf32>
    %698 = vector.extract_strided_slice %627 {offsets = [24, 0], sizes = [8, 128], strides = [1, 1]} : vector<64x128xf32> to vector<8x128xf32>
    %699 = vector.broadcast %697 : vector<8x1xf32> to vector<8x128xf32>
    %700 = arith.mulf %699, %698 : vector<8x128xf32>
    %701 = arith.addf %696, %700 : vector<8x128xf32>
    %702 = arith.mulf %666, %680 : vector<8x1xf32>
    %703 = vector.extract_strided_slice %627 {offsets = [32, 0], sizes = [8, 128], strides = [1, 1]} : vector<64x128xf32> to vector<8x128xf32>
    %704 = vector.broadcast %702 : vector<8x1xf32> to vector<8x128xf32>
    %705 = arith.mulf %704, %703 : vector<8x128xf32>
    %706 = arith.addf %701, %705 : vector<8x128xf32>
    %707 = arith.mulf %668, %680 : vector<8x1xf32>
    %708 = vector.extract_strided_slice %627 {offsets = [40, 0], sizes = [8, 128], strides = [1, 1]} : vector<64x128xf32> to vector<8x128xf32>
    %709 = vector.broadcast %707 : vector<8x1xf32> to vector<8x128xf32>
    %710 = arith.mulf %709, %708 : vector<8x128xf32>
    %711 = arith.addf %706, %710 : vector<8x128xf32>
    %712 = arith.mulf %670, %680 : vector<8x1xf32>
    %713 = vector.extract_strided_slice %627 {offsets = [48, 0], sizes = [8, 128], strides = [1, 1]} : vector<64x128xf32> to vector<8x128xf32>
    %714 = vector.broadcast %712 : vector<8x1xf32> to vector<8x128xf32>
    %715 = arith.mulf %714, %713 : vector<8x128xf32>
    %716 = arith.addf %711, %715 : vector<8x128xf32>
    %717 = arith.mulf %672, %680 : vector<8x1xf32>
    %718 = vector.extract_strided_slice %627 {offsets = [56, 0], sizes = [8, 128], strides = [1, 1]} : vector<64x128xf32> to vector<8x128xf32>
    %719 = vector.broadcast %717 : vector<8x1xf32> to vector<8x128xf32>
    %720 = arith.mulf %719, %718 : vector<8x128xf32>
    %721 = arith.addf %716, %720 : vector<8x128xf32>
    %c0_313 = arith.constant 0 : index
    %c0_314 = arith.constant 0 : index
    %722 = vector.load %arg11[%c0_313, %c0_314] : memref<128x128xf32, #tpu.memory_space<vmem>>, vector<128x128xf32>
    %cst_315 = arith.constant dense<0.000000e+00> : vector<8x128xf32>
    %723 = tpu.matmul %721, %722, %cst_315 {dimension_numbers = #tpu.dot_dimension_numbers<[1], [0], [0], [1], [0, 0, 1, 1], [], []>} : vector<8x128xf32>, vector<128x128xf32>, vector<8x128xf32> -> vector<8x128xf32>
    %c0_316 = arith.constant 0 : index
    %c0_317 = arith.constant 0 : index
    %724 = vector.load %arg12[%c0_316, %c0_317] : memref<1x128xf32, #tpu.memory_space<vmem>>, vector<1x128xf32>
    %725 = vector.broadcast %724 : vector<1x128xf32> to vector<8x128xf32>
    %726 = arith.addf %723, %725 : vector<8x128xf32>
    %cst_318 = arith.constant 0.000000e+00 : f32
    %727 = vector.broadcast %cst_318 : f32 to vector<8x128xf32>
    %728 = arith.maximumf %726, %727 : vector<8x128xf32>
    %c0_319 = arith.constant 0 : index
    %c0_320 = arith.constant 0 : index
    %729 = vector.load %arg13[%c0_319, %c0_320] : memref<128x128xf32, #tpu.memory_space<vmem>>, vector<128x128xf32>
    %cst_321 = arith.constant dense<0.000000e+00> : vector<8x128xf32>
    %730 = tpu.matmul %728, %729, %cst_321 {dimension_numbers = #tpu.dot_dimension_numbers<[1], [0], [0], [1], [0, 0, 1, 1], [], []>} : vector<8x128xf32>, vector<128x128xf32>, vector<8x128xf32> -> vector<8x128xf32>
    %c0_322 = arith.constant 0 : index
    %c0_323 = arith.constant 0 : index
    %731 = vector.load %arg14[%c0_322, %c0_323] : memref<1x128xf32, #tpu.memory_space<vmem>>, vector<1x128xf32>
    %732 = vector.broadcast %731 : vector<1x128xf32> to vector<8x128xf32>
    %733 = arith.addf %730, %732 : vector<8x128xf32>
    %c0_324 = arith.constant 0 : index
    %c0_325 = arith.constant 0 : index
    %734 = vector.load %arg15[%c0_324, %c0_325] : memref<8x128xf32, #tpu.memory_space<vmem>>, vector<8x128xf32>
    tpu.vector_store %arg15[%c0_324, %c0_325], %733 {strides = array<i32>} : memref<8x128xf32, #tpu.memory_space<vmem>>, vector<8x128xf32>,
    return
  }
}

</mosaic_0001>

<bundles_post_ra>
// kernel: advanced_rnn_forward.1
= control target key start
LH: loop header
LB: loop body
LE: loop exit
PB: predicated region body
PF: predicated region fallthrough
CT: control target
= control target key end

     0   :  { %s10984_s0 = inlined_call_operand.vmem [shape: f32[64,128], index: 0, kind: input, shape index: {}]   ;;  %s10985_s1 = inlined_call_operand.hbm [shape: f32[128,512], index: 1, kind: input, shape index: {}]   ;;  %s10986_s2 = inlined_call_operand.hbm [shape: f32[128,512], index: 2, kind: input, shape index: {}]   ;;  %s10987_s3 = inlined_call_operand.vmem [shape: f32[1,512], index: 3, kind: input, shape index: {}]   ;;  %s10988_s4 = inlined_call_operand.hbm [shape: f32[128,512], index: 4, kind: input, shape index: {}]   ;;  %s10989_s5 = inlined_call_operand.hbm [shape: f32[128,512], index: 5, kind: input, shape index: {}]   ;;  %s10990_s6 = inlined_call_operand.vmem [shape: f32[1,512], index: 6, kind: input, shape index: {}]   ;;  %s10991_s7 = inlined_call_operand.vmem [shape: f32[128,128], index: 7, kind: input, shape index: {}]   ;;  %s10992_s8 = inlined_call_operand.vmem [shape: f32[1,128], index: 8, kind: input, shape index: {}]   ;;  %s10993_s9 = inlined_call_operand.hbm [shape: f32[1,128], index: 9, kind: input, shape index: {}]   ;;  %s10994_s10 = inlined_call_operand.<no memory space> [shape: f32[1,1], index: 10, kind: input, shape index: {}]   ;;  %s10995_s11 = inlined_call_operand.hbm [shape: f32[128,128], index: 11, kind: input, shape index: {}]   ;;  %s10996_s12 = inlined_call_operand.vmem [shape: f32[1,128], index: 12, kind: input, shape index: {}]   ;;  %s10997_s13 = inlined_call_operand.hbm [shape: f32[128,128], index: 13, kind: input, shape index: {}]   ;;  %s10998_s14 = inlined_call_operand.hbm [shape: f32[1,128], index: 14, kind: input, shape index: {}]   ;;  %s10999_s15 = inlined_call_operand.vmem [shape: f32[8,128], index: 15, kind: output, shape index: {}]  }
   0x1   :  { %v20_v0 = vstv %s10994_s10 }
   0x2   :  { %21 = vst [vmem:[#allocation5] sm:$0x1] %v20_v0 }
   0x3   :  { %22 = vsyncpa [#allocation7], 0 }
   0x4   :  { %23 = vsyncpa [#allocation9], 0 }
   0x5   :  { %24 = vsyncpa [#allocation12], 0 }
   0x6   :  { %25 = vsyncpa [#allocation15], 0 }
   0x7   :  { %26 = vsyncpa [#allocation18], 0  ;;  %s8958_s20 = smov [#allocation8]   ;;  %s8959_s22 = smov [#allocation11]  }
   0x8   :  { %s46_s21 = sshll.u32 %s8958_s20, 4  ;;  %s72_s23 = sshll.u32 %s8959_s22, 4  ;;  %s47_s21 = int_to_ptr.vmem [resolvable:$true] %s46_s21  ;;  %s9057_s23 = int_to_ptr.vmem [resolvable:$true] %s72_s23 }
   0x9   :  { %s8772_s26 = scalar_lea.hbm %s10986_s2, 8192 }
   0xa   :  { %p8773_p0 = scmp.ne.s32.totalorder %s10986_s2, %s8772_s26  ;;  %p8776_p1 = scmp.lt.u32.totalorder %s8772_s26, %s10986_s2 }
   0xc   :  { %p8778_p2 = pnand %p8776_p1, %p8773_p0 }
   0xe   :  { %8781 = shalt.err (!%p8778_p2)
}
   0xf   :  { %s8782_s30 = scalar_lea.vmem %s47_s21, 8192  ;;  %p8787_p4 = scmp.lt.s32.totalorder %s47_s21, %s47_s21 }
  0x10   :  { %p8783_p3 = scmp.ne.s32.totalorder %s47_s21, %s8782_s30  ;;  %p8788_p5 = scmp.lt.s32.totalorder %s8782_s30, %s8782_s30 }
  0x12   :  { %p8789_p6 = por %p8788_p5, %p8787_p4 }
  0x14   :  { %p8790_p7 = pnand %p8789_p6, %p8783_p3 }
  0x16   :  { %8793 = shalt.err (!%p8790_p7)
}
  0x17   :  { %s8960_s16 = smov 512   ;;  %s8961_s17 = smov 32  }
  0x18   :  { %52 = dma.hbm_to_vmem [thread:$0]  %s10986_s2, 8192, %s47_s21, [#allocation9], %s8960_s16, %s8960_s16, %s8961_s17  }
  0x19   :  { %s8794_s24 = scalar_lea.hbm %s10989_s5, 8192 }
  0x1a   :  { %p8795_p8 = scmp.ne.s32.totalorder %s10989_s5, %s8794_s24  ;;  %p8798_p9 = scmp.lt.u32.totalorder %s8794_s24, %s10989_s5 }
  0x1c   :  { %p8800_p10 = pnand %p8798_p9, %p8795_p8 }
  0x1e   :  { %8803 = shalt.err (!%p8800_p10)
}
  0x1f   :  { %s8804_s10 = scalar_lea.vmem %s9057_s23, 8192  ;;  %p8809_p12 = scmp.lt.s32.totalorder %s9057_s23, %s9057_s23 }
  0x20   :  { %p8805_p11 = scmp.ne.s32.totalorder %s9057_s23, %s8804_s10  ;;  %p8810_p13 = scmp.lt.s32.totalorder %s8804_s10, %s8804_s10 }
  0x22   :  { %p8811_p0 = por %p8810_p13, %p8809_p12 }
  0x24   :  { %p8812_p1 = pnand %p8811_p0, %p8805_p11 }
  0x26   :  { %8815 = shalt.err (!%p8812_p1)
}
  0x27   :  { %78 = dma.hbm_to_vmem [thread:$0]  %s10989_s5, 8192, %s9057_s23, [#allocation12], %s8960_s16, %s8960_s16, %s8961_s17  }
  0x28   :  { %s8962_s29 = smov [#allocation14]   ;;  %s8816_s20 = scalar_lea.hbm %s10995_s11, 2048 }
  0x29   :  { %s102_s30 = sshll.u32 %s8962_s29, 4  ;;  %p8817_p2 = scmp.ne.s32.totalorder %s10995_s11, %s8816_s20  ;;  %s103_s30 = int_to_ptr.vmem [resolvable:$true] %s102_s30 }
  0x2a   :  { %p8820_p3 = scmp.lt.u32.totalorder %s8816_s20, %s10995_s11 }
  0x2c   :  { %p8822_p4 = pnand %p8820_p3, %p8817_p2 }
  0x2e   :  { %8825 = shalt.err (!%p8822_p4)
}
  0x2f   :  { %s8826_s27 = scalar_lea.vmem %s103_s30, 2048  ;;  %p8831_p6 = scmp.lt.s32.totalorder %s103_s30, %s103_s30 }
  0x30   :  { %p8827_p5 = scmp.ne.s32.totalorder %s103_s30, %s8826_s27  ;;  %p8832_p7 = scmp.lt.s32.totalorder %s8826_s27, %s8826_s27 }
  0x32   :  { %p8833_p8 = por %p8832_p7, %p8831_p6 }
  0x34   :  { %p8834_p9 = pnand %p8833_p8, %p8827_p5 }
  0x36   :  { %8837 = shalt.err (!%p8834_p9)
}
  0x37   :  { %s8963_s5 = smov 128   ;;  %s8964_s23 = smov 8  }
  0x38   :  { %108 = dma.hbm_to_vmem [thread:$0]  %s10995_s11, 2048, %s103_s30, [#allocation15], %s8963_s5, %s8963_s5, %s8964_s23  }
  0x39   :  { %s8965_s2 = smov [#allocation6]   ;;  %s8966_s29 = smov [#allocation10]  }
  0x3a   :  { %s34_s21 = sshll.u32 %s8965_s2, 4  ;;  %s60_s18 = sshll.u32 %s8966_s29, 4  ;;  %s35_s21 = int_to_ptr.vmem [resolvable:$true] %s34_s21  ;;  %s61_s18 = int_to_ptr.vmem [resolvable:$true] %s60_s18 }
  0x3b   :  { %s8838_s22 = scalar_lea.hbm %s10985_s1, 8192 }
  0x3c   :  { %p8839_p10 = scmp.ne.s32.totalorder %s10985_s1, %s8838_s22  ;;  %p8842_p11 = scmp.lt.u32.totalorder %s8838_s22, %s10985_s1 }
  0x3e   :  { %p8844_p12 = pnand %p8842_p11, %p8839_p10 }
  0x40   :  { %8847 = shalt.err (!%p8844_p12)
}
  0x41   :  { %s8848_s11 = scalar_lea.vmem %s35_s21, 8192  ;;  %p8853_p0 = scmp.lt.s32.totalorder %s35_s21, %s35_s21 }
  0x42   :  { %p8849_p13 = scmp.ne.s32.totalorder %s35_s21, %s8848_s11  ;;  %p8854_p1 = scmp.lt.s32.totalorder %s8848_s11, %s8848_s11 }
  0x44   :  { %p8855_p2 = por %p8854_p1, %p8853_p0 }
  0x46   :  { %p8856_p3 = pnand %p8855_p2, %p8849_p13 }
  0x48   :  { %8859 = shalt.err (!%p8856_p3)
}
  0x49   :  { %40 = dma.hbm_to_vmem [thread:$0]  %s10985_s1, 8192, %s35_s21, [#allocation7], %s8960_s16, %s8960_s16, %s8961_s17  }
  0x4a   :  { %s8860_s29 = scalar_lea.hbm %s10988_s4, 8192 }
  0x4b   :  { %p8861_p4 = scmp.ne.s32.totalorder %s10988_s4, %s8860_s29  ;;  %p8864_p5 = scmp.lt.u32.totalorder %s8860_s29, %s10988_s4 }
  0x4d   :  { %p8866_p6 = pnand %p8864_p5, %p8861_p4 }
  0x4f   :  { %8869 = shalt.err (!%p8866_p6)
}
  0x50   :  { %s8870_s25 = scalar_lea.vmem %s61_s18, 8192  ;;  %p8875_p8 = scmp.lt.s32.totalorder %s61_s18, %s61_s18 }
  0x51   :  { %p8871_p7 = scmp.ne.s32.totalorder %s61_s18, %s8870_s25  ;;  %p8876_p9 = scmp.lt.s32.totalorder %s8870_s25, %s8870_s25 }
  0x53   :  { %p8877_p10 = por %p8876_p9, %p8875_p8 }
  0x55   :  { %p8878_p11 = pnand %p8877_p10, %p8871_p7 }
  0x57   :  { %8881 = shalt.err (!%p8878_p11)
}
  0x58   :  { %66 = dma.hbm_to_vmem [thread:$0]  %s10988_s4, 8192, %s61_s18, [#allocation9], %s8960_s16, %s8960_s16, %s8961_s17  }
  0x59   :  { %s8967_s26 = smov [#allocation13]   ;;  %s8968_s11 = smov [#allocation16]  }
  0x5a   :  { %s91_s27 = sshll.u32 %s8967_s26, 4  ;;  %s116_s30 = sshll.u32 %s8968_s11, 4  ;;  %s92_s27 = int_to_ptr.vmem [resolvable:$true] %s91_s27  ;;  %s117_s30 = int_to_ptr.vmem [resolvable:$true] %s116_s30 }
  0x5b   :  { %s8882_s2 = scalar_lea.hbm %s10993_s9, 16 }
  0x5c   :  { %p8883_p12 = scmp.ne.s32.totalorder %s10993_s9, %s8882_s2  ;;  %p8886_p13 = scmp.lt.u32.totalorder %s8882_s2, %s10993_s9 }
  0x5e   :  { %p8888_p0 = pnand %p8886_p13, %p8883_p12 }
  0x60   :  { %8891 = shalt.err (!%p8888_p0)
}
  0x61   :  { %s8892_s4 = scalar_lea.vmem %s92_s27, 16  ;;  %s8896_s16 = scalar_lea.vmem %s92_s27, 32 }
  0x62   :  { %p8893_p1 = scmp.ne.s32.totalorder %s92_s27, %s8892_s4  ;;  %p8897_p2 = scmp.lt.s32.totalorder %s92_s27, %s92_s27 }
  0x63   :  { %p8898_p3 = scmp.lt.s32.totalorder %s8896_s16, %s8892_s4 }
  0x65   :  { %p8899_p4 = por %p8898_p3, %p8897_p2 }
  0x67   :  { %p8900_p5 = pnand %p8899_p4, %p8893_p1 }
  0x69   :  { %8903 = shalt.err (!%p8900_p5)
}
  0x6a   :  { %94 = dma.hbm_to_vmem [thread:$0]  %s10993_s9, 16, %s92_s27, [#allocation12]  }
  0x6b   :  { %s8904_s1 = scalar_lea.hbm %s10997_s13, 2048 }
  0x6c   :  { %p8905_p6 = scmp.ne.s32.totalorder %s10997_s13, %s8904_s1  ;;  %p8908_p7 = scmp.lt.u32.totalorder %s8904_s1, %s10997_s13 }
  0x6e   :  { %p8910_p8 = pnand %p8908_p7, %p8905_p6 }
  0x70   :  { %8913 = shalt.err (!%p8910_p8)
}
  0x71   :  { %s8914_s10 = scalar_lea.vmem %s117_s30, 2048  ;;  %p8919_p10 = scmp.lt.s32.totalorder %s117_s30, %s117_s30 }
  0x72   :  { %p8915_p9 = scmp.ne.s32.totalorder %s117_s30, %s8914_s10  ;;  %p8920_p11 = scmp.lt.s32.totalorder %s8914_s10, %s8914_s10 }
  0x74   :  { %p8921_p12 = por %p8920_p11, %p8919_p10 }
  0x76   :  { %p8922_p13 = pnand %p8921_p12, %p8915_p9 }
  0x78   :  { %8925 = shalt.err (!%p8922_p13)
}
  0x79   :  { %122 = dma.hbm_to_vmem [thread:$0]  %s10997_s13, 2048, %s117_s30, [#allocation15], %s8963_s5, %s8963_s5, %s8964_s23  }
  0x7a   :  { %s8969_s2 = smov [#allocation17]   ;;  %s8926_s22 = scalar_lea.hbm %s10998_s14, 16 }
  0x7b   :  { %s129_s29 = sshll.u32 %s8969_s2, 4  ;;  %p8927_p0 = scmp.ne.s32.totalorder %s10998_s14, %s8926_s22  ;;  %s130_s29 = int_to_ptr.vmem [resolvable:$true] %s129_s29 }
  0x7c   :  { %p8930_p1 = scmp.lt.u32.totalorder %s8926_s22, %s10998_s14 }
  0x7e   :  { %p8932_p2 = pnand %p8930_p1, %p8927_p0 }
  0x80   :  { %8935 = shalt.err (!%p8932_p2)
}
  0x81   :  { %s8936_s24 = scalar_lea.vmem %s130_s29, 16  ;;  %s8940_s13 = scalar_lea.vmem %s130_s29, 32 }
  0x82   :  { %p8937_p3 = scmp.ne.s32.totalorder %s130_s29, %s8936_s24  ;;  %p8941_p4 = scmp.lt.s32.totalorder %s130_s29, %s130_s29 }
  0x83   :  { %p8942_p5 = scmp.lt.s32.totalorder %s8940_s13, %s8936_s24 }
  0x85   :  { %p8943_p6 = por %p8942_p5, %p8941_p4 }
  0x87   :  { %p8944_p7 = pnand %p8943_p6, %p8937_p3 }
  0x89   :  { %8947 = shalt.err (!%p8944_p7)
}
  0x8a   :  { %132 = dma.hbm_to_vmem [thread:$0]  %s10998_s14, 16, %s130_s29, [#allocation18]  }
  0x8b   :  { %8948 = dma.done.wait [#allocation7], 8192  }
  0x8c   :  { %8949 = vsyncadd [#allocation7], 4294959104 }
  0x8d   :  { %8950 = dma.done.wait [#allocation9], 16384  }
  0x8e   :  { %8951 = vsyncadd [#allocation9], 4294950912 }
  0x8f   :  { %8952 = dma.done.wait [#allocation12], 8208  }
  0x90   :  { %8953 = vsyncadd [#allocation12], 4294959088 }
  0x91   :  { %8954 = dma.done.wait [#allocation15], 4096  }
  0x92   :  { %8955 = vsyncadd [#allocation15], 4294963200 }
  0x93   :  { %8956 = dma.done.wait [#allocation18], 16  }
  0x94   :  { %8957 = vsyncadd [#allocation18], 4294967280  ;;  %v11000_v1 = vmov 0.0   ;;  %v166_v2 = vld [vmem:[#allocation6 + $0x8] sm:$0xff]  ;;  %v168_v4 = vld [vmem:[#allocation6 + $0x18] sm:$0xff]  ;;  %vm8973_vm0 = vmmov 0  }
  0x95   :  { %315 = vmatprep.mubr.f32.mxu0 %v11000_v1  ;;  %428 = vmatprep.mubr.f32.mxu1 %v11000_v1  ;;  %v170_v3 = vld [vmem:[#allocation6 + $0x28] sm:$0xff]  ;;  %v172_v6 = vld [vmem:[#allocation6 + $0x38] sm:$0xff]  ;;  %v165_v7 = vld [vmem:[#allocation6] sm:$0xff] }
  0x96   :  { %v6752_v5 = vpack.c.bf16 %v170_v3, %v166_v2  ;;  %v169_v8 = vld [vmem:[#allocation6 + $0x20] sm:$0xff]  ;;  %v6784_v9 = vpack.c.bf16 %v172_v6, %v168_v4  ;;  %v167_v11 = vld [vmem:[#allocation6 + $0x10] sm:$0xff]  ;;  %v174_v13 = vld [vmem:[#allocation6 + $0x48] sm:$0xff] }
  0x97   :  { %v6754_v10 = vpack.c.bf16 %v169_v8, %v165_v7  ;;  %v171_v12 = vld [vmem:[#allocation6 + $0x30] sm:$0xff]  ;;  %v178_v15 = vld [vmem:[#allocation6 + $0x68] sm:$0xff]  ;;  %v176_v16 = vld [vmem:[#allocation6 + $0x58] sm:$0xff] }
  0x98   :  { %6753 = vmatprep.subr.bf16.mxu0 %v6752_v5  ;;  %v6786_v14 = vpack.c.bf16 %v171_v12, %v167_v11  ;;  %v180_v17 = vld [vmem:[#allocation6 + $0x78] sm:$0xff]  ;;  %6785 = vmatprep.subr.bf16.mxu1 %v6784_v9  ;;  %v6756_v18 = vpack.c.bf16 %v178_v15, %v174_v13  ;;  %v173_v20 = vld [vmem:[#allocation6 + $0x40] sm:$0xff]  ;;  %v175_v22 = vld [vmem:[#allocation6 + $0x50] sm:$0xff] }
  0x99   :  { %6755 = vmatpush1.bf16.msra.mxu0 %v6754_v10  ;;  %v6788_v19 = vpack.c.bf16 %v180_v17, %v176_v16  ;;  %v177_v21 = vld [vmem:[#allocation6 + $0x60] sm:$0xff]  ;;  %v179_v24 = vld [vmem:[#allocation6 + $0x70] sm:$0xff]  ;;  %v182_v25 = vld [vmem:[#allocation6 + $0x88] sm:$0xff] }
  0x9a   :  { %6787 = vmatpush1.bf16.msra.mxu1 %v6786_v14  ;;  %v6758_v23 = vpack.c.bf16 %v177_v21, %v173_v20  ;;  %v186_v26 = vld [vmem:[#allocation6 + $0xa8] sm:$0xff]  ;;  %6757 = vmatprep.subr.bf16.mxu0 %v6756_v18  ;;  %v6790_v27 = vpack.c.bf16 %v179_v24, %v175_v22  ;;  %v184_v29 = vld [vmem:[#allocation6 + $0x98] sm:$0xff]  ;;  %v181_v31 = vld [vmem:[#allocation6 + $0x80] sm:$0xff] }
  0x9b   :  { %6789 = vmatprep.subr.bf16.mxu1 %v6788_v19  ;;  %v6760_v28 = vpack.c.bf16 %v186_v26, %v182_v25  ;;  %v188_v30 = vld [vmem:[#allocation6 + $0xb8] sm:$0xff]  ;;  %v185_v33 = vld [vmem:[#allocation6 + $0xa0] sm:$0xff]  ;;  %v183_v34 = vld [vmem:[#allocation6 + $0x90] sm:$0xff] }
  0x9c   :  { %v6792_v32 = vpack.c.bf16 %v188_v30, %v184_v29  ;;  %v187_v35 = vld [vmem:[#allocation6 + $0xb0] sm:$0xff]  ;;  %v6762_v36 = vpack.c.bf16 %v185_v33, %v181_v31  ;;  %v190_v37 = vld [vmem:[#allocation6 + $0xc8] sm:$0xff]  ;;  %v192_v39 = vld [vmem:[#allocation6 + $0xd8] sm:$0xff] }
  0x9d   :  { %6759 = vmatpush1.bf16.msra.mxu0 %v6758_v23  ;;  %v194_v38 = vld [vmem:[#allocation6 + $0xe8] sm:$0xff]  ;;  %v6794_v40 = vpack.c.bf16 %v187_v35, %v183_v34  ;;  %v196_v42 = vld [vmem:[#allocation6 + $0xf8] sm:$0xff]  ;;  %v189_v43 = vld [vmem:[#allocation6 + $0xc0] sm:$0xff] }
  0x9e   :  { %6791 = vmatpush1.bf16.msra.mxu1 %v6790_v27  ;;  %6761 = vmatprep.subr.bf16.mxu0 %v6760_v28  ;;  %v6764_v41 = vpack.c.bf16 %v194_v38, %v190_v37  ;;  %v193_v44 = vld [vmem:[#allocation6 + $0xe0] sm:$0xff]  ;;  %v6796_v45 = vpack.c.bf16 %v196_v42, %v192_v39  ;;  %v191_v46 = vld [vmem:[#allocation6 + $0xd0] sm:$0xff]  ;;  %v198_v48 = vld [vmem:[#allocation6 + $0x108] sm:$0xff] }
  0x9f   :  { %6793 = vmatprep.subr.bf16.mxu1 %v6792_v32  ;;  %v195_v47 = vld [vmem:[#allocation6 + $0xf0] sm:$0xff]  ;;  %v202_v49 = vld [vmem:[#allocation6 + $0x128] sm:$0xff]  ;;  %v200_v50 = vld [vmem:[#allocation6 + $0x118] sm:$0xff]  ;;  %v6766_v52 = vpack.c.bf16 %v193_v44, %v189_v43 }
  0xa0   :  { %v204_v51 = vld [vmem:[#allocation6 + $0x138] sm:$0xff]  ;;  %v6798_v53 = vpack.c.bf16 %v195_v47, %v191_v46  ;;  %v6768_v54 = vpack.c.bf16 %v202_v49, %v198_v48  ;;  %v197_v55 = vld [vmem:[#allocation6 + $0x100] sm:$0xff]  ;;  %v199_v57 = vld [vmem:[#allocation6 + $0x110] sm:$0xff] }
  0xa1   :  { %6763 = vmatpush1.bf16.msra.mxu0 %v6762_v36  ;;  %v201_v56 = vld [vmem:[#allocation6 + $0x120] sm:$0xff]  ;;  %v6800_v58 = vpack.c.bf16 %v204_v51, %v200_v50  ;;  %v203_v59 = vld [vmem:[#allocation6 + $0x130] sm:$0xff]  ;;  %v206_v60 = vld [vmem:[#allocation6 + $0x148] sm:$0xff] }
  0xa2   :  { %6795 = vmatpush1.bf16.msra.mxu1 %v6794_v40  ;;  %6765 = vmatprep.subr.bf16.mxu0 %v6764_v41  ;;  %v210_v61 = vld [vmem:[#allocation6 + $0x168] sm:$0xff]  ;;  %v208_v62 = vld [vmem:[#allocation6 + $0x158] sm:$0xff]  ;;  %v6770_v0 = vpack.c.bf16 %v201_v56, %v197_v55  ;;  %v6802_v2 = vpack.c.bf16 %v203_v59, %v199_v57  ;;  %v205_v4 = vld [vmem:[#allocation6 + $0x140] sm:$0xff] }
  0xa3   :  { %6797 = vmatprep.subr.bf16.mxu1 %v6796_v45  ;;  %v212_v63 = vld [vmem:[#allocation6 + $0x178] sm:$0xff]  ;;  %v6772_v3 = vpack.c.bf16 %v210_v61, %v206_v60  ;;  %v209_v5 = vld [vmem:[#allocation6 + $0x160] sm:$0xff]  ;;  %v207_v6 = vld [vmem:[#allocation6 + $0x150] sm:$0xff] }
  0xa4   :  { %v6804_v7 = vpack.c.bf16 %v212_v63, %v208_v62  ;;  %v211_v8 = vld [vmem:[#allocation6 + $0x170] sm:$0xff]  ;;  %v214_v9 = vld [vmem:[#allocation6 + $0x188] sm:$0xff]  ;;  %v216_v11 = vld [vmem:[#allocation6 + $0x198] sm:$0xff]  ;;  %v6774_v13 = vpack.c.bf16 %v209_v5, %v205_v4 }
  0xa5   :  { %6767 = vmatpush1.bf16.msra.mxu0 %v6766_v52  ;;  %v218_v10 = vld [vmem:[#allocation6 + $0x1a8] sm:$0xff]  ;;  %v220_v12 = vld [vmem:[#allocation6 + $0x1b8] sm:$0xff]  ;;  %v6806_v14 = vpack.c.bf16 %v211_v8, %v207_v6  ;;  %v213_v16 = vld [vmem:[#allocation6 + $0x180] sm:$0xff] }
  0xa6   :  { %6799 = vmatpush1.bf16.msra.mxu1 %v6798_v53  ;;  %6769 = vmatprep.subr.bf16.mxu0 %v6768_v54  ;;  %v6776_v15 = vpack.c.bf16 %v218_v10, %v214_v9  ;;  %v217_v17 = vld [vmem:[#allocation6 + $0x1a0] sm:$0xff]  ;;  %v215_v18 = vld [vmem:[#allocation6 + $0x190] sm:$0xff]  ;;  %v6808_v19 = vpack.c.bf16 %v220_v12, %v216_v11  ;;  %v222_v21 = vld [vmem:[#allocation6 + $0x1c8] sm:$0xff] }
  0xa7   :  { %6801 = vmatprep.subr.bf16.mxu1 %v6800_v58  ;;  %v219_v20 = vld [vmem:[#allocation6 + $0x1b0] sm:$0xff]  ;;  %v226_v22 = vld [vmem:[#allocation6 + $0x1e8] sm:$0xff]  ;;  %v224_v23 = vld [vmem:[#allocation6 + $0x1d8] sm:$0xff]  ;;  %v6778_v25 = vpack.c.bf16 %v217_v17, %v213_v16 }
  0xa8   :  { %v228_v24 = vld [vmem:[#allocation6 + $0x1f8] sm:$0xff]  ;;  %v6810_v26 = vpack.c.bf16 %v219_v20, %v215_v18  ;;  %v6780_v27 = vpack.c.bf16 %v226_v22, %v222_v21  ;;  %v221_v28 = vld [vmem:[#allocation6 + $0x1c0] sm:$0xff]  ;;  %v223_v30 = vld [vmem:[#allocation6 + $0x1d0] sm:$0xff] }
  0xa9   :  { %6771 = vmatpush1.bf16.msra.mxu0 %v6770_v0  ;;  %v225_v29 = vld [vmem:[#allocation6 + $0x1e0] sm:$0xff]  ;;  %v6812_v31 = vpack.c.bf16 %v228_v24, %v224_v23  ;;  %v227_v32 = vld [vmem:[#allocation6 + $0x1f0] sm:$0xff]  ;;  %v514_v33 = vld [vmem:[#allocation8 + $0x8] sm:$0xff] }
  0xaa   :  { %6803 = vmatpush1.bf16.msra.mxu1 %v6802_v2  ;;  %6773 = vmatprep.subr.bf16.mxu0 %v6772_v3  ;;  %v518_v34 = vld [vmem:[#allocation8 + $0x28] sm:$0xff]  ;;  %v516_v35 = vld [vmem:[#allocation8 + $0x18] sm:$0xff]  ;;  %v6782_v37 = vpack.c.bf16 %v225_v29, %v221_v28  ;;  %v6814_v38 = vpack.c.bf16 %v227_v32, %v223_v30  ;;  %v513_v40 = vld [vmem:[#allocation8] sm:$0xff] }
  0xab   :  { %6805 = vmatprep.subr.bf16.mxu1 %v6804_v7  ;;  %v520_v36 = vld [vmem:[#allocation8 + $0x38] sm:$0xff]  ;;  %v9180_v39 = vpack.c.bf16 %v518_v34, %v514_v33  ;;  %v517_v41 = vld [vmem:[#allocation8 + $0x20] sm:$0xff]  ;;  %v515_v43 = vld [vmem:[#allocation8 + $0x10] sm:$0xff] }
  0xac   :  { %v9182_v42 = vpack.c.bf16 %v520_v36, %v516_v35  ;;  %v519_v44 = vld [vmem:[#allocation8 + $0x30] sm:$0xff]  ;;  %v522_v45 = vld [vmem:[#allocation8 + $0x48] sm:$0xff]  ;;  %v157_v47 = vld [vmem:[%s10984_s0] sm:$0xff]  ;;  %v9187_v48 = vpack.c.bf16 %v517_v41, %v513_v40 }
  0xad   :  { %6775 = vmatpush1.bf16.msra.mxu0 %v6774_v13  ;;  %v526_v46 = vld [vmem:[#allocation8 + $0x68] sm:$0xff]  ;;  %v524_v49 = vld [vmem:[#allocation8 + $0x58] sm:$0xff]  ;;  %v9190_v51 = vpack.c.bf16 %v519_v44, %v515_v43  ;;  %v521_v52 = vld [vmem:[#allocation8 + $0x40] sm:$0xff] }
  0xae   :  { %6807 = vmatpush1.bf16.msra.mxu1 %v6806_v14  ;;  %6777 = vmatprep.subr.bf16.mxu0 %v6776_v15  ;;  %v528_v50 = vld [vmem:[#allocation8 + $0x78] sm:$0xff]  ;;  %v525_v53 = vld [vmem:[#allocation8 + $0x60] sm:$0xff]  ;;  %v9193_v54 = vpack.c.bf16 %v526_v46, %v522_v45  ;;  %v523_v55 = vld [vmem:[#allocation8 + $0x50] sm:$0xff] }
  0xaf   :  { %6809 = vmatprep.subr.bf16.mxu1 %v6808_v19  ;;  %v527_v56 = vld [vmem:[#allocation8 + $0x70] sm:$0xff]  ;;  %v9195_v57 = vpack.c.bf16 %v528_v50, %v524_v49  ;;  %v530_v58 = vld [vmem:[#allocation8 + $0x88] sm:$0xff]  ;;  %v9201_v61 = vpack.c.bf16 %v525_v53, %v521_v52  ;;  %v532_v62 = vld [vmem:[#allocation8 + $0x98] sm:$0xff] }
  0xb0   :  { %v534_v59 = vld [vmem:[#allocation8 + $0xa8] sm:$0xff]  ;;  %v536_v63 = vld [vmem:[#allocation8 + $0xb8] sm:$0xff]  ;;  %v9205_v0 = vpack.c.bf16 %v527_v56, %v523_v55  ;;  %v529_v2 = vld [vmem:[#allocation8 + $0x80] sm:$0xff] }
  0xb1   :  { %6779 = vmatpush1.bf16.msra.mxu0 %v6778_v25  ;;  %v158_v60 = vld [vmem:[%s10984_s0 + $0x8] sm:$0xff]  ;;  %v9209_v4 = vpack.c.bf16 %v534_v59, %v530_v58  ;;  %v531_v5 = vld [vmem:[#allocation8 + $0x90] sm:$0xff]  ;;  %v9212_v7 = vpack.c.bf16 %v536_v63, %v532_v62  ;;  %v540_v12 = vld [vmem:[#allocation8 + $0xd8] sm:$0xff] }
  0xb2   :  { %6811 = vmatpush1.bf16.msra.mxu1 %v6810_v26  ;;  %6781 = vmatprep.subr.bf16.mxu0 %v6780_v27  ;;  %v533_v3 = vld [vmem:[#allocation8 + $0xa0] sm:$0xff]  ;;  %v535_v6 = vld [vmem:[#allocation8 + $0xb0] sm:$0xff]  ;;  %v538_v8 = vld [vmem:[#allocation8 + $0xc8] sm:$0xff] }
  0xb3   :  { %6813 = vmatprep.subr.bf16.mxu1 %v6812_v31  ;;  %v542_v9 = vld [vmem:[#allocation8 + $0xe8] sm:$0xff]  ;;  %v9218_v11 = vpack.c.bf16 %v533_v3, %v529_v2  ;;  %v544_v13 = vld [vmem:[#allocation8 + $0xf8] sm:$0xff]  ;;  %v9222_v14 = vpack.c.bf16 %v535_v6, %v531_v5  ;;  %v537_v15 = vld [vmem:[#allocation8 + $0xc0] sm:$0xff] }
  0xb4   :  { %v159_v10 = vld [vmem:[%s10984_s0 + $0x10] sm:$0xff]  ;;  %v541_v16 = vld [vmem:[#allocation8 + $0xe0] sm:$0xff]  ;;  %v9226_v17 = vpack.c.bf16 %v542_v9, %v538_v8  ;;  %v9229_v20 = vpack.c.bf16 %v544_v13, %v540_v12  ;;  %v160_v23 = vld [vmem:[%s10984_s0 + $0x18] sm:$0xff] }
  0xb5   :  { %6783 = vmatpush1.bf16.msra.mxu0 %v6782_v37  ;;  %v539_v18 = vld [vmem:[#allocation8 + $0xd0] sm:$0xff]  ;;  %v546_v21 = vld [vmem:[#allocation8 + $0x108] sm:$0xff]  ;;  %v9235_v24 = vpack.c.bf16 %v541_v16, %v537_v15  ;;  %v548_v25 = vld [vmem:[#allocation8 + $0x118] sm:$0xff] }
  0xb6   :  { %6815 = vmatpush1.bf16.msra.mxu1 %v6814_v38  ;;  %6817 = vmatprep.subr.bf16.mxu0 %v9180_v39  ;;  %v543_v19 = vld [vmem:[#allocation8 + $0xf0] sm:$0xff]  ;;  %v550_v22 = vld [vmem:[#allocation8 + $0x128] sm:$0xff]  ;;  %v552_v26 = vld [vmem:[#allocation8 + $0x138] sm:$0xff] }
  0xb7   :  { %6849 = vmatprep.subr.bf16.mxu1 %v9182_v42  ;;  %v9239_v27 = vpack.c.bf16 %v543_v19, %v539_v18  ;;  %v545_v28 = vld [vmem:[#allocation8 + $0x100] sm:$0xff]  ;;  %v9243_v30 = vpack.c.bf16 %v550_v22, %v546_v21  ;;  %v547_v31 = vld [vmem:[#allocation8 + $0x110] sm:$0xff]  ;;  %v9246_v33 = vpack.c.bf16 %v552_v26, %v548_v25  ;;  %v554_v34 = vld [vmem:[#allocation8 + $0x148] sm:$0xff] }
  0xb8   :  { %316 = vmatmul.mubr.f32.vlgmr.msra.gmra.mrb[0].mxu0 %v157_v47  ;;  %v549_v29 = vld [vmem:[#allocation8 + $0x120] sm:$0xff]  ;;  %v551_v32 = vld [vmem:[#allocation8 + $0x130] sm:$0xff]  ;;  %v558_v35 = vld [vmem:[#allocation8 + $0x168] sm:$0xff] }
  0xb9   :  { %429 = vmatmul.mubr.f32.vlgmr.msra.gmra.mrb[0].mxu1 %v157_v47  ;;  %6819 = vmatpush1.bf16.msra.mxu0 %v9187_v48  ;;  %v161_v36 = vld [vmem:[%s10984_s0 + $0x20] sm:$0xff]  ;;  %v9252_v37 = vpack.c.bf16 %v549_v29, %v545_v28  ;;  %v9256_v41 = vpack.c.bf16 %v551_v32, %v547_v31  ;;  %v9260_v45 = vpack.c.bf16 %v558_v35, %v554_v34  ;;  %v555_v46 = vld [vmem:[#allocation8 + $0x150] sm:$0xff]  ;;  %v562_v50 = vld [vmem:[#allocation8 + $0x188] sm:$0xff] }
  0xba   :  { %6851 = vmatpush1.bf16.msra.mxu1 %v9190_v51  ;;  %321 = vmatprep.mubr.f32.mxu0 %v11000_v1  ;;  %v556_v38 = vld [vmem:[#allocation8 + $0x158] sm:$0xff]  ;;  %v553_v43 = vld [vmem:[#allocation8 + $0x140] sm:$0xff]  ;;  %v559_v47 = vld [vmem:[#allocation8 + $0x170] sm:$0xff] }
  0xbb   :  { %434 = vmatprep.mubr.f32.mxu1 %v11000_v1  ;;  %6821 = vmatprep.subr.bf16.mxu0 %v9193_v54  ;;  %v560_v40 = vld [vmem:[#allocation8 + $0x178] sm:$0xff]  ;;  %v557_v44 = vld [vmem:[#allocation8 + $0x160] sm:$0xff]  ;;  %v566_v52 = vld [vmem:[#allocation8 + $0x1a8] sm:$0xff]  ;;  %v9273_v59 = vpack.c.bf16 %v559_v47, %v555_v46 }
  0xbc   :  { %322 = vmatmul.mubr.f32.gmra.mrb[2].mxu0 %v158_v60  ;;  %6853 = vmatprep.subr.bf16.mxu1 %v9195_v57  ;;  %v9263_v49 = vpack.c.bf16 %v560_v40, %v556_v38  ;;  %v162_v53 = vld [vmem:[%s10984_s0 + $0x28] sm:$0xff]  ;;  %v9269_v55 = vpack.c.bf16 %v557_v44, %v553_v43  ;;  %v564_v56 = vld [vmem:[#allocation8 + $0x198] sm:$0xff]  ;;  %v9277_v63 = vpack.c.bf16 %v566_v52, %v562_v50  ;;  %v563_v2 = vld [vmem:[#allocation8 + $0x190] sm:$0xff] }
  0xbd   :  { %435 = vmatmul.mubr.f32.gmra.mrb[2].mxu1 %v158_v60  ;;  %6823 = vmatpush1.bf16.msra.mxu0 %v9201_v61  ;;  %v568_v58 = vld [vmem:[#allocation8 + $0x1b8] sm:$0xff]  ;;  %v561_v60 = vld [vmem:[#allocation8 + $0x180] sm:$0xff]  ;;  %v567_v3 = vld [vmem:[#allocation8 + $0x1b0] sm:$0xff] }
  0xbe   :  { %6855 = vmatpush1.bf16.msra.mxu1 %v9205_v0  ;;  %327 = vmatprep.mubr.f32.mxu0 %v11000_v1  ;;  %v565_v62 = vld [vmem:[#allocation8 + $0x1a0] sm:$0xff]  ;;  %v9280_v5 = vpack.c.bf16 %v568_v58, %v564_v56  ;;  %v570_v6 = vld [vmem:[#allocation8 + $0x1c8] sm:$0xff]  ;;  %v572_v12 = vld [vmem:[#allocation8 + $0x1d8] sm:$0xff]  ;;  %v9290_v15 = vpack.c.bf16 %v567_v3, %v563_v2 }
  0xbf   :  { %440 = vmatprep.mubr.f32.mxu1 %v11000_v1  ;;  %6825 = vmatprep.subr.bf16.mxu0 %v9209_v4  ;;  %v574_v8 = vld [vmem:[#allocation8 + $0x1e8] sm:$0xff]  ;;  %v576_v13 = vld [vmem:[#allocation8 + $0x1f8] sm:$0xff]  ;;  %v569_v16 = vld [vmem:[#allocation8 + $0x1c0] sm:$0xff] }
  0xc0   :  { %328 = vmatmul.mubr.f32.gmra.mrb[4].mxu0 %v159_v10  ;;  %6857 = vmatprep.subr.bf16.mxu1 %v9212_v7  ;;  %v163_v9 = vld [vmem:[%s10984_s0 + $0x30] sm:$0xff]  ;;  %v573_v18 = vld [vmem:[#allocation8 + $0x1e0] sm:$0xff]  ;;  %v9294_v19 = vpack.c.bf16 %v574_v8, %v570_v6  ;;  %v164_v25 = vld [vmem:[%s10984_s0 + $0x38] sm:$0xff] }
  0xc1   :  { %441 = vmatmul.mubr.f32.gmra.mrb[4].mxu1 %v159_v10  ;;  %6827 = vmatpush1.bf16.msra.mxu0 %v9218_v11  ;;  %v9286_v10 = vpack.c.bf16 %v565_v62, %v561_v60  ;;  %v571_v21 = vld [vmem:[#allocation8 + $0x1d0] sm:$0xff]  ;;  %v9303_v26 = vpack.c.bf16 %v573_v18, %v569_v16  ;;  %v742_v29 = vld [vmem:[#allocation10 + $0x8] sm:$0xff]  ;;  %v744_v32 = vld [vmem:[#allocation10 + $0x18] sm:$0xff] }
  0xc2   :  { %6859 = vmatpush1.bf16.msra.mxu1 %v9222_v14  ;;  %333 = vmatprep.mubr.f32.mxu0 %v11000_v1  ;;  %v575_v22 = vld [vmem:[#allocation8 + $0x1f0] sm:$0xff]  ;;  %v746_v31 = vld [vmem:[#allocation10 + $0x28] sm:$0xff]  ;;  %v748_v35 = vld [vmem:[#allocation10 + $0x38] sm:$0xff] }
  0xc3   :  { %446 = vmatprep.mubr.f32.mxu1 %v11000_v1  ;;  %6829 = vmatprep.subr.bf16.mxu0 %v9226_v17  ;;  %v9307_v28 = vpack.c.bf16 %v575_v22, %v571_v21  ;;  %v9320_v34 = vpack.c.bf16 %v746_v31, %v742_v29  ;;  %v745_v38 = vld [vmem:[#allocation10 + $0x20] sm:$0xff]  ;;  %v9322_v40 = vpack.c.bf16 %v748_v35, %v744_v32  ;;  %v743_v44 = vld [vmem:[#allocation10 + $0x10] sm:$0xff]  ;;  %v750_v50 = vld [vmem:[#allocation10 + $0x48] sm:$0xff] }
  0xc4   :  { %334 = vmatmul.mubr.f32.gmra.mrb[6].mxu0 %v160_v23  ;;  %6861 = vmatprep.subr.bf16.mxu1 %v9229_v20  ;;  %v747_v46 = vld [vmem:[#allocation10 + $0x30] sm:$0xff]  ;;  %v754_v52 = vld [vmem:[#allocation10 + $0x68] sm:$0xff]  ;;  %v756_v58 = vld [vmem:[#allocation10 + $0x78] sm:$0xff] }
  0xc5   :  { %447 = vmatmul.mubr.f32.gmra.mrb[6].mxu1 %v160_v23  ;;  %6831 = vmatpush1.bf16.msra.mxu0 %v9235_v24  ;;  %v9297_v23 = vpack.c.bf16 %v576_v13, %v572_v12  ;;  %v9327_v47 = vpack.c.bf16 %v747_v46, %v743_v44  ;;  %v9332_v56 = vpack.c.bf16 %v754_v52, %v750_v50  ;;  %v749_v60 = vld [vmem:[#allocation10 + $0x40] sm:$0xff]  ;;  %v751_v6 = vld [vmem:[#allocation10 + $0x50] sm:$0xff]  ;;  %v758_v12 = vld [vmem:[#allocation10 + $0x88] sm:$0xff] }
  0xc6   :  { %6863 = vmatpush1.bf16.msra.mxu1 %v9239_v27  ;;  %339 = vmatprep.mubr.f32.mxu0 %v11000_v1  ;;  %v753_v62 = vld [vmem:[#allocation10 + $0x60] sm:$0xff]  ;;  %v755_v8 = vld [vmem:[#allocation10 + $0x70] sm:$0xff]  ;;  %v762_v13 = vld [vmem:[#allocation10 + $0xa8] sm:$0xff] }
  0xc7   :  { %452 = vmatprep.mubr.f32.mxu1 %v11000_v1  ;;  %6833 = vmatprep.subr.bf16.mxu0 %v9243_v30  ;;  %v9336_v3 = vpack.c.bf16 %v753_v62, %v749_v60  ;;  %v760_v16 = vld [vmem:[#allocation10 + $0x98] sm:$0xff]  ;;  %v9344_v18 = vpack.c.bf16 %v762_v13, %v758_v12  ;;  %v757_v22 = vld [vmem:[#allocation10 + $0x80] sm:$0xff]  ;;  %v759_v32 = vld [vmem:[#allocation10 + $0x90] sm:$0xff] }
  0xc8   :  { %340 = vmatmul.mubr.f32.gmra.mrb[8].mxu0 %v161_v36  ;;  %6865 = vmatprep.subr.bf16.mxu1 %v9246_v33  ;;  %v764_v21 = vld [vmem:[#allocation10 + $0xb8] sm:$0xff]  ;;  %v763_v35 = vld [vmem:[#allocation10 + $0xb0] sm:$0xff]  ;;  %v770_v44 = vld [vmem:[#allocation10 + $0xe8] sm:$0xff] }
  0xc9   :  { %453 = vmatmul.mubr.f32.gmra.mrb[8].mxu1 %v161_v36  ;;  %6835 = vmatpush1.bf16.msra.mxu0 %v9252_v37  ;;  %v741_v36 = vld [vmem:[#allocation10] sm:$0xff]  ;;  %v9346_v29 = vpack.c.bf16 %v764_v21, %v760_v16  ;;  %v768_v46 = vld [vmem:[#allocation10 + $0xd8] sm:$0xff]  ;;  %v774_v13 = vld [vmem:[#allocation10 + $0x108] sm:$0xff] }
  0xca   :  { %6867 = vmatpush1.bf16.msra.mxu1 %v9256_v41  ;;  %345 = vmatprep.mubr.f32.mxu0 %v11000_v1  ;;  %v9324_v43 = vpack.c.bf16 %v745_v38, %v741_v36  ;;  %v9351_v36 = vpack.c.bf16 %v763_v35, %v759_v32  ;;  %v766_v38 = vld [vmem:[#allocation10 + $0xc8] sm:$0xff]  ;;  %v772_v52 = vld [vmem:[#allocation10 + $0xf8] sm:$0xff]  ;;  %v773_v32 = vld [vmem:[#allocation10 + $0x100] sm:$0xff] }
  0xcb   :  { %458 = vmatprep.mubr.f32.mxu1 %v11000_v1  ;;  %6837 = vmatprep.subr.bf16.mxu0 %v9260_v45  ;;  %v9356_v50 = vpack.c.bf16 %v770_v44, %v766_v38  ;;  %v9358_v60 = vpack.c.bf16 %v772_v52, %v768_v46  ;;  %v778_v16 = vld [vmem:[#allocation10 + $0x128] sm:$0xff]  ;;  %v776_v21 = vld [vmem:[#allocation10 + $0x118] sm:$0xff]  ;;  %v777_v35 = vld [vmem:[#allocation10 + $0x120] sm:$0xff] }
  0xcc   :  { %346 = vmatmul.mubr.f32.gmra.mrb[10].mxu0 %v162_v53  ;;  %6869 = vmatprep.subr.bf16.mxu1 %v9263_v49  ;;  %v9372_v44 = vpack.c.bf16 %v777_v35, %v773_v32  ;;  %v775_v46 = vld [vmem:[#allocation10 + $0x110] sm:$0xff] }
  0xcd   :  { %459 = vmatmul.mubr.f32.gmra.mrb[10].mxu1 %v162_v53  ;;  %6839 = vmatpush1.bf16.msra.mxu0 %v9269_v55  ;;  %v752_v53 = vld [vmem:[#allocation10 + $0x58] sm:$0xff]  ;;  %v779_v52 = vld [vmem:[#allocation10 + $0x130] sm:$0xff] }
  0xce   :  { %6871 = vmatpush1.bf16.msra.mxu1 %v9273_v59  ;;  %351 = vmatprep.mubr.f32.mxu0 %v11000_v1  ;;  %v9334_v2 = vpack.c.bf16 %v756_v58, %v752_v53  ;;  %v765_v53 = vld [vmem:[#allocation10 + $0xc0] sm:$0xff]  ;;  %11102 = vst [vmem:[#allocation28_spill] sm:$0xff] %v9372_v44 }
  0xcf   :  { %464 = vmatprep.mubr.f32.mxu1 %v11000_v1  ;;  %6841 = vmatprep.subr.bf16.mxu0 %v9277_v63  ;;  %v769_v58 = vld [vmem:[#allocation10 + $0xe0] sm:$0xff] }
  0xd0   :  { %352 = vmatmul.mubr.f32.gmra.mrb[12].mxu0 %v163_v9  ;;  %6873 = vmatprep.subr.bf16.mxu1 %v9280_v5  ;;  %v9360_v62 = vpack.c.bf16 %v769_v58, %v765_v53  ;;  %v9375_v53 = vpack.c.bf16 %v779_v52, %v775_v46  ;;  %v782_v58 = vld [vmem:[#allocation10 + $0x148] sm:$0xff]  ;;  %v783_v46 = vld [vmem:[#allocation10 + $0x150] sm:$0xff] }
  0xd1   :  { %465 = vmatmul.mubr.f32.gmra.mrb[12].mxu1 %v163_v9  ;;  %6843 = vmatpush1.bf16.msra.mxu0 %v9286_v10  ;;  %v9339_v9 = vpack.c.bf16 %v755_v8, %v751_v6  ;;  %v767_v6 = vld [vmem:[#allocation10 + $0xd0] sm:$0xff] }
  0xd2   :  { %6875 = vmatpush1.bf16.msra.mxu1 %v9290_v15  ;;  %357 = vmatprep.mubr.f32.mxu0 %v11000_v1  ;;  %11098 = vst [vmem:[#allocation24_spill] sm:$0xff] %v9360_v62  ;;  %v771_v8 = vld [vmem:[#allocation10 + $0xf0] sm:$0xff]  ;;  %11103 = vst [vmem:[#allocation29_spill] sm:$0xff] %v9375_v53 }
  0xd3   :  { %470 = vmatprep.mubr.f32.mxu1 %v11000_v1  ;;  %6845 = vmatprep.subr.bf16.mxu0 %v9294_v19  ;;  %v9363_v12 = vpack.c.bf16 %v771_v8, %v767_v6  ;;  %v786_v6 = vld [vmem:[#allocation10 + $0x168] sm:$0xff]  ;;  %v784_v8 = vld [vmem:[#allocation10 + $0x158] sm:$0xff]  ;;  %v787_v52 = vld [vmem:[#allocation10 + $0x170] sm:$0xff] }
  0xd4   :  { %358 = vmatmul.mubr.f32.gmra.mrb[14].mxu0 %v164_v25  ;;  %6877 = vmatprep.subr.bf16.mxu1 %v9297_v23 }
  0xd5   :  { %471 = vmatmul.mubr.f32.gmra.mrb[14].mxu1 %v164_v25  ;;  %6847 = vmatpush1.bf16.msra.mxu0 %v9303_v26  ;;  %v761_v25 = vld [vmem:[#allocation10 + $0xa0] sm:$0xff]  ;;  %11099 = vst [vmem:[#allocation25_spill] sm:$0xff] %v9363_v12 }
  0xd6   :  { %6879 = vmatpush1.bf16.msra.mxu1 %v9307_v28  ;;  %641 = vmatprep.mubr.f32.mxu0 %v11000_v1  ;;  %v9348_v31 = vpack.c.bf16 %v761_v25, %v757_v22  ;;  %v9368_v22 = vpack.c.bf16 %v778_v16, %v774_v13  ;;  %v780_v25 = vld [vmem:[#allocation10 + $0x138] sm:$0xff]  ;;  %v9380_v13 = vpack.c.bf16 %v786_v6, %v782_v58  ;;  %v794_v58 = vld [vmem:[#allocation10 + $0x1a8] sm:$0xff] }
  0xd7   :  { %712 = vmatprep.mubr.f32.mxu1 %v11000_v1  ;;  %6881 = vmatprep.subr.bf16.mxu0 %v9320_v34  ;;  %v9370_v38 = vpack.c.bf16 %v780_v25, %v776_v21  ;;  %v788_v16 = vld [vmem:[#allocation10 + $0x178] sm:$0xff]  ;;  %v781_v21 = vld [vmem:[#allocation10 + $0x140] sm:$0xff] }
  0xd8   :  { %642 = vmatmul.mubr.f32.vlgmr.msra.gmra.mrb[0].mxu0 %v11000_v1  ;;  %6913 = vmatprep.subr.bf16.mxu1 %v9322_v40  ;;  %11100 = vst [vmem:[#allocation26_spill] sm:$0xff] %v9368_v22  ;;  %11104 = vst [vmem:[#allocation30_spill] sm:$0xff] %v9380_v13  ;;  %v785_v25 = vld [vmem:[#allocation10 + $0x160] sm:$0xff]  ;;  %v9382_v32 = vpack.c.bf16 %v788_v16, %v784_v8  ;;  %v792_v6 = vld [vmem:[#allocation10 + $0x198] sm:$0xff] }
  0xd9   :  { %713 = vmatmul.mubr.f32.vlgmr.msra.gmra.mrb[0].mxu1 %v11000_v1  ;;  %891 = vmatprep.mubr.f32.mxu0 %v11000_v1  ;;  %11101 = vst [vmem:[#allocation27_spill] sm:$0xff] %v9370_v38  ;;  %v9384_v35 = vpack.c.bf16 %v785_v25, %v781_v21  ;;  %v796_v8 = vld [vmem:[#allocation10 + $0x1b8] sm:$0xff]  ;;  %v789_v16 = vld [vmem:[#allocation10 + $0x180] sm:$0xff] }
  0xda   :  { %962 = vmatprep.mubr.f32.mxu1 %v11000_v1  ;;  %6883 = vmatpush1.bf16.msra.mxu0 %v9324_v43  ;;  %11105 = vst [vmem:[#allocation31_spill] sm:$0xff] %v9382_v32  ;;  %v9387_v1 = vpack.c.bf16 %v787_v52, %v783_v46  ;;  %v793_v21 = vld [vmem:[#allocation10 + $0x1a0] sm:$0xff]  ;;  %v9394_v25 = vpack.c.bf16 %v796_v8, %v792_v6  ;;  %v791_v46 = vld [vmem:[#allocation10 + $0x190] sm:$0xff]  ;;  %v804_v6 = vld [vmem:[#allocation10 + $0x1f8] sm:$0xff] }
  0xdb   :  { %6915 = vmatpush1.bf16.msra.mxu1 %v9327_v47  ;;  %6885 = vmatprep.subr.bf16.mxu0 %v9332_v56  ;;  %11106 = vst [vmem:[#allocation32_spill] sm:$0xff] %v9384_v35  ;;  %v795_v52 = vld [vmem:[#allocation10 + $0x1b0] sm:$0xff]  ;;  %v797_v8 = vld [vmem:[#allocation10 + $0x1c0] sm:$0xff] }
  0xdc   :  { %6917 = vmatprep.subr.bf16.mxu1 %v9334_v2  ;;  %11107 = vst [vmem:[#allocation33_spill] sm:$0xff] %v9387_v1  ;;  %11109 = vst [vmem:[#allocation35_spill] sm:$0xff] %v9394_v25 }
  0xde   :  { %6887 = vmatpush1.bf16.msra.mxu0 %v9336_v3 }
  0xdf   :  { %6919 = vmatpush1.bf16.msra.mxu1 %v9339_v9  ;;  %6889 = vmatprep.subr.bf16.mxu0 %v9344_v18 }
  0xe0   :  { %6921 = vmatprep.subr.bf16.mxu1 %v9346_v29 }
  0xe2   :  { %6891 = vmatpush1.bf16.msra.mxu0 %v9348_v31 }
  0xe3   :  { %6923 = vmatpush1.bf16.msra.mxu1 %v9351_v36  ;;  %6893 = vmatprep.subr.bf16.mxu0 %v9356_v50 }
  0xe4   :  { %6925 = vmatprep.subr.bf16.mxu1 %v9358_v60 }
  0xe6   :  { %6895 = vmatpush1.bf16.msra.mxu0 %v9360_v62 }
  0xe7   :  { %6927 = vmatpush1.bf16.msra.mxu1 %v9363_v12  ;;  %6897 = vmatprep.subr.bf16.mxu0 %v9368_v22 }
  0xe8   :  { %6929 = vmatprep.subr.bf16.mxu1 %v9370_v38  ;;  %v9396_v38 = vpack.c.bf16 %v793_v21, %v789_v16  ;;  %v801_v16 = vld [vmem:[#allocation10 + $0x1e0] sm:$0xff] }
  0xea   :  { %6899 = vmatpush1.bf16.msra.mxu0 %v9372_v44  ;;  %11110 = vst [vmem:[#allocation36_spill] sm:$0xff] %v9396_v38 }
  0xeb   :  { %6931 = vmatpush1.bf16.msra.mxu1 %v9375_v53  ;;  %6901 = vmatprep.subr.bf16.mxu0 %v9380_v13  ;;  %v790_v53 = vld [vmem:[#allocation10 + $0x188] sm:$0xff]  ;;  %v9408_v13 = vpack.c.bf16 %v801_v16, %v797_v8 }
  0xec   :  { %6933 = vmatprep.subr.bf16.mxu1 %v9382_v32  ;;  %v9392_v44 = vpack.c.bf16 %v794_v58, %v790_v53  ;;  %v9399_v32 = vpack.c.bf16 %v795_v52, %v791_v46  ;;  %v802_v53 = vld [vmem:[#allocation10 + $0x1e8] sm:$0xff]  ;;  %v800_v58 = vld [vmem:[#allocation10 + $0x1d8] sm:$0xff]  ;;  %v799_v46 = vld [vmem:[#allocation10 + $0x1d0] sm:$0xff] }
  0xed   :  { %v9406_v21 = vpack.c.bf16 %v804_v6, %v800_v58  ;;  %11114 = vst [vmem:[#allocation40_spill] sm:$0xff] %v9408_v13  ;;  %v803_v52 = vld [vmem:[#allocation10 + $0x1f0] sm:$0xff]  ;;  %v229_v6 = vld [vmem:[%s10987_s3] sm:$0xf] }
  0xee   :  { %6903 = vmatpush1.bf16.msra.mxu0 %v9384_v35  ;;  %11108 = vst [vmem:[#allocation34_spill] sm:$0xff] %v9392_v44  ;;  %11111 = vst [vmem:[#allocation37_spill] sm:$0xff] %v9399_v32 }
  0xef   :  { %6935 = vmatpush1.bf16.msra.mxu1 %v9387_v1  ;;  %6905 = vmatprep.subr.bf16.mxu0 %v9392_v44  ;;  %v798_v1 = vld [vmem:[#allocation10 + $0x1c8] sm:$0xff]  ;;  %11113 = vst [vmem:[#allocation39_spill] sm:$0xff] %v9406_v21 }
  0xf0   :  { %6937 = vmatprep.subr.bf16.mxu1 %v9394_v25  ;;  %v9404_v35 = vpack.c.bf16 %v802_v53, %v798_v1  ;;  %v9411_v25 = vpack.c.bf16 %v803_v52, %v799_v46  ;;  %v231_v1 = vlaneseq }
  0xf2   :  { %6907 = vmatpush1.bf16.msra.mxu0 %v9396_v38  ;;  %11112 = vst [vmem:[#allocation38_spill] sm:$0xff] %v9404_v35  ;;  %11115 = vst [vmem:[#allocation41_spill] sm:$0xff] %v9411_v25  ;;  %v232_v53 = vshrl.u32 %v231_v1, 7 }
  0xf3   :  { %6939 = vmatpush1.bf16.msra.mxu1 %v9399_v32  ;;  %6909 = vmatprep.subr.bf16.mxu0 %v9404_v35 }
  0xf4   :  { %6941 = vmatprep.subr.bf16.mxu1 %v9406_v21  ;;  %v9418_v58 = vsub.s32 0, %v232_v53  ;;  %v9423_v8 = vsub.s32 1, %v232_v53  ;;  %v9428_v46 = vsub.s32 2, %v232_v53  ;;  %v9437_v21 = vsub.s32 3, %v232_v53 }
  0xf6   :  { %6911 = vmatpush1.bf16.msra.mxu0 %v9408_v13  ;;  %11116 = vst [vmem:[#allocation42_spill] sm:$0xff] %v9418_v58  ;;  %11117 = vst [vmem:[#allocation43_spill] sm:$0xff] %v9423_v8  ;;  %v9426_v16 = vrot.slane %v229_v6, %v9418_v58  ;;  %v9431_v52 = vrot.slane %v229_v6, %v9423_v8  ;;  %v9435_v1 = vrot.slane %v229_v6, %v9428_v46 }
  0xf7   :  { %6943 = vmatpush1.bf16.msra.mxu1 %v9411_v25  ;;  %6945 = vmatprep.subr.bf16.mxu0 %v9180_v39  ;;  %11119 = vst [vmem:[#allocation45_spill] sm:$0xff] %v9428_v46  ;;  %11121 = vst [vmem:[#allocation47_spill] sm:$0xff] %v9437_v21  ;;  %v9442_v8 = vrot.slane %v229_v6, %v9437_v21 }
  0xf8   :  { %6977 = vmatprep.subr.bf16.mxu1 %v9182_v42  ;;  %11118 = vst [vmem:[#allocation44_spill] sm:$0xff] %v9426_v16  ;;  %11120 = vst [vmem:[#allocation46_spill] sm:$0xff] %v9431_v52 }
 0x1ab   :  { %v643_v39 = vpop.f32.mrb[0].mxu0 }
 0x1ac   :  { %v8432_v42 = vadd.f32 %v643_v39, %v9426_v16  ;;  %v714_v25 = vpop.f32.mrb[0].mxu1  ;;  %v645_v13 = vpop.f32.mrb[1].mxu0 }
 0x1ad   :  { %v8433_v35 = vadd.f32 %v645_v13, %v9431_v52  ;;  %v716_v32 = vpop.f32.mrb[1].mxu1  ;;  %v8448_v44 = vadd.f32 %v714_v25, %v9435_v1 }
 0x1ae   :  { %v723_v58 = vmul.f32 0.5, %v8432_v42  ;;  %v8449_v39 = vadd.f32 %v716_v32, %v9442_v8 }
 0x1af   :  { %v727_v38 = vmul.f32 0.5, %v8433_v35 }
 0x1b0   :  { %8578 = vtanh.f32 %v723_v58  ;;  %v732_v46 = vmul.f32 0.5, %v8449_v39 }
 0x1b1   :  { %8580 = vtanh.f32 %v727_v38 }
 0x1b2   :  { %8582 = vtanh.f32 %v8448_v44 }
 0x1b3   :  { %8584 = vtanh.f32 %v732_v46 }
 0x1ba   :  { %v8579_v16 = vpop.eup %8578 }
 0x1bb   :  { %v8581_v22 = vpop.eup %8580  ;;  %v725_v53 = vmul.f32 0.5, %v8579_v16 }
 0x1bc   :  { %v729_v12 = vmul.f32 0.5, %v8581_v22  ;;  %v8583_v52 = vpop.eup %8582 }
 0x1bd   :  { %v726_v13 = vadd.f32 0.5, %v725_v53  ;;  %v8585_v25 = vpop.eup %8584  ;;  %v1441_v53 = vld [vmem:[#allocation8] sm:$0xff] }
 0x1be   :  { %v730_v42 = vadd.f32 0.5, %v729_v12  ;;  %v734_v38 = vmul.f32 0.5, %v8585_v25  ;;  %v11122_v12 = vmov 0.0   ;;  %v1454_v25 = vld [vmem:[#allocation8 + $0x68] sm:$0xff] }
 0x1bf   :  { %v737_v35 = vmul.f32 %v8583_v52, %v726_v13  ;;  %v1445_v13 = vld [vmem:[#allocation8 + $0x20] sm:$0xff] }
 0x1c0   :  { %v736_v58 = vmul.f32 0.0, %v730_v42  ;;  %v735_v44 = vadd.f32 0.5, %v734_v38  ;;  %v1443_v42 = vld [vmem:[#allocation8 + $0x10] sm:$0xff]  ;;  %v1452_v38 = vld [vmem:[#allocation8 + $0x58] sm:$0xff] }
 0x1c2   :  { %v9445_v62 = vadd.f32 %v737_v35, %v736_v58  ;;  %v1447_v35 = vld [vmem:[#allocation8 + $0x30] sm:$0xff]  ;;  %v1450_v58 = vld [vmem:[#allocation8 + $0x48] sm:$0xff] }
 0x1c4   :  { %8586 = vtanh.f32 %v9445_v62 }
 0x1ce   :  { %v8587_v6 = vpop.eup %8586 }
 0x1cf   :  { %v740_v32 = vmul.f32 %v8587_v6, %v735_v44  ;;  %v1456_v44 = vld [vmem:[#allocation8 + $0x78] sm:$0xff] }
 0x1d1   :  { %892 = vmatmul.mubr.f32.vlgmr.msra.gmra.mrb[16].mxu0 %v740_v32  ;;  %963 = vmatmul.mubr.f32.vlgmr.msra.gmra.mrb[16].mxu1 %v740_v32 }
 0x1d2   :  { %6947 = vmatpush1.bf16.msra.mxu0 %v9187_v48  ;;  %6979 = vmatpush1.bf16.msra.mxu1 %v9190_v51  ;;  %v11123_v48 = vld [vmem:[#allocation24_spill] sm:$0xff]  ;;  %v11124_v51 = vld [vmem:[#allocation25_spill] sm:$0xff] }
 0x1d3   :  { %6949 = vmatprep.subr.bf16.mxu0 %v9193_v54  ;;  %6981 = vmatprep.subr.bf16.mxu1 %v9195_v57  ;;  %v11125_v54 = vld [vmem:[#allocation26_spill] sm:$0xff]  ;;  %v11126_v57 = vld [vmem:[#allocation27_spill] sm:$0xff] }
 0x1d4   :  { %1105 = vmatprep.mubr.f32.mxu0 %v11122_v12  ;;  %1176 = vmatprep.mubr.f32.mxu1 %v11122_v12 }
 0x1d6   :  { %6951 = vmatpush1.bf16.msra.mxu0 %v9201_v61  ;;  %6983 = vmatpush1.bf16.msra.mxu1 %v9205_v0  ;;  %v11127_v61 = vld [vmem:[#allocation28_spill] sm:$0xff]  ;;  %v11128_v0 = vld [vmem:[#allocation29_spill] sm:$0xff] }
 0x1d7   :  { %6953 = vmatprep.subr.bf16.mxu0 %v9209_v4  ;;  %6985 = vmatprep.subr.bf16.mxu1 %v9212_v7  ;;  %v11129_v4 = vld [vmem:[#allocation30_spill] sm:$0xff]  ;;  %v11130_v7 = vld [vmem:[#allocation31_spill] sm:$0xff] }
 0x1da   :  { %6955 = vmatpush1.bf16.msra.mxu0 %v9218_v11  ;;  %6987 = vmatpush1.bf16.msra.mxu1 %v9222_v14  ;;  %v11131_v11 = vld [vmem:[#allocation32_spill] sm:$0xff]  ;;  %v11132_v14 = vld [vmem:[#allocation33_spill] sm:$0xff] }
 0x1db   :  { %6957 = vmatprep.subr.bf16.mxu0 %v9226_v17  ;;  %6989 = vmatprep.subr.bf16.mxu1 %v9229_v20  ;;  %v11133_v17 = vld [vmem:[#allocation34_spill] sm:$0xff]  ;;  %v11134_v20 = vld [vmem:[#allocation35_spill] sm:$0xff] }
 0x1de   :  { %6959 = vmatpush1.bf16.msra.mxu0 %v9235_v24  ;;  %6991 = vmatpush1.bf16.msra.mxu1 %v9239_v27  ;;  %v11135_v24 = vld [vmem:[#allocation36_spill] sm:$0xff]  ;;  %v11136_v27 = vld [vmem:[#allocation37_spill] sm:$0xff] }
 0x1df   :  { %6961 = vmatprep.subr.bf16.mxu0 %v9243_v30  ;;  %6993 = vmatprep.subr.bf16.mxu1 %v9246_v33  ;;  %v11137_v30 = vld [vmem:[#allocation38_spill] sm:$0xff]  ;;  %v11138_v33 = vld [vmem:[#allocation39_spill] sm:$0xff] }
 0x1e2   :  { %6963 = vmatpush1.bf16.msra.mxu0 %v9252_v37  ;;  %6995 = vmatpush1.bf16.msra.mxu1 %v9256_v41  ;;  %v11139_v37 = vld [vmem:[#allocation40_spill] sm:$0xff]  ;;  %v11140_v41 = vld [vmem:[#allocation41_spill] sm:$0xff] }
 0x1e3   :  { %6965 = vmatprep.subr.bf16.mxu0 %v9260_v45  ;;  %6997 = vmatprep.subr.bf16.mxu1 %v9263_v49  ;;  %v1442_v45 = vld [vmem:[#allocation8 + $0x8] sm:$0xff] }
 0x1e4   :  { %v1446_v49 = vld [vmem:[#allocation8 + $0x28] sm:$0xff] }
 0x1e6   :  { %6967 = vmatpush1.bf16.msra.mxu0 %v9269_v55  ;;  %6999 = vmatpush1.bf16.msra.mxu1 %v9273_v59  ;;  %v1444_v55 = vld [vmem:[#allocation8 + $0x18] sm:$0xff]  ;;  %v9514_v59 = vpack.c.bf16 %v1446_v49, %v1442_v45  ;;  %v1459_v45 = vld [vmem:[#allocation8 + $0x90] sm:$0xff] }
 0x1e7   :  { %6969 = vmatprep.subr.bf16.mxu0 %v9277_v63  ;;  %7001 = vmatprep.subr.bf16.mxu1 %v9280_v5  ;;  %v1448_v63 = vld [vmem:[#allocation8 + $0x38] sm:$0xff]  ;;  %v1463_v49 = vld [vmem:[#allocation8 + $0xb0] sm:$0xff] }
 0x1e8   :  { %v9516_v5 = vpack.c.bf16 %v1448_v63, %v1444_v55  ;;  %v1466_v55 = vld [vmem:[#allocation8 + $0xc8] sm:$0xff] }
 0x1e9   :  { %v1470_v63 = vld [vmem:[#allocation8 + $0xe8] sm:$0xff] }
 0x1ea   :  { %6971 = vmatpush1.bf16.msra.mxu0 %v9286_v10  ;;  %7003 = vmatpush1.bf16.msra.mxu1 %v9290_v15 }
 0x1eb   :  { %6973 = vmatprep.subr.bf16.mxu0 %v9294_v19  ;;  %7005 = vmatprep.subr.bf16.mxu1 %v9297_v23  ;;  %v11141_v19 = vld [vmem:[#allocation44_spill] sm:$0xff] }
 0x1ee   :  { %6975 = vmatpush1.bf16.msra.mxu0 %v9303_v26  ;;  %7007 = vmatpush1.bf16.msra.mxu1 %v9307_v28 }
 0x1ef   :  { %7009 = vmatprep.subr.bf16.mxu0 %v9320_v34  ;;  %7041 = vmatprep.subr.bf16.mxu1 %v9322_v40  ;;  %v11142_v34 = vld [vmem:[#allocation46_spill] sm:$0xff] }
 0x1f1   :  { %1106 = vmatmul.mubr.f32.vlgmr.msra.gmra.mrb[2].mxu0 %v740_v32  ;;  %1177 = vmatmul.mubr.f32.vlgmr.msra.gmra.mrb[2].mxu1 %v740_v32 }
 0x1f2   :  { %7011 = vmatpush1.bf16.msra.mxu0 %v9324_v43  ;;  %7043 = vmatpush1.bf16.msra.mxu1 %v9327_v47 }
 0x1f3   :  { %7013 = vmatprep.subr.bf16.mxu0 %v9332_v56  ;;  %7045 = vmatprep.subr.bf16.mxu1 %v9334_v2 }
 0x1f4   :  { %1355 = vmatprep.mubr.f32.mxu0 %v11122_v12  ;;  %1426 = vmatprep.mubr.f32.mxu1 %v11122_v12 }
 0x1f6   :  { %7015 = vmatpush1.bf16.msra.mxu0 %v9336_v3  ;;  %7047 = vmatpush1.bf16.msra.mxu1 %v9339_v9 }
 0x1f7   :  { %7017 = vmatprep.subr.bf16.mxu0 %v9344_v18  ;;  %7049 = vmatprep.subr.bf16.mxu1 %v9346_v29 }
 0x1fa   :  { %7019 = vmatpush1.bf16.msra.mxu0 %v9348_v31  ;;  %7051 = vmatpush1.bf16.msra.mxu1 %v9351_v36 }
 0x1fb   :  { %7021 = vmatprep.subr.bf16.mxu0 %v9356_v50  ;;  %7053 = vmatprep.subr.bf16.mxu1 %v9358_v60 }
 0x1fe   :  { %7023 = vmatpush1.bf16.msra.mxu0 %v11123_v48  ;;  %7055 = vmatpush1.bf16.msra.mxu1 %v11124_v51  ;;  %v9528_v48 = vpack.c.bf16 %v1445_v13, %v1441_v53  ;;  %v9530_v51 = vpack.c.bf16 %v1447_v35, %v1443_v42  ;;  %v1482_v53 = vld [vmem:[#allocation8 + $0x148] sm:$0xff]  ;;  %v1484_v42 = vld [vmem:[#allocation8 + $0x158] sm:$0xff] }
 0x1ff   :  { %7025 = vmatprep.subr.bf16.mxu0 %v11125_v54  ;;  %7057 = vmatprep.subr.bf16.mxu1 %v11126_v57  ;;  %v1453_v54 = vld [vmem:[#allocation8 + $0x60] sm:$0xff]  ;;  %v1486_v13 = vld [vmem:[#allocation8 + $0x168] sm:$0xff]  ;;  %v1488_v35 = vld [vmem:[#allocation8 + $0x178] sm:$0xff] }
 0x202   :  { %7027 = vmatpush1.bf16.msra.mxu0 %v11127_v61  ;;  %7059 = vmatpush1.bf16.msra.mxu1 %v11128_v0  ;;  %v9534_v61 = vpack.c.bf16 %v1454_v25, %v1450_v58  ;;  %v9536_v0 = vpack.c.bf16 %v1456_v44, %v1452_v38  ;;  %v1481_v38 = vld [vmem:[#allocation8 + $0x140] sm:$0xff] }
 0x203   :  { %7029 = vmatprep.subr.bf16.mxu0 %v11129_v4  ;;  %7061 = vmatprep.subr.bf16.mxu1 %v11130_v7  ;;  %v1451_v4 = vld [vmem:[#allocation8 + $0x50] sm:$0xff]  ;;  %v1485_v44 = vld [vmem:[#allocation8 + $0x160] sm:$0xff] }
 0x204   :  { %v1455_v7 = vld [vmem:[#allocation8 + $0x70] sm:$0xff] }
 0x206   :  { %7031 = vmatpush1.bf16.msra.mxu0 %v11131_v11  ;;  %7063 = vmatpush1.bf16.msra.mxu1 %v11132_v14  ;;  %v1458_v11 = vld [vmem:[#allocation8 + $0x88] sm:$0xff] }
 0x207   :  { %7033 = vmatprep.subr.bf16.mxu0 %v11133_v17  ;;  %7065 = vmatprep.subr.bf16.mxu1 %v11134_v20  ;;  %v1462_v14 = vld [vmem:[#allocation8 + $0xa8] sm:$0xff]  ;;  %v1460_v17 = vld [vmem:[#allocation8 + $0x98] sm:$0xff] }
 0x208   :  { %v1464_v20 = vld [vmem:[#allocation8 + $0xb8] sm:$0xff] }
 0x20a   :  { %7035 = vmatpush1.bf16.msra.mxu0 %v11135_v24  ;;  %7067 = vmatpush1.bf16.msra.mxu1 %v11136_v27  ;;  %v9544_v27 = vpack.c.bf16 %v1455_v7, %v1451_v4  ;;  %v1490_v4 = vld [vmem:[#allocation8 + $0x188] sm:$0xff] }
 0x20b   :  { %7037 = vmatprep.subr.bf16.mxu0 %v11137_v30  ;;  %7069 = vmatprep.subr.bf16.mxu1 %v11138_v33  ;;  %v1457_v30 = vld [vmem:[#allocation8 + $0x80] sm:$0xff]  ;;  %v1494_v7 = vld [vmem:[#allocation8 + $0x1a8] sm:$0xff] }
 0x20c   :  { %v1461_v33 = vld [vmem:[#allocation8 + $0xa0] sm:$0xff] }
 0x20e   :  { %7039 = vmatpush1.bf16.msra.mxu0 %v11139_v37  ;;  %7071 = vmatpush1.bf16.msra.mxu1 %v11140_v41  ;;  %v9548_v37 = vpack.c.bf16 %v1462_v14, %v1458_v11  ;;  %v9550_v41 = vpack.c.bf16 %v1464_v20, %v1460_v17  ;;  %v1492_v11 = vld [vmem:[#allocation8 + $0x198] sm:$0xff]  ;;  %v9592_v17 = vpack.c.bf16 %v1485_v44, %v1481_v38  ;;  %v1669_v44 = vld [vmem:[#allocation10] sm:$0xff] }
 0x20f   :  { %7073 = vmatprep.subr.bf16.mxu0 %v9514_v59  ;;  %7105 = vmatprep.subr.bf16.mxu1 %v9516_v5  ;;  %v1496_v14 = vld [vmem:[#allocation8 + $0x1b8] sm:$0xff] }
 0x210   :  { %v1676_v38 = vld [vmem:[#allocation10 + $0x38] sm:$0xff] }
 0x2c4   :  { %v1107_v10 = vpop.f32.mrb[2].mxu0  ;;  %v1178_v15 = vpop.f32.mrb[2].mxu1 }
 0x2c5   :  { %v8434_v23 = vadd.f32 %v1107_v10, %v11141_v19  ;;  %v1109_v26 = vpop.f32.mrb[3].mxu0  ;;  %v1180_v28 = vpop.f32.mrb[3].mxu1  ;;  %v8450_v56 = vadd.f32 %v1178_v15, %v9435_v1  ;;  %v1468_v10 = vld [vmem:[#allocation8 + $0xd8] sm:$0xff] }
 0x2c6   :  { %v8435_v40 = vadd.f32 %v1109_v26, %v11142_v34  ;;  %v8451_v2 = vadd.f32 %v1180_v28, %v9442_v8  ;;  %v1472_v15 = vld [vmem:[#allocation8 + $0xf8] sm:$0xff]  ;;  %v9558_v26 = vpack.c.bf16 %v1463_v49, %v1459_v45  ;;  %v1465_v28 = vld [vmem:[#allocation8 + $0xc0] sm:$0xff]  ;;  %v9598_v45 = vpack.c.bf16 %v1494_v7, %v1490_v4  ;;  %v1671_v7 = vld [vmem:[#allocation10 + $0x10] sm:$0xff] }
 0x2c7   :  { %v1187_v43 = vmul.f32 0.5, %v8434_v23  ;;  %v9556_v23 = vpack.c.bf16 %v1461_v33, %v1457_v30  ;;  %v1489_v30 = vld [vmem:[#allocation8 + $0x180] sm:$0xff]  ;;  %v9600_v49 = vpack.c.bf16 %v1496_v14, %v1492_v11  ;;  %v1675_v11 = vld [vmem:[#allocation10 + $0x30] sm:$0xff]  ;;  %v1678_v14 = vld [vmem:[#allocation10 + $0x48] sm:$0xff] }
 0x2c8   :  { %v1191_v47 = vmul.f32 0.5, %v8435_v40  ;;  %v1196_v3 = vmul.f32 0.5, %v8451_v2  ;;  %v1469_v40 = vld [vmem:[#allocation8 + $0xe0] sm:$0xff]  ;;  %v1471_v2 = vld [vmem:[#allocation8 + $0xf0] sm:$0xff] }
 0x2c9   :  { %8588 = vtanh.f32 %v1187_v43  ;;  %v9562_v43 = vpack.c.bf16 %v1470_v63, %v1466_v55  ;;  %v1493_v33 = vld [vmem:[#allocation8 + $0x1a0] sm:$0xff]  ;;  %v1491_v55 = vld [vmem:[#allocation8 + $0x190] sm:$0xff] }
 0x2ca   :  { %8590 = vtanh.f32 %v1191_v47  ;;  %v9564_v47 = vpack.c.bf16 %v1472_v15, %v1468_v10  ;;  %v1495_v63 = vld [vmem:[#allocation8 + $0x1b0] sm:$0xff]  ;;  %v1498_v10 = vld [vmem:[#allocation8 + $0x1c8] sm:$0xff] }
 0x2cb   :  { %8592 = vtanh.f32 %v8450_v56  ;;  %v1467_v56 = vld [vmem:[#allocation8 + $0xd0] sm:$0xff]  ;;  %v1502_v15 = vld [vmem:[#allocation8 + $0x1e8] sm:$0xff] }
 0x2cc   :  { %8594 = vtanh.f32 %v1196_v3  ;;  %v1474_v3 = vld [vmem:[#allocation8 + $0x108] sm:$0xff] }
 0x2d3   :  { %v8589_v9 = vpop.eup %8588 }
 0x2d4   :  { %v8591_v18 = vpop.eup %8590  ;;  %v1189_v29 = vmul.f32 0.5, %v8589_v9  ;;  %v1478_v9 = vld [vmem:[#allocation8 + $0x128] sm:$0xff] }
 0x2d5   :  { %v1193_v31 = vmul.f32 0.5, %v8591_v18  ;;  %v8593_v50 = vpop.eup %8592  ;;  %v1476_v18 = vld [vmem:[#allocation8 + $0x118] sm:$0xff] }
 0x2d6   :  { %v1190_v36 = vadd.f32 0.5, %v1189_v29  ;;  %v8595_v52 = vpop.eup %8594  ;;  %v1480_v29 = vld [vmem:[#allocation8 + $0x138] sm:$0xff] }
 0x2d7   :  { %v1194_v60 = vadd.f32 0.5, %v1193_v31  ;;  %v1198_v39 = vmul.f32 0.5, %v8595_v52  ;;  %v9568_v31 = vpack.c.bf16 %v1469_v40, %v1465_v28  ;;  %v1475_v52 = vld [vmem:[#allocation8 + $0x110] sm:$0xff]  ;;  %v1500_v28 = vld [vmem:[#allocation8 + $0x1d8] sm:$0xff] }
 0x2d8   :  { %v1201_v22 = vmul.f32 %v8593_v50, %v1190_v36  ;;  %v9570_v36 = vpack.c.bf16 %v1471_v2, %v1467_v56  ;;  %v1473_v50 = vld [vmem:[#allocation8 + $0x100] sm:$0xff]  ;;  %v1504_v40 = vld [vmem:[#allocation8 + $0x1f8] sm:$0xff]  ;;  %v9604_v56 = vpack.c.bf16 %v1493_v33, %v1489_v30  ;;  %v9606_v2 = vpack.c.bf16 %v1495_v63, %v1491_v55  ;;  %v1682_v30 = vld [vmem:[#allocation10 + $0x68] sm:$0xff] }
 0x2d9   :  { %v1200_v16 = vmul.f32 %v1194_v60, %v9445_v62  ;;  %v1199_v6 = vadd.f32 0.5, %v1198_v39  ;;  %v1449_v62 = vld [vmem:[#allocation8 + $0x40] sm:$0xff]  ;;  %v1479_v39 = vld [vmem:[#allocation8 + $0x130] sm:$0xff]  ;;  %v1680_v33 = vld [vmem:[#allocation10 + $0x58] sm:$0xff]  ;;  %v9640_v55 = vpack.c.bf16 %v1682_v30, %v1678_v14 }
 0x2da   :  { %v9542_v24 = vpack.c.bf16 %v1453_v54, %v1449_v62  ;;  %v1477_v60 = vld [vmem:[#allocation8 + $0x120] sm:$0xff]  ;;  %v9582_v25 = vpack.c.bf16 %v1479_v39, %v1475_v52  ;;  %v1483_v62 = vld [vmem:[#allocation8 + $0x150] sm:$0xff]  ;;  %v1684_v63 = vld [vmem:[#allocation10 + $0x78] sm:$0xff] }
 0x2db   :  { %v9525_v46 = vadd.f32 %v1201_v22, %v1200_v16  ;;  %v9574_v22 = vpack.c.bf16 %v1478_v9, %v1474_v3  ;;  %v9576_v16 = vpack.c.bf16 %v1480_v29, %v1476_v18  ;;  %v9580_v58 = vpack.c.bf16 %v1477_v60, %v1473_v50  ;;  %v1487_v54 = vld [vmem:[#allocation8 + $0x170] sm:$0xff]  ;;  %v1497_v3 = vld [vmem:[#allocation8 + $0x1c0] sm:$0xff] }
 0x2dc   :  { %v9594_v20 = vpack.c.bf16 %v1487_v54, %v1483_v62  ;;  %v9610_v9 = vpack.c.bf16 %v1502_v15, %v1498_v10  ;;  %v9612_v18 = vpack.c.bf16 %v1504_v40, %v1500_v28  ;;  %v1501_v29 = vld [vmem:[#allocation8 + $0x1e0] sm:$0xff]  ;;  %v1499_v50 = vld [vmem:[#allocation8 + $0x1d0] sm:$0xff]  ;;  %v9642_v28 = vpack.c.bf16 %v1684_v63, %v1680_v33  ;;  %v1694_v63 = vld [vmem:[#allocation10 + $0xc8] sm:$0xff] }
 0x2dd   :  { %8596 = vtanh.f32 %v9525_v46  ;;  %v1503_v60 = vld [vmem:[#allocation8 + $0x1f0] sm:$0xff]  ;;  %v9616_v52 = vpack.c.bf16 %v1501_v29, %v1497_v3  ;;  %v1673_v62 = vld [vmem:[#allocation10 + $0x20] sm:$0xff] }
 0x2de   :  { %v9618_v39 = vpack.c.bf16 %v1503_v60, %v1499_v50  ;;  %v9632_v4 = vpack.c.bf16 %v1673_v62, %v1669_v44  ;;  %v1677_v10 = vld [vmem:[#allocation10 + $0x40] sm:$0xff]  ;;  %v1679_v3 = vld [vmem:[#allocation10 + $0x50] sm:$0xff]  ;;  %v1686_v60 = vld [vmem:[#allocation10 + $0x88] sm:$0xff] }
 0x2df   :  { %v1681_v15 = vld [vmem:[#allocation10 + $0x60] sm:$0xff]  ;;  %v1683_v29 = vld [vmem:[#allocation10 + $0x70] sm:$0xff] }
 0x2e0   :  { %v9644_v40 = vpack.c.bf16 %v1681_v15, %v1677_v10  ;;  %v9647_v50 = vpack.c.bf16 %v1683_v29, %v1679_v3  ;;  %v1685_v44 = vld [vmem:[#allocation10 + $0x80] sm:$0xff]  ;;  %v1687_v14 = vld [vmem:[#allocation10 + $0x90] sm:$0xff]  ;;  %v1698_v10 = vld [vmem:[#allocation10 + $0xe8] sm:$0xff] }
 0x2e1   :  { %v1689_v62 = vld [vmem:[#allocation10 + $0xa0] sm:$0xff]  ;;  %v1691_v30 = vld [vmem:[#allocation10 + $0xb0] sm:$0xff]  ;;  %v1696_v15 = vld [vmem:[#allocation10 + $0xd8] sm:$0xff]  ;;  %v9664_v3 = vpack.c.bf16 %v1698_v10, %v1694_v63 }
 0x2e2   :  { %v9659_v33 = vpack.c.bf16 %v1691_v30, %v1687_v14  ;;  %v1700_v29 = vld [vmem:[#allocation10 + $0xf8] sm:$0xff]  ;;  %v1702_v30 = vld [vmem:[#allocation10 + $0x108] sm:$0xff] }
 0x2e3   :  { %11144 = vst [vmem:[#allocation25_spill] sm:$0xff] %v9664_v3  ;;  %v1706_v63 = vld [vmem:[#allocation10 + $0x128] sm:$0xff]  ;;  %v1704_v10 = vld [vmem:[#allocation10 + $0x118] sm:$0xff] }
 0x2e4   :  { %11143 = vst [vmem:[#allocation24_spill] sm:$0xff] %v9659_v33  ;;  %v9676_v21 = vpack.c.bf16 %v1706_v63, %v1702_v30  ;;  %v1714_v30 = vld [vmem:[#allocation10 + $0x168] sm:$0xff]  ;;  %v1712_v63 = vld [vmem:[#allocation10 + $0x158] sm:$0xff] }
 0x2e6   :  { %11148 = vst [vmem:[#allocation29_spill] sm:$0xff] %v9676_v21 }
 0x2e7   :  { %v8597_v32 = vpop.eup %8596 }
 0x2e8   :  { %v9532_v57 = vmul.f32 %v8597_v32, %v1199_v6  ;;  %v9586_v6 = vpack.c.bf16 %v1486_v13, %v1482_v53  ;;  %v9588_v32 = vpack.c.bf16 %v1488_v35, %v1484_v42  ;;  %v1670_v53 = vld [vmem:[#allocation10 + $0x8] sm:$0xff]  ;;  %v1672_v42 = vld [vmem:[#allocation10 + $0x18] sm:$0xff] }
 0x2e9   :  { %v1674_v13 = vld [vmem:[#allocation10 + $0x28] sm:$0xff]  ;;  %v9630_v54 = vpack.c.bf16 %v1676_v38, %v1672_v42  ;;  %v1692_v38 = vld [vmem:[#allocation10 + $0xb8] sm:$0xff] }
 0x2ea   :  { %1356 = vmatmul.mubr.f32.vlgmr.msra.gmra.mrb[18].mxu0 %v9532_v57  ;;  %1427 = vmatmul.mubr.f32.vlgmr.msra.gmra.mrb[18].mxu1 %v9532_v57  ;;  %v9628_v35 = vpack.c.bf16 %v1674_v13, %v1670_v53  ;;  %v1690_v53 = vld [vmem:[#allocation10 + $0xa8] sm:$0xff]  ;;  %v1688_v13 = vld [vmem:[#allocation10 + $0x98] sm:$0xff] }
 0x2eb   :  { %7075 = vmatpush1.bf16.msra.mxu0 %v9528_v48  ;;  %7107 = vmatpush1.bf16.msra.mxu1 %v9530_v51  ;;  %v9652_v42 = vpack.c.bf16 %v1690_v53, %v1686_v60  ;;  %v1693_v60 = vld [vmem:[#allocation10 + $0xc0] sm:$0xff] }
 0x2ec   :  { %7077 = vmatprep.subr.bf16.mxu0 %v9534_v61  ;;  %7109 = vmatprep.subr.bf16.mxu1 %v9536_v0  ;;  %v1697_v53 = vld [vmem:[#allocation10 + $0xe0] sm:$0xff] }
 0x2ed   :  { %1569 = vmatprep.mubr.f32.mxu0 %v11122_v12  ;;  %1640 = vmatprep.mubr.f32.mxu1 %v11122_v12 }
 0x2ef   :  { %7079 = vmatpush1.bf16.msra.mxu0 %v9542_v24  ;;  %7111 = vmatpush1.bf16.msra.mxu1 %v9544_v27 }
 0x2f0   :  { %7081 = vmatprep.subr.bf16.mxu0 %v9548_v37  ;;  %7113 = vmatprep.subr.bf16.mxu1 %v9550_v41 }
 0x2f3   :  { %7083 = vmatpush1.bf16.msra.mxu0 %v9556_v23  ;;  %7115 = vmatpush1.bf16.msra.mxu1 %v9558_v26 }
 0x2f4   :  { %7085 = vmatprep.subr.bf16.mxu0 %v9562_v43  ;;  %7117 = vmatprep.subr.bf16.mxu1 %v9564_v47 }
 0x2f7   :  { %7087 = vmatpush1.bf16.msra.mxu0 %v9568_v31  ;;  %7119 = vmatpush1.bf16.msra.mxu1 %v9570_v36 }
 0x2f8   :  { %7089 = vmatprep.subr.bf16.mxu0 %v9574_v22  ;;  %7121 = vmatprep.subr.bf16.mxu1 %v9576_v16 }
 0x2fb   :  { %7091 = vmatpush1.bf16.msra.mxu0 %v9580_v58  ;;  %7123 = vmatpush1.bf16.msra.mxu1 %v9582_v25 }
 0x2fc   :  { %7093 = vmatprep.subr.bf16.mxu0 %v9586_v6  ;;  %7125 = vmatprep.subr.bf16.mxu1 %v9588_v32 }
 0x2ff   :  { %7095 = vmatpush1.bf16.msra.mxu0 %v9592_v17  ;;  %7127 = vmatpush1.bf16.msra.mxu1 %v9594_v20 }
 0x300   :  { %7097 = vmatprep.subr.bf16.mxu0 %v9598_v45  ;;  %7129 = vmatprep.subr.bf16.mxu1 %v9600_v49 }
 0x303   :  { %7099 = vmatpush1.bf16.msra.mxu0 %v9604_v56  ;;  %7131 = vmatpush1.bf16.msra.mxu1 %v9606_v2 }
 0x304   :  { %7101 = vmatprep.subr.bf16.mxu0 %v9610_v9  ;;  %7133 = vmatprep.subr.bf16.mxu1 %v9612_v18 }
 0x307   :  { %7103 = vmatpush1.bf16.msra.mxu0 %v9616_v52  ;;  %7135 = vmatpush1.bf16.msra.mxu1 %v9618_v39 }
 0x308   :  { %7137 = vmatprep.subr.bf16.mxu0 %v9628_v35  ;;  %7169 = vmatprep.subr.bf16.mxu1 %v9630_v54 }
 0x30a   :  { %1570 = vmatmul.mubr.f32.vlgmr.msra.gmra.mrb[4].mxu0 %v9532_v57  ;;  %1641 = vmatmul.mubr.f32.vlgmr.msra.gmra.mrb[4].mxu1 %v9532_v57  ;;  %v9635_v57 = vpack.c.bf16 %v1675_v11, %v1671_v7  ;;  %v9654_v7 = vpack.c.bf16 %v1692_v38, %v1688_v13  ;;  %v9656_v11 = vpack.c.bf16 %v1689_v62, %v1685_v44  ;;  %v1695_v44 = vld [vmem:[#allocation10 + $0xd0] sm:$0xff] }
 0x30b   :  { %1819 = vmatprep.mubr.f32.mxu0 %v11122_v12  ;;  %1890 = vmatprep.mubr.f32.mxu1 %v11122_v12  ;;  %v9666_v13 = vpack.c.bf16 %v1700_v29, %v1696_v15  ;;  %v9668_v38 = vpack.c.bf16 %v1697_v53, %v1693_v60  ;;  %v1699_v62 = vld [vmem:[#allocation10 + $0xf0] sm:$0xff]  ;;  %v1708_v15 = vld [vmem:[#allocation10 + $0x138] sm:$0xff]  ;;  %v1701_v29 = vld [vmem:[#allocation10 + $0x100] sm:$0xff] }
 0x30c   :  { %7139 = vmatpush1.bf16.msra.mxu0 %v9632_v4  ;;  %7171 = vmatpush1.bf16.msra.mxu1 %v9635_v57  ;;  %v9671_v14 = vpack.c.bf16 %v1699_v62, %v1695_v44  ;;  %v1705_v60 = vld [vmem:[#allocation10 + $0x120] sm:$0xff]  ;;  %v9678_v53 = vpack.c.bf16 %v1708_v15, %v1704_v10  ;;  %v1703_v44 = vld [vmem:[#allocation10 + $0x110] sm:$0xff]  ;;  %v1716_v10 = vld [vmem:[#allocation10 + $0x178] sm:$0xff] }
 0x30d   :  { %7141 = vmatprep.subr.bf16.mxu0 %v9640_v55  ;;  %7173 = vmatprep.subr.bf16.mxu1 %v9642_v28  ;;  %11145 = vst [vmem:[#allocation26_spill] sm:$0xff] %v9666_v13  ;;  %11146 = vst [vmem:[#allocation27_spill] sm:$0xff] %v9668_v38  ;;  %v1707_v62 = vld [vmem:[#allocation10 + $0x130] sm:$0xff]  ;;  %v1709_v15 = vld [vmem:[#allocation10 + $0x140] sm:$0xff] }
 0x30e   :  { %11147 = vst [vmem:[#allocation28_spill] sm:$0xff] %v9671_v14  ;;  %11149 = vst [vmem:[#allocation30_spill] sm:$0xff] %v9678_v53 }
 0x310   :  { %7143 = vmatpush1.bf16.msra.mxu0 %v9644_v40  ;;  %7175 = vmatpush1.bf16.msra.mxu1 %v9647_v50 }
 0x311   :  { %7145 = vmatprep.subr.bf16.mxu0 %v9652_v42  ;;  %7177 = vmatprep.subr.bf16.mxu1 %v9654_v7 }
 0x314   :  { %7147 = vmatpush1.bf16.msra.mxu0 %v9656_v11  ;;  %7179 = vmatpush1.bf16.msra.mxu1 %v9659_v33  ;;  %v9680_v33 = vpack.c.bf16 %v1705_v60, %v1701_v29  ;;  %v1713_v29 = vld [vmem:[#allocation10 + $0x160] sm:$0xff]  ;;  %v9690_v60 = vpack.c.bf16 %v1716_v10, %v1712_v63  ;;  %v1724_v63 = vld [vmem:[#allocation10 + $0x1b8] sm:$0xff] }
 0x315   :  { %7149 = vmatprep.subr.bf16.mxu0 %v9664_v3  ;;  %7181 = vmatprep.subr.bf16.mxu1 %v9666_v13  ;;  %v9683_v13 = vpack.c.bf16 %v1707_v62, %v1703_v44  ;;  %v9692_v3 = vpack.c.bf16 %v1713_v29, %v1709_v15  ;;  %v1711_v44 = vld [vmem:[#allocation10 + $0x150] sm:$0xff]  ;;  %v1717_v10 = vld [vmem:[#allocation10 + $0x180] sm:$0xff] }
 0x316   :  { %11150 = vst [vmem:[#allocation31_spill] sm:$0xff] %v9680_v33  ;;  %11153 = vst [vmem:[#allocation34_spill] sm:$0xff] %v9690_v60  ;;  %v1715_v62 = vld [vmem:[#allocation10 + $0x170] sm:$0xff]  ;;  %v1721_v15 = vld [vmem:[#allocation10 + $0x1a0] sm:$0xff] }
 0x317   :  { %11151 = vst [vmem:[#allocation32_spill] sm:$0xff] %v9683_v13  ;;  %11154 = vst [vmem:[#allocation35_spill] sm:$0xff] %v9692_v3 }
 0x318   :  { %7151 = vmatpush1.bf16.msra.mxu0 %v9668_v38  ;;  %7183 = vmatpush1.bf16.msra.mxu1 %v9671_v14  ;;  %v1710_v14 = vld [vmem:[#allocation10 + $0x148] sm:$0xff] }
 0x319   :  { %7153 = vmatprep.subr.bf16.mxu0 %v9676_v21  ;;  %7185 = vmatprep.subr.bf16.mxu1 %v9678_v53  ;;  %v9688_v38 = vpack.c.bf16 %v1714_v30, %v1710_v14  ;;  %v9695_v53 = vpack.c.bf16 %v1715_v62, %v1711_v44  ;;  %v1722_v14 = vld [vmem:[#allocation10 + $0x1a8] sm:$0xff]  ;;  %v1720_v30 = vld [vmem:[#allocation10 + $0x198] sm:$0xff]  ;;  %v9704_v21 = vpack.c.bf16 %v1721_v15, %v1717_v10  ;;  %v1719_v44 = vld [vmem:[#allocation10 + $0x190] sm:$0xff] }
 0x31a   :  { %v9702_v29 = vpack.c.bf16 %v1724_v63, %v1720_v30  ;;  %v1723_v62 = vld [vmem:[#allocation10 + $0x1b0] sm:$0xff]  ;;  %v1732_v30 = vld [vmem:[#allocation10 + $0x1f8] sm:$0xff]  ;;  %v1725_v63 = vld [vmem:[#allocation10 + $0x1c0] sm:$0xff] }
 0x31b   :  { %11152 = vst [vmem:[#allocation33_spill] sm:$0xff] %v9688_v38  ;;  %11155 = vst [vmem:[#allocation36_spill] sm:$0xff] %v9695_v53  ;;  %v1729_v10 = vld [vmem:[#allocation10 + $0x1e0] sm:$0xff] }
 0x31c   :  { %7155 = vmatpush1.bf16.msra.mxu0 %v9680_v33  ;;  %7187 = vmatpush1.bf16.msra.mxu1 %v9683_v13  ;;  %v1718_v13 = vld [vmem:[#allocation10 + $0x188] sm:$0xff]  ;;  %11157 = vst [vmem:[#allocation38_spill] sm:$0xff] %v9702_v29  ;;  %11158 = vst [vmem:[#allocation39_spill] sm:$0xff] %v9704_v21 }
 0x31d   :  { %7157 = vmatprep.subr.bf16.mxu0 %v9688_v38  ;;  %7189 = vmatprep.subr.bf16.mxu1 %v9690_v60  ;;  %v9700_v33 = vpack.c.bf16 %v1722_v14, %v1718_v13  ;;  %v9707_v60 = vpack.c.bf16 %v1723_v62, %v1719_v44  ;;  %v1730_v13 = vld [vmem:[#allocation10 + $0x1e8] sm:$0xff]  ;;  %v1728_v14 = vld [vmem:[#allocation10 + $0x1d8] sm:$0xff]  ;;  %v9716_v38 = vpack.c.bf16 %v1729_v10, %v1725_v63  ;;  %v1727_v44 = vld [vmem:[#allocation10 + $0x1d0] sm:$0xff] }
 0x31e   :  { %v9714_v15 = vpack.c.bf16 %v1732_v30, %v1728_v14  ;;  %v1731_v62 = vld [vmem:[#allocation10 + $0x1f0] sm:$0xff] }
 0x31f   :  { %11156 = vst [vmem:[#allocation37_spill] sm:$0xff] %v9700_v33  ;;  %11159 = vst [vmem:[#allocation40_spill] sm:$0xff] %v9707_v60 }
 0x320   :  { %7159 = vmatpush1.bf16.msra.mxu0 %v9692_v3  ;;  %7191 = vmatpush1.bf16.msra.mxu1 %v9695_v53  ;;  %v1726_v53 = vld [vmem:[#allocation10 + $0x1c8] sm:$0xff]  ;;  %11161 = vst [vmem:[#allocation46_spill] sm:$0xff] %v9714_v15  ;;  %11162 = vst [vmem:[#allocation48_spill] sm:$0xff] %v9716_v38 }
 0x321   :  { %7161 = vmatprep.subr.bf16.mxu0 %v9700_v33  ;;  %7193 = vmatprep.subr.bf16.mxu1 %v9702_v29  ;;  %v9712_v3 = vpack.c.bf16 %v1730_v13, %v1726_v53  ;;  %v9719_v29 = vpack.c.bf16 %v1731_v62, %v1727_v44 }
 0x323   :  { %11160 = vst [vmem:[#allocation41_spill] sm:$0xff] %v9712_v3  ;;  %11163 = vst [vmem:[#allocation49_spill] sm:$0xff] %v9719_v29 }
 0x324   :  { %7163 = vmatpush1.bf16.msra.mxu0 %v9704_v21  ;;  %7195 = vmatpush1.bf16.msra.mxu1 %v9707_v60 }
 0x325   :  { %7165 = vmatprep.subr.bf16.mxu0 %v9712_v3  ;;  %7197 = vmatprep.subr.bf16.mxu1 %v9714_v15 }
 0x328   :  { %7167 = vmatpush1.bf16.msra.mxu0 %v9716_v38  ;;  %7199 = vmatpush1.bf16.msra.mxu1 %v9719_v29 }
 0x329   :  { %7201 = vmatprep.subr.bf16.mxu0 %v9514_v59  ;;  %7233 = vmatprep.subr.bf16.mxu1 %v9516_v5 }
 0x3dd   :  { %v1571_v53 = vpop.f32.mrb[4].mxu0  ;;  %v1642_v13 = vpop.f32.mrb[4].mxu1 }
 0x3de   :  { %v8436_v14 = vadd.f32 %v1571_v53, %v11141_v19  ;;  %v1573_v30 = vpop.f32.mrb[5].mxu0  ;;  %v1644_v63 = vpop.f32.mrb[5].mxu1  ;;  %v8452_v15 = vadd.f32 %v1642_v13, %v9435_v1 }
 0x3df   :  { %v8437_v10 = vadd.f32 %v1573_v30, %v11142_v34  ;;  %v8453_v29 = vadd.f32 %v1644_v63, %v9442_v8 }
 0x3e0   :  { %v1651_v44 = vmul.f32 0.5, %v8436_v14 }
 0x3e1   :  { %v1655_v62 = vmul.f32 0.5, %v8437_v10  ;;  %v1660_v59 = vmul.f32 0.5, %v8453_v29 }
 0x3e2   :  { %8598 = vtanh.f32 %v1651_v44 }
 0x3e3   :  { %8600 = vtanh.f32 %v1655_v62 }
 0x3e4   :  { %8602 = vtanh.f32 %v8452_v15 }
 0x3e5   :  { %8604 = vtanh.f32 %v1660_v59 }
 0x3ec   :  { %v8599_v38 = vpop.eup %8598 }
 0x3ed   :  { %v8601_v5 = vpop.eup %8600  ;;  %v1653_v3 = vmul.f32 0.5, %v8599_v38 }
 0x3ee   :  { %v1657_v60 = vmul.f32 0.5, %v8601_v5  ;;  %v8603_v19 = vpop.eup %8602  ;;  %v2369_v5 = vld [vmem:[#allocation8] sm:$0xff] }
 0x3ef   :  { %v1654_v53 = vadd.f32 0.5, %v1653_v3  ;;  %v8605_v13 = vpop.eup %8604 }
 0x3f0   :  { %v1658_v21 = vadd.f32 0.5, %v1657_v60  ;;  %v1662_v15 = vmul.f32 0.5, %v8605_v13  ;;  %v2375_v13 = vld [vmem:[#allocation8 + $0x30] sm:$0xff] }
 0x3f1   :  { %v1665_v33 = vmul.f32 %v8603_v19, %v1654_v53  ;;  %v11165_v19 = vld [vmem:[#allocation25_spill] sm:$0xff]  ;;  %v2373_v53 = vld [vmem:[#allocation8 + $0x20] sm:$0xff] }
 0x3f2   :  { %v1664_v14 = vmul.f32 %v1658_v21, %v9525_v46  ;;  %v1663_v10 = vadd.f32 0.5, %v1662_v15  ;;  %v11164_v21 = vld [vmem:[#allocation24_spill] sm:$0xff]  ;;  %v11166_v46 = vld [vmem:[#allocation26_spill] sm:$0xff] }
 0x3f3   :  { %v2378_v15 = vld [vmem:[#allocation8 + $0x48] sm:$0xff] }
 0x3f4   :  { %v9731_v30 = vadd.f32 %v1665_v33, %v1664_v14  ;;  %v2371_v14 = vld [vmem:[#allocation8 + $0x10] sm:$0xff] }
 0x3f6   :  { %8606 = vtanh.f32 %v9731_v30 }
 0x400   :  { %v8607_v63 = vpop.eup %8606 }
 0x401   :  { %v1668_v29 = vmul.f32 %v8607_v63, %v1663_v10  ;;  %v2382_v10 = vld [vmem:[#allocation8 + $0x68] sm:$0xff]  ;;  %v2380_v63 = vld [vmem:[#allocation8 + $0x58] sm:$0xff] }
 0x403   :  { %1820 = vmatmul.mubr.f32.vlgmr.msra.gmra.mrb[20].mxu0 %v1668_v29  ;;  %1891 = vmatmul.mubr.f32.vlgmr.msra.gmra.mrb[20].mxu1 %v1668_v29 }
 0x404   :  { %7203 = vmatpush1.bf16.msra.mxu0 %v9528_v48  ;;  %7235 = vmatpush1.bf16.msra.mxu1 %v9530_v51  ;;  %v11167_v48 = vld [vmem:[#allocation27_spill] sm:$0xff]  ;;  %v11168_v51 = vld [vmem:[#allocation28_spill] sm:$0xff] }
 0x405   :  { %7205 = vmatprep.subr.bf16.mxu0 %v9534_v61  ;;  %7237 = vmatprep.subr.bf16.mxu1 %v9536_v0  ;;  %v11169_v61 = vld [vmem:[#allocation29_spill] sm:$0xff]  ;;  %v11170_v0 = vld [vmem:[#allocation30_spill] sm:$0xff] }
 0x406   :  { %2033 = vmatprep.mubr.f32.mxu0 %v11122_v12  ;;  %2104 = vmatprep.mubr.f32.mxu1 %v11122_v12 }
 0x408   :  { %7207 = vmatpush1.bf16.msra.mxu0 %v9542_v24  ;;  %7239 = vmatpush1.bf16.msra.mxu1 %v9544_v27  ;;  %v11171_v24 = vld [vmem:[#allocation31_spill] sm:$0xff]  ;;  %v11172_v27 = vld [vmem:[#allocation32_spill] sm:$0xff] }
 0x409   :  { %7209 = vmatprep.subr.bf16.mxu0 %v9548_v37  ;;  %7241 = vmatprep.subr.bf16.mxu1 %v9550_v41  ;;  %v11173_v37 = vld [vmem:[#allocation33_spill] sm:$0xff]  ;;  %v11174_v41 = vld [vmem:[#allocation34_spill] sm:$0xff] }
 0x40c   :  { %7211 = vmatpush1.bf16.msra.mxu0 %v9556_v23  ;;  %7243 = vmatpush1.bf16.msra.mxu1 %v9558_v26  ;;  %v11175_v23 = vld [vmem:[#allocation35_spill] sm:$0xff]  ;;  %v11176_v26 = vld [vmem:[#allocation36_spill] sm:$0xff] }
 0x40d   :  { %7213 = vmatprep.subr.bf16.mxu0 %v9562_v43  ;;  %7245 = vmatprep.subr.bf16.mxu1 %v9564_v47  ;;  %v11177_v43 = vld [vmem:[#allocation37_spill] sm:$0xff]  ;;  %v11178_v47 = vld [vmem:[#allocation38_spill] sm:$0xff] }
 0x410   :  { %7215 = vmatpush1.bf16.msra.mxu0 %v9568_v31  ;;  %7247 = vmatpush1.bf16.msra.mxu1 %v9570_v36  ;;  %v11179_v31 = vld [vmem:[#allocation39_spill] sm:$0xff]  ;;  %v11180_v36 = vld [vmem:[#allocation40_spill] sm:$0xff] }
 0x411   :  { %7217 = vmatprep.subr.bf16.mxu0 %v9574_v22  ;;  %7249 = vmatprep.subr.bf16.mxu1 %v9576_v16  ;;  %v11181_v22 = vld [vmem:[#allocation41_spill] sm:$0xff]  ;;  %v11182_v16 = vld [vmem:[#allocation46_spill] sm:$0xff] }
 0x414   :  { %7219 = vmatpush1.bf16.msra.mxu0 %v9580_v58  ;;  %7251 = vmatpush1.bf16.msra.mxu1 %v9582_v25  ;;  %v11183_v58 = vld [vmem:[#allocation48_spill] sm:$0xff]  ;;  %v11184_v25 = vld [vmem:[#allocation49_spill] sm:$0xff] }
 0x415   :  { %7221 = vmatprep.subr.bf16.mxu0 %v9586_v6  ;;  %7253 = vmatprep.subr.bf16.mxu1 %v9588_v32  ;;  %v2370_v6 = vld [vmem:[#allocation8 + $0x8] sm:$0xff] }
 0x416   :  { %v2374_v32 = vld [vmem:[#allocation8 + $0x28] sm:$0xff] }
 0x418   :  { %7223 = vmatpush1.bf16.msra.mxu0 %v9592_v17  ;;  %7255 = vmatpush1.bf16.msra.mxu1 %v9594_v20  ;;  %v2372_v17 = vld [vmem:[#allocation8 + $0x18] sm:$0xff]  ;;  %v9800_v20 = vpack.c.bf16 %v2374_v32, %v2370_v6  ;;  %v2391_v6 = vld [vmem:[#allocation8 + $0xb0] sm:$0xff]  ;;  %v2394_v32 = vld [vmem:[#allocation8 + $0xc8] sm:$0xff] }
 0x419   :  { %7225 = vmatprep.subr.bf16.mxu0 %v9598_v45  ;;  %7257 = vmatprep.subr.bf16.mxu1 %v9600_v49  ;;  %v2376_v45 = vld [vmem:[#allocation8 + $0x38] sm:$0xff] }
 0x41a   :  { %v9802_v49 = vpack.c.bf16 %v2376_v45, %v2372_v17  ;;  %v2398_v17 = vld [vmem:[#allocation8 + $0xe8] sm:$0xff]  ;;  %v2396_v45 = vld [vmem:[#allocation8 + $0xd8] sm:$0xff] }
 0x41c   :  { %7227 = vmatpush1.bf16.msra.mxu0 %v9604_v56  ;;  %7259 = vmatpush1.bf16.msra.mxu1 %v9606_v2 }
 0x41d   :  { %7229 = vmatprep.subr.bf16.mxu0 %v9610_v9  ;;  %7261 = vmatprep.subr.bf16.mxu1 %v9612_v18  ;;  %v11185_v9 = vld [vmem:[#allocation44_spill] sm:$0xff] }
 0x420   :  { %7231 = vmatpush1.bf16.msra.mxu0 %v9616_v52  ;;  %7263 = vmatpush1.bf16.msra.mxu1 %v9618_v39 }
 0x421   :  { %7265 = vmatprep.subr.bf16.mxu0 %v9628_v35  ;;  %7297 = vmatprep.subr.bf16.mxu1 %v9630_v54 }
 0x423   :  { %2034 = vmatmul.mubr.f32.vlgmr.msra.gmra.mrb[6].mxu0 %v1668_v29  ;;  %2105 = vmatmul.mubr.f32.vlgmr.msra.gmra.mrb[6].mxu1 %v1668_v29  ;;  %v2384_v29 = vld [vmem:[#allocation8 + $0x78] sm:$0xff] }
 0x424   :  { %7267 = vmatpush1.bf16.msra.mxu0 %v9632_v4  ;;  %7299 = vmatpush1.bf16.msra.mxu1 %v9635_v57 }
 0x425   :  { %7269 = vmatprep.subr.bf16.mxu0 %v9640_v55  ;;  %7301 = vmatprep.subr.bf16.mxu1 %v9642_v28 }
 0x426   :  { %2283 = vmatprep.mubr.f32.mxu0 %v11122_v12  ;;  %2354 = vmatprep.mubr.f32.mxu1 %v11122_v12 }
 0x428   :  { %7271 = vmatpush1.bf16.msra.mxu0 %v9644_v40  ;;  %7303 = vmatpush1.bf16.msra.mxu1 %v9647_v50 }
 0x429   :  { %7273 = vmatprep.subr.bf16.mxu0 %v9652_v42  ;;  %7305 = vmatprep.subr.bf16.mxu1 %v9654_v7 }
 0x42c   :  { %7275 = vmatpush1.bf16.msra.mxu0 %v9656_v11  ;;  %7307 = vmatpush1.bf16.msra.mxu1 %v11164_v21 }
 0x42d   :  { %7277 = vmatprep.subr.bf16.mxu0 %v11165_v19  ;;  %7309 = vmatprep.subr.bf16.mxu1 %v11166_v46  ;;  %v9814_v46 = vpack.c.bf16 %v2373_v53, %v2369_v5  ;;  %v2414_v5 = vld [vmem:[#allocation8 + $0x168] sm:$0xff]  ;;  %v2412_v53 = vld [vmem:[#allocation8 + $0x158] sm:$0xff] }
 0x430   :  { %7279 = vmatpush1.bf16.msra.mxu0 %v11167_v48  ;;  %7311 = vmatpush1.bf16.msra.mxu1 %v11168_v51  ;;  %v9816_v48 = vpack.c.bf16 %v2375_v13, %v2371_v14  ;;  %v2381_v51 = vld [vmem:[#allocation8 + $0x60] sm:$0xff]  ;;  %v2416_v14 = vld [vmem:[#allocation8 + $0x178] sm:$0xff] }
 0x431   :  { %7281 = vmatprep.subr.bf16.mxu0 %v11169_v61  ;;  %7313 = vmatprep.subr.bf16.mxu1 %v11170_v0  ;;  %v9820_v0 = vpack.c.bf16 %v2382_v10, %v2378_v15  ;;  %v2409_v10 = vld [vmem:[#allocation8 + $0x140] sm:$0xff] }
 0x434   :  { %7283 = vmatpush1.bf16.msra.mxu0 %v11171_v24  ;;  %7315 = vmatpush1.bf16.msra.mxu1 %v11172_v27  ;;  %v9822_v24 = vpack.c.bf16 %v2384_v29, %v2380_v63  ;;  %v2379_v27 = vld [vmem:[#allocation8 + $0x50] sm:$0xff]  ;;  %v2413_v63 = vld [vmem:[#allocation8 + $0x160] sm:$0xff] }
 0x435   :  { %7285 = vmatprep.subr.bf16.mxu0 %v11173_v37  ;;  %7317 = vmatprep.subr.bf16.mxu1 %v11174_v41  ;;  %v2383_v37 = vld [vmem:[#allocation8 + $0x70] sm:$0xff]  ;;  %v2386_v41 = vld [vmem:[#allocation8 + $0x88] sm:$0xff] }
 0x438   :  { %7287 = vmatpush1.bf16.msra.mxu0 %v11175_v23  ;;  %7319 = vmatpush1.bf16.msra.mxu1 %v11176_v26  ;;  %v2390_v23 = vld [vmem:[#allocation8 + $0xa8] sm:$0xff]  ;;  %v2388_v26 = vld [vmem:[#allocation8 + $0x98] sm:$0xff] }
 0x439   :  { %7289 = vmatprep.subr.bf16.mxu0 %v11177_v43  ;;  %7321 = vmatprep.subr.bf16.mxu1 %v11178_v47  ;;  %v2392_v43 = vld [vmem:[#allocation8 + $0xb8] sm:$0xff] }
 0x43c   :  { %7291 = vmatpush1.bf16.msra.mxu0 %v11179_v31  ;;  %7323 = vmatpush1.bf16.msra.mxu1 %v11180_v36  ;;  %v9830_v31 = vpack.c.bf16 %v2383_v37, %v2379_v27  ;;  %v2385_v36 = vld [vmem:[#allocation8 + $0x80] sm:$0xff]  ;;  %v2422_v27 = vld [vmem:[#allocation8 + $0x1a8] sm:$0xff]  ;;  %v2420_v37 = vld [vmem:[#allocation8 + $0x198] sm:$0xff] }
 0x43d   :  { %7293 = vmatprep.subr.bf16.mxu0 %v11181_v22  ;;  %7325 = vmatprep.subr.bf16.mxu1 %v11182_v16  ;;  %v2389_v22 = vld [vmem:[#allocation8 + $0xa0] sm:$0xff]  ;;  %v9834_v16 = vpack.c.bf16 %v2390_v23, %v2386_v41  ;;  %v2424_v41 = vld [vmem:[#allocation8 + $0x1b8] sm:$0xff]  ;;  %v9878_v23 = vpack.c.bf16 %v2413_v63, %v2409_v10 }
 0x43e   :  { %v2597_v10 = vld [vmem:[#allocation10] sm:$0xff] }
 0x43f   :  { %v2601_v63 = vld [vmem:[#allocation10 + $0x20] sm:$0xff] }
 0x440   :  { %7295 = vmatpush1.bf16.msra.mxu0 %v11183_v58  ;;  %7327 = vmatpush1.bf16.msra.mxu1 %v11184_v25  ;;  %v9836_v58 = vpack.c.bf16 %v2392_v43, %v2388_v26  ;;  %v2387_v25 = vld [vmem:[#allocation8 + $0x90] sm:$0xff]  ;;  %v2417_v43 = vld [vmem:[#allocation8 + $0x180] sm:$0xff] }
 0x441   :  { %7329 = vmatprep.subr.bf16.mxu0 %v9800_v20  ;;  %7361 = vmatprep.subr.bf16.mxu1 %v9802_v49 }
 0x4f6   :  { %v2035_v56 = vpop.f32.mrb[6].mxu0  ;;  %v2106_v2 = vpop.f32.mrb[6].mxu1 }
 0x4f7   :  { %v8438_v18 = vadd.f32 %v2035_v56, %v11185_v9  ;;  %v2037_v52 = vpop.f32.mrb[7].mxu0  ;;  %v2108_v39 = vpop.f32.mrb[7].mxu1  ;;  %v8454_v57 = vadd.f32 %v2106_v2, %v9435_v1  ;;  %v2400_v56 = vld [vmem:[#allocation8 + $0xf8] sm:$0xff]  ;;  %v9842_v2 = vpack.c.bf16 %v2389_v22, %v2385_v36  ;;  %v2421_v36 = vld [vmem:[#allocation8 + $0x1a0] sm:$0xff] }
 0x4f8   :  { %v8439_v35 = vadd.f32 %v2037_v52, %v11142_v34  ;;  %v8455_v55 = vadd.f32 %v2108_v39, %v9442_v8  ;;  %v2393_v52 = vld [vmem:[#allocation8 + $0xc0] sm:$0xff] }
 0x4f9   :  { %v2115_v54 = vmul.f32 0.5, %v8438_v18  ;;  %v9844_v18 = vpack.c.bf16 %v2391_v6, %v2387_v25  ;;  %v2397_v39 = vld [vmem:[#allocation8 + $0xe0] sm:$0xff]  ;;  %v9886_v25 = vpack.c.bf16 %v2424_v41, %v2420_v37  ;;  %v2419_v6 = vld [vmem:[#allocation8 + $0x190] sm:$0xff]  ;;  %v2606_v37 = vld [vmem:[#allocation10 + $0x48] sm:$0xff] }
 0x4fa   :  { %v2119_v4 = vmul.f32 0.5, %v8439_v35  ;;  %v2124_v28 = vmul.f32 0.5, %v8455_v55  ;;  %v9848_v35 = vpack.c.bf16 %v2398_v17, %v2394_v32  ;;  %v2402_v55 = vld [vmem:[#allocation8 + $0x108] sm:$0xff]  ;;  %v2423_v32 = vld [vmem:[#allocation8 + $0x1b0] sm:$0xff] }
 0x4fb   :  { %8608 = vtanh.f32 %v2115_v54  ;;  %v9850_v54 = vpack.c.bf16 %v2400_v56, %v2396_v45  ;;  %v2426_v17 = vld [vmem:[#allocation8 + $0x1c8] sm:$0xff]  ;;  %v2428_v56 = vld [vmem:[#allocation8 + $0x1d8] sm:$0xff] }
 0x4fc   :  { %8610 = vtanh.f32 %v2119_v4  ;;  %v2395_v4 = vld [vmem:[#allocation8 + $0xd0] sm:$0xff]  ;;  %v2430_v45 = vld [vmem:[#allocation8 + $0x1e8] sm:$0xff] }
 0x4fd   :  { %8612 = vtanh.f32 %v8454_v57  ;;  %v2399_v57 = vld [vmem:[#allocation8 + $0xf0] sm:$0xff]  ;;  %v2610_v41 = vld [vmem:[#allocation10 + $0x68] sm:$0xff] }
 0x4fe   :  { %8614 = vtanh.f32 %v2124_v28  ;;  %v2406_v28 = vld [vmem:[#allocation8 + $0x128] sm:$0xff] }
 0x505   :  { %v8609_v40 = vpop.eup %8608 }
 0x506   :  { %v8611_v50 = vpop.eup %8610  ;;  %v2117_v42 = vmul.f32 0.5, %v8609_v40  ;;  %v2404_v40 = vld [vmem:[#allocation8 + $0x118] sm:$0xff] }
 0x507   :  { %v2121_v7 = vmul.f32 0.5, %v8611_v50  ;;  %v8613_v33 = vpop.eup %8612  ;;  %v2408_v50 = vld [vmem:[#allocation8 + $0x138] sm:$0xff] }
 0x508   :  { %v2118_v11 = vadd.f32 0.5, %v2117_v42  ;;  %v8615_v62 = vpop.eup %8614  ;;  %v9854_v42 = vpack.c.bf16 %v2397_v39, %v2393_v52  ;;  %v2432_v52 = vld [vmem:[#allocation8 + $0x1f8] sm:$0xff]  ;;  %v9890_v39 = vpack.c.bf16 %v2421_v36, %v2417_v43  ;;  %v9926_v36 = vpack.c.bf16 %v2610_v41, %v2606_v37  ;;  %v2619_v37 = vld [vmem:[#allocation10 + $0xb0] sm:$0xff] }
 0x509   :  { %v2122_v3 = vadd.f32 0.5, %v2121_v7  ;;  %v2126_v59 = vmul.f32 0.5, %v8615_v62  ;;  %v9856_v7 = vpack.c.bf16 %v2399_v57, %v2395_v4  ;;  %v2407_v62 = vld [vmem:[#allocation8 + $0x130] sm:$0xff]  ;;  %v9892_v4 = vpack.c.bf16 %v2423_v32, %v2419_v6  ;;  %v2425_v57 = vld [vmem:[#allocation8 + $0x1c0] sm:$0xff]  ;;  %v2608_v43 = vld [vmem:[#allocation10 + $0x58] sm:$0xff] }
 0x50a   :  { %v2129_v38 = vmul.f32 %v8613_v33, %v2118_v11  ;;  %v2401_v11 = vld [vmem:[#allocation8 + $0x100] sm:$0xff]  ;;  %v2612_v6 = vld [vmem:[#allocation10 + $0x78] sm:$0xff] }
 0x50b   :  { %v2128_v60 = vmul.f32 %v2122_v3, %v9731_v30  ;;  %v2127_v21 = vadd.f32 0.5, %v2126_v59  ;;  %v2377_v30 = vld [vmem:[#allocation8 + $0x40] sm:$0xff]  ;;  %v9860_v3 = vpack.c.bf16 %v2406_v28, %v2402_v55  ;;  %v2410_v59 = vld [vmem:[#allocation8 + $0x148] sm:$0xff]  ;;  %v9896_v55 = vpack.c.bf16 %v2430_v45, %v2426_v17 }
 0x50c   :  { %v9828_v47 = vpack.c.bf16 %v2381_v51, %v2377_v30  ;;  %v2405_v33 = vld [vmem:[#allocation8 + $0x120] sm:$0xff]  ;;  %v9872_v29 = vpack.c.bf16 %v2414_v5, %v2410_v59  ;;  %v2415_v30 = vld [vmem:[#allocation8 + $0x170] sm:$0xff]  ;;  %v2418_v51 = vld [vmem:[#allocation8 + $0x188] sm:$0xff]  ;;  %v9898_v28 = vpack.c.bf16 %v2432_v52, %v2428_v56  ;;  %v9928_v45 = vpack.c.bf16 %v2612_v6, %v2608_v43 }
 0x50d   :  { %v9811_v44 = vadd.f32 %v2129_v38, %v2128_v60  ;;  %v9862_v38 = vpack.c.bf16 %v2408_v50, %v2404_v40  ;;  %v2403_v60 = vld [vmem:[#allocation8 + $0x110] sm:$0xff]  ;;  %v9866_v13 = vpack.c.bf16 %v2405_v33, %v2401_v11  ;;  %v9884_v22 = vpack.c.bf16 %v2422_v27, %v2418_v51  ;;  %v2429_v40 = vld [vmem:[#allocation8 + $0x1e0] sm:$0xff]  ;;  %v2602_v59 = vld [vmem:[#allocation10 + $0x28] sm:$0xff] }
 0x50e   :  { %v9868_v15 = vpack.c.bf16 %v2407_v62, %v2403_v60  ;;  %v2427_v50 = vld [vmem:[#allocation8 + $0x1d0] sm:$0xff]  ;;  %v9902_v33 = vpack.c.bf16 %v2429_v40, %v2425_v57  ;;  %v2598_v62 = vld [vmem:[#allocation10 + $0x8] sm:$0xff]  ;;  %v2600_v5 = vld [vmem:[#allocation10 + $0x18] sm:$0xff] }
 0x50f   :  { %8616 = vtanh.f32 %v9811_v44  ;;  %v2431_v11 = vld [vmem:[#allocation8 + $0x1f0] sm:$0xff]  ;;  %v2605_v32 = vld [vmem:[#allocation10 + $0x40] sm:$0xff]  ;;  %v2622_v43 = vld [vmem:[#allocation10 + $0xc8] sm:$0xff] }
 0x510   :  { %v9904_v60 = vpack.c.bf16 %v2431_v11, %v2427_v50  ;;  %v2599_v51 = vld [vmem:[#allocation10 + $0x10] sm:$0xff]  ;;  %v2609_v17 = vld [vmem:[#allocation10 + $0x60] sm:$0xff]  ;;  %v2614_v50 = vld [vmem:[#allocation10 + $0x88] sm:$0xff] }
 0x511   :  { %v2603_v27 = vld [vmem:[#allocation10 + $0x30] sm:$0xff]  ;;  %v9930_v56 = vpack.c.bf16 %v2609_v17, %v2605_v32  ;;  %v2618_v11 = vld [vmem:[#allocation10 + $0xa8] sm:$0xff]  ;;  %v2624_v32 = vld [vmem:[#allocation10 + $0xd8] sm:$0xff] }
 0x512   :  { %v2607_v52 = vld [vmem:[#allocation10 + $0x50] sm:$0xff]  ;;  %v2626_v6 = vld [vmem:[#allocation10 + $0xe8] sm:$0xff] }
 0x513   :  { %v2611_v57 = vld [vmem:[#allocation10 + $0x70] sm:$0xff]  ;;  %v9950_v17 = vpack.c.bf16 %v2626_v6, %v2622_v43  ;;  %v2632_v43 = vld [vmem:[#allocation10 + $0x118] sm:$0xff] }
 0x514   :  { %v9933_v40 = vpack.c.bf16 %v2611_v57, %v2607_v52  ;;  %v2628_v52 = vld [vmem:[#allocation10 + $0xf8] sm:$0xff]  ;;  %v2621_v57 = vld [vmem:[#allocation10 + $0xc0] sm:$0xff] }
 0x515   :  { %11187 = vst [vmem:[#allocation25_spill] sm:$0xff] %v9950_v17 }
 0x519   :  { %v8617_v19 = vpop.eup %8616 }
 0x51a   :  { %v9818_v61 = vmul.f32 %v8617_v19, %v2127_v21  ;;  %v9874_v21 = vpack.c.bf16 %v2416_v14, %v2412_v53  ;;  %v2411_v19 = vld [vmem:[#allocation8 + $0x150] sm:$0xff]  ;;  %v9914_v53 = vpack.c.bf16 %v2602_v59, %v2598_v62  ;;  %v2604_v14 = vld [vmem:[#allocation10 + $0x38] sm:$0xff]  ;;  %v9938_v59 = vpack.c.bf16 %v2618_v11, %v2614_v50  ;;  %v2625_v50 = vld [vmem:[#allocation10 + $0xe0] sm:$0xff] }
 0x51b   :  { %v9880_v26 = vpack.c.bf16 %v2415_v30, %v2411_v19  ;;  %v9916_v19 = vpack.c.bf16 %v2604_v14, %v2600_v5  ;;  %v9918_v30 = vpack.c.bf16 %v2601_v63, %v2597_v10  ;;  %v2616_v62 = vld [vmem:[#allocation10 + $0x98] sm:$0xff]  ;;  %v2613_v14 = vld [vmem:[#allocation10 + $0x80] sm:$0xff]  ;;  %v9952_v11 = vpack.c.bf16 %v2628_v52, %v2624_v32 }
 0x51c   :  { %2284 = vmatmul.mubr.f32.vlgmr.msra.gmra.mrb[22].mxu0 %v9818_v61  ;;  %2355 = vmatmul.mubr.f32.vlgmr.msra.gmra.mrb[22].mxu1 %v9818_v61  ;;  %v2620_v5 = vld [vmem:[#allocation10 + $0xb8] sm:$0xff]  ;;  %v2617_v10 = vld [vmem:[#allocation10 + $0xa0] sm:$0xff] }
 0x51d   :  { %7331 = vmatpush1.bf16.msra.mxu0 %v9814_v46  ;;  %7363 = vmatpush1.bf16.msra.mxu1 %v9816_v48  ;;  %v9940_v63 = vpack.c.bf16 %v2620_v5, %v2616_v62  ;;  %11188 = vst [vmem:[#allocation26_spill] sm:$0xff] %v9952_v11  ;;  %v9954_v62 = vpack.c.bf16 %v2625_v50, %v2621_v57  ;;  %v2623_v5 = vld [vmem:[#allocation10 + $0xd0] sm:$0xff]  ;;  %v2636_v32 = vld [vmem:[#allocation10 + $0x138] sm:$0xff]  ;;  %v2629_v52 = vld [vmem:[#allocation10 + $0x100] sm:$0xff] }
 0x51e   :  { %7333 = vmatprep.subr.bf16.mxu0 %v9820_v0  ;;  %7365 = vmatprep.subr.bf16.mxu1 %v9822_v24  ;;  %v2633_v57 = vld [vmem:[#allocation10 + $0x120] sm:$0xff]  ;;  %v9964_v50 = vpack.c.bf16 %v2636_v32, %v2632_v43  ;;  %v2644_v43 = vld [vmem:[#allocation10 + $0x178] sm:$0xff] }
 0x51f   :  { %2497 = vmatprep.mubr.f32.mxu0 %v11122_v12  ;;  %2568 = vmatprep.mubr.f32.mxu1 %v11122_v12  ;;  %11189 = vst [vmem:[#allocation27_spill] sm:$0xff] %v9954_v62  ;;  %v2637_v32 = vld [vmem:[#allocation10 + $0x140] sm:$0xff] }
 0x520   :  { %11192 = vst [vmem:[#allocation30_spill] sm:$0xff] %v9964_v50 }
 0x521   :  { %7335 = vmatpush1.bf16.msra.mxu0 %v9828_v47  ;;  %7367 = vmatpush1.bf16.msra.mxu1 %v9830_v31 }
 0x522   :  { %7337 = vmatprep.subr.bf16.mxu0 %v9834_v16  ;;  %7369 = vmatprep.subr.bf16.mxu1 %v9836_v58 }
 0x525   :  { %7339 = vmatpush1.bf16.msra.mxu0 %v9842_v2  ;;  %7371 = vmatpush1.bf16.msra.mxu1 %v9844_v18 }
 0x526   :  { %7341 = vmatprep.subr.bf16.mxu0 %v9848_v35  ;;  %7373 = vmatprep.subr.bf16.mxu1 %v9850_v54 }
 0x529   :  { %7343 = vmatpush1.bf16.msra.mxu0 %v9854_v42  ;;  %7375 = vmatpush1.bf16.msra.mxu1 %v9856_v7 }
 0x52a   :  { %7345 = vmatprep.subr.bf16.mxu0 %v9860_v3  ;;  %7377 = vmatprep.subr.bf16.mxu1 %v9862_v38 }
 0x52d   :  { %7347 = vmatpush1.bf16.msra.mxu0 %v9866_v13  ;;  %7379 = vmatpush1.bf16.msra.mxu1 %v9868_v15 }
 0x52e   :  { %7349 = vmatprep.subr.bf16.mxu0 %v9872_v29  ;;  %7381 = vmatprep.subr.bf16.mxu1 %v9874_v21 }
 0x531   :  { %7351 = vmatpush1.bf16.msra.mxu0 %v9878_v23  ;;  %7383 = vmatpush1.bf16.msra.mxu1 %v9880_v26 }
 0x532   :  { %7353 = vmatprep.subr.bf16.mxu0 %v9884_v22  ;;  %7385 = vmatprep.subr.bf16.mxu1 %v9886_v25 }
 0x535   :  { %7355 = vmatpush1.bf16.msra.mxu0 %v9890_v39  ;;  %7387 = vmatpush1.bf16.msra.mxu1 %v9892_v4 }
 0x536   :  { %7357 = vmatprep.subr.bf16.mxu0 %v9896_v55  ;;  %7389 = vmatprep.subr.bf16.mxu1 %v9898_v28 }
 0x539   :  { %7359 = vmatpush1.bf16.msra.mxu0 %v9902_v33  ;;  %7391 = vmatpush1.bf16.msra.mxu1 %v9904_v60 }
 0x53a   :  { %7393 = vmatprep.subr.bf16.mxu0 %v9914_v53  ;;  %7425 = vmatprep.subr.bf16.mxu1 %v9916_v19 }
 0x53c   :  { %2498 = vmatmul.mubr.f32.vlgmr.msra.gmra.mrb[8].mxu0 %v9818_v61  ;;  %2569 = vmatmul.mubr.f32.vlgmr.msra.gmra.mrb[8].mxu1 %v9818_v61  ;;  %v9921_v61 = vpack.c.bf16 %v2603_v27, %v2599_v51  ;;  %v9942_v51 = vpack.c.bf16 %v2617_v10, %v2613_v14  ;;  %v2615_v27 = vld [vmem:[#allocation10 + $0x90] sm:$0xff] }
 0x53d   :  { %2747 = vmatprep.mubr.f32.mxu0 %v11122_v12  ;;  %2818 = vmatprep.mubr.f32.mxu1 %v11122_v12  ;;  %v9945_v41 = vpack.c.bf16 %v2619_v37, %v2615_v27  ;;  %v2627_v14 = vld [vmem:[#allocation10 + $0xf0] sm:$0xff]  ;;  %v2630_v27 = vld [vmem:[#allocation10 + $0x108] sm:$0xff] }
 0x53e   :  { %7395 = vmatpush1.bf16.msra.mxu0 %v9918_v30  ;;  %7427 = vmatpush1.bf16.msra.mxu1 %v9921_v61  ;;  %v9957_v10 = vpack.c.bf16 %v2627_v14, %v2623_v5  ;;  %v2634_v37 = vld [vmem:[#allocation10 + $0x128] sm:$0xff]  ;;  %v2631_v5 = vld [vmem:[#allocation10 + $0x110] sm:$0xff] }
 0x53f   :  { %7397 = vmatprep.subr.bf16.mxu0 %v9926_v36  ;;  %7429 = vmatprep.subr.bf16.mxu1 %v9928_v45  ;;  %11186 = vst [vmem:[#allocation24_spill] sm:$0xff] %v9945_v41  ;;  %v9962_v6 = vpack.c.bf16 %v2634_v37, %v2630_v27  ;;  %v2635_v14 = vld [vmem:[#allocation10 + $0x130] sm:$0xff]  ;;  %v2642_v27 = vld [vmem:[#allocation10 + $0x168] sm:$0xff]  ;;  %v2640_v37 = vld [vmem:[#allocation10 + $0x158] sm:$0xff] }
 0x540   :  { %11190 = vst [vmem:[#allocation28_spill] sm:$0xff] %v9957_v10 }
 0x541   :  { %11191 = vst [vmem:[#allocation29_spill] sm:$0xff] %v9962_v6 }
 0x542   :  { %7399 = vmatpush1.bf16.msra.mxu0 %v9930_v56  ;;  %7431 = vmatpush1.bf16.msra.mxu1 %v9933_v40 }
 0x543   :  { %7401 = vmatprep.subr.bf16.mxu0 %v9938_v59  ;;  %7433 = vmatprep.subr.bf16.mxu1 %v9940_v63 }
 0x546   :  { %7403 = vmatpush1.bf16.msra.mxu0 %v9942_v51  ;;  %7435 = vmatpush1.bf16.msra.mxu1 %v9945_v41  ;;  %v9966_v41 = vpack.c.bf16 %v2633_v57, %v2629_v52  ;;  %v2641_v52 = vld [vmem:[#allocation10 + $0x160] sm:$0xff]  ;;  %v9976_v57 = vpack.c.bf16 %v2644_v43, %v2640_v37  ;;  %v2652_v37 = vld [vmem:[#allocation10 + $0x1b8] sm:$0xff] }
 0x547   :  { %7405 = vmatprep.subr.bf16.mxu0 %v9950_v17  ;;  %7437 = vmatprep.subr.bf16.mxu1 %v9952_v11  ;;  %v9969_v11 = vpack.c.bf16 %v2635_v14, %v2631_v5  ;;  %v9978_v17 = vpack.c.bf16 %v2641_v52, %v2637_v32  ;;  %v2639_v5 = vld [vmem:[#allocation10 + $0x150] sm:$0xff]  ;;  %v2645_v43 = vld [vmem:[#allocation10 + $0x180] sm:$0xff] }
 0x548   :  { %11193 = vst [vmem:[#allocation31_spill] sm:$0xff] %v9966_v41  ;;  %11196 = vst [vmem:[#allocation34_spill] sm:$0xff] %v9976_v57  ;;  %v2643_v14 = vld [vmem:[#allocation10 + $0x170] sm:$0xff]  ;;  %v2649_v32 = vld [vmem:[#allocation10 + $0x1a0] sm:$0xff] }
 0x549   :  { %11194 = vst [vmem:[#allocation32_spill] sm:$0xff] %v9969_v11  ;;  %11197 = vst [vmem:[#allocation35_spill] sm:$0xff] %v9978_v17 }
 0x54a   :  { %7407 = vmatpush1.bf16.msra.mxu0 %v9954_v62  ;;  %7439 = vmatpush1.bf16.msra.mxu1 %v9957_v10  ;;  %v2638_v10 = vld [vmem:[#allocation10 + $0x148] sm:$0xff] }
 0x54b   :  { %7409 = vmatprep.subr.bf16.mxu0 %v9962_v6  ;;  %7441 = vmatprep.subr.bf16.mxu1 %v9964_v50  ;;  %v9974_v62 = vpack.c.bf16 %v2642_v27, %v2638_v10  ;;  %v9981_v50 = vpack.c.bf16 %v2643_v14, %v2639_v5  ;;  %v2650_v10 = vld [vmem:[#allocation10 + $0x1a8] sm:$0xff]  ;;  %v2648_v27 = vld [vmem:[#allocation10 + $0x198] sm:$0xff]  ;;  %v9990_v6 = vpack.c.bf16 %v2649_v32, %v2645_v43  ;;  %v2647_v5 = vld [vmem:[#allocation10 + $0x190] sm:$0xff] }
 0x54c   :  { %v9988_v52 = vpack.c.bf16 %v2652_v37, %v2648_v27  ;;  %v2651_v14 = vld [vmem:[#allocation10 + $0x1b0] sm:$0xff]  ;;  %v2660_v27 = vld [vmem:[#allocation10 + $0x1f8] sm:$0xff]  ;;  %v2653_v37 = vld [vmem:[#allocation10 + $0x1c0] sm:$0xff] }
 0x54d   :  { %11195 = vst [vmem:[#allocation33_spill] sm:$0xff] %v9974_v62  ;;  %11198 = vst [vmem:[#allocation36_spill] sm:$0xff] %v9981_v50  ;;  %v2657_v43 = vld [vmem:[#allocation10 + $0x1e0] sm:$0xff] }
 0x54e   :  { %7411 = vmatpush1.bf16.msra.mxu0 %v9966_v41  ;;  %7443 = vmatpush1.bf16.msra.mxu1 %v9969_v11  ;;  %v2646_v11 = vld [vmem:[#allocation10 + $0x188] sm:$0xff]  ;;  %11200 = vst [vmem:[#allocation38_spill] sm:$0xff] %v9988_v52  ;;  %11201 = vst [vmem:[#allocation39_spill] sm:$0xff] %v9990_v6 }
 0x54f   :  { %7413 = vmatprep.subr.bf16.mxu0 %v9974_v62  ;;  %7445 = vmatprep.subr.bf16.mxu1 %v9976_v57  ;;  %v9986_v41 = vpack.c.bf16 %v2650_v10, %v2646_v11  ;;  %v9993_v57 = vpack.c.bf16 %v2651_v14, %v2647_v5  ;;  %v2658_v11 = vld [vmem:[#allocation10 + $0x1e8] sm:$0xff]  ;;  %v2656_v10 = vld [vmem:[#allocation10 + $0x1d8] sm:$0xff]  ;;  %v10002_v62 = vpack.c.bf16 %v2657_v43, %v2653_v37  ;;  %v2655_v5 = vld [vmem:[#allocation10 + $0x1d0] sm:$0xff] }
 0x550   :  { %v10000_v32 = vpack.c.bf16 %v2660_v27, %v2656_v10  ;;  %v2659_v14 = vld [vmem:[#allocation10 + $0x1f0] sm:$0xff] }
 0x551   :  { %11199 = vst [vmem:[#allocation37_spill] sm:$0xff] %v9986_v41  ;;  %11202 = vst [vmem:[#allocation40_spill] sm:$0xff] %v9993_v57 }
 0x552   :  { %7415 = vmatpush1.bf16.msra.mxu0 %v9978_v17  ;;  %7447 = vmatpush1.bf16.msra.mxu1 %v9981_v50  ;;  %v2654_v50 = vld [vmem:[#allocation10 + $0x1c8] sm:$0xff]  ;;  %11204 = vst [vmem:[#allocation46_spill] sm:$0xff] %v10000_v32  ;;  %11205 = vst [vmem:[#allocation48_spill] sm:$0xff] %v10002_v62 }
 0x553   :  { %7417 = vmatprep.subr.bf16.mxu0 %v9986_v41  ;;  %7449 = vmatprep.subr.bf16.mxu1 %v9988_v52  ;;  %v9998_v17 = vpack.c.bf16 %v2658_v11, %v2654_v50  ;;  %v10005_v52 = vpack.c.bf16 %v2659_v14, %v2655_v5 }
 0x555   :  { %11203 = vst [vmem:[#allocation41_spill] sm:$0xff] %v9998_v17  ;;  %11206 = vst [vmem:[#allocation49_spill] sm:$0xff] %v10005_v52 }
 0x556   :  { %7419 = vmatpush1.bf16.msra.mxu0 %v9990_v6  ;;  %7451 = vmatpush1.bf16.msra.mxu1 %v9993_v57 }
 0x557   :  { %7421 = vmatprep.subr.bf16.mxu0 %v9998_v17  ;;  %7453 = vmatprep.subr.bf16.mxu1 %v10000_v32 }
 0x55a   :  { %7423 = vmatpush1.bf16.msra.mxu0 %v10002_v62  ;;  %7455 = vmatpush1.bf16.msra.mxu1 %v10005_v52 }
 0x55b   :  { %7457 = vmatprep.subr.bf16.mxu0 %v9800_v20  ;;  %7489 = vmatprep.subr.bf16.mxu1 %v9802_v49 }
 0x60f   :  { %v2499_v50 = vpop.f32.mrb[8].mxu0  ;;  %v2570_v11 = vpop.f32.mrb[8].mxu1 }
 0x610   :  { %v8440_v10 = vadd.f32 %v2499_v50, %v11185_v9  ;;  %v2501_v27 = vpop.f32.mrb[9].mxu0  ;;  %v2572_v37 = vpop.f32.mrb[9].mxu1  ;;  %v8456_v32 = vadd.f32 %v2570_v11, %v9435_v1 }
 0x611   :  { %v8441_v43 = vadd.f32 %v2501_v27, %v11142_v34  ;;  %v8457_v52 = vadd.f32 %v2572_v37, %v9442_v8 }
 0x612   :  { %v2579_v5 = vmul.f32 0.5, %v8440_v10 }
 0x613   :  { %v2583_v14 = vmul.f32 0.5, %v8441_v43  ;;  %v2588_v20 = vmul.f32 0.5, %v8457_v52 }
 0x614   :  { %8618 = vtanh.f32 %v2579_v5 }
 0x615   :  { %8620 = vtanh.f32 %v2583_v14 }
 0x616   :  { %8622 = vtanh.f32 %v8456_v32 }
 0x617   :  { %8624 = vtanh.f32 %v2588_v20 }
 0x61e   :  { %v8619_v62 = vpop.eup %8618 }
 0x61f   :  { %v8621_v49 = vpop.eup %8620  ;;  %v2581_v17 = vmul.f32 0.5, %v8619_v62 }
 0x620   :  { %v2585_v57 = vmul.f32 0.5, %v8621_v49  ;;  %v8623_v9 = vpop.eup %8622  ;;  %v3297_v49 = vld [vmem:[#allocation8] sm:$0xff] }
 0x621   :  { %v2582_v50 = vadd.f32 0.5, %v2581_v17  ;;  %v8625_v11 = vpop.eup %8624 }
 0x622   :  { %v2586_v6 = vadd.f32 0.5, %v2585_v57  ;;  %v2590_v32 = vmul.f32 0.5, %v8625_v11  ;;  %v3303_v11 = vld [vmem:[#allocation8 + $0x30] sm:$0xff] }
 0x623   :  { %v2593_v41 = vmul.f32 %v8623_v9, %v2582_v50  ;;  %v11207_v9 = vld [vmem:[#allocation24_spill] sm:$0xff] }
 0x624   :  { %v2592_v10 = vmul.f32 %v2586_v6, %v9811_v44  ;;  %v2591_v43 = vadd.f32 0.5, %v2590_v32  ;;  %v11208_v44 = vld [vmem:[#allocation25_spill] sm:$0xff]  ;;  %v3301_v50 = vld [vmem:[#allocation8 + $0x20] sm:$0xff] }
 0x625   :  { %v3306_v32 = vld [vmem:[#allocation8 + $0x48] sm:$0xff] }
 0x626   :  { %v10017_v27 = vadd.f32 %v2593_v41, %v2592_v10  ;;  %v3299_v10 = vld [vmem:[#allocation8 + $0x10] sm:$0xff] }
 0x628   :  { %8626 = vtanh.f32 %v10017_v27 }
 0x632   :  { %v8627_v37 = vpop.eup %8626 }
 0x633   :  { %v2596_v52 = vmul.f32 %v8627_v37, %v2591_v43  ;;  %v3310_v43 = vld [vmem:[#allocation8 + $0x68] sm:$0xff]  ;;  %v3308_v37 = vld [vmem:[#allocation8 + $0x58] sm:$0xff] }
 0x635   :  { %2748 = vmatmul.mubr.f32.vlgmr.msra.gmra.mrb[24].mxu0 %v2596_v52  ;;  %2819 = vmatmul.mubr.f32.vlgmr.msra.gmra.mrb[24].mxu1 %v2596_v52 }
 0x636   :  { %7459 = vmatpush1.bf16.msra.mxu0 %v9814_v46  ;;  %7491 = vmatpush1.bf16.msra.mxu1 %v9816_v48  ;;  %v11209_v46 = vld [vmem:[#allocation26_spill] sm:$0xff]  ;;  %v11210_v48 = vld [vmem:[#allocation27_spill] sm:$0xff] }
 0x637   :  { %7461 = vmatprep.subr.bf16.mxu0 %v9820_v0  ;;  %7493 = vmatprep.subr.bf16.mxu1 %v9822_v24  ;;  %v11211_v0 = vld [vmem:[#allocation28_spill] sm:$0xff]  ;;  %v11212_v24 = vld [vmem:[#allocation29_spill] sm:$0xff] }
 0x638   :  { %2961 = vmatprep.mubr.f32.mxu0 %v11122_v12  ;;  %3032 = vmatprep.mubr.f32.mxu1 %v11122_v12 }
 0x63a   :  { %7463 = vmatpush1.bf16.msra.mxu0 %v9828_v47  ;;  %7495 = vmatpush1.bf16.msra.mxu1 %v9830_v31  ;;  %v11213_v47 = vld [vmem:[#allocation30_spill] sm:$0xff]  ;;  %v11214_v31 = vld [vmem:[#allocation31_spill] sm:$0xff] }
 0x63b   :  { %7465 = vmatprep.subr.bf16.mxu0 %v9834_v16  ;;  %7497 = vmatprep.subr.bf16.mxu1 %v9836_v58  ;;  %v11215_v16 = vld [vmem:[#allocation32_spill] sm:$0xff]  ;;  %v11216_v58 = vld [vmem:[#allocation33_spill] sm:$0xff] }
 0x63e   :  { %7467 = vmatpush1.bf16.msra.mxu0 %v9842_v2  ;;  %7499 = vmatpush1.bf16.msra.mxu1 %v9844_v18  ;;  %v11217_v2 = vld [vmem:[#allocation34_spill] sm:$0xff]  ;;  %v11218_v18 = vld [vmem:[#allocation35_spill] sm:$0xff] }
 0x63f   :  { %7469 = vmatprep.subr.bf16.mxu0 %v9848_v35  ;;  %7501 = vmatprep.subr.bf16.mxu1 %v9850_v54  ;;  %v11219_v35 = vld [vmem:[#allocation36_spill] sm:$0xff]  ;;  %v11220_v54 = vld [vmem:[#allocation37_spill] sm:$0xff] }
 0x642   :  { %7471 = vmatpush1.bf16.msra.mxu0 %v9854_v42  ;;  %7503 = vmatpush1.bf16.msra.mxu1 %v9856_v7  ;;  %v11221_v42 = vld [vmem:[#allocation38_spill] sm:$0xff]  ;;  %v11222_v7 = vld [vmem:[#allocation39_spill] sm:$0xff] }
 0x643   :  { %7473 = vmatprep.subr.bf16.mxu0 %v9860_v3  ;;  %7505 = vmatprep.subr.bf16.mxu1 %v9862_v38  ;;  %v11223_v3 = vld [vmem:[#allocation40_spill] sm:$0xff]  ;;  %v11224_v38 = vld [vmem:[#allocation41_spill] sm:$0xff] }
 0x646   :  { %7475 = vmatpush1.bf16.msra.mxu0 %v9866_v13  ;;  %7507 = vmatpush1.bf16.msra.mxu1 %v9868_v15  ;;  %v11225_v13 = vld [vmem:[#allocation46_spill] sm:$0xff]  ;;  %v11226_v15 = vld [vmem:[#allocation48_spill] sm:$0xff] }
 0x647   :  { %7477 = vmatprep.subr.bf16.mxu0 %v9872_v29  ;;  %7509 = vmatprep.subr.bf16.mxu1 %v9874_v21  ;;  %v11227_v29 = vld [vmem:[#allocation49_spill] sm:$0xff] }
 0x648   :  { %v3298_v21 = vld [vmem:[#allocation8 + $0x8] sm:$0xff] }
 0x64a   :  { %7479 = vmatpush1.bf16.msra.mxu0 %v9878_v23  ;;  %7511 = vmatpush1.bf16.msra.mxu1 %v9880_v26  ;;  %v3302_v23 = vld [vmem:[#allocation8 + $0x28] sm:$0xff]  ;;  %v3300_v26 = vld [vmem:[#allocation8 + $0x18] sm:$0xff] }
 0x64b   :  { %7481 = vmatprep.subr.bf16.mxu0 %v9884_v22  ;;  %7513 = vmatprep.subr.bf16.mxu1 %v9886_v25  ;;  %v10086_v22 = vpack.c.bf16 %v3302_v23, %v3298_v21  ;;  %v3304_v25 = vld [vmem:[#allocation8 + $0x38] sm:$0xff]  ;;  %v3319_v21 = vld [vmem:[#allocation8 + $0xb0] sm:$0xff]  ;;  %v3322_v23 = vld [vmem:[#allocation8 + $0xc8] sm:$0xff] }
 0x64e   :  { %7483 = vmatpush1.bf16.msra.mxu0 %v9890_v39  ;;  %7515 = vmatpush1.bf16.msra.mxu1 %v9892_v4  ;;  %v10088_v39 = vpack.c.bf16 %v3304_v25, %v3300_v26  ;;  %v3326_v26 = vld [vmem:[#allocation8 + $0xe8] sm:$0xff]  ;;  %v3324_v25 = vld [vmem:[#allocation8 + $0xd8] sm:$0xff] }
 0x64f   :  { %7485 = vmatprep.subr.bf16.mxu0 %v9896_v55  ;;  %7517 = vmatprep.subr.bf16.mxu1 %v9898_v28  ;;  %v11228_v28 = vld [vmem:[#allocation44_spill] sm:$0xff] }
 0x652   :  { %7487 = vmatpush1.bf16.msra.mxu0 %v9902_v33  ;;  %7519 = vmatpush1.bf16.msra.mxu1 %v9904_v60 }
 0x653   :  { %7521 = vmatprep.subr.bf16.mxu0 %v9914_v53  ;;  %7553 = vmatprep.subr.bf16.mxu1 %v9916_v19 }
 0x655   :  { %2962 = vmatmul.mubr.f32.vlgmr.msra.gmra.mrb[10].mxu0 %v2596_v52  ;;  %3033 = vmatmul.mubr.f32.vlgmr.msra.gmra.mrb[10].mxu1 %v2596_v52  ;;  %v3312_v52 = vld [vmem:[#allocation8 + $0x78] sm:$0xff] }
 0x656   :  { %7523 = vmatpush1.bf16.msra.mxu0 %v9918_v30  ;;  %7555 = vmatpush1.bf16.msra.mxu1 %v9921_v61 }
 0x657   :  { %7525 = vmatprep.subr.bf16.mxu0 %v9926_v36  ;;  %7557 = vmatprep.subr.bf16.mxu1 %v9928_v45 }
 0x658   :  { %3211 = vmatprep.mubr.f32.mxu0 %v11122_v12  ;;  %3282 = vmatprep.mubr.f32.mxu1 %v11122_v12 }
 0x65a   :  { %7527 = vmatpush1.bf16.msra.mxu0 %v9930_v56  ;;  %7559 = vmatpush1.bf16.msra.mxu1 %v9933_v40 }
 0x65b   :  { %7529 = vmatprep.subr.bf16.mxu0 %v9938_v59  ;;  %7561 = vmatprep.subr.bf16.mxu1 %v9940_v63 }
 0x65e   :  { %7531 = vmatpush1.bf16.msra.mxu0 %v9942_v51  ;;  %7563 = vmatpush1.bf16.msra.mxu1 %v11207_v9 }
 0x65f   :  { %7533 = vmatprep.subr.bf16.mxu0 %v11208_v44  ;;  %7565 = vmatprep.subr.bf16.mxu1 %v11209_v46  ;;  %v10100_v46 = vpack.c.bf16 %v3301_v50, %v3297_v49  ;;  %v3342_v49 = vld [vmem:[#allocation8 + $0x168] sm:$0xff]  ;;  %v3340_v50 = vld [vmem:[#allocation8 + $0x158] sm:$0xff] }
 0x662   :  { %7535 = vmatpush1.bf16.msra.mxu0 %v11210_v48  ;;  %7567 = vmatpush1.bf16.msra.mxu1 %v11211_v0  ;;  %v10102_v48 = vpack.c.bf16 %v3303_v11, %v3299_v10  ;;  %v3309_v0 = vld [vmem:[#allocation8 + $0x60] sm:$0xff]  ;;  %v3344_v10 = vld [vmem:[#allocation8 + $0x178] sm:$0xff] }
 0x663   :  { %7537 = vmatprep.subr.bf16.mxu0 %v11212_v24  ;;  %7569 = vmatprep.subr.bf16.mxu1 %v11213_v47  ;;  %v10106_v47 = vpack.c.bf16 %v3310_v43, %v3306_v32  ;;  %v3337_v43 = vld [vmem:[#allocation8 + $0x140] sm:$0xff] }
 0x666   :  { %7539 = vmatpush1.bf16.msra.mxu0 %v11214_v31  ;;  %7571 = vmatpush1.bf16.msra.mxu1 %v11215_v16  ;;  %v10108_v31 = vpack.c.bf16 %v3312_v52, %v3308_v37  ;;  %v3307_v16 = vld [vmem:[#allocation8 + $0x50] sm:$0xff]  ;;  %v3341_v37 = vld [vmem:[#allocation8 + $0x160] sm:$0xff] }
 0x667   :  { %7541 = vmatprep.subr.bf16.mxu0 %v11216_v58  ;;  %7573 = vmatprep.subr.bf16.mxu1 %v11217_v2  ;;  %v3311_v58 = vld [vmem:[#allocation8 + $0x70] sm:$0xff]  ;;  %v3314_v2 = vld [vmem:[#allocation8 + $0x88] sm:$0xff] }
 0x66a   :  { %7543 = vmatpush1.bf16.msra.mxu0 %v11218_v18  ;;  %7575 = vmatpush1.bf16.msra.mxu1 %v11219_v35  ;;  %v3318_v18 = vld [vmem:[#allocation8 + $0xa8] sm:$0xff]  ;;  %v3316_v35 = vld [vmem:[#allocation8 + $0x98] sm:$0xff] }
 0x66b   :  { %7545 = vmatprep.subr.bf16.mxu0 %v11220_v54  ;;  %7577 = vmatprep.subr.bf16.mxu1 %v11221_v42  ;;  %v3320_v54 = vld [vmem:[#allocation8 + $0xb8] sm:$0xff] }
 0x66e   :  { %7547 = vmatpush1.bf16.msra.mxu0 %v11222_v7  ;;  %7579 = vmatpush1.bf16.msra.mxu1 %v11223_v3  ;;  %v10116_v7 = vpack.c.bf16 %v3311_v58, %v3307_v16  ;;  %v3313_v3 = vld [vmem:[#allocation8 + $0x80] sm:$0xff]  ;;  %v3350_v16 = vld [vmem:[#allocation8 + $0x1a8] sm:$0xff]  ;;  %v3348_v58 = vld [vmem:[#allocation8 + $0x198] sm:$0xff] }
 0x66f   :  { %7549 = vmatprep.subr.bf16.mxu0 %v11224_v38  ;;  %7581 = vmatprep.subr.bf16.mxu1 %v11225_v13  ;;  %v3317_v38 = vld [vmem:[#allocation8 + $0xa0] sm:$0xff]  ;;  %v10120_v13 = vpack.c.bf16 %v3318_v18, %v3314_v2  ;;  %v3352_v2 = vld [vmem:[#allocation8 + $0x1b8] sm:$0xff]  ;;  %v10164_v18 = vpack.c.bf16 %v3341_v37, %v3337_v43 }
 0x670   :  { %v3525_v43 = vld [vmem:[#allocation10] sm:$0xff] }
 0x671   :  { %v3529_v37 = vld [vmem:[#allocation10 + $0x20] sm:$0xff] }
 0x672   :  { %7551 = vmatpush1.bf16.msra.mxu0 %v11226_v15  ;;  %7583 = vmatpush1.bf16.msra.mxu1 %v11227_v29  ;;  %v10122_v15 = vpack.c.bf16 %v3320_v54, %v3316_v35  ;;  %v3315_v29 = vld [vmem:[#allocation8 + $0x90] sm:$0xff]  ;;  %v3345_v54 = vld [vmem:[#allocation8 + $0x180] sm:$0xff] }
 0x673   :  { %7585 = vmatprep.subr.bf16.mxu0 %v10086_v22  ;;  %7617 = vmatprep.subr.bf16.mxu1 %v10088_v39 }
 0x728   :  { %v2963_v4 = vpop.f32.mrb[10].mxu0  ;;  %v3034_v55 = vpop.f32.mrb[10].mxu1 }
 0x729   :  { %v8442_v33 = vadd.f32 %v2963_v4, %v11228_v28  ;;  %v2965_v60 = vpop.f32.mrb[11].mxu0  ;;  %v3036_v53 = vpop.f32.mrb[11].mxu1  ;;  %v8458_v36 = vadd.f32 %v3034_v55, %v9435_v1  ;;  %v3328_v4 = vld [vmem:[#allocation8 + $0xf8] sm:$0xff]  ;;  %v10128_v55 = vpack.c.bf16 %v3317_v38, %v3313_v3  ;;  %v3349_v3 = vld [vmem:[#allocation8 + $0x1a0] sm:$0xff] }
 0x72a   :  { %v8443_v19 = vadd.f32 %v2965_v60, %v11142_v34  ;;  %v8459_v45 = vadd.f32 %v3036_v53, %v9442_v8  ;;  %v3321_v60 = vld [vmem:[#allocation8 + $0xc0] sm:$0xff] }
 0x72b   :  { %v3043_v30 = vmul.f32 0.5, %v8442_v33  ;;  %v10130_v33 = vpack.c.bf16 %v3319_v21, %v3315_v29  ;;  %v3325_v53 = vld [vmem:[#allocation8 + $0xe0] sm:$0xff]  ;;  %v10172_v29 = vpack.c.bf16 %v3352_v2, %v3348_v58  ;;  %v3347_v21 = vld [vmem:[#allocation8 + $0x190] sm:$0xff]  ;;  %v3534_v58 = vld [vmem:[#allocation10 + $0x48] sm:$0xff] }
 0x72c   :  { %v3047_v61 = vmul.f32 0.5, %v8443_v19  ;;  %v3052_v56 = vmul.f32 0.5, %v8459_v45  ;;  %v10134_v19 = vpack.c.bf16 %v3326_v26, %v3322_v23  ;;  %v3330_v45 = vld [vmem:[#allocation8 + $0x108] sm:$0xff]  ;;  %v3351_v23 = vld [vmem:[#allocation8 + $0x1b0] sm:$0xff] }
 0x72d   :  { %8628 = vtanh.f32 %v3043_v30  ;;  %v10136_v30 = vpack.c.bf16 %v3328_v4, %v3324_v25  ;;  %v3354_v26 = vld [vmem:[#allocation8 + $0x1c8] sm:$0xff]  ;;  %v3356_v4 = vld [vmem:[#allocation8 + $0x1d8] sm:$0xff] }
 0x72e   :  { %8630 = vtanh.f32 %v3047_v61  ;;  %v3323_v61 = vld [vmem:[#allocation8 + $0xd0] sm:$0xff]  ;;  %v3358_v25 = vld [vmem:[#allocation8 + $0x1e8] sm:$0xff] }
 0x72f   :  { %8632 = vtanh.f32 %v8458_v36  ;;  %v3327_v36 = vld [vmem:[#allocation8 + $0xf0] sm:$0xff]  ;;  %v3538_v2 = vld [vmem:[#allocation10 + $0x68] sm:$0xff] }
 0x730   :  { %8634 = vtanh.f32 %v3052_v56  ;;  %v3334_v56 = vld [vmem:[#allocation8 + $0x128] sm:$0xff] }
 0x737   :  { %v8629_v40 = vpop.eup %8628 }
 0x738   :  { %v8631_v59 = vpop.eup %8630  ;;  %v3045_v63 = vmul.f32 0.5, %v8629_v40  ;;  %v3332_v40 = vld [vmem:[#allocation8 + $0x118] sm:$0xff] }
 0x739   :  { %v3049_v51 = vmul.f32 0.5, %v8631_v59  ;;  %v8633_v17 = vpop.eup %8632  ;;  %v3336_v59 = vld [vmem:[#allocation8 + $0x138] sm:$0xff] }
 0x73a   :  { %v3046_v41 = vadd.f32 0.5, %v3045_v63  ;;  %v8635_v14 = vpop.eup %8634  ;;  %v10140_v63 = vpack.c.bf16 %v3325_v53, %v3321_v60  ;;  %v3360_v60 = vld [vmem:[#allocation8 + $0x1f8] sm:$0xff]  ;;  %v10176_v53 = vpack.c.bf16 %v3349_v3, %v3345_v54  ;;  %v10212_v3 = vpack.c.bf16 %v3538_v2, %v3534_v58  ;;  %v3547_v58 = vld [vmem:[#allocation10 + $0xb0] sm:$0xff] }
 0x73b   :  { %v3050_v62 = vadd.f32 0.5, %v3049_v51  ;;  %v3054_v20 = vmul.f32 0.5, %v8635_v14  ;;  %v10142_v51 = vpack.c.bf16 %v3327_v36, %v3323_v61  ;;  %v3335_v14 = vld [vmem:[#allocation8 + $0x130] sm:$0xff]  ;;  %v10178_v61 = vpack.c.bf16 %v3351_v23, %v3347_v21  ;;  %v3353_v36 = vld [vmem:[#allocation8 + $0x1c0] sm:$0xff]  ;;  %v3536_v54 = vld [vmem:[#allocation10 + $0x58] sm:$0xff] }
 0x73c   :  { %v3057_v6 = vmul.f32 %v8633_v17, %v3046_v41  ;;  %v3329_v41 = vld [vmem:[#allocation8 + $0x100] sm:$0xff]  ;;  %v3540_v21 = vld [vmem:[#allocation10 + $0x78] sm:$0xff] }
 0x73d   :  { %v3056_v57 = vmul.f32 %v3050_v62, %v10017_v27  ;;  %v3055_v9 = vadd.f32 0.5, %v3054_v20  ;;  %v3305_v27 = vld [vmem:[#allocation8 + $0x40] sm:$0xff]  ;;  %v10146_v62 = vpack.c.bf16 %v3334_v56, %v3330_v45  ;;  %v3338_v20 = vld [vmem:[#allocation8 + $0x148] sm:$0xff]  ;;  %v10182_v45 = vpack.c.bf16 %v3358_v25, %v3354_v26 }
 0x73e   :  { %v10114_v42 = vpack.c.bf16 %v3309_v0, %v3305_v27  ;;  %v3333_v17 = vld [vmem:[#allocation8 + $0x120] sm:$0xff]  ;;  %v10158_v52 = vpack.c.bf16 %v3342_v49, %v3338_v20  ;;  %v3343_v27 = vld [vmem:[#allocation8 + $0x170] sm:$0xff]  ;;  %v3346_v0 = vld [vmem:[#allocation8 + $0x188] sm:$0xff]  ;;  %v10184_v56 = vpack.c.bf16 %v3360_v60, %v3356_v4  ;;  %v10214_v25 = vpack.c.bf16 %v3540_v21, %v3536_v54 }
 0x73f   :  { %v10097_v5 = vadd.f32 %v3057_v6, %v3056_v57  ;;  %v10148_v6 = vpack.c.bf16 %v3336_v59, %v3332_v40  ;;  %v3331_v57 = vld [vmem:[#allocation8 + $0x110] sm:$0xff]  ;;  %v10152_v11 = vpack.c.bf16 %v3333_v17, %v3329_v41  ;;  %v10170_v38 = vpack.c.bf16 %v3350_v16, %v3346_v0  ;;  %v3357_v40 = vld [vmem:[#allocation8 + $0x1e0] sm:$0xff]  ;;  %v3530_v20 = vld [vmem:[#allocation10 + $0x28] sm:$0xff] }
 0x740   :  { %v10154_v32 = vpack.c.bf16 %v3335_v14, %v3331_v57  ;;  %v3355_v59 = vld [vmem:[#allocation8 + $0x1d0] sm:$0xff]  ;;  %v10188_v17 = vpack.c.bf16 %v3357_v40, %v3353_v36  ;;  %v3526_v14 = vld [vmem:[#allocation10 + $0x8] sm:$0xff]  ;;  %v3528_v49 = vld [vmem:[#allocation10 + $0x18] sm:$0xff] }
 0x741   :  { %8636 = vtanh.f32 %v10097_v5  ;;  %v3359_v41 = vld [vmem:[#allocation8 + $0x1f0] sm:$0xff]  ;;  %v3533_v23 = vld [vmem:[#allocation10 + $0x40] sm:$0xff]  ;;  %v3550_v54 = vld [vmem:[#allocation10 + $0xc8] sm:$0xff] }
 0x742   :  { %v10190_v57 = vpack.c.bf16 %v3359_v41, %v3355_v59  ;;  %v3527_v0 = vld [vmem:[#allocation10 + $0x10] sm:$0xff]  ;;  %v3537_v26 = vld [vmem:[#allocation10 + $0x60] sm:$0xff]  ;;  %v3542_v59 = vld [vmem:[#allocation10 + $0x88] sm:$0xff] }
 0x743   :  { %v3531_v16 = vld [vmem:[#allocation10 + $0x30] sm:$0xff]  ;;  %v10216_v4 = vpack.c.bf16 %v3537_v26, %v3533_v23  ;;  %v3546_v41 = vld [vmem:[#allocation10 + $0xa8] sm:$0xff]  ;;  %v3552_v23 = vld [vmem:[#allocation10 + $0xd8] sm:$0xff] }
 0x744   :  { %v3535_v60 = vld [vmem:[#allocation10 + $0x50] sm:$0xff]  ;;  %v3554_v21 = vld [vmem:[#allocation10 + $0xe8] sm:$0xff] }
 0x745   :  { %v3539_v36 = vld [vmem:[#allocation10 + $0x70] sm:$0xff]  ;;  %v10236_v26 = vpack.c.bf16 %v3554_v21, %v3550_v54  ;;  %v3560_v54 = vld [vmem:[#allocation10 + $0x118] sm:$0xff] }
 0x746   :  { %v10219_v40 = vpack.c.bf16 %v3539_v36, %v3535_v60  ;;  %v3556_v60 = vld [vmem:[#allocation10 + $0xf8] sm:$0xff]  ;;  %v3549_v36 = vld [vmem:[#allocation10 + $0xc0] sm:$0xff] }
 0x747   :  { %11230 = vst [vmem:[#allocation25_spill] sm:$0xff] %v10236_v26 }
 0x74b   :  { %v8637_v44 = vpop.eup %8636 }
 0x74c   :  { %v10104_v24 = vmul.f32 %v8637_v44, %v3055_v9  ;;  %v10160_v9 = vpack.c.bf16 %v3344_v10, %v3340_v50  ;;  %v3339_v44 = vld [vmem:[#allocation8 + $0x150] sm:$0xff]  ;;  %v10200_v50 = vpack.c.bf16 %v3530_v20, %v3526_v14  ;;  %v3532_v10 = vld [vmem:[#allocation10 + $0x38] sm:$0xff]  ;;  %v10224_v20 = vpack.c.bf16 %v3546_v41, %v3542_v59  ;;  %v3553_v59 = vld [vmem:[#allocation10 + $0xe0] sm:$0xff] }
 0x74d   :  { %v10166_v35 = vpack.c.bf16 %v3343_v27, %v3339_v44  ;;  %v10202_v44 = vpack.c.bf16 %v3532_v10, %v3528_v49  ;;  %v10204_v27 = vpack.c.bf16 %v3529_v37, %v3525_v43  ;;  %v3544_v14 = vld [vmem:[#allocation10 + $0x98] sm:$0xff]  ;;  %v3541_v10 = vld [vmem:[#allocation10 + $0x80] sm:$0xff]  ;;  %v10238_v41 = vpack.c.bf16 %v3556_v60, %v3552_v23 }
 0x74e   :  { %3212 = vmatmul.mubr.f32.vlgmr.msra.gmra.mrb[26].mxu0 %v10104_v24  ;;  %3283 = vmatmul.mubr.f32.vlgmr.msra.gmra.mrb[26].mxu1 %v10104_v24  ;;  %v3548_v49 = vld [vmem:[#allocation10 + $0xb8] sm:$0xff]  ;;  %v3545_v43 = vld [vmem:[#allocation10 + $0xa0] sm:$0xff] }
 0x74f   :  { %7587 = vmatpush1.bf16.msra.mxu0 %v10100_v46  ;;  %7619 = vmatpush1.bf16.msra.mxu1 %v10102_v48  ;;  %v10226_v37 = vpack.c.bf16 %v3548_v49, %v3544_v14  ;;  %11231 = vst [vmem:[#allocation26_spill] sm:$0xff] %v10238_v41  ;;  %v10240_v14 = vpack.c.bf16 %v3553_v59, %v3549_v36  ;;  %v3551_v49 = vld [vmem:[#allocation10 + $0xd0] sm:$0xff]  ;;  %v3564_v23 = vld [vmem:[#allocation10 + $0x138] sm:$0xff]  ;;  %v3557_v60 = vld [vmem:[#allocation10 + $0x100] sm:$0xff] }
 0x750   :  { %7589 = vmatprep.subr.bf16.mxu0 %v10106_v47  ;;  %7621 = vmatprep.subr.bf16.mxu1 %v10108_v31  ;;  %v3561_v36 = vld [vmem:[#allocation10 + $0x120] sm:$0xff]  ;;  %v10250_v59 = vpack.c.bf16 %v3564_v23, %v3560_v54  ;;  %v3572_v54 = vld [vmem:[#allocation10 + $0x178] sm:$0xff] }
 0x751   :  { %3425 = vmatprep.mubr.f32.mxu0 %v11122_v12  ;;  %3496 = vmatprep.mubr.f32.mxu1 %v11122_v12  ;;  %11232 = vst [vmem:[#allocation27_spill] sm:$0xff] %v10240_v14  ;;  %v3565_v23 = vld [vmem:[#allocation10 + $0x140] sm:$0xff] }
 0x752   :  { %11235 = vst [vmem:[#allocation30_spill] sm:$0xff] %v10250_v59 }
 0x753   :  { %7591 = vmatpush1.bf16.msra.mxu0 %v10114_v42  ;;  %7623 = vmatpush1.bf16.msra.mxu1 %v10116_v7 }
 0x754   :  { %7593 = vmatprep.subr.bf16.mxu0 %v10120_v13  ;;  %7625 = vmatprep.subr.bf16.mxu1 %v10122_v15 }
 0x757   :  { %7595 = vmatpush1.bf16.msra.mxu0 %v10128_v55  ;;  %7627 = vmatpush1.bf16.msra.mxu1 %v10130_v33 }
 0x758   :  { %7597 = vmatprep.subr.bf16.mxu0 %v10134_v19  ;;  %7629 = vmatprep.subr.bf16.mxu1 %v10136_v30 }
 0x75b   :  { %7599 = vmatpush1.bf16.msra.mxu0 %v10140_v63  ;;  %7631 = vmatpush1.bf16.msra.mxu1 %v10142_v51 }
 0x75c   :  { %7601 = vmatprep.subr.bf16.mxu0 %v10146_v62  ;;  %7633 = vmatprep.subr.bf16.mxu1 %v10148_v6 }
 0x75f   :  { %7603 = vmatpush1.bf16.msra.mxu0 %v10152_v11  ;;  %7635 = vmatpush1.bf16.msra.mxu1 %v10154_v32 }
 0x760   :  { %7605 = vmatprep.subr.bf16.mxu0 %v10158_v52  ;;  %7637 = vmatprep.subr.bf16.mxu1 %v10160_v9 }
 0x763   :  { %7607 = vmatpush1.bf16.msra.mxu0 %v10164_v18  ;;  %7639 = vmatpush1.bf16.msra.mxu1 %v10166_v35 }
 0x764   :  { %7609 = vmatprep.subr.bf16.mxu0 %v10170_v38  ;;  %7641 = vmatprep.subr.bf16.mxu1 %v10172_v29 }
 0x767   :  { %7611 = vmatpush1.bf16.msra.mxu0 %v10176_v53  ;;  %7643 = vmatpush1.bf16.msra.mxu1 %v10178_v61 }
 0x768   :  { %7613 = vmatprep.subr.bf16.mxu0 %v10182_v45  ;;  %7645 = vmatprep.subr.bf16.mxu1 %v10184_v56 }
 0x76b   :  { %7615 = vmatpush1.bf16.msra.mxu0 %v10188_v17  ;;  %7647 = vmatpush1.bf16.msra.mxu1 %v10190_v57 }
 0x76c   :  { %7649 = vmatprep.subr.bf16.mxu0 %v10200_v50  ;;  %7681 = vmatprep.subr.bf16.mxu1 %v10202_v44 }
 0x76e   :  { %3426 = vmatmul.mubr.f32.vlgmr.msra.gmra.mrb[12].mxu0 %v10104_v24  ;;  %3497 = vmatmul.mubr.f32.vlgmr.msra.gmra.mrb[12].mxu1 %v10104_v24  ;;  %v10207_v24 = vpack.c.bf16 %v3531_v16, %v3527_v0  ;;  %v10228_v0 = vpack.c.bf16 %v3545_v43, %v3541_v10  ;;  %v3543_v16 = vld [vmem:[#allocation10 + $0x90] sm:$0xff] }
 0x76f   :  { %3675 = vmatprep.mubr.f32.mxu0 %v11122_v12  ;;  %3746 = vmatprep.mubr.f32.mxu1 %v11122_v12  ;;  %v10231_v2 = vpack.c.bf16 %v3547_v58, %v3543_v16  ;;  %v3555_v10 = vld [vmem:[#allocation10 + $0xf0] sm:$0xff]  ;;  %v3558_v16 = vld [vmem:[#allocation10 + $0x108] sm:$0xff] }
 0x770   :  { %7651 = vmatpush1.bf16.msra.mxu0 %v10204_v27  ;;  %7683 = vmatpush1.bf16.msra.mxu1 %v10207_v24  ;;  %v10243_v43 = vpack.c.bf16 %v3555_v10, %v3551_v49  ;;  %v3562_v58 = vld [vmem:[#allocation10 + $0x128] sm:$0xff]  ;;  %v3559_v49 = vld [vmem:[#allocation10 + $0x110] sm:$0xff] }
 0x771   :  { %7653 = vmatprep.subr.bf16.mxu0 %v10212_v3  ;;  %7685 = vmatprep.subr.bf16.mxu1 %v10214_v25  ;;  %11229 = vst [vmem:[#allocation24_spill] sm:$0xff] %v10231_v2  ;;  %v10248_v21 = vpack.c.bf16 %v3562_v58, %v3558_v16  ;;  %v3563_v10 = vld [vmem:[#allocation10 + $0x130] sm:$0xff]  ;;  %v3570_v16 = vld [vmem:[#allocation10 + $0x168] sm:$0xff]  ;;  %v3568_v58 = vld [vmem:[#allocation10 + $0x158] sm:$0xff] }
 0x772   :  { %11233 = vst [vmem:[#allocation28_spill] sm:$0xff] %v10243_v43 }
 0x773   :  { %11234 = vst [vmem:[#allocation29_spill] sm:$0xff] %v10248_v21 }
 0x774   :  { %7655 = vmatpush1.bf16.msra.mxu0 %v10216_v4  ;;  %7687 = vmatpush1.bf16.msra.mxu1 %v10219_v40 }
 0x775   :  { %7657 = vmatprep.subr.bf16.mxu0 %v10224_v20  ;;  %7689 = vmatprep.subr.bf16.mxu1 %v10226_v37 }
 0x778   :  { %7659 = vmatpush1.bf16.msra.mxu0 %v10228_v0  ;;  %7691 = vmatpush1.bf16.msra.mxu1 %v10231_v2  ;;  %v10252_v2 = vpack.c.bf16 %v3561_v36, %v3557_v60  ;;  %v3569_v60 = vld [vmem:[#allocation10 + $0x160] sm:$0xff]  ;;  %v10262_v36 = vpack.c.bf16 %v3572_v54, %v3568_v58  ;;  %v3580_v58 = vld [vmem:[#allocation10 + $0x1b8] sm:$0xff] }
 0x779   :  { %7661 = vmatprep.subr.bf16.mxu0 %v10236_v26  ;;  %7693 = vmatprep.subr.bf16.mxu1 %v10238_v41  ;;  %v10255_v41 = vpack.c.bf16 %v3563_v10, %v3559_v49  ;;  %v10264_v26 = vpack.c.bf16 %v3569_v60, %v3565_v23  ;;  %v3567_v49 = vld [vmem:[#allocation10 + $0x150] sm:$0xff]  ;;  %v3573_v54 = vld [vmem:[#allocation10 + $0x180] sm:$0xff] }
 0x77a   :  { %11236 = vst [vmem:[#allocation31_spill] sm:$0xff] %v10252_v2  ;;  %11239 = vst [vmem:[#allocation34_spill] sm:$0xff] %v10262_v36  ;;  %v3571_v10 = vld [vmem:[#allocation10 + $0x170] sm:$0xff]  ;;  %v3577_v23 = vld [vmem:[#allocation10 + $0x1a0] sm:$0xff] }
 0x77b   :  { %11237 = vst [vmem:[#allocation32_spill] sm:$0xff] %v10255_v41  ;;  %11240 = vst [vmem:[#allocation35_spill] sm:$0xff] %v10264_v26 }
 0x77c   :  { %7663 = vmatpush1.bf16.msra.mxu0 %v10240_v14  ;;  %7695 = vmatpush1.bf16.msra.mxu1 %v10243_v43  ;;  %v3566_v43 = vld [vmem:[#allocation10 + $0x148] sm:$0xff] }
 0x77d   :  { %7665 = vmatprep.subr.bf16.mxu0 %v10248_v21  ;;  %7697 = vmatprep.subr.bf16.mxu1 %v10250_v59  ;;  %v10260_v14 = vpack.c.bf16 %v3570_v16, %v3566_v43  ;;  %v10267_v59 = vpack.c.bf16 %v3571_v10, %v3567_v49  ;;  %v3578_v43 = vld [vmem:[#allocation10 + $0x1a8] sm:$0xff]  ;;  %v3576_v16 = vld [vmem:[#allocation10 + $0x198] sm:$0xff]  ;;  %v10276_v21 = vpack.c.bf16 %v3577_v23, %v3573_v54  ;;  %v3575_v49 = vld [vmem:[#allocation10 + $0x190] sm:$0xff] }
 0x77e   :  { %v10274_v60 = vpack.c.bf16 %v3580_v58, %v3576_v16  ;;  %v3579_v10 = vld [vmem:[#allocation10 + $0x1b0] sm:$0xff]  ;;  %v3588_v16 = vld [vmem:[#allocation10 + $0x1f8] sm:$0xff]  ;;  %v3581_v58 = vld [vmem:[#allocation10 + $0x1c0] sm:$0xff] }
 0x77f   :  { %11238 = vst [vmem:[#allocation33_spill] sm:$0xff] %v10260_v14  ;;  %11241 = vst [vmem:[#allocation36_spill] sm:$0xff] %v10267_v59  ;;  %v3585_v54 = vld [vmem:[#allocation10 + $0x1e0] sm:$0xff] }
 0x780   :  { %7667 = vmatpush1.bf16.msra.mxu0 %v10252_v2  ;;  %7699 = vmatpush1.bf16.msra.mxu1 %v10255_v41  ;;  %v3574_v41 = vld [vmem:[#allocation10 + $0x188] sm:$0xff]  ;;  %11243 = vst [vmem:[#allocation38_spill] sm:$0xff] %v10274_v60  ;;  %11244 = vst [vmem:[#allocation39_spill] sm:$0xff] %v10276_v21 }
 0x781   :  { %7669 = vmatprep.subr.bf16.mxu0 %v10260_v14  ;;  %7701 = vmatprep.subr.bf16.mxu1 %v10262_v36  ;;  %v10272_v2 = vpack.c.bf16 %v3578_v43, %v3574_v41  ;;  %v10279_v36 = vpack.c.bf16 %v3579_v10, %v3575_v49  ;;  %v3586_v41 = vld [vmem:[#allocation10 + $0x1e8] sm:$0xff]  ;;  %v3584_v43 = vld [vmem:[#allocation10 + $0x1d8] sm:$0xff]  ;;  %v10288_v14 = vpack.c.bf16 %v3585_v54, %v3581_v58  ;;  %v3583_v49 = vld [vmem:[#allocation10 + $0x1d0] sm:$0xff] }
 0x782   :  { %v10286_v23 = vpack.c.bf16 %v3588_v16, %v3584_v43  ;;  %v3587_v10 = vld [vmem:[#allocation10 + $0x1f0] sm:$0xff] }
 0x783   :  { %11242 = vst [vmem:[#allocation37_spill] sm:$0xff] %v10272_v2  ;;  %11245 = vst [vmem:[#allocation40_spill] sm:$0xff] %v10279_v36 }
 0x784   :  { %7671 = vmatpush1.bf16.msra.mxu0 %v10264_v26  ;;  %7703 = vmatpush1.bf16.msra.mxu1 %v10267_v59  ;;  %v3582_v59 = vld [vmem:[#allocation10 + $0x1c8] sm:$0xff]  ;;  %11247 = vst [vmem:[#allocation46_spill] sm:$0xff] %v10286_v23  ;;  %11248 = vst [vmem:[#allocation48_spill] sm:$0xff] %v10288_v14 }
 0x785   :  { %7673 = vmatprep.subr.bf16.mxu0 %v10272_v2  ;;  %7705 = vmatprep.subr.bf16.mxu1 %v10274_v60  ;;  %v10284_v26 = vpack.c.bf16 %v3586_v41, %v3582_v59  ;;  %v10291_v60 = vpack.c.bf16 %v3587_v10, %v3583_v49 }
 0x787   :  { %11246 = vst [vmem:[#allocation41_spill] sm:$0xff] %v10284_v26  ;;  %11249 = vst [vmem:[#allocation49_spill] sm:$0xff] %v10291_v60 }
 0x788   :  { %7675 = vmatpush1.bf16.msra.mxu0 %v10276_v21  ;;  %7707 = vmatpush1.bf16.msra.mxu1 %v10279_v36 }
 0x789   :  { %7677 = vmatprep.subr.bf16.mxu0 %v10284_v26  ;;  %7709 = vmatprep.subr.bf16.mxu1 %v10286_v23 }
 0x78c   :  { %7679 = vmatpush1.bf16.msra.mxu0 %v10288_v14  ;;  %7711 = vmatpush1.bf16.msra.mxu1 %v10291_v60 }
 0x78d   :  { %7713 = vmatprep.subr.bf16.mxu0 %v10086_v22  ;;  %7745 = vmatprep.subr.bf16.mxu1 %v10088_v39 }
 0x841   :  { %v3427_v59 = vpop.f32.mrb[12].mxu0  ;;  %v3498_v41 = vpop.f32.mrb[12].mxu1 }
 0x842   :  { %v8444_v43 = vadd.f32 %v3427_v59, %v11228_v28  ;;  %v3429_v16 = vpop.f32.mrb[13].mxu0  ;;  %v3500_v58 = vpop.f32.mrb[13].mxu1  ;;  %v8460_v23 = vadd.f32 %v3498_v41, %v9435_v1 }
 0x843   :  { %v8445_v54 = vadd.f32 %v3429_v16, %v11142_v34  ;;  %v8461_v60 = vadd.f32 %v3500_v58, %v9442_v8 }
 0x844   :  { %v3507_v49 = vmul.f32 0.5, %v8444_v43 }
 0x845   :  { %v3511_v10 = vmul.f32 0.5, %v8445_v54  ;;  %v3516_v22 = vmul.f32 0.5, %v8461_v60 }
 0x846   :  { %8638 = vtanh.f32 %v3507_v49 }
 0x847   :  { %8640 = vtanh.f32 %v3511_v10  ;;  %v4225_v10 = vld [vmem:[#allocation11] sm:$0xff] }
 0x848   :  { %8642 = vtanh.f32 %v8460_v23 }
 0x849   :  { %8644 = vtanh.f32 %v3516_v22  ;;  %v4229_v22 = vld [vmem:[#allocation11 + $0x20] sm:$0xff] }
 0x850   :  { %v8639_v14 = vpop.eup %8638 }
 0x851   :  { %v8641_v39 = vpop.eup %8640  ;;  %v3509_v26 = vmul.f32 0.5, %v8639_v14 }
 0x852   :  { %v3513_v36 = vmul.f32 0.5, %v8641_v39  ;;  %v8643_v28 = vpop.eup %8642  ;;  %v4227_v39 = vld [vmem:[#allocation11 + $0x10] sm:$0xff] }
 0x853   :  { %v3510_v59 = vadd.f32 0.5, %v3509_v26  ;;  %v8645_v41 = vpop.eup %8644 }
 0x854   :  { %v3514_v21 = vadd.f32 0.5, %v3513_v36  ;;  %v3518_v23 = vmul.f32 0.5, %v8645_v41  ;;  %v4236_v41 = vld [vmem:[#allocation11 + $0x58] sm:$0xff] }
 0x855   :  { %v3521_v2 = vmul.f32 %v8643_v28, %v3510_v59  ;;  %v11250_v28 = vld [vmem:[#allocation24_spill] sm:$0xff] }
 0x856   :  { %v3520_v43 = vmul.f32 %v3514_v21, %v10097_v5  ;;  %v3519_v54 = vadd.f32 0.5, %v3518_v23  ;;  %v11251_v5 = vld [vmem:[#allocation25_spill] sm:$0xff]  ;;  %v4240_v23 = vld [vmem:[#allocation11 + $0x78] sm:$0xff] }
 0x857   :  { %v4234_v59 = vld [vmem:[#allocation11 + $0x48] sm:$0xff] }
 0x858   :  { %v10303_v16 = vadd.f32 %v3521_v2, %v3520_v43  ;;  %v4238_v43 = vld [vmem:[#allocation11 + $0x68] sm:$0xff] }
 0x85a   :  { %8646 = vtanh.f32 %v10303_v16 }
 0x864   :  { %v8647_v58 = vpop.eup %8646 }
 0x865   :  { %v3524_v60 = vmul.f32 %v8647_v58, %v3519_v54 }
 0x867   :  { %3676 = vmatmul.mubr.f32.vlgmr.msra.gmra.mrb[28].mxu0 %v3524_v60  ;;  %3747 = vmatmul.mubr.f32.vlgmr.msra.gmra.mrb[28].mxu1 %v3524_v60 }
 0x868   :  { %7715 = vmatpush1.bf16.msra.mxu0 %v10100_v46  ;;  %7747 = vmatpush1.bf16.msra.mxu1 %v10102_v48  ;;  %v11252_v46 = vld [vmem:[#allocation26_spill] sm:$0xff]  ;;  %v11253_v48 = vld [vmem:[#allocation27_spill] sm:$0xff] }
 0x869   :  { %7717 = vmatprep.subr.bf16.mxu0 %v10106_v47  ;;  %7749 = vmatprep.subr.bf16.mxu1 %v10108_v31  ;;  %v11254_v47 = vld [vmem:[#allocation28_spill] sm:$0xff]  ;;  %v11255_v31 = vld [vmem:[#allocation29_spill] sm:$0xff] }
 0x86a   :  { %3889 = vmatprep.mubr.f32.mxu0 %v11122_v12  ;;  %3960 = vmatprep.mubr.f32.mxu1 %v11122_v12 }
 0x86c   :  { %7719 = vmatpush1.bf16.msra.mxu0 %v10114_v42  ;;  %7751 = vmatpush1.bf16.msra.mxu1 %v10116_v7  ;;  %v11256_v42 = vld [vmem:[#allocation30_spill] sm:$0xff]  ;;  %v11257_v7 = vld [vmem:[#allocation31_spill] sm:$0xff] }
 0x86d   :  { %7721 = vmatprep.subr.bf16.mxu0 %v10120_v13  ;;  %7753 = vmatprep.subr.bf16.mxu1 %v10122_v15  ;;  %v11258_v13 = vld [vmem:[#allocation32_spill] sm:$0xff]  ;;  %v11259_v15 = vld [vmem:[#allocation33_spill] sm:$0xff] }
 0x870   :  { %7723 = vmatpush1.bf16.msra.mxu0 %v10128_v55  ;;  %7755 = vmatpush1.bf16.msra.mxu1 %v10130_v33  ;;  %v11260_v55 = vld [vmem:[#allocation34_spill] sm:$0xff]  ;;  %v11261_v33 = vld [vmem:[#allocation35_spill] sm:$0xff] }
 0x871   :  { %7725 = vmatprep.subr.bf16.mxu0 %v10134_v19  ;;  %7757 = vmatprep.subr.bf16.mxu1 %v10136_v30  ;;  %v11262_v19 = vld [vmem:[#allocation36_spill] sm:$0xff]  ;;  %v11263_v30 = vld [vmem:[#allocation37_spill] sm:$0xff] }
 0x874   :  { %7727 = vmatpush1.bf16.msra.mxu0 %v10140_v63  ;;  %7759 = vmatpush1.bf16.msra.mxu1 %v10142_v51  ;;  %v11264_v63 = vld [vmem:[#allocation38_spill] sm:$0xff]  ;;  %v11265_v51 = vld [vmem:[#allocation39_spill] sm:$0xff] }
 0x875   :  { %7729 = vmatprep.subr.bf16.mxu0 %v10146_v62  ;;  %7761 = vmatprep.subr.bf16.mxu1 %v10148_v6  ;;  %v11266_v62 = vld [vmem:[#allocation40_spill] sm:$0xff]  ;;  %v11267_v6 = vld [vmem:[#allocation41_spill] sm:$0xff] }
 0x878   :  { %7731 = vmatpush1.bf16.msra.mxu0 %v10152_v11  ;;  %7763 = vmatpush1.bf16.msra.mxu1 %v10154_v32  ;;  %v11268_v11 = vld [vmem:[#allocation46_spill] sm:$0xff]  ;;  %v11269_v32 = vld [vmem:[#allocation48_spill] sm:$0xff] }
 0x879   :  { %7733 = vmatprep.subr.bf16.mxu0 %v10158_v52  ;;  %7765 = vmatprep.subr.bf16.mxu1 %v10160_v9  ;;  %v11270_v52 = vld [vmem:[#allocation49_spill] sm:$0xff] }
 0x87a   :  { %v4226_v9 = vld [vmem:[#allocation11 + $0x8] sm:$0xff] }
 0x87c   :  { %7735 = vmatpush1.bf16.msra.mxu0 %v10164_v18  ;;  %7767 = vmatpush1.bf16.msra.mxu1 %v10166_v35  ;;  %v4230_v18 = vld [vmem:[#allocation11 + $0x28] sm:$0xff]  ;;  %v4228_v35 = vld [vmem:[#allocation11 + $0x18] sm:$0xff] }
 0x87d   :  { %7737 = vmatprep.subr.bf16.mxu0 %v10170_v38  ;;  %7769 = vmatprep.subr.bf16.mxu1 %v10172_v29  ;;  %v10372_v38 = vpack.c.bf16 %v4230_v18, %v4226_v9  ;;  %v4232_v29 = vld [vmem:[#allocation11 + $0x38] sm:$0xff] }
 0x87e   :  { %v4252_v9 = vld [vmem:[#allocation11 + $0xd8] sm:$0xff] }
 0x87f   :  { %v4256_v18 = vld [vmem:[#allocation11 + $0xf8] sm:$0xff] }
 0x880   :  { %7739 = vmatpush1.bf16.msra.mxu0 %v10176_v53  ;;  %7771 = vmatpush1.bf16.msra.mxu1 %v10178_v61  ;;  %v10374_v53 = vpack.c.bf16 %v4232_v29, %v4228_v35 }
 0x881   :  { %7741 = vmatprep.subr.bf16.mxu0 %v10182_v45  ;;  %7773 = vmatprep.subr.bf16.mxu1 %v10184_v56  ;;  %v11271_v56 = vld [vmem:[#allocation44_spill] sm:$0xff] }
 0x884   :  { %7743 = vmatpush1.bf16.msra.mxu0 %v10188_v17  ;;  %7775 = vmatpush1.bf16.msra.mxu1 %v10190_v57 }
 0x885   :  { %7777 = vmatprep.subr.bf16.mxu0 %v10200_v50  ;;  %7809 = vmatprep.subr.bf16.mxu1 %v10202_v44 }
 0x887   :  { %3890 = vmatmul.mubr.f32.vlgmr.msra.gmra.mrb[14].mxu0 %v3524_v60  ;;  %3961 = vmatmul.mubr.f32.vlgmr.msra.gmra.mrb[14].mxu1 %v3524_v60  ;;  %v10383_v60 = vpack.c.bf16 %v4229_v22, %v4225_v10  ;;  %v4265_v10 = vld [vmem:[#allocation11 + $0x140] sm:$0xff] }
 0x888   :  { %7779 = vmatpush1.bf16.msra.mxu0 %v10204_v27  ;;  %7811 = vmatpush1.bf16.msra.mxu1 %v10207_v24  ;;  %v4269_v22 = vld [vmem:[#allocation11 + $0x160] sm:$0xff] }
 0x889   :  { %7781 = vmatprep.subr.bf16.mxu0 %v10212_v3  ;;  %7813 = vmatprep.subr.bf16.mxu1 %v10214_v25 }
 0x88a   :  { %4139 = vmatprep.mubr.f32.mxu0 %v11122_v12  ;;  %4210 = vmatprep.mubr.f32.mxu1 %v11122_v12 }
 0x88c   :  { %7783 = vmatpush1.bf16.msra.mxu0 %v10216_v4  ;;  %7815 = vmatpush1.bf16.msra.mxu1 %v10219_v40 }
 0x88d   :  { %7785 = vmatprep.subr.bf16.mxu0 %v10224_v20  ;;  %7817 = vmatprep.subr.bf16.mxu1 %v10226_v37 }
 0x890   :  { %7787 = vmatpush1.bf16.msra.mxu0 %v10228_v0  ;;  %7819 = vmatpush1.bf16.msra.mxu1 %v11250_v28 }
 0x891   :  { %7789 = vmatprep.subr.bf16.mxu0 %v11251_v5  ;;  %7821 = vmatprep.subr.bf16.mxu1 %v11252_v46  ;;  %v4233_v5 = vld [vmem:[#allocation11 + $0x40] sm:$0xff] }
 0x894   :  { %7791 = vmatpush1.bf16.msra.mxu0 %v11253_v48  ;;  %7823 = vmatpush1.bf16.msra.mxu1 %v11254_v47  ;;  %v10387_v48 = vpack.c.bf16 %v4238_v43, %v4234_v59  ;;  %v10389_v47 = vpack.c.bf16 %v4240_v23, %v4236_v41  ;;  %v4267_v59 = vld [vmem:[#allocation11 + $0x150] sm:$0xff]  ;;  %v4274_v41 = vld [vmem:[#allocation11 + $0x188] sm:$0xff] }
 0x895   :  { %7793 = vmatprep.subr.bf16.mxu0 %v11255_v31  ;;  %7825 = vmatprep.subr.bf16.mxu1 %v11256_v42  ;;  %v4235_v31 = vld [vmem:[#allocation11 + $0x50] sm:$0xff]  ;;  %v4278_v23 = vld [vmem:[#allocation11 + $0x1a8] sm:$0xff] }
 0x896   :  { %v4239_v42 = vld [vmem:[#allocation11 + $0x70] sm:$0xff] }
 0x897   :  { %v4271_v43 = vld [vmem:[#allocation11 + $0x170] sm:$0xff] }
 0x898   :  { %7795 = vmatpush1.bf16.msra.mxu0 %v11257_v7  ;;  %7827 = vmatpush1.bf16.msra.mxu1 %v11258_v13  ;;  %v4242_v7 = vld [vmem:[#allocation11 + $0x88] sm:$0xff] }
 0x899   :  { %7797 = vmatprep.subr.bf16.mxu0 %v11259_v15  ;;  %7829 = vmatprep.subr.bf16.mxu1 %v11260_v55  ;;  %v4246_v13 = vld [vmem:[#allocation11 + $0xa8] sm:$0xff]  ;;  %v4244_v15 = vld [vmem:[#allocation11 + $0x98] sm:$0xff] }
 0x89a   :  { %v4248_v55 = vld [vmem:[#allocation11 + $0xb8] sm:$0xff] }
 0x89c   :  { %7799 = vmatpush1.bf16.msra.mxu0 %v11261_v33  ;;  %7831 = vmatpush1.bf16.msra.mxu1 %v11262_v19  ;;  %v10395_v19 = vpack.c.bf16 %v4239_v42, %v4235_v31  ;;  %v4277_v31 = vld [vmem:[#allocation11 + $0x1a0] sm:$0xff]  ;;  %v10449_v42 = vpack.c.bf16 %v4278_v23, %v4274_v41 }
 0x89d   :  { %7801 = vmatprep.subr.bf16.mxu0 %v11263_v30  ;;  %7833 = vmatprep.subr.bf16.mxu1 %v11264_v63  ;;  %v4241_v30 = vld [vmem:[#allocation11 + $0x80] sm:$0xff] }
 0x89e   :  { %v4245_v63 = vld [vmem:[#allocation11 + $0xa0] sm:$0xff] }
 0x89f   :  { %v10407_v35 = vpack.c.bf16 %v4245_v63, %v4241_v30  ;;  %v4286_v30 = vld [vmem:[#allocation11 + $0x1e8] sm:$0xff]  ;;  %v4284_v63 = vld [vmem:[#allocation11 + $0x1d8] sm:$0xff] }
 0x8a0   :  { %7803 = vmatpush1.bf16.msra.mxu0 %v11265_v51  ;;  %7835 = vmatpush1.bf16.msra.mxu1 %v11266_v62  ;;  %v10399_v51 = vpack.c.bf16 %v4246_v13, %v4242_v7  ;;  %v10401_v62 = vpack.c.bf16 %v4248_v55, %v4244_v15  ;;  %v4275_v13 = vld [vmem:[#allocation11 + $0x190] sm:$0xff]  ;;  %v4282_v55 = vld [vmem:[#allocation11 + $0x1c8] sm:$0xff]  ;;  %v11275_v23 = vld [vmem:[#allocation47_spill] sm:$0xff] }
 0x8a1   :  { %7805 = vmatprep.subr.bf16.mxu0 %v11267_v6  ;;  %7837 = vmatprep.subr.bf16.mxu1 %v11268_v11  ;;  %v4243_v6 = vld [vmem:[#allocation11 + $0x90] sm:$0xff] }
 0x8a2   :  { %v4247_v11 = vld [vmem:[#allocation11 + $0xb0] sm:$0xff] }
 0x8a3   :  { %v10409_v29 = vpack.c.bf16 %v4247_v11, %v4243_v6  ;;  %v4279_v15 = vld [vmem:[#allocation11 + $0x1b0] sm:$0xff]  ;;  %v4288_v6 = vld [vmem:[#allocation11 + $0x1f8] sm:$0xff] }
 0x8a4   :  { %7807 = vmatpush1.bf16.msra.mxu0 %v11269_v32  ;;  %7839 = vmatpush1.bf16.msra.mxu1 %v11270_v52  ;;  %v4250_v32 = vld [vmem:[#allocation11 + $0xc8] sm:$0xff] }
 0x8a5   :  { %7841 = vmatprep.subr.bf16.mxu0 %v10372_v38  ;;  %7873 = vmatprep.subr.bf16.mxu1 %v10374_v53  ;;  %v4254_v52 = vld [vmem:[#allocation11 + $0xe8] sm:$0xff] }
 0x95a   :  { %v3891_v61 = vpop.f32.mrb[14].mxu0  ;;  %v3962_v45 = vpop.f32.mrb[14].mxu1 }
 0x95b   :  { %v8446_v17 = vadd.f32 %v3891_v61, %v11271_v56  ;;  %v3893_v57 = vpop.f32.mrb[15].mxu0  ;;  %v3964_v50 = vpop.f32.mrb[15].mxu1  ;;  %v8462_v3 = vadd.f32 %v3962_v45, %v9435_v1  ;;  %v4249_v61 = vld [vmem:[#allocation11 + $0xc0] sm:$0xff]  ;;  %v10413_v56 = vpack.c.bf16 %v4254_v52, %v4250_v32  ;;  %v10457_v32 = vpack.c.bf16 %v4279_v15, %v4275_v13 }
 0x95c   :  { %v8447_v44 = vadd.f32 %v3893_v57, %v11142_v34  ;;  %v8463_v25 = vadd.f32 %v3964_v50, %v9442_v8  ;;  %v4231_v8 = vld [vmem:[#allocation11 + $0x30] sm:$0xff]  ;;  %v4253_v45 = vld [vmem:[#allocation11 + $0xe0] sm:$0xff] }
 0x95d   :  { %v3971_v27 = vmul.f32 0.5, %v8446_v17  ;;  %v10385_v28 = vpack.c.bf16 %v4231_v8, %v4227_v39  ;;  %v10415_v17 = vpack.c.bf16 %v4256_v18, %v4252_v9  ;;  %v4251_v57 = vld [vmem:[#allocation11 + $0xd0] sm:$0xff]  ;;  %v4281_v52 = vld [vmem:[#allocation11 + $0x1c0] sm:$0xff]  ;;  %v10461_v9 = vpack.c.bf16 %v4286_v30, %v4282_v55 }
 0x95e   :  { %v3975_v24 = vmul.f32 0.5, %v8447_v44  ;;  %v3980_v4 = vmul.f32 0.5, %v8463_v25  ;;  %v4255_v50 = vld [vmem:[#allocation11 + $0xf0] sm:$0xff]  ;;  %v4258_v44 = vld [vmem:[#allocation11 + $0x108] sm:$0xff]  ;;  %v10419_v25 = vpack.c.bf16 %v4253_v45, %v4249_v61  ;;  %v10463_v18 = vpack.c.bf16 %v4288_v6, %v4284_v63  ;;  %v4285_v61 = vld [vmem:[#allocation11 + $0x1e0] sm:$0xff] }
 0x95f   :  { %8648 = vtanh.f32 %v3971_v27  ;;  %v4262_v27 = vld [vmem:[#allocation11 + $0x128] sm:$0xff]  ;;  %v4283_v45 = vld [vmem:[#allocation11 + $0x1d0] sm:$0xff] }
 0x960   :  { %8650 = vtanh.f32 %v3975_v24  ;;  %v4260_v24 = vld [vmem:[#allocation11 + $0x118] sm:$0xff] }
 0x961   :  { %8652 = vtanh.f32 %v8462_v3  ;;  %v4264_v3 = vld [vmem:[#allocation11 + $0x138] sm:$0xff] }
 0x962   :  { %8654 = vtanh.f32 %v3980_v4  ;;  %v10421_v4 = vpack.c.bf16 %v4255_v50, %v4251_v57  ;;  %v4287_v57 = vld [vmem:[#allocation11 + $0x1f0] sm:$0xff]  ;;  %v10467_v50 = vpack.c.bf16 %v4285_v61, %v4281_v52 }
 0x969   :  { %v8649_v40 = vpop.eup %8648 }
 0x96a   :  { %v8651_v20 = vpop.eup %8650  ;;  %v3973_v37 = vmul.f32 0.5, %v8649_v40  ;;  %v4257_v40 = vld [vmem:[#allocation11 + $0x100] sm:$0xff] }
 0x96b   :  { %v3977_v0 = vmul.f32 0.5, %v8651_v20  ;;  %v8653_v26 = vpop.eup %8652  ;;  %v4261_v20 = vld [vmem:[#allocation11 + $0x120] sm:$0xff] }
 0x96c   :  { %v3974_v2 = vadd.f32 0.5, %v3973_v37  ;;  %v8655_v49 = vpop.eup %8654  ;;  %v10425_v37 = vpack.c.bf16 %v4262_v27, %v4258_v44  ;;  %v10469_v44 = vpack.c.bf16 %v4287_v57, %v4283_v45  ;;  %v805_v27 = vld [vmem:[%s10990_s6] sm:$0xf] }
 0x96d   :  { %v3978_v14 = vadd.f32 0.5, %v3977_v0  ;;  %v3982_v1 = vmul.f32 0.5, %v8655_v49  ;;  %v10427_v0 = vpack.c.bf16 %v4264_v3, %v4260_v24  ;;  %v10431_v49 = vpack.c.bf16 %v4261_v20, %v4257_v40  ;;  %v11272_v24 = vld [vmem:[#allocation42_spill] sm:$0xff]  ;;  %v11273_v40 = vld [vmem:[#allocation43_spill] sm:$0xff] }
 0x96e   :  { %v3985_v21 = vmul.f32 %v8653_v26, %v3974_v2  ;;  %v4259_v2 = vld [vmem:[#allocation11 + $0x110] sm:$0xff]  ;;  %v810_v3 = vrot.slane %v805_v27, %v11272_v24  ;;  %v814_v20 = vrot.slane %v805_v27, %v11273_v40 }
 0x96f   :  { %v3984_v34 = vmul.f32 %v3978_v14, %v10303_v16  ;;  %v3983_v54 = vadd.f32 0.5, %v3982_v1  ;;  %v4237_v16 = vld [vmem:[#allocation11 + $0x60] sm:$0xff]  ;;  %v4263_v26 = vld [vmem:[#allocation11 + $0x130] sm:$0xff]  ;;  %v4266_v14 = vld [vmem:[#allocation11 + $0x148] sm:$0xff] }
 0x970   :  { %v10393_v33 = vpack.c.bf16 %v4237_v16, %v4233_v5  ;;  %v10433_v1 = vpack.c.bf16 %v4263_v26, %v4259_v2  ;;  %v10443_v5 = vpack.c.bf16 %v4269_v22, %v4265_v10  ;;  %v10445_v16 = vpack.c.bf16 %v4271_v43, %v4267_v59 }
 0x971   :  { %v3986_v36 = vadd.f32 %v3985_v21, %v3984_v34  ;;  %v4270_v21 = vld [vmem:[#allocation11 + $0x168] sm:$0xff]  ;;  %v4268_v34 = vld [vmem:[#allocation11 + $0x158] sm:$0xff] }
 0x972   :  { %v10437_v39 = vpack.c.bf16 %v4270_v21, %v4266_v14  ;;  %v11274_v21 = vld [vmem:[#allocation45_spill] sm:$0xff] }
 0x973   :  { %8656 = vtanh.f32 %v3986_v36  ;;  %v4272_v36 = vld [vmem:[#allocation11 + $0x178] sm:$0xff] }
 0x974   :  { %v10439_v8 = vpack.c.bf16 %v4272_v36, %v4268_v34  ;;  %v818_v34 = vrot.slane %v805_v27, %v11274_v21 }
 0x97d   :  { %v8657_v58 = vpop.eup %8656 }
 0x97e   :  { %v3988_v46 = vmul.f32 %v8657_v58, %v3983_v54  ;;  %v4276_v54 = vld [vmem:[#allocation11 + $0x198] sm:$0xff] }
 0x97f   :  { %v4280_v58 = vld [vmem:[#allocation11 + $0x1b8] sm:$0xff] }
 0x980   :  { %4140 = vmatmul.mubr.f32.vlgmr.msra.gmra.mrb[30].mxu0 %v3988_v46  ;;  %4211 = vmatmul.mubr.f32.vlgmr.msra.gmra.mrb[30].mxu1 %v3988_v46  ;;  %v4273_v46 = vld [vmem:[#allocation11 + $0x180] sm:$0xff]  ;;  %v10451_v7 = vpack.c.bf16 %v4280_v58, %v4276_v54  ;;  %v822_v54 = vrot.slane %v805_v27, %v11275_v23 }
 0x981   :  { %7843 = vmatpush1.bf16.msra.mxu0 %v10383_v60  ;;  %7875 = vmatpush1.bf16.msra.mxu1 %v10385_v28  ;;  %v10455_v11 = vpack.c.bf16 %v4277_v31, %v4273_v46 }
 0x982   :  { %7845 = vmatprep.subr.bf16.mxu0 %v10387_v48  ;;  %7877 = vmatprep.subr.bf16.mxu1 %v10389_v47 }
 0x983   :  { %4353 = vmatprep.mubr.f32.mxu0 %v11122_v12  ;;  %4424 = vmatprep.mubr.f32.mxu1 %v11122_v12 }
 0x985   :  { %7847 = vmatpush1.bf16.msra.mxu0 %v10393_v33  ;;  %7879 = vmatpush1.bf16.msra.mxu1 %v10395_v19 }
 0x986   :  { %7849 = vmatprep.subr.bf16.mxu0 %v10399_v51  ;;  %7881 = vmatprep.subr.bf16.mxu1 %v10401_v62 }
 0x989   :  { %7851 = vmatpush1.bf16.msra.mxu0 %v10407_v35  ;;  %7883 = vmatpush1.bf16.msra.mxu1 %v10409_v29 }
 0x98a   :  { %7853 = vmatprep.subr.bf16.mxu0 %v10413_v56  ;;  %7885 = vmatprep.subr.bf16.mxu1 %v10415_v17 }
 0x98d   :  { %7855 = vmatpush1.bf16.msra.mxu0 %v10419_v25  ;;  %7887 = vmatpush1.bf16.msra.mxu1 %v10421_v4 }
 0x98e   :  { %7857 = vmatprep.subr.bf16.mxu0 %v10425_v37  ;;  %7889 = vmatprep.subr.bf16.mxu1 %v10427_v0 }
 0x991   :  { %7859 = vmatpush1.bf16.msra.mxu0 %v10431_v49  ;;  %7891 = vmatpush1.bf16.msra.mxu1 %v10433_v1 }
 0x992   :  { %7861 = vmatprep.subr.bf16.mxu0 %v10437_v39  ;;  %7893 = vmatprep.subr.bf16.mxu1 %v10439_v8 }
 0x995   :  { %7863 = vmatpush1.bf16.msra.mxu0 %v10443_v5  ;;  %7895 = vmatpush1.bf16.msra.mxu1 %v10445_v16 }
 0x996   :  { %7865 = vmatprep.subr.bf16.mxu0 %v10449_v42  ;;  %7897 = vmatprep.subr.bf16.mxu1 %v10451_v7 }
 0x999   :  { %7867 = vmatpush1.bf16.msra.mxu0 %v10455_v11  ;;  %7899 = vmatpush1.bf16.msra.mxu1 %v10457_v32 }
 0x99a   :  { %7869 = vmatprep.subr.bf16.mxu0 %v10461_v9  ;;  %7901 = vmatprep.subr.bf16.mxu1 %v10463_v18 }
 0x99d   :  { %7871 = vmatpush1.bf16.msra.mxu0 %v10467_v50  ;;  %7903 = vmatpush1.bf16.msra.mxu1 %v10469_v44 }
 0x99e   :  { %7905 = vmatprep.subr.bf16.mxu0 %v10372_v38  ;;  %7937 = vmatprep.subr.bf16.mxu1 %v10374_v53 }
 0x9a0   :  { %4354 = vmatmul.mubr.f32.vlgmr.msra.gmra.mrb[16].mxu0 %v11122_v12  ;;  %4425 = vmatmul.mubr.f32.vlgmr.msra.gmra.mrb[16].mxu1 %v11122_v12 }
 0x9a1   :  { %7907 = vmatpush1.bf16.msra.mxu0 %v10383_v60  ;;  %7939 = vmatpush1.bf16.msra.mxu1 %v10385_v28 }
 0x9a2   :  { %7909 = vmatprep.subr.bf16.mxu0 %v10387_v48  ;;  %7941 = vmatprep.subr.bf16.mxu1 %v10389_v47 }
 0x9a3   :  { %4586 = vmatprep.mubr.f32.mxu0 %v11122_v12  ;;  %4657 = vmatprep.mubr.f32.mxu1 %v11122_v12 }
 0x9a5   :  { %7911 = vmatpush1.bf16.msra.mxu0 %v10393_v33  ;;  %7943 = vmatpush1.bf16.msra.mxu1 %v10395_v19 }
 0x9a6   :  { %7913 = vmatprep.subr.bf16.mxu0 %v10399_v51  ;;  %7945 = vmatprep.subr.bf16.mxu1 %v10401_v62 }
 0x9a9   :  { %7915 = vmatpush1.bf16.msra.mxu0 %v10407_v35  ;;  %7947 = vmatpush1.bf16.msra.mxu1 %v10409_v29 }
 0x9aa   :  { %7917 = vmatprep.subr.bf16.mxu0 %v10413_v56  ;;  %7949 = vmatprep.subr.bf16.mxu1 %v10415_v17 }
 0x9ad   :  { %7919 = vmatpush1.bf16.msra.mxu0 %v10419_v25  ;;  %7951 = vmatpush1.bf16.msra.mxu1 %v10421_v4 }
 0x9ae   :  { %7921 = vmatprep.subr.bf16.mxu0 %v10425_v37  ;;  %7953 = vmatprep.subr.bf16.mxu1 %v10427_v0 }
 0x9b1   :  { %7923 = vmatpush1.bf16.msra.mxu0 %v10431_v49  ;;  %7955 = vmatpush1.bf16.msra.mxu1 %v10433_v1 }
 0x9b2   :  { %7925 = vmatprep.subr.bf16.mxu0 %v10437_v39  ;;  %7957 = vmatprep.subr.bf16.mxu1 %v10439_v8 }
 0x9b5   :  { %7927 = vmatpush1.bf16.msra.mxu0 %v10443_v5  ;;  %7959 = vmatpush1.bf16.msra.mxu1 %v10445_v16 }
 0x9b6   :  { %7929 = vmatprep.subr.bf16.mxu0 %v10449_v42  ;;  %7961 = vmatprep.subr.bf16.mxu1 %v10451_v7 }
 0x9b9   :  { %7931 = vmatpush1.bf16.msra.mxu0 %v10455_v11  ;;  %7963 = vmatpush1.bf16.msra.mxu1 %v10457_v32 }
 0x9ba   :  { %7933 = vmatprep.subr.bf16.mxu0 %v10461_v9  ;;  %7965 = vmatprep.subr.bf16.mxu1 %v10463_v18 }
 0x9bd   :  { %7935 = vmatpush1.bf16.msra.mxu0 %v10467_v50  ;;  %7967 = vmatpush1.bf16.msra.mxu1 %v10469_v44 }
 0x9be   :  { %7969 = vmatprep.subr.bf16.mxu0 %v10372_v38  ;;  %8001 = vmatprep.subr.bf16.mxu1 %v10374_v53 }
 0xa73   :  { %v4355_v2 = vpop.f32.mrb[16].mxu0  ;;  %v4426_v26 = vpop.f32.mrb[16].mxu1 }
 0xa74   :  { %v8464_v14 = vadd.f32 %v4355_v2, %v810_v3  ;;  %v4357_v36 = vpop.f32.mrb[17].mxu0  ;;  %v4428_v10 = vpop.f32.mrb[17].mxu1  ;;  %v8466_v41 = vadd.f32 %v4426_v26, %v818_v34  ;;  %v1269_v26 = vld [vmem:[%s10990_s6] sm:$0xf] }
 0xa75   :  { %v8465_v22 = vadd.f32 %v4357_v36, %v814_v20  ;;  %v8467_v58 = vadd.f32 %v4428_v10, %v822_v54  ;;  %v1278_v34 = vrot.slane %v1269_v26, %v11273_v40 }
 0xa76   :  { %v4435_v59 = vmul.f32 0.5, %v8464_v14  ;;  %v1274_v14 = vrot.slane %v1269_v26, %v11272_v24 }
 0xa77   :  { %v4439_v43 = vmul.f32 0.5, %v8465_v22  ;;  %v4444_v46 = vmul.f32 0.5, %v8467_v58 }
 0xa78   :  { %8658 = vtanh.f32 %v4435_v59  ;;  %v1282_v59 = vrot.slane %v1269_v26, %v11274_v21 }
 0xa79   :  { %8660 = vtanh.f32 %v4439_v43 }
 0xa7a   :  { %8662 = vtanh.f32 %v8466_v41 }
 0xa7b   :  { %8664 = vtanh.f32 %v4444_v46  ;;  %v1286_v46 = vrot.slane %v1269_v26, %v11275_v23 }
 0xa82   :  { %v8659_v31 = vpop.eup %8658 }
 0xa83   :  { %v8661_v13 = vpop.eup %8660  ;;  %v4437_v15 = vmul.f32 0.5, %v8659_v31 }
 0xa84   :  { %v4441_v55 = vmul.f32 0.5, %v8661_v13  ;;  %v8663_v63 = vpop.eup %8662 }
 0xa85   :  { %v4438_v30 = vadd.f32 0.5, %v4437_v15  ;;  %v8665_v57 = vpop.eup %8664 }
 0xa86   :  { %v4442_v6 = vadd.f32 0.5, %v4441_v55  ;;  %v4446_v27 = vmul.f32 0.5, %v8665_v57 }
 0xa87   :  { %v4449_v52 = vmul.f32 %v8663_v63, %v4438_v30 }
 0xa88   :  { %v4448_v61 = vmul.f32 0.0, %v4442_v6  ;;  %v4447_v3 = vadd.f32 0.5, %v4446_v27 }
 0xa8a   :  { %v10520_v45 = vadd.f32 %v4449_v52, %v4448_v61 }
 0xa8c   :  { %8666 = vtanh.f32 %v10520_v45 }
 0xa96   :  { %v8667_v20 = vpop.eup %8666 }
 0xa97   :  { %v10523_v2 = vmul.f32 %v8667_v20, %v4447_v3 }
 0xa99   :  { %4587 = vmatmul.mubr.f32.vlgmr.msra.gmra.mrb[18].mxu0 %v10523_v2  ;;  %4658 = vmatmul.mubr.f32.vlgmr.msra.gmra.mrb[18].mxu1 %v10523_v2 }
 0xa9a   :  { %7971 = vmatpush1.bf16.msra.mxu0 %v10383_v60  ;;  %8003 = vmatpush1.bf16.msra.mxu1 %v10385_v28 }
 0xa9b   :  { %7973 = vmatprep.subr.bf16.mxu0 %v10387_v48  ;;  %8005 = vmatprep.subr.bf16.mxu1 %v10389_v47 }
 0xa9c   :  { %4819 = vmatprep.mubr.f32.mxu0 %v11122_v12  ;;  %4890 = vmatprep.mubr.f32.mxu1 %v11122_v12 }
 0xa9e   :  { %7975 = vmatpush1.bf16.msra.mxu0 %v10393_v33  ;;  %8007 = vmatpush1.bf16.msra.mxu1 %v10395_v19 }
 0xa9f   :  { %7977 = vmatprep.subr.bf16.mxu0 %v10399_v51  ;;  %8009 = vmatprep.subr.bf16.mxu1 %v10401_v62 }
 0xaa2   :  { %7979 = vmatpush1.bf16.msra.mxu0 %v10407_v35  ;;  %8011 = vmatpush1.bf16.msra.mxu1 %v10409_v29 }
 0xaa3   :  { %7981 = vmatprep.subr.bf16.mxu0 %v10413_v56  ;;  %8013 = vmatprep.subr.bf16.mxu1 %v10415_v17 }
 0xaa6   :  { %7983 = vmatpush1.bf16.msra.mxu0 %v10419_v25  ;;  %8015 = vmatpush1.bf16.msra.mxu1 %v10421_v4 }
 0xaa7   :  { %7985 = vmatprep.subr.bf16.mxu0 %v10425_v37  ;;  %8017 = vmatprep.subr.bf16.mxu1 %v10427_v0 }
 0xaaa   :  { %7987 = vmatpush1.bf16.msra.mxu0 %v10431_v49  ;;  %8019 = vmatpush1.bf16.msra.mxu1 %v10433_v1 }
 0xaab   :  { %7989 = vmatprep.subr.bf16.mxu0 %v10437_v39  ;;  %8021 = vmatprep.subr.bf16.mxu1 %v10439_v8 }
 0xaae   :  { %7991 = vmatpush1.bf16.msra.mxu0 %v10443_v5  ;;  %8023 = vmatpush1.bf16.msra.mxu1 %v10445_v16 }
 0xaaf   :  { %7993 = vmatprep.subr.bf16.mxu0 %v10449_v42  ;;  %8025 = vmatprep.subr.bf16.mxu1 %v10451_v7 }
 0xab2   :  { %7995 = vmatpush1.bf16.msra.mxu0 %v10455_v11  ;;  %8027 = vmatpush1.bf16.msra.mxu1 %v10457_v32 }
 0xab3   :  { %7997 = vmatprep.subr.bf16.mxu0 %v10461_v9  ;;  %8029 = vmatprep.subr.bf16.mxu1 %v10463_v18 }
 0xab6   :  { %7999 = vmatpush1.bf16.msra.mxu0 %v10467_v50  ;;  %8031 = vmatpush1.bf16.msra.mxu1 %v10469_v44 }
 0xab7   :  { %8033 = vmatprep.subr.bf16.mxu0 %v10372_v38  ;;  %8065 = vmatprep.subr.bf16.mxu1 %v10374_v53 }
 0xb6c   :  { %v4588_v36 = vpop.f32.mrb[18].mxu0  ;;  %v4659_v10 = vpop.f32.mrb[18].mxu1 }
 0xb6d   :  { %v8468_v22 = vadd.f32 %v4588_v36, %v1274_v14  ;;  %v4590_v43 = vpop.f32.mrb[19].mxu0  ;;  %v4661_v41 = vpop.f32.mrb[19].mxu1  ;;  %v8470_v53 = vadd.f32 %v4659_v10, %v1282_v59  ;;  %v5158_v10 = vld [vmem:[#allocation11 + $0x8] sm:$0xff]  ;;  %v5160_v59 = vld [vmem:[#allocation11 + $0x18] sm:$0xff] }
 0xb6e   :  { %v8469_v54 = vadd.f32 %v4590_v43, %v1278_v34  ;;  %v8471_v31 = vadd.f32 %v4661_v41, %v1286_v46  ;;  %v5164_v41 = vld [vmem:[#allocation11 + $0x38] sm:$0xff]  ;;  %v5159_v46 = vld [vmem:[#allocation11 + $0x10] sm:$0xff] }
 0xb6f   :  { %v4668_v58 = vmul.f32 0.5, %v8468_v22  ;;  %v5162_v22 = vld [vmem:[#allocation11 + $0x28] sm:$0xff] }
 0xb70   :  { %v4672_v38 = vmul.f32 0.5, %v8469_v54  ;;  %v4677_v13 = vmul.f32 0.5, %v8471_v31  ;;  %v10625_v43 = vpack.c.bf16 %v5162_v22, %v5158_v10  ;;  %v5157_v54 = vld [vmem:[#allocation11] sm:$0xff]  ;;  %v5163_v31 = vld [vmem:[#allocation11 + $0x30] sm:$0xff] }
 0xb71   :  { %8668 = vtanh.f32 %v4668_v58  ;;  %v5161_v58 = vld [vmem:[#allocation11 + $0x20] sm:$0xff] }
 0xb72   :  { %8670 = vtanh.f32 %v4672_v38  ;;  %v10627_v38 = vpack.c.bf16 %v5164_v41, %v5160_v59  ;;  %v5191_v59 = vld [vmem:[#allocation11 + $0x110] sm:$0xff] }
 0xb73   :  { %8672 = vtanh.f32 %v8470_v53  ;;  %v10629_v53 = vpack.c.bf16 %v5161_v58, %v5157_v54  ;;  %v5195_v41 = vld [vmem:[#allocation11 + $0x130] sm:$0xff]  ;;  %v5198_v58 = vld [vmem:[#allocation11 + $0x148] sm:$0xff] }
 0xb74   :  { %8674 = vtanh.f32 %v4677_v13  ;;  %v10632_v13 = vpack.c.bf16 %v5163_v31, %v5159_v46  ;;  %v10680_v54 = vpack.c.bf16 %v5195_v41, %v5191_v59  ;;  %v5202_v46 = vld [vmem:[#allocation11 + $0x168] sm:$0xff]  ;;  %v5200_v31 = vld [vmem:[#allocation11 + $0x158] sm:$0xff]  ;;  %v5215_v59 = vld [vmem:[#allocation11 + $0x1d0] sm:$0xff] }
 0xb75   :  { %v5219_v41 = vld [vmem:[#allocation11 + $0x1f0] sm:$0xff] }
 0xb7b   :  { %v8669_v15 = vpop.eup %8668 }
 0xb7c   :  { %v8671_v55 = vpop.eup %8670  ;;  %v4670_v30 = vmul.f32 0.5, %v8669_v15  ;;  %v5166_v15 = vld [vmem:[#allocation11 + $0x48] sm:$0xff] }
 0xb7d   :  { %v4674_v63 = vmul.f32 0.5, %v8671_v55  ;;  %v8673_v52 = vpop.eup %8672  ;;  %v5170_v55 = vld [vmem:[#allocation11 + $0x68] sm:$0xff] }
 0xb7e   :  { %v4671_v6 = vadd.f32 0.5, %v4670_v30  ;;  %v8675_v20 = vpop.eup %8674  ;;  %v5168_v30 = vld [vmem:[#allocation11 + $0x58] sm:$0xff] }
 0xb7f   :  { %v4675_v61 = vadd.f32 0.5, %v4674_v63  ;;  %v4679_v26 = vmul.f32 0.5, %v8675_v20  ;;  %v10637_v63 = vpack.c.bf16 %v5170_v55, %v5166_v15  ;;  %v5171_v20 = vld [vmem:[#allocation11 + $0x70] sm:$0xff]  ;;  %v10685_v15 = vpack.c.bf16 %v5202_v46, %v5198_v58  ;;  %v5204_v55 = vld [vmem:[#allocation11 + $0x178] sm:$0xff] }
 0xb80   :  { %v4682_v57 = vmul.f32 %v8673_v52, %v4671_v6  ;;  %v5172_v6 = vld [vmem:[#allocation11 + $0x78] sm:$0xff]  ;;  %v5165_v52 = vld [vmem:[#allocation11 + $0x40] sm:$0xff]  ;;  %v10716_v58 = vpack.c.bf16 %v5219_v41, %v5215_v59 }
 0xb81   :  { %v4681_v27 = vmul.f32 %v4675_v61, %v10520_v45  ;;  %v4680_v14 = vadd.f32 0.5, %v4679_v26  ;;  %v5169_v61 = vld [vmem:[#allocation11 + $0x60] sm:$0xff] }
 0xb82   :  { %v2197_v46 = vld [vmem:[%s10990_s6] sm:$0xf] }
 0xb83   :  { %v10569_v3 = vadd.f32 %v4682_v57, %v4681_v27  ;;  %v10639_v57 = vpack.c.bf16 %v5172_v6, %v5168_v30  ;;  %v10641_v27 = vpack.c.bf16 %v5169_v61, %v5165_v52  ;;  %v5197_v30 = vld [vmem:[#allocation11 + $0x140] sm:$0xff]  ;;  %v10687_v52 = vpack.c.bf16 %v5204_v55, %v5200_v31 }
 0xb84   :  { %v5201_v6 = vld [vmem:[#allocation11 + $0x160] sm:$0xff]  ;;  %v2202_v31 = vrot.slane %v2197_v46, %v11272_v24  ;;  %v2206_v55 = vrot.slane %v2197_v46, %v11273_v40 }
 0xb85   :  { %8676 = vtanh.f32 %v10569_v3  ;;  %v10689_v61 = vpack.c.bf16 %v5201_v6, %v5197_v30 }
 0xb8f   :  { %v8677_v34 = vpop.eup %8676 }
 0xb90   :  { %v10572_v36 = vmul.f32 %v8677_v34, %v4680_v14  ;;  %v5174_v14 = vld [vmem:[#allocation11 + $0x88] sm:$0xff] }
 0xb91   :  { %v5178_v34 = vld [vmem:[#allocation11 + $0xa8] sm:$0xff] }
 0xb92   :  { %4820 = vmatmul.mubr.f32.vlgmr.msra.gmra.mrb[20].mxu0 %v10572_v36  ;;  %4891 = vmatmul.mubr.f32.vlgmr.msra.gmra.mrb[20].mxu1 %v10572_v36 }
 0xb93   :  { %8035 = vmatpush1.bf16.msra.mxu0 %v10383_v60  ;;  %8067 = vmatpush1.bf16.msra.mxu1 %v10385_v28  ;;  %v1733_v60 = vld [vmem:[%s10990_s6] sm:$0xf] }
 0xb94   :  { %8037 = vmatprep.subr.bf16.mxu0 %v10387_v48  ;;  %8069 = vmatprep.subr.bf16.mxu1 %v10389_v47  ;;  %v1738_v28 = vrot.slane %v1733_v60, %v11272_v24  ;;  %v1742_v48 = vrot.slane %v1733_v60, %v11273_v40 }
 0xb95   :  { %5052 = vmatprep.mubr.f32.mxu0 %v11122_v12  ;;  %5123 = vmatprep.mubr.f32.mxu1 %v11122_v12 }
 0xb97   :  { %8039 = vmatpush1.bf16.msra.mxu0 %v10393_v33  ;;  %8071 = vmatpush1.bf16.msra.mxu1 %v10395_v19 }
 0xb98   :  { %8041 = vmatprep.subr.bf16.mxu0 %v10399_v51  ;;  %8073 = vmatprep.subr.bf16.mxu1 %v10401_v62  ;;  %v1746_v51 = vrot.slane %v1733_v60, %v11274_v21 }
 0xb9b   :  { %8043 = vmatpush1.bf16.msra.mxu0 %v10407_v35  ;;  %8075 = vmatpush1.bf16.msra.mxu1 %v10409_v29 }
 0xb9c   :  { %8045 = vmatprep.subr.bf16.mxu0 %v10413_v56  ;;  %8077 = vmatprep.subr.bf16.mxu1 %v10415_v17 }
 0xb9f   :  { %8047 = vmatpush1.bf16.msra.mxu0 %v10419_v25  ;;  %8079 = vmatpush1.bf16.msra.mxu1 %v10421_v4  ;;  %v1750_v4 = vrot.slane %v1733_v60, %v11275_v23  ;;  %v5176_v60 = vld [vmem:[#allocation11 + $0x98] sm:$0xff] }
 0xba0   :  { %8049 = vmatprep.subr.bf16.mxu0 %v10425_v37  ;;  %8081 = vmatprep.subr.bf16.mxu1 %v10427_v0 }
 0xba3   :  { %8051 = vmatpush1.bf16.msra.mxu0 %v10431_v49  ;;  %8083 = vmatpush1.bf16.msra.mxu1 %v10433_v1 }
 0xba4   :  { %8053 = vmatprep.subr.bf16.mxu0 %v10437_v39  ;;  %8085 = vmatprep.subr.bf16.mxu1 %v10439_v8 }
 0xba7   :  { %8055 = vmatpush1.bf16.msra.mxu0 %v10443_v5  ;;  %8087 = vmatpush1.bf16.msra.mxu1 %v10445_v16 }
 0xba8   :  { %8057 = vmatprep.subr.bf16.mxu0 %v10449_v42  ;;  %8089 = vmatprep.subr.bf16.mxu1 %v10451_v7 }
 0xbab   :  { %8059 = vmatpush1.bf16.msra.mxu0 %v10455_v11  ;;  %8091 = vmatpush1.bf16.msra.mxu1 %v10457_v32 }
 0xbac   :  { %8061 = vmatprep.subr.bf16.mxu0 %v10461_v9  ;;  %8093 = vmatprep.subr.bf16.mxu1 %v10463_v18 }
 0xbaf   :  { %8063 = vmatpush1.bf16.msra.mxu0 %v10467_v50  ;;  %8095 = vmatpush1.bf16.msra.mxu1 %v10469_v44 }
 0xbb0   :  { %8097 = vmatprep.subr.bf16.mxu0 %v10625_v43  ;;  %8129 = vmatprep.subr.bf16.mxu1 %v10627_v38 }
 0xc65   :  { %v4821_v47 = vpop.f32.mrb[20].mxu0  ;;  %v4892_v33 = vpop.f32.mrb[20].mxu1 }
 0xc66   :  { %v8472_v19 = vadd.f32 %v4821_v47, %v1738_v28  ;;  %v4823_v62 = vpop.f32.mrb[21].mxu0  ;;  %v4894_v35 = vpop.f32.mrb[21].mxu1  ;;  %v8474_v25 = vadd.f32 %v4892_v33, %v1746_v51  ;;  %v10649_v28 = vpack.c.bf16 %v5178_v34, %v5174_v14  ;;  %v5173_v47 = vld [vmem:[#allocation11 + $0x80] sm:$0xff]  ;;  %v5206_v34 = vld [vmem:[#allocation11 + $0x188] sm:$0xff] }
 0xc67   :  { %v8473_v29 = vadd.f32 %v4823_v62, %v1742_v48  ;;  %v8475_v37 = vadd.f32 %v4894_v35, %v1750_v4  ;;  %v5180_v48 = vld [vmem:[#allocation11 + $0xb8] sm:$0xff]  ;;  %v5177_v33 = vld [vmem:[#allocation11 + $0xa0] sm:$0xff]  ;;  %v5175_v62 = vld [vmem:[#allocation11 + $0x90] sm:$0xff] }
 0xc68   :  { %v4901_v56 = vmul.f32 0.5, %v8472_v19  ;;  %v10651_v19 = vpack.c.bf16 %v5180_v48, %v5176_v60  ;;  %v10653_v51 = vpack.c.bf16 %v5177_v33, %v5173_v47  ;;  %v5179_v35 = vld [vmem:[#allocation11 + $0xb0] sm:$0xff]  ;;  %v5210_v60 = vld [vmem:[#allocation11 + $0x1a8] sm:$0xff]  ;;  %v5208_v48 = vld [vmem:[#allocation11 + $0x198] sm:$0xff] }
 0xc69   :  { %v4905_v17 = vmul.f32 0.5, %v8473_v29  ;;  %v4910_v0 = vmul.f32 0.5, %v8475_v37  ;;  %v10656_v29 = vpack.c.bf16 %v5179_v35, %v5175_v62  ;;  %v5188_v37 = vld [vmem:[#allocation11 + $0xf8] sm:$0xff]  ;;  %v10697_v47 = vpack.c.bf16 %v5210_v60, %v5206_v34  ;;  %v5205_v62 = vld [vmem:[#allocation11 + $0x180] sm:$0xff] }
 0xc6a   :  { %8678 = vtanh.f32 %v4901_v56  ;;  %v5182_v56 = vld [vmem:[#allocation11 + $0xc8] sm:$0xff]  ;;  %v5212_v33 = vld [vmem:[#allocation11 + $0x1b8] sm:$0xff]  ;;  %v5209_v35 = vld [vmem:[#allocation11 + $0x1a0] sm:$0xff] }
 0xc6b   :  { %8680 = vtanh.f32 %v4905_v17  ;;  %v5186_v17 = vld [vmem:[#allocation11 + $0xe8] sm:$0xff] }
 0xc6c   :  { %8682 = vtanh.f32 %v8474_v25  ;;  %v5184_v25 = vld [vmem:[#allocation11 + $0xd8] sm:$0xff]  ;;  %v10661_v4 = vpack.c.bf16 %v5186_v17, %v5182_v56  ;;  %v10699_v56 = vpack.c.bf16 %v5212_v33, %v5208_v48  ;;  %v10701_v17 = vpack.c.bf16 %v5209_v35, %v5205_v62 }
 0xc6d   :  { %8684 = vtanh.f32 %v4910_v0  ;;  %v5181_v0 = vld [vmem:[#allocation11 + $0xc0] sm:$0xff] }
 0xc74   :  { %v8679_v49 = vpop.eup %8678 }
 0xc75   :  { %v8681_v1 = vpop.eup %8680  ;;  %v4903_v39 = vmul.f32 0.5, %v8679_v49  ;;  %v5185_v49 = vld [vmem:[#allocation11 + $0xe0] sm:$0xff] }
 0xc76   :  { %v4907_v8 = vmul.f32 0.5, %v8681_v1  ;;  %v8683_v16 = vpop.eup %8682  ;;  %v10663_v1 = vpack.c.bf16 %v5188_v37, %v5184_v25  ;;  %v5207_v25 = vld [vmem:[#allocation11 + $0x190] sm:$0xff] }
 0xc77   :  { %v4904_v5 = vadd.f32 0.5, %v4903_v39  ;;  %v8685_v9 = vpop.eup %8684  ;;  %v10665_v39 = vpack.c.bf16 %v5185_v49, %v5181_v0  ;;  %v5211_v37 = vld [vmem:[#allocation11 + $0x1b0] sm:$0xff]  ;;  %v5214_v49 = vld [vmem:[#allocation11 + $0x1c8] sm:$0xff] }
 0xc78   :  { %v4908_v42 = vadd.f32 0.5, %v4907_v8  ;;  %v4912_v18 = vmul.f32 0.5, %v8685_v9  ;;  %v5183_v8 = vld [vmem:[#allocation11 + $0xd0] sm:$0xff]  ;;  %v10704_v0 = vpack.c.bf16 %v5211_v37, %v5207_v25  ;;  %v2214_v25 = vrot.slane %v2197_v46, %v11275_v23 }
 0xc79   :  { %v4915_v7 = vmul.f32 %v8683_v16, %v4904_v5  ;;  %v5187_v5 = vld [vmem:[#allocation11 + $0xf0] sm:$0xff] }
 0xc7a   :  { %v4914_v11 = vmul.f32 %v4908_v42, %v10569_v3  ;;  %v4913_v50 = vadd.f32 0.5, %v4912_v18  ;;  %v5167_v3 = vld [vmem:[#allocation11 + $0x50] sm:$0xff]  ;;  %v10668_v16 = vpack.c.bf16 %v5187_v5, %v5183_v8  ;;  %v5190_v42 = vld [vmem:[#allocation11 + $0x108] sm:$0xff]  ;;  %v5196_v18 = vld [vmem:[#allocation11 + $0x138] sm:$0xff] }
 0xc7b   :  { %v10644_v26 = vpack.c.bf16 %v5171_v20, %v5167_v3  ;;  %v5199_v3 = vld [vmem:[#allocation11 + $0x150] sm:$0xff]  ;;  %v5218_v8 = vld [vmem:[#allocation11 + $0x1e8] sm:$0xff]  ;;  %v5216_v5 = vld [vmem:[#allocation11 + $0x1d8] sm:$0xff] }
 0xc7c   :  { %v10616_v32 = vadd.f32 %v4915_v7, %v4914_v11  ;;  %v5194_v7 = vld [vmem:[#allocation11 + $0x128] sm:$0xff]  ;;  %v5192_v11 = vld [vmem:[#allocation11 + $0x118] sm:$0xff]  ;;  %v5203_v20 = vld [vmem:[#allocation11 + $0x170] sm:$0xff] }
 0xc7d   :  { %v10673_v9 = vpack.c.bf16 %v5194_v7, %v5190_v42  ;;  %v10675_v10 = vpack.c.bf16 %v5196_v18, %v5192_v11  ;;  %v10692_v14 = vpack.c.bf16 %v5203_v20, %v5199_v3  ;;  %v10709_v42 = vpack.c.bf16 %v5218_v8, %v5214_v49  ;;  %v5220_v7 = vld [vmem:[#allocation11 + $0x1f8] sm:$0xff]  ;;  %v5213_v11 = vld [vmem:[#allocation11 + $0x1c0] sm:$0xff] }
 0xc7e   :  { %8686 = vtanh.f32 %v10616_v32  ;;  %v5217_v18 = vld [vmem:[#allocation11 + $0x1e0] sm:$0xff]  ;;  %v2210_v20 = vrot.slane %v2197_v46, %v11274_v21 }
 0xc88   :  { %v8687_v44 = vpop.eup %8686 }
 0xc89   :  { %v10619_v45 = vmul.f32 %v8687_v44, %v4913_v50  ;;  %v5189_v50 = vld [vmem:[#allocation11 + $0x100] sm:$0xff] }
 0xc8a   :  { %v5193_v44 = vld [vmem:[#allocation11 + $0x120] sm:$0xff] }
 0xc8b   :  { %5053 = vmatmul.mubr.f32.vlgmr.msra.gmra.mrb[22].mxu0 %v10619_v45  ;;  %5124 = vmatmul.mubr.f32.vlgmr.msra.gmra.mrb[22].mxu1 %v10619_v45  ;;  %v10677_v22 = vpack.c.bf16 %v5193_v44, %v5189_v50  ;;  %v10711_v50 = vpack.c.bf16 %v5220_v7, %v5216_v5  ;;  %v10713_v44 = vpack.c.bf16 %v5217_v18, %v5213_v11 }
 0xc8c   :  { %5285 = vmatprep.mubr.f32.mxu0 %v11122_v12  ;;  %5356 = vmatprep.mubr.f32.mxu1 %v11122_v12 }
 0xc8d   :  { %8099 = vmatpush1.bf16.msra.mxu0 %v10629_v53  ;;  %8131 = vmatpush1.bf16.msra.mxu1 %v10632_v13 }
 0xc8e   :  { %8101 = vmatprep.subr.bf16.mxu0 %v10637_v63  ;;  %8133 = vmatprep.subr.bf16.mxu1 %v10639_v57 }
 0xc91   :  { %8103 = vmatpush1.bf16.msra.mxu0 %v10641_v27  ;;  %8135 = vmatpush1.bf16.msra.mxu1 %v10644_v26 }
 0xc92   :  { %8105 = vmatprep.subr.bf16.mxu0 %v10649_v28  ;;  %8137 = vmatprep.subr.bf16.mxu1 %v10651_v19 }
 0xc95   :  { %8107 = vmatpush1.bf16.msra.mxu0 %v10653_v51  ;;  %8139 = vmatpush1.bf16.msra.mxu1 %v10656_v29 }
 0xc96   :  { %8109 = vmatprep.subr.bf16.mxu0 %v10661_v4  ;;  %8141 = vmatprep.subr.bf16.mxu1 %v10663_v1 }
 0xc99   :  { %8111 = vmatpush1.bf16.msra.mxu0 %v10665_v39  ;;  %8143 = vmatpush1.bf16.msra.mxu1 %v10668_v16 }
 0xc9a   :  { %8113 = vmatprep.subr.bf16.mxu0 %v10673_v9  ;;  %8145 = vmatprep.subr.bf16.mxu1 %v10675_v10 }
 0xc9d   :  { %8115 = vmatpush1.bf16.msra.mxu0 %v10677_v22  ;;  %8147 = vmatpush1.bf16.msra.mxu1 %v10680_v54 }
 0xc9e   :  { %8117 = vmatprep.subr.bf16.mxu0 %v10685_v15  ;;  %8149 = vmatprep.subr.bf16.mxu1 %v10687_v52 }
 0xca1   :  { %8119 = vmatpush1.bf16.msra.mxu0 %v10689_v61  ;;  %8151 = vmatpush1.bf16.msra.mxu1 %v10692_v14 }
 0xca2   :  { %8121 = vmatprep.subr.bf16.mxu0 %v10697_v47  ;;  %8153 = vmatprep.subr.bf16.mxu1 %v10699_v56 }
 0xca5   :  { %8123 = vmatpush1.bf16.msra.mxu0 %v10701_v17  ;;  %8155 = vmatpush1.bf16.msra.mxu1 %v10704_v0 }
 0xca6   :  { %8125 = vmatprep.subr.bf16.mxu0 %v10709_v42  ;;  %8157 = vmatprep.subr.bf16.mxu1 %v10711_v50 }
 0xca9   :  { %8127 = vmatpush1.bf16.msra.mxu0 %v10713_v44  ;;  %8159 = vmatpush1.bf16.msra.mxu1 %v10716_v58 }
 0xcaa   :  { %8161 = vmatprep.subr.bf16.mxu0 %v10625_v43  ;;  %8193 = vmatprep.subr.bf16.mxu1 %v10627_v38 }
 0xd5e   :  { %v5054_v30 = vpop.f32.mrb[22].mxu0  ;;  %v5125_v6 = vpop.f32.mrb[22].mxu1 }
 0xd5f   :  { %v8476_v3 = vadd.f32 %v5054_v30, %v2202_v31  ;;  %v5056_v34 = vpop.f32.mrb[23].mxu0  ;;  %v5127_v60 = vpop.f32.mrb[23].mxu1  ;;  %v8478_v35 = vadd.f32 %v5125_v6, %v2210_v20 }
 0xd60   :  { %v8477_v48 = vadd.f32 %v5056_v34, %v2206_v55  ;;  %v8479_v37 = vadd.f32 %v5127_v60, %v2214_v25 }
 0xd61   :  { %v5134_v33 = vmul.f32 0.5, %v8476_v3 }
 0xd62   :  { %v5138_v62 = vmul.f32 0.5, %v8477_v48  ;;  %v5143_v49 = vmul.f32 0.5, %v8479_v37 }
 0xd63   :  { %8688 = vtanh.f32 %v5134_v33 }
 0xd64   :  { %8690 = vtanh.f32 %v5138_v62 }
 0xd65   :  { %8692 = vtanh.f32 %v8478_v35 }
 0xd66   :  { %8694 = vtanh.f32 %v5143_v49 }
 0xd6d   :  { %v8689_v8 = vpop.eup %8688 }
 0xd6e   :  { %v8691_v5 = vpop.eup %8690  ;;  %v5136_v7 = vmul.f32 0.5, %v8689_v8 }
 0xd6f   :  { %v5140_v11 = vmul.f32 0.5, %v8691_v5  ;;  %v8693_v59 = vpop.eup %8692 }
 0xd70   :  { %v5137_v18 = vadd.f32 0.5, %v5136_v7  ;;  %v8695_v46 = vpop.eup %8694 }
 0xd71   :  { %v5141_v41 = vadd.f32 0.5, %v5140_v11  ;;  %v5145_v6 = vmul.f32 0.5, %v8695_v46 }
 0xd72   :  { %v5148_v31 = vmul.f32 %v8693_v59, %v5137_v18 }
 0xd73   :  { %v5147_v55 = vmul.f32 %v5141_v41, %v10616_v32  ;;  %v5146_v3 = vadd.f32 0.5, %v5145_v6  ;;  %v2661_v32 = vld [vmem:[%s10990_s6] sm:$0xf] }
 0xd74   :  { %v2666_v60 = vrot.slane %v2661_v32, %v11272_v24  ;;  %v2670_v48 = vrot.slane %v2661_v32, %v11273_v40  ;;  %v2674_v25 = vrot.slane %v2661_v32, %v11274_v21  ;;  %v2678_v18 = vrot.slane %v2661_v32, %v11275_v23 }
 0xd75   :  { %v10731_v30 = vadd.f32 %v5148_v31, %v5147_v55 }
 0xd77   :  { %8696 = vtanh.f32 %v10731_v30 }
 0xd81   :  { %v8697_v20 = vpop.eup %8696 }
 0xd82   :  { %v10734_v34 = vmul.f32 %v8697_v20, %v5146_v3 }
 0xd84   :  { %5286 = vmatmul.mubr.f32.vlgmr.msra.gmra.mrb[24].mxu0 %v10734_v34  ;;  %5357 = vmatmul.mubr.f32.vlgmr.msra.gmra.mrb[24].mxu1 %v10734_v34 }
 0xd85   :  { %8163 = vmatpush1.bf16.msra.mxu0 %v10629_v53  ;;  %8195 = vmatpush1.bf16.msra.mxu1 %v10632_v13 }
 0xd86   :  { %8165 = vmatprep.subr.bf16.mxu0 %v10637_v63  ;;  %8197 = vmatprep.subr.bf16.mxu1 %v10639_v57 }
 0xd87   :  { %5518 = vmatprep.mubr.f32.mxu0 %v11122_v12  ;;  %5589 = vmatprep.mubr.f32.mxu1 %v11122_v12 }
 0xd89   :  { %8167 = vmatpush1.bf16.msra.mxu0 %v10641_v27  ;;  %8199 = vmatpush1.bf16.msra.mxu1 %v10644_v26 }
 0xd8a   :  { %8169 = vmatprep.subr.bf16.mxu0 %v10649_v28  ;;  %8201 = vmatprep.subr.bf16.mxu1 %v10651_v19 }
 0xd8d   :  { %8171 = vmatpush1.bf16.msra.mxu0 %v10653_v51  ;;  %8203 = vmatpush1.bf16.msra.mxu1 %v10656_v29 }
 0xd8e   :  { %8173 = vmatprep.subr.bf16.mxu0 %v10661_v4  ;;  %8205 = vmatprep.subr.bf16.mxu1 %v10663_v1 }
 0xd91   :  { %8175 = vmatpush1.bf16.msra.mxu0 %v10665_v39  ;;  %8207 = vmatpush1.bf16.msra.mxu1 %v10668_v16 }
 0xd92   :  { %8177 = vmatprep.subr.bf16.mxu0 %v10673_v9  ;;  %8209 = vmatprep.subr.bf16.mxu1 %v10675_v10 }
 0xd95   :  { %8179 = vmatpush1.bf16.msra.mxu0 %v10677_v22  ;;  %8211 = vmatpush1.bf16.msra.mxu1 %v10680_v54 }
 0xd96   :  { %8181 = vmatprep.subr.bf16.mxu0 %v10685_v15  ;;  %8213 = vmatprep.subr.bf16.mxu1 %v10687_v52 }
 0xd99   :  { %8183 = vmatpush1.bf16.msra.mxu0 %v10689_v61  ;;  %8215 = vmatpush1.bf16.msra.mxu1 %v10692_v14 }
 0xd9a   :  { %8185 = vmatprep.subr.bf16.mxu0 %v10697_v47  ;;  %8217 = vmatprep.subr.bf16.mxu1 %v10699_v56 }
 0xd9d   :  { %8187 = vmatpush1.bf16.msra.mxu0 %v10701_v17  ;;  %8219 = vmatpush1.bf16.msra.mxu1 %v10704_v0 }
 0xd9e   :  { %8189 = vmatprep.subr.bf16.mxu0 %v10709_v42  ;;  %8221 = vmatprep.subr.bf16.mxu1 %v10711_v50 }
 0xda1   :  { %8191 = vmatpush1.bf16.msra.mxu0 %v10713_v44  ;;  %8223 = vmatpush1.bf16.msra.mxu1 %v10716_v58 }
 0xda2   :  { %8225 = vmatprep.subr.bf16.mxu0 %v10625_v43  ;;  %8257 = vmatprep.subr.bf16.mxu1 %v10627_v38 }
 0xe57   :  { %v5287_v33 = vpop.f32.mrb[24].mxu0  ;;  %v5358_v62 = vpop.f32.mrb[24].mxu1 }
 0xe58   :  { %v8480_v35 = vadd.f32 %v5287_v33, %v2666_v60  ;;  %v5289_v37 = vpop.f32.mrb[25].mxu0  ;;  %v5360_v49 = vpop.f32.mrb[25].mxu1  ;;  %v8482_v11 = vadd.f32 %v5358_v62, %v2674_v25 }
 0xe59   :  { %v8481_v8 = vadd.f32 %v5289_v37, %v2670_v48  ;;  %v8483_v59 = vadd.f32 %v5360_v49, %v2678_v18 }
 0xe5a   :  { %v5367_v5 = vmul.f32 0.5, %v8480_v35 }
 0xe5b   :  { %v5371_v7 = vmul.f32 0.5, %v8481_v8  ;;  %v5376_v41 = vmul.f32 0.5, %v8483_v59 }
 0xe5c   :  { %8698 = vtanh.f32 %v5367_v5 }
 0xe5d   :  { %8700 = vtanh.f32 %v5371_v7 }
 0xe5e   :  { %8702 = vtanh.f32 %v8482_v11 }
 0xe5f   :  { %8704 = vtanh.f32 %v5376_v41 }
 0xe66   :  { %v8699_v31 = vpop.eup %8698 }
 0xe67   :  { %v8701_v55 = vpop.eup %8700  ;;  %v5369_v46 = vmul.f32 0.5, %v8699_v31 }
 0xe68   :  { %v5373_v6 = vmul.f32 0.5, %v8701_v55  ;;  %v8703_v20 = vpop.eup %8702 }
 0xe69   :  { %v5370_v3 = vadd.f32 0.5, %v5369_v46  ;;  %v8705_v32 = vpop.eup %8704 }
 0xe6a   :  { %v5374_v60 = vadd.f32 0.5, %v5373_v6  ;;  %v5378_v62 = vmul.f32 0.5, %v8705_v32 }
 0xe6b   :  { %v5381_v33 = vmul.f32 %v8703_v20, %v5370_v3 }
 0xe6c   :  { %v5380_v48 = vmul.f32 %v5374_v60, %v10731_v30  ;;  %v5379_v25 = vadd.f32 0.5, %v5378_v62  ;;  %v3125_v30 = vld [vmem:[%s10990_s6] sm:$0xf] }
 0xe6d   :  { %v3130_v8 = vrot.slane %v3125_v30, %v11272_v24  ;;  %v3134_v5 = vrot.slane %v3125_v30, %v11273_v40  ;;  %v3138_v59 = vrot.slane %v3125_v30, %v11274_v21  ;;  %v3142_v6 = vrot.slane %v3125_v30, %v11275_v23 }
 0xe6e   :  { %v10780_v35 = vadd.f32 %v5381_v33, %v5380_v48 }
 0xe70   :  { %8706 = vtanh.f32 %v10780_v35 }
 0xe7a   :  { %v8707_v37 = vpop.eup %8706 }
 0xe7b   :  { %v10783_v49 = vmul.f32 %v8707_v37, %v5379_v25 }
 0xe7d   :  { %5519 = vmatmul.mubr.f32.vlgmr.msra.gmra.mrb[26].mxu0 %v10783_v49  ;;  %5590 = vmatmul.mubr.f32.vlgmr.msra.gmra.mrb[26].mxu1 %v10783_v49 }
 0xe7e   :  { %8227 = vmatpush1.bf16.msra.mxu0 %v10629_v53  ;;  %8259 = vmatpush1.bf16.msra.mxu1 %v10632_v13 }
 0xe7f   :  { %8229 = vmatprep.subr.bf16.mxu0 %v10637_v63  ;;  %8261 = vmatprep.subr.bf16.mxu1 %v10639_v57 }
 0xe80   :  { %5751 = vmatprep.mubr.f32.mxu0 %v11122_v12  ;;  %5822 = vmatprep.mubr.f32.mxu1 %v11122_v12 }
 0xe82   :  { %8231 = vmatpush1.bf16.msra.mxu0 %v10641_v27  ;;  %8263 = vmatpush1.bf16.msra.mxu1 %v10644_v26 }
 0xe83   :  { %8233 = vmatprep.subr.bf16.mxu0 %v10649_v28  ;;  %8265 = vmatprep.subr.bf16.mxu1 %v10651_v19 }
 0xe86   :  { %8235 = vmatpush1.bf16.msra.mxu0 %v10653_v51  ;;  %8267 = vmatpush1.bf16.msra.mxu1 %v10656_v29 }
 0xe87   :  { %8237 = vmatprep.subr.bf16.mxu0 %v10661_v4  ;;  %8269 = vmatprep.subr.bf16.mxu1 %v10663_v1 }
 0xe8a   :  { %8239 = vmatpush1.bf16.msra.mxu0 %v10665_v39  ;;  %8271 = vmatpush1.bf16.msra.mxu1 %v10668_v16 }
 0xe8b   :  { %8241 = vmatprep.subr.bf16.mxu0 %v10673_v9  ;;  %8273 = vmatprep.subr.bf16.mxu1 %v10675_v10 }
 0xe8e   :  { %8243 = vmatpush1.bf16.msra.mxu0 %v10677_v22  ;;  %8275 = vmatpush1.bf16.msra.mxu1 %v10680_v54 }
 0xe8f   :  { %8245 = vmatprep.subr.bf16.mxu0 %v10685_v15  ;;  %8277 = vmatprep.subr.bf16.mxu1 %v10687_v52 }
 0xe92   :  { %8247 = vmatpush1.bf16.msra.mxu0 %v10689_v61  ;;  %8279 = vmatpush1.bf16.msra.mxu1 %v10692_v14 }
 0xe93   :  { %8249 = vmatprep.subr.bf16.mxu0 %v10697_v47  ;;  %8281 = vmatprep.subr.bf16.mxu1 %v10699_v56 }
 0xe96   :  { %8251 = vmatpush1.bf16.msra.mxu0 %v10701_v17  ;;  %8283 = vmatpush1.bf16.msra.mxu1 %v10704_v0 }
 0xe97   :  { %8253 = vmatprep.subr.bf16.mxu0 %v10709_v42  ;;  %8285 = vmatprep.subr.bf16.mxu1 %v10711_v50 }
 0xe9a   :  { %8255 = vmatpush1.bf16.msra.mxu0 %v10713_v44  ;;  %8287 = vmatpush1.bf16.msra.mxu1 %v10716_v58 }
 0xe9b   :  { %8289 = vmatprep.subr.bf16.mxu0 %v10625_v43  ;;  %8321 = vmatprep.subr.bf16.mxu1 %v10627_v38 }
 0xf50   :  { %v5520_v7 = vpop.f32.mrb[26].mxu0  ;;  %v5591_v11 = vpop.f32.mrb[26].mxu1 }
 0xf51   :  { %v8484_v18 = vadd.f32 %v5520_v7, %v3130_v8  ;;  %v5522_v41 = vpop.f32.mrb[27].mxu0  ;;  %v5593_v31 = vpop.f32.mrb[27].mxu1  ;;  %v8486_v38 = vadd.f32 %v5591_v11, %v3138_v59 }
 0xf52   :  { %v8485_v55 = vadd.f32 %v5522_v41, %v3134_v5  ;;  %v8487_v3 = vadd.f32 %v5593_v31, %v3142_v6  ;;  %v6095_v31 = vld [vmem:[%s10991_s7 + $0x10] sm:$0xff] }
 0xf53   :  { %v5600_v46 = vmul.f32 0.5, %v8484_v18 }
 0xf54   :  { %v5604_v43 = vmul.f32 0.5, %v8485_v55  ;;  %v5609_v20 = vmul.f32 0.5, %v8487_v3  ;;  %v6096_v55 = vld [vmem:[%s10991_s7 + $0x18] sm:$0xff]  ;;  %v6097_v3 = vld [vmem:[%s10991_s7 + $0x20] sm:$0xff] }
 0xf55   :  { %8708 = vtanh.f32 %v5600_v46  ;;  %v8356_v6 = vpack.c.bf16 %v6096_v55, %v6095_v31 }
 0xf56   :  { %8710 = vtanh.f32 %v5604_v43 }
 0xf57   :  { %8712 = vtanh.f32 %v8486_v38 }
 0xf58   :  { %8714 = vtanh.f32 %v5609_v20  ;;  %v6098_v20 = vld [vmem:[%s10991_s7 + $0x28] sm:$0xff] }
 0xf5f   :  { %v8709_v60 = vpop.eup %8708 }
 0xf60   :  { %v8711_v33 = vpop.eup %8710  ;;  %v5602_v48 = vmul.f32 0.5, %v8709_v60  ;;  %v8360_v60 = vpack.c.bf16 %v6098_v20, %v6097_v3 }
 0xf61   :  { %v5606_v32 = vmul.f32 0.5, %v8711_v33  ;;  %v8713_v25 = vpop.eup %8712  ;;  %v6099_v33 = vld [vmem:[%s10991_s7 + $0x30] sm:$0xff] }
 0xf62   :  { %v5603_v62 = vadd.f32 0.5, %v5602_v48  ;;  %v8715_v30 = vpop.eup %8714  ;;  %v6100_v48 = vld [vmem:[%s10991_s7 + $0x38] sm:$0xff] }
 0xf63   :  { %v5607_v37 = vadd.f32 0.5, %v5606_v32  ;;  %v5611_v11 = vmul.f32 0.5, %v8715_v30  ;;  %v8364_v32 = vpack.c.bf16 %v6100_v48, %v6099_v33  ;;  %v6105_v30 = vld [vmem:[%s10991_s7 + $0x60] sm:$0xff] }
 0xf64   :  { %v5614_v8 = vmul.f32 %v8713_v25, %v5603_v62  ;;  %v6101_v62 = vld [vmem:[%s10991_s7 + $0x40] sm:$0xff]  ;;  %v6102_v25 = vld [vmem:[%s10991_s7 + $0x48] sm:$0xff] }
 0xf65   :  { %v5613_v5 = vmul.f32 %v5607_v37, %v10780_v35  ;;  %v5612_v18 = vadd.f32 0.5, %v5611_v11  ;;  %v8368_v37 = vpack.c.bf16 %v6102_v25, %v6101_v62  ;;  %v6106_v11 = vld [vmem:[%s10991_s7 + $0x68] sm:$0xff]  ;;  %v6576_v62 = vld [vmem:[#allocation13] ss:$0 sm:$0xff] }
 0xf67   :  { %v10829_v7 = vadd.f32 %v5614_v8, %v5613_v5  ;;  %v6103_v8 = vld [vmem:[%s10991_s7 + $0x50] sm:$0xff]  ;;  %v6104_v5 = vld [vmem:[%s10991_s7 + $0x58] sm:$0xff] }
 0xf69   :  { %8716 = vtanh.f32 %v10829_v7 }
 0xf73   :  { %v8717_v59 = vpop.eup %8716 }
 0xf74   :  { %v10832_v41 = vmul.f32 %v8717_v59, %v5612_v18  ;;  %v8376_v18 = vpack.c.bf16 %v6106_v11, %v6105_v30  ;;  %v6107_v59 = vld [vmem:[%s10991_s7 + $0x70] sm:$0xff] }
 0xf76   :  { %5752 = vmatmul.mubr.f32.vlgmr.msra.gmra.mrb[28].mxu0 %v10832_v41  ;;  %5823 = vmatmul.mubr.f32.vlgmr.msra.gmra.mrb[28].mxu1 %v10832_v41 }
 0xf77   :  { %8291 = vmatpush1.bf16.msra.mxu0 %v10629_v53  ;;  %8323 = vmatpush1.bf16.msra.mxu1 %v10632_v13  ;;  %v6093_v53 = vld [vmem:[%s10991_s7] sm:$0xff]  ;;  %v6094_v13 = vld [vmem:[%s10991_s7 + $0x8] sm:$0xff] }
 0xf78   :  { %8293 = vmatprep.subr.bf16.mxu0 %v10637_v63  ;;  %8325 = vmatprep.subr.bf16.mxu1 %v10639_v57  ;;  %v8352_v63 = vpack.c.bf16 %v6094_v13, %v6093_v53  ;;  %v3589_v57 = vld [vmem:[%s10990_s6] sm:$0xf]  ;;  %v6108_v53 = vld [vmem:[%s10991_s7 + $0x78] sm:$0xff] }
 0xf79   :  { %5984 = vmatprep.mubr.f32.mxu0 %v11122_v12  ;;  %6055 = vmatprep.mubr.f32.mxu1 %v11122_v12  ;;  %v8380_v13 = vpack.c.bf16 %v6108_v53, %v6107_v59 }
 0xf7b   :  { %8295 = vmatpush1.bf16.msra.mxu0 %v10641_v27  ;;  %8327 = vmatpush1.bf16.msra.mxu1 %v10644_v26  ;;  %v3594_v27 = vrot.slane %v3589_v57, %v11272_v24  ;;  %v3598_v26 = vrot.slane %v3589_v57, %v11273_v40 }
 0xf7c   :  { %8297 = vmatprep.subr.bf16.mxu0 %v10649_v28  ;;  %8329 = vmatprep.subr.bf16.mxu1 %v10651_v19 }
 0xf7f   :  { %8299 = vmatpush1.bf16.msra.mxu0 %v10653_v51  ;;  %8331 = vmatpush1.bf16.msra.mxu1 %v10656_v29  ;;  %v3602_v29 = vrot.slane %v3589_v57, %v11274_v21 }
 0xf80   :  { %8301 = vmatprep.subr.bf16.mxu0 %v10661_v4  ;;  %8333 = vmatprep.subr.bf16.mxu1 %v10663_v1 }
 0xf83   :  { %8303 = vmatpush1.bf16.msra.mxu0 %v10665_v39  ;;  %8335 = vmatpush1.bf16.msra.mxu1 %v10668_v16 }
 0xf84   :  { %8305 = vmatprep.subr.bf16.mxu0 %v10673_v9  ;;  %8337 = vmatprep.subr.bf16.mxu1 %v10675_v10 }
 0xf87   :  { %8307 = vmatpush1.bf16.msra.mxu0 %v10677_v22  ;;  %8339 = vmatpush1.bf16.msra.mxu1 %v10680_v54  ;;  %v3606_v22 = vrot.slane %v3589_v57, %v11275_v23 }
 0xf88   :  { %8309 = vmatprep.subr.bf16.mxu0 %v10685_v15  ;;  %8341 = vmatprep.subr.bf16.mxu1 %v10687_v52 }
 0xf8b   :  { %8311 = vmatpush1.bf16.msra.mxu0 %v10689_v61  ;;  %8343 = vmatpush1.bf16.msra.mxu1 %v10692_v14 }
 0xf8c   :  { %8313 = vmatprep.subr.bf16.mxu0 %v10697_v47  ;;  %8345 = vmatprep.subr.bf16.mxu1 %v10699_v56 }
 0xf8f   :  { %8315 = vmatpush1.bf16.msra.mxu0 %v10701_v17  ;;  %8347 = vmatpush1.bf16.msra.mxu1 %v10704_v0 }
 0xf90   :  { %8317 = vmatprep.subr.bf16.mxu0 %v10709_v42  ;;  %8349 = vmatprep.subr.bf16.mxu1 %v10711_v50 }
 0xf93   :  { %8319 = vmatpush1.bf16.msra.mxu0 %v10713_v44  ;;  %8351 = vmatpush1.bf16.msra.mxu1 %v10716_v58 }
 0xf94   :  { %8353 = vmatprep.subr.bf16.mxu0 %v8352_v63 }
0x1049   :  { %v5753_v28 = vpop.f32.mrb[28].mxu0  ;;  %v5824_v19 = vpop.f32.mrb[28].mxu1 }
0x104a   :  { %v8488_v51 = vadd.f32 %v5753_v28, %v3594_v27  ;;  %v5755_v4 = vpop.f32.mrb[29].mxu0  ;;  %v5826_v1 = vpop.f32.mrb[29].mxu1  ;;  %v8490_v10 = vadd.f32 %v5824_v19, %v3602_v29 }
0x104b   :  { %v8489_v39 = vadd.f32 %v5755_v4, %v3598_v26  ;;  %v8491_v54 = vadd.f32 %v5826_v1, %v3606_v22 }
0x104c   :  { %v5833_v16 = vmul.f32 0.5, %v8488_v51 }
0x104d   :  { %v5837_v9 = vmul.f32 0.5, %v8489_v39  ;;  %v5842_v15 = vmul.f32 0.5, %v8491_v54 }
0x104e   :  { %8718 = vtanh.f32 %v5833_v16 }
0x104f   :  { %8720 = vtanh.f32 %v5837_v9 }
0x1050   :  { %8722 = vtanh.f32 %v8490_v10 }
0x1051   :  { %8724 = vtanh.f32 %v5842_v15 }
0x1058   :  { %v8719_v52 = vpop.eup %8718 }
0x1059   :  { %v8721_v61 = vpop.eup %8720  ;;  %v5835_v14 = vmul.f32 0.5, %v8719_v52 }
0x105a   :  { %v5839_v47 = vmul.f32 0.5, %v8721_v61  ;;  %v8723_v17 = vpop.eup %8722 }
0x105b   :  { %v5836_v56 = vadd.f32 0.5, %v5835_v14  ;;  %v8725_v58 = vpop.eup %8724 }
0x105c   :  { %v5840_v0 = vadd.f32 0.5, %v5839_v47  ;;  %v5844_v35 = vmul.f32 0.5, %v8725_v58 }
0x105d   :  { %v5847_v42 = vmul.f32 %v8723_v17, %v5836_v56 }
0x105e   :  { %v5846_v50 = vmul.f32 %v5840_v0, %v10829_v7  ;;  %v5845_v46 = vadd.f32 0.5, %v5844_v35  ;;  %v8372_v7 = vpack.c.bf16 %v6104_v5, %v6103_v8 }
0x1060   :  { %v10882_v44 = vadd.f32 %v5847_v42, %v5846_v50 }
0x1062   :  { %8726 = vtanh.f32 %v10882_v44 }
0x106c   :  { %v8727_v43 = vpop.eup %8726 }
0x106d   :  { %v10891_v38 = vmul.f32 %v8727_v43, %v5845_v46 }
0x106f   :  { %5985 = vmatmul.mubr.f32.vlgmr.msra.gmra.mrb[30].mxu0 %v10891_v38  ;;  %6056 = vmatmul.mubr.f32.vlgmr.msra.gmra.mrb[30].mxu1 %v10891_v38 }
0x1070   :  { %8355 = vmatpush3.bf16.msra.mxu0 %v8352_v63  ;;  %6670 = vmatprep.mubr.f32.mxu0 %v10523_v2  ;;  %v4053_v63 = vld [vmem:[%s10990_s6] sm:$0xf] }
0x1071   :  { %8357 = vmatprep.subr.bf16.mxu0 %v8356_v6  ;;  %v4058_v57 = vrot.slane %v4053_v63, %v11272_v24  ;;  %v4062_v27 = vrot.slane %v4053_v63, %v11273_v40  ;;  %v4066_v51 = vrot.slane %v4053_v63, %v11274_v21  ;;  %v4070_v10 = vrot.slane %v4053_v63, %v11275_v23  ;;  %v6575_v23 = vld [vmem:[%s10992_s8] ss:$0 sm:$0xff] }
0x1072   :  { %6714 = vmatprep.mubr.msk.f32.mxu1 %vm8973_vm0, %v11122_v12 }
0x1074   :  { %8359 = vmatpush3.bf16.msra.mxu0 %v8356_v6 }
0x1075   :  { %8361 = vmatprep.subr.bf16.mxu0 %v8360_v60 }
0x1078   :  { %8363 = vmatpush3.bf16.msra.mxu0 %v8360_v60 }
0x1079   :  { %8365 = vmatprep.subr.bf16.mxu0 %v8364_v32 }
0x107c   :  { %8367 = vmatpush3.bf16.msra.mxu0 %v8364_v32 }
0x107d   :  { %8369 = vmatprep.subr.bf16.mxu0 %v8368_v37 }
0x1080   :  { %8371 = vmatpush3.bf16.msra.mxu0 %v8368_v37 }
0x1081   :  { %8373 = vmatprep.subr.bf16.mxu0 %v8372_v7 }
0x1084   :  { %8375 = vmatpush3.bf16.msra.mxu0 %v8372_v7 }
0x1085   :  { %8377 = vmatprep.subr.bf16.mxu0 %v8376_v18 }
0x1088   :  { %8379 = vmatpush3.bf16.msra.mxu0 %v8376_v18 }
0x1089   :  { %8381 = vmatprep.subr.bf16.mxu0 %v8380_v13 }
0x108c   :  { %8383 = vmatpush3.bf16.msra.mxu0 %v8380_v13 }
0x108f   :  { %6671 = vmatmul.mubr.f32.vlgmr.msra.gmra.mrb[32].mxu0 %v10572_v36 }
0x1090   :  { %6673 = vmatprep.mubr.f32.mxu0 %v10619_v45 }
0x1093   :  { %6674 = vmatmul.mubr.f32.gmra.mrb[34].mxu0 %v10734_v34 }
0x1094   :  { %6676 = vmatprep.mubr.f32.mxu0 %v10783_v49 }
0x1097   :  { %6677 = vmatmul.mubr.f32.gmra.mrb[36].mxu0 %v10832_v41 }
0x1098   :  { %6679 = vmatprep.mubr.f32.mxu0 %v10891_v38 }
0x1142   :  { %v5986_v26 = vpop.f32.mrb[30].mxu0  ;;  %v6057_v28 = vpop.f32.mrb[30].mxu1 }
0x1143   :  { %v8492_v19 = vadd.f32 %v5986_v26, %v4058_v57  ;;  %v5988_v29 = vpop.f32.mrb[31].mxu0  ;;  %v6059_v4 = vpop.f32.mrb[31].mxu1  ;;  %v8494_v9 = vadd.f32 %v6057_v28, %v4066_v51 }
0x1144   :  { %v8493_v1 = vadd.f32 %v5988_v29, %v4062_v27  ;;  %v8495_v22 = vadd.f32 %v6059_v4, %v4070_v10 }
0x1145   :  { %v6066_v39 = vmul.f32 0.5, %v8492_v19 }
0x1146   :  { %v6070_v16 = vmul.f32 0.5, %v8493_v1  ;;  %v6075_v24 = vmul.f32 0.5, %v8495_v22  ;;  %v8971_v1 = vmov 0  }
0x1147   :  { %8728 = vtanh.f32 %v6066_v39  ;;  %8577 = vset.pattern.permute.xlu1 %v8971_v1  ;;  %8576 = vset.pattern.permute.xlu0 %v8971_v1  ;;  %v6378_v39 = vld [vmem:[#allocation14] sm:$0xff] }
0x1148   :  { %8730 = vtanh.f32 %v6070_v16  ;;  %v6379_v16 = vld [vmem:[#allocation14 + $0x8] sm:$0xff] }
0x1149   :  { %8732 = vtanh.f32 %v8494_v9  ;;  %v8972_v9 = vmov 0.0|0.0   ;;  %v8385_v10 = vpack.c.bf16 %v6379_v16, %v6378_v39 }
0x114a   :  { %8734 = vtanh.f32 %v6075_v24  ;;  %8384 = vmatprep.subr.bf16.mxu1 %v8972_v9  ;;  %8408 = vmatprep.subr.bf16.mxu0 %v8972_v9 }
0x114b   :  { %8386 = vmatpush3.bf16.msra.mxu1 %v8385_v10 }
0x114c   :  { %8387 = vmatprep.subr.bf16.mxu1 %v8972_v9 }
0x1151   :  { %v8729_v54 = vpop.eup %8728 }
0x1152   :  { %v8731_v40 = vpop.eup %8730  ;;  %v6068_v15 = vmul.f32 0.5, %v8729_v54  ;;  %v6577_v54 = vld [vmem:[#allocation5] ss:$0 sm:$0xff] }
0x1153   :  { %v6072_v52 = vmul.f32 0.5, %v8731_v40  ;;  %v8733_v21 = vpop.eup %8732 }
0x1154   :  { %v6069_v61 = vadd.f32 0.5, %v6068_v15  ;;  %v8735_v0 = vpop.eup %8734 }
0x1155   :  { %v6073_v14 = vadd.f32 0.5, %v6072_v52  ;;  %v6077_v42 = vmul.f32 0.5, %v8735_v0 }
0x1156   :  { %v6080_v47 = vmul.f32 %v8733_v21, %v6069_v61 }
0x1157   :  { %v6079_v56 = vmul.f32 %v6073_v14, %v10882_v44  ;;  %v6078_v35 = vadd.f32 0.5, %v6077_v42 }
0x1159   :  { %v6081_v17 = vadd.f32 %v6080_v47, %v6079_v56 }
0x115b   :  { %8736 = vtanh.f32 %v6081_v17 }
0x1162   :  { %v6672_v50 = vpop.f32.mrb[32].mxu0 }
0x1163   :  { %v6182_v58 = vpop.f32.mrb[33].mxu0  ;;  %v6188_v31 = vadd.f32 %v6672_v50, %v6575_v23 }
0x1164   :  { %v6183_v55 = vadd.f32 %v6575_v23, %v6182_v58 }
0x1165   :  { %v8737_v46 = vpop.eup %8736 }
0x1166   :  { %8738 = vtanh.f32 %v6183_v55  ;;  %v6675_v43 = vpop.f32.mrb[34].mxu0  ;;  %v10949_v6 = vmul.f32 %v8737_v46, %v6078_v35 }
0x1167   :  { %v6192_v3 = vpop.f32.mrb[35].mxu0  ;;  %8740 = vtanh.f32 %v6188_v31  ;;  %v6198_v44 = vadd.f32 %v6675_v43, %v6575_v23 }
0x1168   :  { %v6193_v20 = vadd.f32 %v6575_v23, %v6192_v3  ;;  %6680 = vmatmul.mubr.f32.gmra.mrb[38].mxu0 %v10949_v6 }
0x1169   :  { %6749 = vmatprep.mubr.msk.f32.mxu0 %vm8973_vm0, %v11122_v12 }
0x116a   :  { %8742 = vtanh.f32 %v6193_v20  ;;  %v6678_v60 = vpop.f32.mrb[36].mxu0 }
0x116b   :  { %v6202_v33 = vpop.f32.mrb[37].mxu0  ;;  %8744 = vtanh.f32 %v6198_v44  ;;  %v6208_v48 = vadd.f32 %v6678_v60, %v6575_v23 }
0x116c   :  { %v6203_v32 = vadd.f32 %v6575_v23, %v6202_v33 }
0x116e   :  { %8746 = vtanh.f32 %v6203_v32 }
0x116f   :  { %8748 = vtanh.f32 %v6208_v48 }
0x1170   :  { %v8739_v25 = vpop.eup %8738 }
0x1171   :  { %v6236_v37 = vmul.f32 %v8739_v25, %v6576_v62  ;;  %v8741_v8 = vpop.eup %8740 }
0x1172   :  { %v6237_v30 = vmul.f32 %v8741_v8, %v6576_v62 }
0x1173   :  { %6244 = vadd.xlane.f32.xlu0 %v6236_v37 }
0x1174   :  { %v8743_v5 = vpop.eup %8742 }
0x1175   :  { %v6238_v7 = vmul.f32 %v8743_v5, %v6576_v62  ;;  %v8745_v11 = vpop.eup %8744 }
0x1176   :  { %v6239_v59 = vmul.f32 %v8745_v11, %v6576_v62 }
0x1177   :  { %6248 = vadd.xlane.f32.xlu1 %v6238_v7  ;;  %6246 = vadd.xlane.f32.xlu0 %v6237_v30 }
0x1178   :  { %v8747_v18 = vpop.eup %8746 }
0x1179   :  { %v6240_v53 = vmul.f32 %v8747_v18, %v6576_v62  ;;  %v8749_v13 = vpop.eup %8748 }
0x117a   :  { %v6241_v63 = vmul.f32 %v8749_v13, %v6576_v62 }
0x117b   :  { %6250 = vadd.xlane.f32.xlu1 %v6239_v59  ;;  %6252 = vadd.xlane.f32.xlu0 %v6240_v53 }
0x117f   :  { %6254 = vadd.xlane.f32.xlu1 %v6241_v63 }
0x1200   :  { %v6245_v22 = vpop.xlane.xlu0 %6244 }
0x1201   :  { %v6267_v52 = vadd.f32 %v6577_v54, %v6245_v22 }
0x1204   :  { %v6247_v24 = vpop.xlane.xlu0 %6246  ;;  %v6249_v40 = vpop.xlane.xlu1 %6248 }
0x1205   :  { %v6268_v15 = vadd.f32 %v6577_v54, %v6247_v24  ;;  %v6269_v14 = vadd.f32 %v6577_v54, %v6249_v40 }
0x1207   :  { %v6275_v61 = vmax.f32 %v6267_v52, %v6268_v15 }
0x1208   :  { %v6251_v21 = vpop.xlane.xlu1 %6250  ;;  %v6253_v17 = vpop.xlane.xlu0 %6252 }
0x1209   :  { %v6270_v47 = vadd.f32 %v6577_v54, %v6251_v21  ;;  %v6276_v56 = vmax.f32 %v6275_v61, %v6269_v14  ;;  %v6381_v61 = vld [vmem:[#allocation14 + $0x18] sm:$0xff] }
0x120b   :  { %v6277_v0 = vmax.f32 %v6276_v56, %v6270_v47  ;;  %v6383_v56 = vld [vmem:[#allocation14 + $0x28] sm:$0xff] }
0x120c   :  { %v6255_v42 = vpop.xlane.xlu1 %6254 }
0x120d   :  { %v6272_v58 = vadd.f32 %v6577_v54, %v6255_v42  ;;  %v6384_v42 = vld [vmem:[#allocation14 + $0x30] sm:$0xff] }
0x123b   :  { %v6681_v57 = vpop.f32.mrb[38].mxu0 }
0x123c   :  { %v6218_v27 = vadd.f32 %v6681_v57, %v6575_v23  ;;  %v6212_v26 = vpop.f32.mrb[39].mxu0 }
0x123d   :  { %v6213_v28 = vadd.f32 %v6575_v23, %v6212_v26  ;;  %v6271_v23 = vadd.f32 %v6577_v54, %v6253_v17 }
0x123e   :  { %8750 = vtanh.f32 %v6218_v27 }
0x123f   :  { %8752 = vtanh.f32 %v6213_v28  ;;  %v6278_v50 = vmax.f32 %v6277_v0, %v6271_v23 }
0x1241   :  { %v6279_v55 = vmax.f32 %v6278_v50, %v6272_v58 }
0x1248   :  { %v8751_v19 = vpop.eup %8750 }
0x1249   :  { %v8753_v51 = vpop.eup %8752  ;;  %v6243_v29 = vmul.f32 %v8751_v19, %v6576_v62 }
0x124a   :  { %v6242_v4 = vmul.f32 %v8753_v51, %v6576_v62 }
0x124b   :  { %6258 = vadd.xlane.f32.xlu1 %v6243_v29 }
0x124c   :  { %6256 = vadd.xlane.f32.xlu0 %v6242_v4 }
0x12d8   :  { %v6259_v35 = vpop.xlane.xlu1 %6258 }
0x12d9   :  { %v6257_v31 = vpop.xlane.xlu0 %6256  ;;  %v6274_v43 = vadd.f32 %v6577_v54, %v6259_v35  ;;  %v6386_v35 = vld [vmem:[#allocation14 + $0x40] sm:$0xff] }
0x12da   :  { %v6273_v46 = vadd.f32 %v6577_v54, %v6257_v31  ;;  %v6387_v31 = vld [vmem:[#allocation14 + $0x48] sm:$0xff] }
0x12dc   :  { %v6280_v3 = vmax.f32 %v6279_v55, %v6273_v46  ;;  %v8397_v55 = vpack.c.bf16 %v6387_v31, %v6386_v35 }
0x12de   :  { %v6281_v44 = vmax.f32 %v6280_v3, %v6274_v43  ;;  %v6389_v3 = vld [vmem:[#allocation14 + $0x58] sm:$0xff] }
0x12e0   :  { %v6282_v20 = vsub.f32 %v6267_v52, %v6281_v44  ;;  %v6285_v60 = vsub.f32 %v6268_v15, %v6281_v44  ;;  %v6288_v33 = vsub.f32 %v6269_v14, %v6281_v44  ;;  %v6291_v48 = vsub.f32 %v6270_v47, %v6281_v44  ;;  %v6380_v52 = vld [vmem:[#allocation14 + $0x10] sm:$0xff]  ;;  %v6382_v47 = vld [vmem:[#allocation14 + $0x20] sm:$0xff] }
0x12e1   :  { %v6294_v37 = vsub.f32 %v6271_v23, %v6281_v44  ;;  %v6297_v5 = vsub.f32 %v6272_v58, %v6281_v44  ;;  %v6300_v30 = vsub.f32 %v6273_v46, %v6281_v44  ;;  %v6303_v18 = vsub.f32 %v6274_v43, %v6281_v44  ;;  %v6385_v23 = vld [vmem:[#allocation14 + $0x38] sm:$0xff]  ;;  %v6388_v43 = vld [vmem:[#allocation14 + $0x50] sm:$0xff] }
0x12e2   :  { %v6283_v32 = vmul.f32 1.442695, %v6282_v20  ;;  %v6286_v62 = vmul.f32 1.442695, %v6285_v60  ;;  %v6289_v25 = vmul.f32 1.442695, %v6288_v33  ;;  %v8388_v21 = vpack.c.bf16 %v6381_v61, %v6380_v52 }
0x12e3   :  { %v6292_v8 = vmul.f32 1.442695, %v6291_v48  ;;  %v6295_v7 = vmul.f32 1.442695, %v6294_v37  ;;  %v6298_v11 = vmul.f32 1.442695, %v6297_v5  ;;  %v8391_v17 = vpack.c.bf16 %v6383_v56, %v6382_v47 }
0x12e4   :  { %8754 = vpow2.f32 %v6283_v32  ;;  %v6301_v59 = vmul.f32 1.442695, %v6300_v30  ;;  %v6304_v53 = vmul.f32 1.442695, %v6303_v18  ;;  %8389 = vmatpush3.bf16.msra.mxu1 %v8388_v21  ;;  %v8394_v50 = vpack.c.bf16 %v6385_v23, %v6384_v42  ;;  %v6390_v60 = vld [vmem:[#allocation14 + $0x60] sm:$0xff]  ;;  %v6391_v33 = vld [vmem:[#allocation14 + $0x68] sm:$0xff] }
0x12e5   :  { %8756 = vpow2.f32 %v6286_v62  ;;  %8390 = vmatprep.subr.bf16.mxu1 %v8972_v9  ;;  %v8400_v44 = vpack.c.bf16 %v6389_v3, %v6388_v43  ;;  %v8403_v48 = vpack.c.bf16 %v6391_v33, %v6390_v60  ;;  %v6392_v32 = vld [vmem:[#allocation14 + $0x70] sm:$0xff]  ;;  %v6393_v62 = vld [vmem:[#allocation14 + $0x78] sm:$0xff]  ;;  %v6472_v37 = vld [vmem:[#allocation16] sm:$0xff] }
0x12e6   :  { %8758 = vpow2.f32 %v6289_v25  ;;  %v8406_v25 = vpack.c.bf16 %v6393_v62, %v6392_v32  ;;  %v6474_v5 = vld [vmem:[#allocation16 + $0x10] sm:$0xff]  ;;  %v6475_v30 = vld [vmem:[#allocation16 + $0x18] sm:$0xff]  ;;  %v6476_v18 = vld [vmem:[#allocation16 + $0x20] sm:$0xff] }
0x12e7   :  { %8760 = vpow2.f32 %v6292_v8  ;;  %v6473_v8 = vld [vmem:[#allocation16 + $0x8] sm:$0xff] }
0x12e8   :  { %8762 = vpow2.f32 %v6295_v7  ;;  %8392 = vmatpush3.bf16.msra.mxu1 %v8391_v17  ;;  %v8409_v7 = vpack.c.bf16 %v6473_v8, %v6472_v37 }
0x12e9   :  { %8764 = vpow2.f32 %v6298_v11  ;;  %8393 = vmatprep.subr.bf16.mxu1 %v8972_v9  ;;  %v8412_v11 = vpack.c.bf16 %v6475_v30, %v6474_v5 }
0x12ea   :  { %8766 = vpow2.f32 %v6301_v59  ;;  %8410 = vmatpush3.bf16.msra.mxu0 %v8409_v7  ;;  %v6477_v59 = vld [vmem:[#allocation16 + $0x28] sm:$0xff] }
0x12eb   :  { %8768 = vpow2.f32 %v6304_v53  ;;  %8411 = vmatprep.subr.bf16.mxu0 %v8972_v9  ;;  %v8415_v53 = vpack.c.bf16 %v6477_v59, %v6476_v18 }
0x12ec   :  { %8395 = vmatpush3.bf16.msra.mxu1 %v8394_v50 }
0x12ed   :  { %8396 = vmatprep.subr.bf16.mxu1 %v8972_v9 }
0x12ee   :  { %v8755_v13 = vpop.eup %8754  ;;  %8413 = vmatpush3.bf16.msra.mxu0 %v8412_v11 }
0x12ef   :  { %v8757_v63 = vpop.eup %8756  ;;  %8414 = vmatprep.subr.bf16.mxu0 %v8972_v9 }
0x12f0   :  { %v6306_v57 = vadd.f32 %v8757_v63, %v8755_v13  ;;  %v8759_v27 = vpop.eup %8758  ;;  %8398 = vmatpush3.bf16.msra.mxu1 %v8397_v55 }
0x12f1   :  { %v8761_v28 = vpop.eup %8760  ;;  %8399 = vmatprep.subr.bf16.mxu1 %v8972_v9 }
0x12f2   :  { %v6307_v26 = vadd.f32 %v8759_v27, %v6306_v57  ;;  %v8763_v51 = vpop.eup %8762  ;;  %8416 = vmatpush3.bf16.msra.mxu0 %v8415_v53  ;;  %v6480_v57 = vld [vmem:[#allocation16 + $0x40] sm:$0xff] }
0x12f3   :  { %v8765_v4 = vpop.eup %8764  ;;  %8417 = vmatprep.subr.bf16.mxu0 %v8972_v9 }
0x12f4   :  { %v6308_v19 = vadd.f32 %v8761_v28, %v6307_v26  ;;  %v8767_v39 = vpop.eup %8766  ;;  %8401 = vmatpush3.bf16.msra.mxu1 %v8400_v44 }
0x12f5   :  { %v8769_v10 = vpop.eup %8768  ;;  %8402 = vmatprep.subr.bf16.mxu1 %v8972_v9 }
0x12f6   :  { %v6309_v29 = vadd.f32 %v8763_v51, %v6308_v19  ;;  %v6483_v19 = vld [vmem:[#allocation16 + $0x58] sm:$0xff] }
0x12f8   :  { %v6310_v1 = vadd.f32 %v8765_v4, %v6309_v29  ;;  %8404 = vmatpush3.bf16.msra.mxu1 %v8403_v48  ;;  %v6484_v29 = vld [vmem:[#allocation16 + $0x60] sm:$0xff] }
0x12f9   :  { %8405 = vmatprep.subr.bf16.mxu1 %v8972_v9 }
0x12fa   :  { %v6311_v16 = vadd.f32 %v8767_v39, %v6310_v1 }
0x12fc   :  { %v6312_v22 = vadd.f32 %v8769_v10, %v6311_v16  ;;  %8407 = vmatpush3.bf16.msra.mxu1 %v8406_v25 }
0x12fe   :  { %8770 = vrcp.f32 %v6312_v22 }
0x1308   :  { %v8771_v24 = vpop.eup %8770 }
0x1309   :  { %v6322_v54 = vmul.f32 %v8771_v24, %v8757_v63  ;;  %v6314_v40 = vmul.f32 %v8771_v24, %v8755_v13  ;;  %v6330_v15 = vmul.f32 %v8771_v24, %v8759_v27  ;;  %v6338_v14 = vmul.f32 %v8771_v24, %v8761_v28  ;;  %v6478_v13 = vld [vmem:[#allocation16 + $0x30] sm:$0xff]  ;;  %v6479_v63 = vld [vmem:[#allocation16 + $0x38] sm:$0xff]  ;;  %v6481_v27 = vld [vmem:[#allocation16 + $0x48] sm:$0xff] }
0x130a   :  { %v6346_v0 = vmul.f32 %v8771_v24, %v8763_v51  ;;  %v6354_v58 = vmul.f32 %v8771_v24, %v8765_v4  ;;  %v6362_v46 = vmul.f32 %v8771_v24, %v8767_v39  ;;  %v6370_v20 = vmul.f32 %v8771_v24, %v8769_v10  ;;  %v6482_v28 = vld [vmem:[#allocation16 + $0x50] sm:$0xff]  ;;  %v6485_v4 = vld [vmem:[#allocation16 + $0x68] sm:$0xff] }
0x130b   :  { %6325 = vperm.xlu1 %8577, %v6322_v54   ;;  %6317 = vperm.xlu0 %8576, %v6314_v40   ;;  %v8418_v12 = vpack.c.bf16 %v6479_v63, %v6478_v13  ;;  %v8421_v26 = vpack.c.bf16 %v6481_v27, %v6480_v57  ;;  %v8424_v51 = vpack.c.bf16 %v6483_v19, %v6482_v28 }
0x130c   :  { %v8427_v1 = vpack.c.bf16 %v6485_v4, %v6484_v29 }
0x130d   :  { %8419 = vmatpush3.bf16.msra.mxu0 %v8418_v12 }
0x130e   :  { %8420 = vmatprep.subr.bf16.mxu0 %v8972_v9 }
0x130f   :  { %6333 = vperm.xlu1 %8577, %v6330_v15  }
0x1311   :  { %8422 = vmatpush3.bf16.msra.mxu0 %v8421_v26 }
0x1312   :  { %8423 = vmatprep.subr.bf16.mxu0 %v8972_v9 }
0x1313   :  { %6341 = vperm.xlu1 %8577, %v6338_v14  }
0x1315   :  { %8425 = vmatpush3.bf16.msra.mxu0 %v8424_v51 }
0x1316   :  { %8426 = vmatprep.subr.bf16.mxu0 %v8972_v9 }
0x1317   :  { %6349 = vperm.xlu1 %8577, %v6346_v0  }
0x1319   :  { %8428 = vmatpush3.bf16.msra.mxu0 %v8427_v1 }
0x131a   :  { %8429 = vmatprep.subr.bf16.mxu0 %v8972_v9 }
0x131b   :  { %6357 = vperm.xlu1 %8577, %v6354_v58   ;;  %v6486_v58 = vld [vmem:[#allocation16 + $0x70] sm:$0xff] }
0x131f   :  { %6365 = vperm.xlu1 %8577, %v6362_v46  }
0x1323   :  { %6373 = vperm.xlu1 %8577, %v6370_v20  }
0x138a   :  { %v6326_v39 = vpop.permute.xlu1 %6325  ;;  %v6318_v10 = vpop.permute.xlu0 %6317 }
0x138b   :  { %v6328_v24 = vmul.f32 %v6326_v39, %v10572_v36  ;;  %v6320_v54 = vmul.f32 %v6318_v10, %v10523_v2 }
0x138d   :  { %v6329_v52 = vadd.f32 %v6328_v24, %v6320_v54 }
0x138e   :  { %v6334_v16 = vpop.permute.xlu1 %6333 }
0x138f   :  { %v6336_v15 = vmul.f32 %v6334_v16, %v10619_v45 }
0x1391   :  { %v6337_v14 = vadd.f32 %v6336_v15, %v6329_v52 }
0x1392   :  { %v6342_v22 = vpop.permute.xlu1 %6341 }
0x1393   :  { %v6344_v61 = vmul.f32 %v6342_v22, %v10734_v34  ;;  %v6487_v34 = vld [vmem:[#allocation16 + $0x78] sm:$0xff] }
0x1394   :  { %v8430_v35 = vpack.c.bf16 %v6487_v34, %v6486_v58 }
0x1395   :  { %v6345_v56 = vadd.f32 %v6344_v61, %v6337_v14 }
0x1396   :  { %v6350_v40 = vpop.permute.xlu1 %6349  ;;  %8431 = vmatpush3.bf16.msra.mxu0 %v8430_v35 }
0x1397   :  { %v6352_v47 = vmul.f32 %v6350_v40, %v10783_v49  ;;  %v6578_v49 = vld [vmem:[%s10996_s12] ss:$0 sm:$0xff] }
0x1399   :  { %v6353_v0 = vadd.f32 %v6352_v47, %v6345_v56 }
0x139a   :  { %v6358_v21 = vpop.permute.xlu1 %6357 }
0x139b   :  { %v6360_v9 = vmul.f32 %v6358_v21, %v10832_v41 }
0x139d   :  { %v6361_v36 = vadd.f32 %v6360_v9, %v6353_v0 }
0x139e   :  { %v6366_v17 = vpop.permute.xlu1 %6365 }
0x139f   :  { %v6368_v42 = vmul.f32 %v6366_v17, %v10891_v38  ;;  %v6579_v38 = vld [vmem:[#allocation17] ss:$0 sm:$0xff] }
0x13a1   :  { %v6369_v2 = vadd.f32 %v6368_v42, %v6361_v36 }
0x13a2   :  { %v6374_v23 = vpop.permute.xlu1 %6373 }
0x13a3   :  { %v6376_v50 = vmul.f32 %v6374_v23, %v10949_v6 }
0x13a5   :  { %v6377_v45 = vadd.f32 %v6376_v50, %v6369_v2 }
0x13a7   :  { %6715 = vmatmul.mubr.f32.vlgmr.msra.gmra.mrb[32].mxu1 %v6377_v45 }
0x147a   :  { %v6467_v41 = vpop.f32.mrb[32].mxu1 }
0x147b   :  { %v6468_v31 = vadd.f32 %v6578_v49, %v6467_v41  ;;  %v6716_v55 = vpop.f32.mrb[33].mxu1 }
0x147d   :  { %v6471_v46 = vmax.f32 %v6468_v31, 0.0 }
0x147f   :  { %6750 = vmatmul.mubr.f32.vlgmr.msra.gmra.mrb[40].mxu0 %v6471_v46 }
0x1552   :  { %v6561_v43 = vpop.f32.mrb[40].mxu0 }
0x1553   :  { %v6562_v3 = vadd.f32 %v6579_v38, %v6561_v43  ;;  %v6751_v44 = vpop.f32.mrb[41].mxu0 }
0x1555   :  { %6565 = vst [vmem:[%s10999_s15] sm:$0xff] %v6562_v3 }
0x1556   :  { %6570 = vsyncpa [#allocation7], 1 }
0x1557   :  { %6571 = vsyncpa [#allocation9], 1 }
0x1558   :  { %6572 = vsyncpa [#allocation12], 1 }
0x1559   :  { %6573 = vsyncpa [#allocation15], 1 }
0x155a   :  { %6574 = vsyncpa [#allocation18], 1 }

</bundles_post_ra>
